<compile_context>
chip_gen: v5e
topology: v5e:2x2
jax: 0.10.0
libtpu: 0.0.40
codegen_flags: <defaults>
</compile_context>

<pallas_src>
import jax
import jax.numpy as jnp
from jax.experimental import pallas as pl
from jax.experimental.pallas import tpu as pltpu

# ---- small demo dimensions (lane-dense feature dim; torch default was dim=512) ----
BATCH = 4
DIM = 128                       # feature dim (multiple of 128 -> lane-dense)
NUM_HEADS = 8                   # nhead=8 as in nn.TransformerEncoderLayer
HEAD_DIM = DIM // NUM_HEADS     # 16
FFN_DIM = 2 * DIM               # transformer feed-forward width (small choice)
K_COMP = 6                      # DEGM K (Gaussian components / tokens)
STEPS = 3                       # DEGM refine steps (transformer layers)
CHANNELS = 3
IMG_HW = 16
IMG_FEATS = CHANNELS * IMG_HW * IMG_HW   # 768


# ======================================================================================
# Shared math (pure jnp): used both inside the Pallas kernel and by the plain-JAX
# reference, so kernel-vs-reference differences are only MXU accumulation order.
# ======================================================================================

def _layer_norm(x, gamma, beta, eps=1e-5):
    mu = jnp.mean(x, axis=-1, keepdims=True)
    xc = x - mu
    var = jnp.mean(xc * xc, axis=-1, keepdims=True)
    return xc * jax.lax.rsqrt(var + eps) * gamma + beta


def _l2_normalize(x, eps=1e-12):
    n2 = jnp.sum(x * x, axis=-1, keepdims=True)
    return x * jax.lax.rsqrt(jnp.maximum(n2, eps * eps))


def _sigmoid(x):
    # numerically stable logistic without relying on lax.logistic lowering in Mosaic
    pos = 1.0 / (1.0 + jnp.exp(-jnp.abs(x)))
    return jnp.where(x >= 0, pos, 1.0 - pos)


def _group_index(idx, group_size, num_groups):
    """idx // group_size via comparisons (avoids vector int division inside the kernel)."""
    gid = jnp.zeros_like(idx)
    for g in range(1, num_groups):
        gid = gid + (idx >= g * group_size).astype(idx.dtype)
    return gid


def _attn_bias(n, num_groups):
    """(n, n) additive mask: 0 within a batch element's K tokens, -1e30 across elements."""
    r = jax.lax.broadcasted_iota(jnp.int32, (n, n), 0)
    c = jax.lax.broadcasted_iota(jnp.int32, (n, n), 1)
    same = _group_index(r, K_COMP, num_groups) == _group_index(c, K_COMP, num_groups)
    return jnp.where(same, 0.0, -1e30).astype(jnp.float32)


def _pool_matrix(b, n):
    """(b, n) 0/1 matrix assigning each of the n = b*K tokens to its batch row."""
    r = jax.lax.broadcasted_iota(jnp.int32, (b, n), 0)
    c = jax.lax.broadcasted_iota(jnp.int32, (b, n), 1)
    return (r == _group_index(c, K_COMP, b)).astype(jnp.float32)


def _visual_math(x_flat, w, b):
    y = jnp.dot(x_flat.astype(jnp.bfloat16), w, preferred_element_type=jnp.float32) + b
    return _l2_normalize(y)


def _anf_math(img, txt, aux, w1t, w1a, b1, w2, b2):
    def _cos(a, c):
        num = jnp.sum(a * c, axis=-1, keepdims=True)
        den2 = (jnp.sum(a * a, axis=-1, keepdims=True) *
                jnp.sum(c * c, axis=-1, keepdims=True))
        return num * jax.lax.rsqrt(jnp.maximum(den2, 1e-16))

    delta = jnp.abs(_cos(img, aux) - _cos(img, txt))                       # (B, 1)
    # Linear(2*dim -> dim) with the concat folded into two matmuls (no in-kernel concat).
    h = (jnp.dot(txt.astype(jnp.bfloat16), w1t, preferred_element_type=jnp.float32)
         + jnp.dot(aux.astype(jnp.bfloat16), w1a, preferred_element_type=jnp.float32)
         + b1)
    h = jnp.maximum(h, 0.0)
    logit = jnp.sum(h * w2, axis=-1, keepdims=True) + b2                   # Linear(dim -> 1)
    gate = _sigmoid(logit)
    refined = gate * aux + (1.0 - gate) * txt
    return refined, delta


def _encoder_layer(x, bias, wq, bq, wk, bk, wv, bv, wo_heads, bo,
                   g1, be1, wf1, bf1, wf2, bf2, g2, be2):
    """One post-norm nn.TransformerEncoderLayer (MHA + FFN), eval mode (dropout skipped).

    x: (N, D) f32, N = batch * K tokens. wq/wk/wv: (D, D) bf16 lane-dense (heads fused);
    wo_heads: (H, HEAD_DIM, D) bf16 lane-dense per-head rows of the output projection.
    `bias` is an additive block-diagonal mask (0 within a batch element, -1e30 across).
    """
    x_bf = x.astype(jnp.bfloat16)
    scale = 1.0 / (HEAD_DIM ** 0.5)

    # Single lane-dense projections for all heads at once.
    q = (jnp.dot(x_bf, wq, preferred_element_type=jnp.float32) + bq) * scale
    k = jnp.dot(x_bf, wk, preferred_element_type=jnp.float32) + bk
    v = jnp.dot(x_bf, wv, preferred_element_type=jnp.float32) + bv

    attn = jnp.zeros_like(x)          # f32 accumulator for the output projection chain
    for h in range(NUM_HEADS):
        sl = slice(h * HEAD_DIM, (h + 1) * HEAD_DIM)
        qh = q[:, sl].astype(jnp.bfloat16)
        kh = k[:, sl].astype(jnp.bfloat16)
        vh = v[:, sl].astype(jnp.bfloat16)
        s = jax.lax.dot_general(qh, kh, (((1,), (1,)), ((), ())),
                                preferred_element_type=jnp.float32) + bias
        p = jnp.exp(s - jnp.max(s, axis=-1, keepdims=True))
        p = p / jnp.sum(p, axis=-1, keepdims=True)
        oh = jnp.dot(p.astype(jnp.bfloat16), vh, preferred_element_type=jnp.float32)
        attn = attn + jnp.dot(oh.astype(jnp.bfloat16), wo_heads[h],
                              preferred_element_type=jnp.float32)
    attn = attn + bo

    x = _layer_norm(x + attn, g1, be1)
    hmid = jnp.maximum(jnp.dot(x.astype(jnp.bfloat16), wf1,
                               preferred_element_type=jnp.float32) + bf1, 0.0)
    ff = jnp.dot(hmid.astype(jnp.bfloat16), wf2,
                 preferred_element_type=jnp.float32) + bf2
    return _layer_norm(x + ff, g2, be2)


def _degm_head(z, pool, g_feat, ln_g, ln_b, w1, b1, w2, b2):
    """Z.mean(tokens) + global feat -> LayerNorm -> Linear -> ReLU -> Linear -> L2 normalize."""
    zsum = jnp.dot(pool, z, preferred_element_type=jnp.float32)            # f32 (tiny) matmul
    y = _layer_norm(zsum * (1.0 / K_COMP) + g_feat, ln_g, ln_b)
    hmid = jnp.maximum(jnp.dot(y.astype(jnp.bfloat16), w1,
                               preferred_element_type=jnp.float32) + b1, 0.0)
    t = jnp.dot(hmid.astype(jnp.bfloat16), w2,
                preferred_element_type=jnp.float32) + b2
    return _l2_normalize(t)


def _clip_loss_math(text_feat, img_feat, temp):
    """0.5 * (CE(sim, arange) + CE(sim.T, arange)); sim = text @ img.T / temp, kept f32."""
    sim = jax.lax.dot_general(text_feat, img_feat, (((1,), (1,)), ((), ())),
                              preferred_element_type=jnp.float32) * (1.0 / temp)
    n = sim.shape[0]
    r = jax.lax.broadcasted_iota(jnp.int32, sim.shape, 0)
    c = jax.lax.broadcasted_iota(jnp.int32, sim.shape, 1)
    diag = jnp.where(r == c, sim, 0.0)
    diag_r = jnp.sum(diag, axis=1, keepdims=True)                          # (n, 1)
    diag_c = jnp.sum(diag, axis=0, keepdims=True)                          # (1, n)
    m_r = jnp.max(sim, axis=1, keepdims=True)
    lse_r = m_r + jnp.log(jnp.sum(jnp.exp(sim - m_r), axis=1, keepdims=True))
    m_c = jnp.max(sim, axis=0, keepdims=True)
    lse_c = m_c + jnp.log(jnp.sum(jnp.exp(sim - m_c), axis=0, keepdims=True))
    ce_r = jnp.sum(lse_r - diag_r, axis=0, keepdims=True) * (1.0 / n)
    ce_c = jnp.sum(lse_c - diag_c, axis=1, keepdims=True) * (1.0 / n)
    return 0.5 * (ce_r + ce_c)                                             # (1, 1)


# ======================================================================================
# Single fused Pallas kernel
# ======================================================================================

def _full_kernel(
    # visual encoder stand-in
    x_ref, wvis_ref, bvis_ref,
    # AdaptiveNoiseFilter
    raw_ref, aux_ref, wa1t_ref, wa1a_ref, ba1_ref, wa2_ref, ba2_ref,
    # DEGM
    z0_ref,
    wq_ref, bq_ref, wk_ref, bk_ref, wv_ref, bv_ref, wo_ref, bo_ref,
    ln1g_ref, ln1b_ref, wf1_ref, bf1_ref, wf2_ref, bf2_ref, ln2g_ref, ln2b_ref,
    hlng_ref, hlnb_ref, wm1_ref, bm1_ref, wm2_ref, bm2_ref,
    # loss
    temp_ref,
    # outputs
    img_out_ref, text_out_ref, delta_out_ref, loss_out_ref,
):
    b = x_ref.shape[0]
    n = z0_ref.shape[0]

    # 1. VisualEncoder stand-in + L2 normalize
    img = _visual_math(x_ref[...], wvis_ref[...], bvis_ref[...])           # (B, D) f32

    # 2. AdaptiveNoiseFilter
    refined, delta = _anf_math(img, raw_ref[...], aux_ref[...],
                               wa1t_ref[...], wa1a_ref[...], ba1_ref[...],
                               wa2_ref[...], ba2_ref[0, 0])

    # 3. DEGM: 3 transformer encoder layers, statically unrolled, all weights resident.
    bias = _attn_bias(n, b)                                                # built from iota
    z = z0_ref[...]
    for s in range(STEPS):
        z = _encoder_layer(
            z, bias,
            wq_ref[s], bq_ref[s], wk_ref[s], bk_ref[s],
            wv_ref[s], bv_ref[s], wo_ref[s], bo_ref[s],
            ln1g_ref[s], ln1b_ref[s], wf1_ref[s], bf1_ref[s],
            wf2_ref[s], bf2_ref[s], ln2g_ref[s], ln2b_ref[s])

    pool = _pool_matrix(b, n)                                              # built from iota
    text = _degm_head(z, pool, refined, hlng_ref[...], hlnb_ref[...],
                      wm1_ref[...], bm1_ref[...], wm2_ref[...], bm2_ref[...])

    # 4. symmetric contrastive loss (f32 similarity matmul)
    loss = _clip_loss_math(text, img, temp_ref[0, 0])                      # (1, 1)

    img_out_ref[...] = img
    text_out_ref[...] = text
    delta_out_ref[...] = jnp.broadcast_to(delta, (b, DIM))                 # lane-dense slab
    loss_out_ref[...] = jnp.broadcast_to(loss, (1, DIM))                   # lane-dense slab


# ======================================================================================
# pallas_call wrapper
# ======================================================================================

@jax.jit
def full_model_forward(params, images, raw_text_feat, aux_text_feat, word_feats, eps):
    # NOTE: word_feats is accepted (as in the reference) but unused by DEGM.
    del word_feats
    B = images.shape[0]
    BK = B * K_COMP

    x_flat = images.reshape(B, -1)
    # Reparameterize (plain-JAX glue; deterministic eps supplied instead of in-kernel randn).
    z0 = (params["mu"][None, :, :] + jnp.exp(params["log_sigma"])[None, :, :] * eps)
    z0 = z0.reshape(BK, DIM).astype(jnp.float32)

    vmem = pl.BlockSpec(memory_space=pltpu.MemorySpace.VMEM)
    smem = pl.BlockSpec(memory_space=pltpu.MemorySpace.SMEM)
    in_specs = [vmem] * 34
    in_specs[9] = smem        # b_a2 scalar
    in_specs[33] = smem       # temperature scalar

    img_feat, text_feat, delta_slab, loss_slab = pl.pallas_call(
        _full_kernel,
        out_shape=(jax.ShapeDtypeStruct((B, DIM), jnp.float32),
                   jax.ShapeDtypeStruct((B, DIM), jnp.float32),
                   jax.ShapeDtypeStruct((B, DIM), jnp.float32),
                   jax.ShapeDtypeStruct((1, DIM), jnp.float32)),
        in_specs=in_specs,
        out_specs=(vmem, vmem, vmem, vmem),
    )(
        x_flat, params["w_v"], params["b_v"],
        raw_text_feat, aux_text_feat,
        params["w_a1t"], params["w_a1a"], params["b_a1"], params["w_a2"], params["b_a2"],
        z0,
        params["wq"], params["bq"], params["wk"], params["bk"],
        params["wv"], params["bv"], params["wo"], params["bo"],
        params["ln1_g"], params["ln1_b"], params["wf1"], params["bf1"],
        params["wf2"], params["bf2"], params["ln2_g"], params["ln2_b"],
        params["hln_g"], params["hln_b"], params["wm1"], params["bm1"],
        params["wm2"], params["bm2"],
        params["temp"],
    )

    return loss_slab[0, 0], img_feat, text_feat, delta_slab[:, 0]


# ======================================================================================
# Parameters, plain-JAX reference, demo
# ======================================================================================

def init_params(key):
    ks = iter(jax.random.split(key, 40))
    bf = jnp.bfloat16

    def rnd(shape, scale, dtype=jnp.float32):
        return (jax.random.normal(next(ks), shape, jnp.float32) * scale).astype(dtype)

    return {
        # VisualEncoder stand-in (bf16 weight, f32 bias)
        "w_v": rnd((IMG_FEATS, DIM), 0.05, bf), "b_v": rnd((1, DIM), 0.02),
        # AdaptiveNoiseFilter gate MLP: Linear(2d->d) split into text/aux halves, Linear(d->1)
        "w_a1t": rnd((DIM, DIM), 0.08, bf), "w_a1a": rnd((DIM, DIM), 0.08, bf),
        "b_a1": rnd((1, DIM), 0.02),
        "w_a2": rnd((1, DIM), 0.08), "b_a2": rnd((1, 1), 0.02),
        # DEGM Gaussian mixture parameters (match torch zero init)
        "mu": jnp.zeros((K_COMP, DIM), jnp.float32),
        "log_sigma": jnp.zeros((K_COMP, DIM), jnp.float32),
        # 3 transformer encoder layers; q/k/v lane-dense (heads fused), wo per-head lane-dense
        "wq": rnd((STEPS, DIM, DIM), 0.08, bf), "bq": rnd((STEPS, 1, DIM), 0.02),
        "wk": rnd((STEPS, DIM, DIM), 0.08, bf), "bk": rnd((STEPS, 1, DIM), 0.02),
        "wv": rnd((STEPS, DIM, DIM), 0.08, bf), "bv": rnd((STEPS, 1, DIM), 0.02),
        "wo": rnd((STEPS, NUM_HEADS, HEAD_DIM, DIM), 0.08, bf),
        "bo": rnd((STEPS, 1, DIM), 0.02),
        "ln1_g": jnp.ones((STEPS, 1, DIM), jnp.float32),
        "ln1_b": jnp.zeros((STEPS, 1, DIM), jnp.float32),
        "wf1": rnd((STEPS, DIM, FFN_DIM), 0.08, bf), "bf1": rnd((STEPS, 1, FFN_DIM), 0.02),
        "wf2": rnd((STEPS, FFN_DIM, DIM), 0.08, bf), "bf2": rnd((STEPS, 1, DIM), 0.02),
        "ln2_g": jnp.ones((STEPS, 1, DIM), jnp.float32),
        "ln2_b": jnp.zeros((STEPS, 1, DIM), jnp.float32),
        # DEGM output MLP: LayerNorm, Linear, ReLU, Linear
        "hln_g": jnp.ones((1, DIM), jnp.float32), "hln_b": jnp.zeros((1, DIM), jnp.float32),
        "wm1": rnd((DIM, DIM), 0.08, bf), "bm1": rnd((1, DIM), 0.02),
        "wm2": rnd((DIM, DIM), 0.08, bf), "bm2": rnd((1, DIM), 0.02),
        # learnable temperature
        "temp": jnp.full((1, 1), 0.07, jnp.float32),
    }


def reference_forward(params, images, raw_text_feat, aux_text_feat, word_feats, eps):
    del word_feats
    B = images.shape[0]
    BK = B * K_COMP
    img_feat = _visual_math(images.reshape(B, -1), params["w_v"], params["b_v"])
    refined, delta = _anf_math(img_feat, raw_text_feat, aux_text_feat,
                               params["w_a1t"], params["w_a1a"], params["b_a1"],
                               params["w_a2"], params["b_a2"][0, 0])
    z = (params["mu"][None] + jnp.exp(params["log_sigma"])[None] * eps).reshape(BK, DIM)
    bias = _attn_bias(BK, B)
    for s in range(STEPS):
        z = _encoder_layer(
            z, bias,
            params["wq"][s], params["bq"][s], params["wk"][s], params["bk"][s],
            params["wv"][s], params["bv"][s], params["wo"][s], params["bo"][s],
            params["ln1_g"][s], params["ln1_b"][s], params["wf1"][s], params["bf1"][s],
            params["wf2"][s], params["bf2"][s], params["ln2_g"][s], params["ln2_b"][s])
    pool = _pool_matrix(B, BK)
    text_feat = _degm_head(z, pool, refined, params["hln_g"], params["hln_b"],
                           params["wm1"], params["bm1"], params["wm2"], params["bm2"])
    loss = _clip_loss_math(text_feat, img_feat, params["temp"][0, 0])[0, 0]
    return loss, img_feat, text_feat, delta[:, 0]


if __name__ == "__main__":
    key = jax.random.PRNGKey(0)
    k_par, k_img, k_txt, k_aux, k_word, k_eps = jax.random.split(key, 6)
    params = init_params(k_par)

    images = jax.random.normal(k_img, (BATCH, CHANNELS, IMG_HW, IMG_HW), jnp.float32)
    raw_text_feat = jax.random.normal(k_txt, (BATCH, DIM), jnp.float32)
    aux_text_feat = raw_text_feat + 0.1 * jax.random.normal(k_aux, (BATCH, DIM), jnp.float32)
    word_feats = jax.random.normal(k_word, (BATCH, 7, DIM), jnp.float32)   # unused (as in reference)
    eps = jax.random.normal(k_eps, (BATCH, K_COMP, DIM), jnp.float32)       # DEGM noise

    loss, img_feat, text_feat, delta = full_model_forward(
        params, images, raw_text_feat, aux_text_feat, word_feats, eps)
    jax.block_until_ready((loss, img_feat, text_feat, delta))

    loss_r, img_r, text_r, delta_r = reference_forward(
        params, images, raw_text_feat, aux_text_feat, word_feats, eps)

    assert loss.shape == () and img_feat.shape == (BATCH, DIM)
    assert text_feat.shape == (BATCH, DIM) and delta.shape == (BATCH,)
    assert jnp.allclose(loss, loss_r, atol=5e-3, rtol=5e-3), (loss, loss_r)
    assert jnp.allclose(img_feat, img_r, atol=5e-3, rtol=5e-3)
    assert jnp.allclose(text_feat, text_r, atol=5e-3, rtol=5e-3)
    assert jnp.allclose(delta, delta_r, atol=5e-3, rtol=5e-3)
    print("KERNEL_OK")
</pallas_src>

<mosaic_0001>
module attributes {stable_mosaic.version = 11 : i64} {
  func.func @_full_kernel(%arg0: memref<4x768xf32, #tpu.memory_space<vmem>>, %arg1: memref<768x128xbf16, #tpu.memory_space<vmem>>, %arg2: memref<1x128xf32, #tpu.memory_space<vmem>>, %arg3: memref<4x128xf32, #tpu.memory_space<vmem>>, %arg4: memref<4x128xf32, #tpu.memory_space<vmem>>, %arg5: memref<128x128xbf16, #tpu.memory_space<vmem>>, %arg6: memref<128x128xbf16, #tpu.memory_space<vmem>>, %arg7: memref<1x128xf32, #tpu.memory_space<vmem>>, %arg8: memref<1x128xf32, #tpu.memory_space<vmem>>, %arg9: memref<1x1xf32, #tpu.memory_space<smem>>, %arg10: memref<24x128xf32, #tpu.memory_space<vmem>>, %arg11: memref<3x128x128xbf16, #tpu.memory_space<vmem>>, %arg12: memref<3x1x128xf32, #tpu.memory_space<vmem>>, %arg13: memref<3x128x128xbf16, #tpu.memory_space<vmem>>, %arg14: memref<3x1x128xf32, #tpu.memory_space<vmem>>, %arg15: memref<3x128x128xbf16, #tpu.memory_space<vmem>>, %arg16: memref<3x1x128xf32, #tpu.memory_space<vmem>>, %arg17: memref<3x8x16x128xbf16, #tpu.memory_space<vmem>>, %arg18: memref<3x1x128xf32, #tpu.memory_space<vmem>>, %arg19: memref<3x1x128xf32, #tpu.memory_space<vmem>>, %arg20: memref<3x1x128xf32, #tpu.memory_space<vmem>>, %arg21: memref<3x128x256xbf16, #tpu.memory_space<vmem>>, %arg22: memref<3x1x256xf32, #tpu.memory_space<vmem>>, %arg23: memref<3x256x128xbf16, #tpu.memory_space<vmem>>, %arg24: memref<3x1x128xf32, #tpu.memory_space<vmem>>, %arg25: memref<3x1x128xf32, #tpu.memory_space<vmem>>, %arg26: memref<3x1x128xf32, #tpu.memory_space<vmem>>, %arg27: memref<1x128xf32, #tpu.memory_space<vmem>>, %arg28: memref<1x128xf32, #tpu.memory_space<vmem>>, %arg29: memref<128x128xbf16, #tpu.memory_space<vmem>>, %arg30: memref<1x128xf32, #tpu.memory_space<vmem>>, %arg31: memref<128x128xbf16, #tpu.memory_space<vmem>>, %arg32: memref<1x128xf32, #tpu.memory_space<vmem>>, %arg33: memref<1x1xf32, #tpu.memory_space<smem>>, %arg34: memref<4x128xf32, #tpu.memory_space<vmem>>, %arg35: memref<4x128xf32, #tpu.memory_space<vmem>>, %arg36: memref<4x128xf32, #tpu.memory_space<vmem>>, %arg37: memref<1x128xf32, #tpu.memory_space<vmem>>) attributes {dimension_semantics = [], scalar_prefetch = 0 : i64, scratch_operands = 0 : i64, tpu.core_type = #tpu.core_type<tc>} {
    %c0 = arith.constant 0 : index
    %c0_0 = arith.constant 0 : index
    %0 = vector.load %arg0[%c0, %c0_0] : memref<4x768xf32, #tpu.memory_space<vmem>>, vector<4x768xf32>
    %c0_1 = arith.constant 0 : index
    %c0_2 = arith.constant 0 : index
    %1 = vector.load %arg1[%c0_1, %c0_2] : memref<768x128xbf16, #tpu.memory_space<vmem>>, vector<768x128xbf16>
    %c0_3 = arith.constant 0 : index
    %c0_4 = arith.constant 0 : index
    %2 = vector.load %arg2[%c0_3, %c0_4] : memref<1x128xf32, #tpu.memory_space<vmem>>, vector<1x128xf32>
    %3 = arith.truncf %0 : vector<4x768xf32> to vector<4x768xbf16>
    %cst = arith.constant dense<0.000000e+00> : vector<4x128xf32>
    %4 = tpu.matmul %3, %1, %cst {dimension_numbers = #tpu.dot_dimension_numbers<[1], [0], [0], [1], [0, 0, 1, 1], [], []>} : vector<4x768xbf16>, vector<768x128xbf16>, vector<4x128xf32> -> vector<4x128xf32>
    %5 = vector.broadcast %2 : vector<1x128xf32> to vector<4x128xf32>
    %6 = arith.addf %4, %5 : vector<4x128xf32>
    %7 = arith.mulf %6, %6 : vector<4x128xf32>
    %cst_5 = arith.constant dense<0.000000e+00> : vector<4xf32>
    %8 = vector.multi_reduction <add>, %7, %cst_5 [1] : vector<4x128xf32> to vector<4xf32>
    %9 = vector.shape_cast %8 : vector<4xf32> to vector<4x1xf32>
    %cst_6 = arith.constant 1.000000e-24 : f32
    %10 = vector.broadcast %cst_6 : f32 to vector<4x1xf32>
    %11 = arith.maximumf %9, %10 : vector<4x1xf32>
    %12 = math.rsqrt %11 : vector<4x1xf32>
    %13 = vector.broadcast %12 : vector<4x1xf32> to vector<4x128xf32>
    %14 = arith.mulf %6, %13 : vector<4x128xf32>
    %c0_7 = arith.constant 0 : index
    %c0_8 = arith.constant 0 : index
    %15 = vector.load %arg3[%c0_7, %c0_8] : memref<4x128xf32, #tpu.memory_space<vmem>>, vector<4x128xf32>
    %c0_9 = arith.constant 0 : index
    %c0_10 = arith.constant 0 : index
    %16 = vector.load %arg4[%c0_9, %c0_10] : memref<4x128xf32, #tpu.memory_space<vmem>>, vector<4x128xf32>
    %c0_11 = arith.constant 0 : index
    %c0_12 = arith.constant 0 : index
    %17 = vector.load %arg5[%c0_11, %c0_12] : memref<128x128xbf16, #tpu.memory_space<vmem>>, vector<128x128xbf16>
    %c0_13 = arith.constant 0 : index
    %c0_14 = arith.constant 0 : index
    %18 = vector.load %arg6[%c0_13, %c0_14] : memref<128x128xbf16, #tpu.memory_space<vmem>>, vector<128x128xbf16>
    %c0_15 = arith.constant 0 : index
    %c0_16 = arith.constant 0 : index
    %19 = vector.load %arg7[%c0_15, %c0_16] : memref<1x128xf32, #tpu.memory_space<vmem>>, vector<1x128xf32>
    %c0_17 = arith.constant 0 : index
    %c0_18 = arith.constant 0 : index
    %20 = vector.load %arg8[%c0_17, %c0_18] : memref<1x128xf32, #tpu.memory_space<vmem>>, vector<1x128xf32>
    %c0_19 = arith.constant 0 : index
    %c0_20 = arith.constant 0 : index
    %21 = memref.load %arg9[%c0_19, %c0_20] : memref<1x1xf32, #tpu.memory_space<smem>>
    %22 = arith.mulf %14, %16 : vector<4x128xf32>
    %cst_21 = arith.constant dense<0.000000e+00> : vector<4xf32>
    %23 = vector.multi_reduction <add>, %22, %cst_21 [1] : vector<4x128xf32> to vector<4xf32>
    %24 = vector.shape_cast %23 : vector<4xf32> to vector<4x1xf32>
    %25 = arith.mulf %14, %14 : vector<4x128xf32>
    %cst_22 = arith.constant dense<0.000000e+00> : vector<4xf32>
    %26 = vector.multi_reduction <add>, %25, %cst_22 [1] : vector<4x128xf32> to vector<4xf32>
    %27 = vector.shape_cast %26 : vector<4xf32> to vector<4x1xf32>
    %28 = arith.mulf %16, %16 : vector<4x128xf32>
    %cst_23 = arith.constant dense<0.000000e+00> : vector<4xf32>
    %29 = vector.multi_reduction <add>, %28, %cst_23 [1] : vector<4x128xf32> to vector<4xf32>
    %30 = vector.shape_cast %29 : vector<4xf32> to vector<4x1xf32>
    %31 = arith.mulf %27, %30 : vector<4x1xf32>
    %cst_24 = arith.constant 1.000000e-16 : f32
    %32 = vector.broadcast %cst_24 : f32 to vector<4x1xf32>
    %33 = arith.maximumf %31, %32 : vector<4x1xf32>
    %34 = math.rsqrt %33 : vector<4x1xf32>
    %35 = arith.mulf %24, %34 : vector<4x1xf32>
    %36 = arith.mulf %14, %15 : vector<4x128xf32>
    %cst_25 = arith.constant dense<0.000000e+00> : vector<4xf32>
    %37 = vector.multi_reduction <add>, %36, %cst_25 [1] : vector<4x128xf32> to vector<4xf32>
    %38 = vector.shape_cast %37 : vector<4xf32> to vector<4x1xf32>
    %39 = arith.mulf %14, %14 : vector<4x128xf32>
    %cst_26 = arith.constant dense<0.000000e+00> : vector<4xf32>
    %40 = vector.multi_reduction <add>, %39, %cst_26 [1] : vector<4x128xf32> to vector<4xf32>
    %41 = vector.shape_cast %40 : vector<4xf32> to vector<4x1xf32>
    %42 = arith.mulf %15, %15 : vector<4x128xf32>
    %cst_27 = arith.constant dense<0.000000e+00> : vector<4xf32>
    %43 = vector.multi_reduction <add>, %42, %cst_27 [1] : vector<4x128xf32> to vector<4xf32>
    %44 = vector.shape_cast %43 : vector<4xf32> to vector<4x1xf32>
    %45 = arith.mulf %41, %44 : vector<4x1xf32>
    %cst_28 = arith.constant 1.000000e-16 : f32
    %46 = vector.broadcast %cst_28 : f32 to vector<4x1xf32>
    %47 = arith.maximumf %45, %46 : vector<4x1xf32>
    %48 = math.rsqrt %47 : vector<4x1xf32>
    %49 = arith.mulf %38, %48 : vector<4x1xf32>
    %50 = arith.subf %35, %49 : vector<4x1xf32>
    %51 = math.absf %50 : vector<4x1xf32>
    %52 = arith.truncf %15 : vector<4x128xf32> to vector<4x128xbf16>
    %cst_29 = arith.constant dense<0.000000e+00> : vector<4x128xf32>
    %53 = tpu.matmul %52, %17, %cst_29 {dimension_numbers = #tpu.dot_dimension_numbers<[1], [0], [0], [1], [0, 0, 1, 1], [], []>} : vector<4x128xbf16>, vector<128x128xbf16>, vector<4x128xf32> -> vector<4x128xf32>
    %54 = arith.truncf %16 : vector<4x128xf32> to vector<4x128xbf16>
    %cst_30 = arith.constant dense<0.000000e+00> : vector<4x128xf32>
    %55 = tpu.matmul %54, %18, %cst_30 {dimension_numbers = #tpu.dot_dimension_numbers<[1], [0], [0], [1], [0, 0, 1, 1], [], []>} : vector<4x128xbf16>, vector<128x128xbf16>, vector<4x128xf32> -> vector<4x128xf32>
    %56 = arith.addf %53, %55 : vector<4x128xf32>
    %57 = vector.broadcast %19 : vector<1x128xf32> to vector<4x128xf32>
    %58 = arith.addf %56, %57 : vector<4x128xf32>
    %cst_31 = arith.constant 0.000000e+00 : f32
    %59 = vector.broadcast %cst_31 : f32 to vector<4x128xf32>
    %60 = arith.maximumf %58, %59 : vector<4x128xf32>
    %61 = vector.broadcast %20 : vector<1x128xf32> to vector<4x128xf32>
    %62 = arith.mulf %60, %61 : vector<4x128xf32>
    %cst_32 = arith.constant dense<0.000000e+00> : vector<4xf32>
    %63 = vector.multi_reduction <add>, %62, %cst_32 [1] : vector<4x128xf32> to vector<4xf32>
    %64 = vector.shape_cast %63 : vector<4xf32> to vector<4x1xf32>
    %65 = vector.broadcast %21 : f32 to vector<4x1xf32>
    %66 = arith.addf %64, %65 : vector<4x1xf32>
    %67 = math.absf %66 : vector<4x1xf32>
    %cst_33 = arith.constant 0.000000e+00 : f32
    %68 = vector.broadcast %cst_33 : f32 to vector<4x1xf32>
    %69 = arith.subf %68, %67 : vector<4x1xf32>
    %70 = math.exp %69 : vector<4x1xf32>
    %cst_34 = arith.constant 1.000000e+00 : f32
    %71 = vector.broadcast %cst_34 : f32 to vector<4x1xf32>
    %72 = arith.addf %71, %70 : vector<4x1xf32>
    %cst_35 = arith.constant 1.000000e+00 : f32
    %73 = vector.broadcast %cst_35 : f32 to vector<4x1xf32>
    %74 = arith.divf %73, %72 : vector<4x1xf32>
    %cst_36 = arith.constant 0.000000e+00 : f32
    %75 = vector.broadcast %cst_36 : f32 to vector<4x1xf32>
    %76 = arith.cmpf oge, %66, %75 : vector<4x1xf32>
    %cst_37 = arith.constant 1.000000e+00 : f32
    %77 = vector.broadcast %cst_37 : f32 to vector<4x1xf32>
    %78 = arith.subf %77, %74 : vector<4x1xf32>
    %79 = arith.select %76, %74, %78 : vector<4x1xi1>, vector<4x1xf32>
    %80 = vector.broadcast %79 : vector<4x1xf32> to vector<4x128xf32>
    %81 = arith.mulf %80, %16 : vector<4x128xf32>
    %cst_38 = arith.constant 1.000000e+00 : f32
    %82 = vector.broadcast %cst_38 : f32 to vector<4x1xf32>
    %83 = arith.subf %82, %79 : vector<4x1xf32>
    %84 = vector.broadcast %83 : vector<4x1xf32> to vector<4x128xf32>
    %85 = arith.mulf %84, %15 : vector<4x128xf32>
    %86 = arith.addf %81, %85 : vector<4x128xf32>
    %87 = tpu.iota {dimensions = array<i32: 0>} : vector<24x24xi32>
    %88 = tpu.iota {dimensions = array<i32: 1>} : vector<24x24xi32>
    %c0_i32 = arith.constant 0 : i32
    %89 = vector.broadcast %c0_i32 : i32 to vector<24x24xi32>
    %c6_i32 = arith.constant 6 : i32
    %90 = vector.broadcast %c6_i32 : i32 to vector<24x24xi32>
    %91 = arith.cmpi sge, %87, %90 : vector<24x24xi32>
    %92 = arith.extui %91 : vector<24x24xi1> to vector<24x24xi32>
    %93 = arith.addi %89, %92 : vector<24x24xi32>
    %c12_i32 = arith.constant 12 : i32
    %94 = vector.broadcast %c12_i32 : i32 to vector<24x24xi32>
    %95 = arith.cmpi sge, %87, %94 : vector<24x24xi32>
    %96 = arith.extui %95 : vector<24x24xi1> to vector<24x24xi32>
    %97 = arith.addi %93, %96 : vector<24x24xi32>
    %c18_i32 = arith.constant 18 : i32
    %98 = vector.broadcast %c18_i32 : i32 to vector<24x24xi32>
    %99 = arith.cmpi sge, %87, %98 : vector<24x24xi32>
    %100 = arith.extui %99 : vector<24x24xi1> to vector<24x24xi32>
    %101 = arith.addi %97, %100 : vector<24x24xi32>
    %c0_i32_39 = arith.constant 0 : i32
    %102 = vector.broadcast %c0_i32_39 : i32 to vector<24x24xi32>
    %c6_i32_40 = arith.constant 6 : i32
    %103 = vector.broadcast %c6_i32_40 : i32 to vector<24x24xi32>
    %104 = arith.cmpi sge, %88, %103 : vector<24x24xi32>
    %105 = arith.extui %104 : vector<24x24xi1> to vector<24x24xi32>
    %106 = arith.addi %102, %105 : vector<24x24xi32>
    %c12_i32_41 = arith.constant 12 : i32
    %107 = vector.broadcast %c12_i32_41 : i32 to vector<24x24xi32>
    %108 = arith.cmpi sge, %88, %107 : vector<24x24xi32>
    %109 = arith.extui %108 : vector<24x24xi1> to vector<24x24xi32>
    %110 = arith.addi %106, %109 : vector<24x24xi32>
    %c18_i32_42 = arith.constant 18 : i32
    %111 = vector.broadcast %c18_i32_42 : i32 to vector<24x24xi32>
    %112 = arith.cmpi sge, %88, %111 : vector<24x24xi32>
    %113 = arith.extui %112 : vector<24x24xi1> to vector<24x24xi32>
    %114 = arith.addi %110, %113 : vector<24x24xi32>
    %115 = arith.cmpi eq, %101, %114 : vector<24x24xi32>
    %cst_43 = arith.constant 0.000000e+00 : f32
    %cst_44 = arith.constant -1.000000e+30 : f32
    %116 = vector.broadcast %cst_43 : f32 to vector<24x24xf32>
    %117 = vector.broadcast %cst_44 : f32 to vector<24x24xf32>
    %118 = arith.select %115, %116, %117 : vector<24x24xi1>, vector<24x24xf32>
    %c0_45 = arith.constant 0 : index
    %c0_46 = arith.constant 0 : index
    %119 = vector.load %arg10[%c0_45, %c0_46] : memref<24x128xf32, #tpu.memory_space<vmem>>, vector<24x128xf32>
    %c0_47 = arith.constant 0 : index
    %c0_48 = arith.constant 0 : index
    %c0_49 = arith.constant 0 : index
    %120 = vector.load %arg11[%c0_47, %c0_48, %c0_49] : memref<3x128x128xbf16, #tpu.memory_space<vmem>>, vector<1x128x128xbf16>
    %121 = vector.shape_cast %120 : vector<1x128x128xbf16> to vector<128x128xbf16>
    %c0_50 = arith.constant 0 : index
    %c0_51 = arith.constant 0 : index
    %c0_52 = arith.constant 0 : index
    %122 = vector.load %arg12[%c0_50, %c0_51, %c0_52] : memref<3x1x128xf32, #tpu.memory_space<vmem>>, vector<1x1x128xf32>
    %123 = vector.shape_cast %122 : vector<1x1x128xf32> to vector<1x128xf32>
    %c0_53 = arith.constant 0 : index
    %c0_54 = arith.constant 0 : index
    %c0_55 = arith.constant 0 : index
    %124 = vector.load %arg13[%c0_53, %c0_54, %c0_55] : memref<3x128x128xbf16, #tpu.memory_space<vmem>>, vector<1x128x128xbf16>
    %125 = vector.shape_cast %124 : vector<1x128x128xbf16> to vector<128x128xbf16>
    %c0_56 = arith.constant 0 : index
    %c0_57 = arith.constant 0 : index
    %c0_58 = arith.constant 0 : index
    %126 = vector.load %arg14[%c0_56, %c0_57, %c0_58] : memref<3x1x128xf32, #tpu.memory_space<vmem>>, vector<1x1x128xf32>
    %127 = vector.shape_cast %126 : vector<1x1x128xf32> to vector<1x128xf32>
    %c0_59 = arith.constant 0 : index
    %c0_60 = arith.constant 0 : index
    %c0_61 = arith.constant 0 : index
    %128 = vector.load %arg15[%c0_59, %c0_60, %c0_61] : memref<3x128x128xbf16, #tpu.memory_space<vmem>>, vector<1x128x128xbf16>
    %129 = vector.shape_cast %128 : vector<1x128x128xbf16> to vector<128x128xbf16>
    %c0_62 = arith.constant 0 : index
    %c0_63 = arith.constant 0 : index
    %c0_64 = arith.constant 0 : index
    %130 = vector.load %arg16[%c0_62, %c0_63, %c0_64] : memref<3x1x128xf32, #tpu.memory_space<vmem>>, vector<1x1x128xf32>
    %131 = vector.shape_cast %130 : vector<1x1x128xf32> to vector<1x128xf32>
    %c0_65 = arith.constant 0 : index
    %c0_66 = arith.constant 0 : index
    %c0_67 = arith.constant 0 : index
    %c0_68 = arith.constant 0 : index
    %132 = vector.load %arg17[%c0_65, %c0_66, %c0_67, %c0_68] : memref<3x8x16x128xbf16, #tpu.memory_space<vmem>>, vector<1x8x16x128xbf16>
    %133 = vector.shape_cast %132 : vector<1x8x16x128xbf16> to vector<8x16x128xbf16>
    %c0_69 = arith.constant 0 : index
    %c0_70 = arith.constant 0 : index
    %c0_71 = arith.constant 0 : index
    %134 = vector.load %arg18[%c0_69, %c0_70, %c0_71] : memref<3x1x128xf32, #tpu.memory_space<vmem>>, vector<1x1x128xf32>
    %135 = vector.shape_cast %134 : vector<1x1x128xf32> to vector<1x128xf32>
    %c0_72 = arith.constant 0 : index
    %c0_73 = arith.constant 0 : index
    %c0_74 = arith.constant 0 : index
    %136 = vector.load %arg19[%c0_72, %c0_73, %c0_74] : memref<3x1x128xf32, #tpu.memory_space<vmem>>, vector<1x1x128xf32>
    %137 = vector.shape_cast %136 : vector<1x1x128xf32> to vector<1x128xf32>
    %c0_75 = arith.constant 0 : index
    %c0_76 = arith.constant 0 : index
    %c0_77 = arith.constant 0 : index
    %138 = vector.load %arg20[%c0_75, %c0_76, %c0_77] : memref<3x1x128xf32, #tpu.memory_space<vmem>>, vector<1x1x128xf32>
    %139 = vector.shape_cast %138 : vector<1x1x128xf32> to vector<1x128xf32>
    %c0_78 = arith.constant 0 : index
    %c0_79 = arith.constant 0 : index
    %c0_80 = arith.constant 0 : index
    %140 = vector.load %arg21[%c0_78, %c0_79, %c0_80] : memref<3x128x256xbf16, #tpu.memory_space<vmem>>, vector<1x128x256xbf16>
    %141 = vector.shape_cast %140 : vector<1x128x256xbf16> to vector<128x256xbf16>
    %c0_81 = arith.constant 0 : index
    %c0_82 = arith.constant 0 : index
    %c0_83 = arith.constant 0 : index
    %142 = vector.load %arg22[%c0_81, %c0_82, %c0_83] : memref<3x1x256xf32, #tpu.memory_space<vmem>>, vector<1x1x256xf32>
    %143 = vector.shape_cast %142 : vector<1x1x256xf32> to vector<1x256xf32>
    %c0_84 = arith.constant 0 : index
    %c0_85 = arith.constant 0 : index
    %c0_86 = arith.constant 0 : index
    %144 = vector.load %arg23[%c0_84, %c0_85, %c0_86] : memref<3x256x128xbf16, #tpu.memory_space<vmem>>, vector<1x256x128xbf16>
    %145 = vector.shape_cast %144 : vector<1x256x128xbf16> to vector<256x128xbf16>
    %c0_87 = arith.constant 0 : index
    %c0_88 = arith.constant 0 : index
    %c0_89 = arith.constant 0 : index
    %146 = vector.load %arg24[%c0_87, %c0_88, %c0_89] : memref<3x1x128xf32, #tpu.memory_space<vmem>>, vector<1x1x128xf32>
    %147 = vector.shape_cast %146 : vector<1x1x128xf32> to vector<1x128xf32>
    %c0_90 = arith.constant 0 : index
    %c0_91 = arith.constant 0 : index
    %c0_92 = arith.constant 0 : index
    %148 = vector.load %arg25[%c0_90, %c0_91, %c0_92] : memref<3x1x128xf32, #tpu.memory_space<vmem>>, vector<1x1x128xf32>
    %149 = vector.shape_cast %148 : vector<1x1x128xf32> to vector<1x128xf32>
    %c0_93 = arith.constant 0 : index
    %c0_94 = arith.constant 0 : index
    %c0_95 = arith.constant 0 : index
    %150 = vector.load %arg26[%c0_93, %c0_94, %c0_95] : memref<3x1x128xf32, #tpu.memory_space<vmem>>, vector<1x1x128xf32>
    %151 = vector.shape_cast %150 : vector<1x1x128xf32> to vector<1x128xf32>
    %152 = arith.truncf %119 : vector<24x128xf32> to vector<24x128xbf16>
    %cst_96 = arith.constant dense<0.000000e+00> : vector<24x128xf32>
    %153 = tpu.matmul %152, %121, %cst_96 {dimension_numbers = #tpu.dot_dimension_numbers<[1], [0], [0], [1], [0, 0, 1, 1], [], []>} : vector<24x128xbf16>, vector<128x128xbf16>, vector<24x128xf32> -> vector<24x128xf32>
    %154 = vector.broadcast %123 : vector<1x128xf32> to vector<24x128xf32>
    %155 = arith.addf %153, %154 : vector<24x128xf32>
    %cst_97 = arith.constant 2.500000e-01 : f32
    %156 = vector.broadcast %cst_97 : f32 to vector<24x128xf32>
    %157 = arith.mulf %155, %156 : vector<24x128xf32>
    %cst_98 = arith.constant dense<0.000000e+00> : vector<24x128xf32>
    %158 = tpu.matmul %152, %125, %cst_98 {dimension_numbers = #tpu.dot_dimension_numbers<[1], [0], [0], [1], [0, 0, 1, 1], [], []>} : vector<24x128xbf16>, vector<128x128xbf16>, vector<24x128xf32> -> vector<24x128xf32>
    %159 = vector.broadcast %127 : vector<1x128xf32> to vector<24x128xf32>
    %160 = arith.addf %158, %159 : vector<24x128xf32>
    %cst_99 = arith.constant dense<0.000000e+00> : vector<24x128xf32>
    %161 = tpu.matmul %152, %129, %cst_99 {dimension_numbers = #tpu.dot_dimension_numbers<[1], [0], [0], [1], [0, 0, 1, 1], [], []>} : vector<24x128xbf16>, vector<128x128xbf16>, vector<24x128xf32> -> vector<24x128xf32>
    %162 = vector.broadcast %131 : vector<1x128xf32> to vector<24x128xf32>
    %163 = arith.addf %161, %162 : vector<24x128xf32>
    %cst_100 = arith.constant 0.000000e+00 : f32
    %164 = vector.broadcast %cst_100 : f32 to vector<24x128xf32>
    %165 = vector.extract_strided_slice %157 {offsets = [0, 0], sizes = [24, 16], strides = [1, 1]} : vector<24x128xf32> to vector<24x16xf32>
    %166 = arith.truncf %165 : vector<24x16xf32> to vector<24x16xbf16>
    %167 = vector.extract_strided_slice %160 {offsets = [0, 0], sizes = [24, 16], strides = [1, 1]} : vector<24x128xf32> to vector<24x16xf32>
    %168 = arith.truncf %167 : vector<24x16xf32> to vector<24x16xbf16>
    %169 = vector.extract_strided_slice %163 {offsets = [0, 0], sizes = [24, 16], strides = [1, 1]} : vector<24x128xf32> to vector<24x16xf32>
    %170 = arith.truncf %169 : vector<24x16xf32> to vector<24x16xbf16>
    %cst_101 = arith.constant dense<0.000000e+00> : vector<24x24xf32>
    %171 = tpu.matmul %166, %168, %cst_101 {dimension_numbers = #tpu.dot_dimension_numbers<[1], [1], [0], [0], [0, 0, 1, 0], [], []>} : vector<24x16xbf16>, vector<24x16xbf16>, vector<24x24xf32> -> vector<24x24xf32>
    %172 = arith.addf %171, %118 : vector<24x24xf32>
    %cst_102 = arith.constant dense<0xFF800000> : vector<24xf32>
    %173 = vector.multi_reduction <maximumf>, %172, %cst_102 [1] : vector<24x24xf32> to vector<24xf32>
    %174 = vector.shape_cast %173 : vector<24xf32> to vector<24x1xf32>
    %175 = vector.broadcast %174 : vector<24x1xf32> to vector<24x24xf32>
    %176 = arith.subf %172, %175 : vector<24x24xf32>
    %177 = math.exp %176 : vector<24x24xf32>
    %cst_103 = arith.constant dense<0.000000e+00> : vector<24xf32>
    %178 = vector.multi_reduction <add>, %177, %cst_103 [1] : vector<24x24xf32> to vector<24xf32>
    %179 = vector.shape_cast %178 : vector<24xf32> to vector<24x1xf32>
    %180 = vector.broadcast %179 : vector<24x1xf32> to vector<24x24xf32>
    %181 = arith.divf %177, %180 : vector<24x24xf32>
    %182 = arith.truncf %181 : vector<24x24xf32> to vector<24x24xbf16>
    %cst_104 = arith.constant dense<0.000000e+00> : vector<24x16xf32>
    %183 = tpu.matmul %182, %170, %cst_104 {dimension_numbers = #tpu.dot_dimension_numbers<[1], [0], [0], [1], [0, 0, 1, 1], [], []>} : vector<24x24xbf16>, vector<24x16xbf16>, vector<24x16xf32> -> vector<24x16xf32>
    %184 = arith.truncf %183 : vector<24x16xf32> to vector<24x16xbf16>
    %185 = vector.extract_strided_slice %133 {offsets = [0, 0, 0], sizes = [1, 16, 128], strides = [1, 1, 1]} : vector<8x16x128xbf16> to vector<1x16x128xbf16>
    %186 = vector.shape_cast %185 : vector<1x16x128xbf16> to vector<16x128xbf16>
    %cst_105 = arith.constant dense<0.000000e+00> : vector<24x128xf32>
    %187 = tpu.matmul %184, %186, %cst_105 {dimension_numbers = #tpu.dot_dimension_numbers<[1], [0], [0], [1], [0, 0, 1, 1], [], []>} : vector<24x16xbf16>, vector<16x128xbf16>, vector<24x128xf32> -> vector<24x128xf32>
    %188 = arith.addf %164, %187 : vector<24x128xf32>
    %189 = vector.extract_strided_slice %157 {offsets = [0, 16], sizes = [24, 16], strides = [1, 1]} : vector<24x128xf32> to vector<24x16xf32>
    %190 = arith.truncf %189 : vector<24x16xf32> to vector<24x16xbf16>
    %191 = vector.extract_strided_slice %160 {offsets = [0, 16], sizes = [24, 16], strides = [1, 1]} : vector<24x128xf32> to vector<24x16xf32>
    %192 = arith.truncf %191 : vector<24x16xf32> to vector<24x16xbf16>
    %193 = vector.extract_strided_slice %163 {offsets = [0, 16], sizes = [24, 16], strides = [1, 1]} : vector<24x128xf32> to vector<24x16xf32>
    %194 = arith.truncf %193 : vector<24x16xf32> to vector<24x16xbf16>
    %cst_106 = arith.constant dense<0.000000e+00> : vector<24x24xf32>
    %195 = tpu.matmul %190, %192, %cst_106 {dimension_numbers = #tpu.dot_dimension_numbers<[1], [1], [0], [0], [0, 0, 1, 0], [], []>} : vector<24x16xbf16>, vector<24x16xbf16>, vector<24x24xf32> -> vector<24x24xf32>
    %196 = arith.addf %195, %118 : vector<24x24xf32>
    %cst_107 = arith.constant dense<0xFF800000> : vector<24xf32>
    %197 = vector.multi_reduction <maximumf>, %196, %cst_107 [1] : vector<24x24xf32> to vector<24xf32>
    %198 = vector.shape_cast %197 : vector<24xf32> to vector<24x1xf32>
    %199 = vector.broadcast %198 : vector<24x1xf32> to vector<24x24xf32>
    %200 = arith.subf %196, %199 : vector<24x24xf32>
    %201 = math.exp %200 : vector<24x24xf32>
    %cst_108 = arith.constant dense<0.000000e+00> : vector<24xf32>
    %202 = vector.multi_reduction <add>, %201, %cst_108 [1] : vector<24x24xf32> to vector<24xf32>
    %203 = vector.shape_cast %202 : vector<24xf32> to vector<24x1xf32>
    %204 = vector.broadcast %203 : vector<24x1xf32> to vector<24x24xf32>
    %205 = arith.divf %201, %204 : vector<24x24xf32>
    %206 = arith.truncf %205 : vector<24x24xf32> to vector<24x24xbf16>
    %cst_109 = arith.constant dense<0.000000e+00> : vector<24x16xf32>
    %207 = tpu.matmul %206, %194, %cst_109 {dimension_numbers = #tpu.dot_dimension_numbers<[1], [0], [0], [1], [0, 0, 1, 1], [], []>} : vector<24x24xbf16>, vector<24x16xbf16>, vector<24x16xf32> -> vector<24x16xf32>
    %208 = arith.truncf %207 : vector<24x16xf32> to vector<24x16xbf16>
    %209 = vector.extract_strided_slice %133 {offsets = [1, 0, 0], sizes = [1, 16, 128], strides = [1, 1, 1]} : vector<8x16x128xbf16> to vector<1x16x128xbf16>
    %210 = vector.shape_cast %209 : vector<1x16x128xbf16> to vector<16x128xbf16>
    %cst_110 = arith.constant dense<0.000000e+00> : vector<24x128xf32>
    %211 = tpu.matmul %208, %210, %cst_110 {dimension_numbers = #tpu.dot_dimension_numbers<[1], [0], [0], [1], [0, 0, 1, 1], [], []>} : vector<24x16xbf16>, vector<16x128xbf16>, vector<24x128xf32> -> vector<24x128xf32>
    %212 = arith.addf %188, %211 : vector<24x128xf32>
    %213 = vector.extract_strided_slice %157 {offsets = [0, 32], sizes = [24, 16], strides = [1, 1]} : vector<24x128xf32> to vector<24x16xf32>
    %214 = arith.truncf %213 : vector<24x16xf32> to vector<24x16xbf16>
    %215 = vector.extract_strided_slice %160 {offsets = [0, 32], sizes = [24, 16], strides = [1, 1]} : vector<24x128xf32> to vector<24x16xf32>
    %216 = arith.truncf %215 : vector<24x16xf32> to vector<24x16xbf16>
    %217 = vector.extract_strided_slice %163 {offsets = [0, 32], sizes = [24, 16], strides = [1, 1]} : vector<24x128xf32> to vector<24x16xf32>
    %218 = arith.truncf %217 : vector<24x16xf32> to vector<24x16xbf16>
    %cst_111 = arith.constant dense<0.000000e+00> : vector<24x24xf32>
    %219 = tpu.matmul %214, %216, %cst_111 {dimension_numbers = #tpu.dot_dimension_numbers<[1], [1], [0], [0], [0, 0, 1, 0], [], []>} : vector<24x16xbf16>, vector<24x16xbf16>, vector<24x24xf32> -> vector<24x24xf32>
    %220 = arith.addf %219, %118 : vector<24x24xf32>
    %cst_112 = arith.constant dense<0xFF800000> : vector<24xf32>
    %221 = vector.multi_reduction <maximumf>, %220, %cst_112 [1] : vector<24x24xf32> to vector<24xf32>
    %222 = vector.shape_cast %221 : vector<24xf32> to vector<24x1xf32>
    %223 = vector.broadcast %222 : vector<24x1xf32> to vector<24x24xf32>
    %224 = arith.subf %220, %223 : vector<24x24xf32>
    %225 = math.exp %224 : vector<24x24xf32>
    %cst_113 = arith.constant dense<0.000000e+00> : vector<24xf32>
    %226 = vector.multi_reduction <add>, %225, %cst_113 [1] : vector<24x24xf32> to vector<24xf32>
    %227 = vector.shape_cast %226 : vector<24xf32> to vector<24x1xf32>
    %228 = vector.broadcast %227 : vector<24x1xf32> to vector<24x24xf32>
    %229 = arith.divf %225, %228 : vector<24x24xf32>
    %230 = arith.truncf %229 : vector<24x24xf32> to vector<24x24xbf16>
    %cst_114 = arith.constant dense<0.000000e+00> : vector<24x16xf32>
    %231 = tpu.matmul %230, %218, %cst_114 {dimension_numbers = #tpu.dot_dimension_numbers<[1], [0], [0], [1], [0, 0, 1, 1], [], []>} : vector<24x24xbf16>, vector<24x16xbf16>, vector<24x16xf32> -> vector<24x16xf32>
    %232 = arith.truncf %231 : vector<24x16xf32> to vector<24x16xbf16>
    %233 = vector.extract_strided_slice %133 {offsets = [2, 0, 0], sizes = [1, 16, 128], strides = [1, 1, 1]} : vector<8x16x128xbf16> to vector<1x16x128xbf16>
    %234 = vector.shape_cast %233 : vector<1x16x128xbf16> to vector<16x128xbf16>
    %cst_115 = arith.constant dense<0.000000e+00> : vector<24x128xf32>
    %235 = tpu.matmul %232, %234, %cst_115 {dimension_numbers = #tpu.dot_dimension_numbers<[1], [0], [0], [1], [0, 0, 1, 1], [], []>} : vector<24x16xbf16>, vector<16x128xbf16>, vector<24x128xf32> -> vector<24x128xf32>
    %236 = arith.addf %212, %235 : vector<24x128xf32>
    %237 = vector.extract_strided_slice %157 {offsets = [0, 48], sizes = [24, 16], strides = [1, 1]} : vector<24x128xf32> to vector<24x16xf32>
    %238 = arith.truncf %237 : vector<24x16xf32> to vector<24x16xbf16>
    %239 = vector.extract_strided_slice %160 {offsets = [0, 48], sizes = [24, 16], strides = [1, 1]} : vector<24x128xf32> to vector<24x16xf32>
    %240 = arith.truncf %239 : vector<24x16xf32> to vector<24x16xbf16>
    %241 = vector.extract_strided_slice %163 {offsets = [0, 48], sizes = [24, 16], strides = [1, 1]} : vector<24x128xf32> to vector<24x16xf32>
    %242 = arith.truncf %241 : vector<24x16xf32> to vector<24x16xbf16>
    %cst_116 = arith.constant dense<0.000000e+00> : vector<24x24xf32>
    %243 = tpu.matmul %238, %240, %cst_116 {dimension_numbers = #tpu.dot_dimension_numbers<[1], [1], [0], [0], [0, 0, 1, 0], [], []>} : vector<24x16xbf16>, vector<24x16xbf16>, vector<24x24xf32> -> vector<24x24xf32>
    %244 = arith.addf %243, %118 : vector<24x24xf32>
    %cst_117 = arith.constant dense<0xFF800000> : vector<24xf32>
    %245 = vector.multi_reduction <maximumf>, %244, %cst_117 [1] : vector<24x24xf32> to vector<24xf32>
    %246 = vector.shape_cast %245 : vector<24xf32> to vector<24x1xf32>
    %247 = vector.broadcast %246 : vector<24x1xf32> to vector<24x24xf32>
    %248 = arith.subf %244, %247 : vector<24x24xf32>
    %249 = math.exp %248 : vector<24x24xf32>
    %cst_118 = arith.constant dense<0.000000e+00> : vector<24xf32>
    %250 = vector.multi_reduction <add>, %249, %cst_118 [1] : vector<24x24xf32> to vector<24xf32>
    %251 = vector.shape_cast %250 : vector<24xf32> to vector<24x1xf32>
    %252 = vector.broadcast %251 : vector<24x1xf32> to vector<24x24xf32>
    %253 = arith.divf %249, %252 : vector<24x24xf32>
    %254 = arith.truncf %253 : vector<24x24xf32> to vector<24x24xbf16>
    %cst_119 = arith.constant dense<0.000000e+00> : vector<24x16xf32>
    %255 = tpu.matmul %254, %242, %cst_119 {dimension_numbers = #tpu.dot_dimension_numbers<[1], [0], [0], [1], [0, 0, 1, 1], [], []>} : vector<24x24xbf16>, vector<24x16xbf16>, vector<24x16xf32> -> vector<24x16xf32>
    %256 = arith.truncf %255 : vector<24x16xf32> to vector<24x16xbf16>
    %257 = vector.extract_strided_slice %133 {offsets = [3, 0, 0], sizes = [1, 16, 128], strides = [1, 1, 1]} : vector<8x16x128xbf16> to vector<1x16x128xbf16>
    %258 = vector.shape_cast %257 : vector<1x16x128xbf16> to vector<16x128xbf16>
    %cst_120 = arith.constant dense<0.000000e+00> : vector<24x128xf32>
    %259 = tpu.matmul %256, %258, %cst_120 {dimension_numbers = #tpu.dot_dimension_numbers<[1], [0], [0], [1], [0, 0, 1, 1], [], []>} : vector<24x16xbf16>, vector<16x128xbf16>, vector<24x128xf32> -> vector<24x128xf32>
    %260 = arith.addf %236, %259 : vector<24x128xf32>
    %261 = vector.extract_strided_slice %157 {offsets = [0, 64], sizes = [24, 16], strides = [1, 1]} : vector<24x128xf32> to vector<24x16xf32>
    %262 = arith.truncf %261 : vector<24x16xf32> to vector<24x16xbf16>
    %263 = vector.extract_strided_slice %160 {offsets = [0, 64], sizes = [24, 16], strides = [1, 1]} : vector<24x128xf32> to vector<24x16xf32>
    %264 = arith.truncf %263 : vector<24x16xf32> to vector<24x16xbf16>
    %265 = vector.extract_strided_slice %163 {offsets = [0, 64], sizes = [24, 16], strides = [1, 1]} : vector<24x128xf32> to vector<24x16xf32>
    %266 = arith.truncf %265 : vector<24x16xf32> to vector<24x16xbf16>
    %cst_121 = arith.constant dense<0.000000e+00> : vector<24x24xf32>
    %267 = tpu.matmul %262, %264, %cst_121 {dimension_numbers = #tpu.dot_dimension_numbers<[1], [1], [0], [0], [0, 0, 1, 0], [], []>} : vector<24x16xbf16>, vector<24x16xbf16>, vector<24x24xf32> -> vector<24x24xf32>
    %268 = arith.addf %267, %118 : vector<24x24xf32>
    %cst_122 = arith.constant dense<0xFF800000> : vector<24xf32>
    %269 = vector.multi_reduction <maximumf>, %268, %cst_122 [1] : vector<24x24xf32> to vector<24xf32>
    %270 = vector.shape_cast %269 : vector<24xf32> to vector<24x1xf32>
    %271 = vector.broadcast %270 : vector<24x1xf32> to vector<24x24xf32>
    %272 = arith.subf %268, %271 : vector<24x24xf32>
    %273 = math.exp %272 : vector<24x24xf32>
    %cst_123 = arith.constant dense<0.000000e+00> : vector<24xf32>
    %274 = vector.multi_reduction <add>, %273, %cst_123 [1] : vector<24x24xf32> to vector<24xf32>
    %275 = vector.shape_cast %274 : vector<24xf32> to vector<24x1xf32>
    %276 = vector.broadcast %275 : vector<24x1xf32> to vector<24x24xf32>
    %277 = arith.divf %273, %276 : vector<24x24xf32>
    %278 = arith.truncf %277 : vector<24x24xf32> to vector<24x24xbf16>
    %cst_124 = arith.constant dense<0.000000e+00> : vector<24x16xf32>
    %279 = tpu.matmul %278, %266, %cst_124 {dimension_numbers = #tpu.dot_dimension_numbers<[1], [0], [0], [1], [0, 0, 1, 1], [], []>} : vector<24x24xbf16>, vector<24x16xbf16>, vector<24x16xf32> -> vector<24x16xf32>
    %280 = arith.truncf %279 : vector<24x16xf32> to vector<24x16xbf16>
    %281 = vector.extract_strided_slice %133 {offsets = [4, 0, 0], sizes = [1, 16, 128], strides = [1, 1, 1]} : vector<8x16x128xbf16> to vector<1x16x128xbf16>
    %282 = vector.shape_cast %281 : vector<1x16x128xbf16> to vector<16x128xbf16>
    %cst_125 = arith.constant dense<0.000000e+00> : vector<24x128xf32>
    %283 = tpu.matmul %280, %282, %cst_125 {dimension_numbers = #tpu.dot_dimension_numbers<[1], [0], [0], [1], [0, 0, 1, 1], [], []>} : vector<24x16xbf16>, vector<16x128xbf16>, vector<24x128xf32> -> vector<24x128xf32>
    %284 = arith.addf %260, %283 : vector<24x128xf32>
    %285 = vector.extract_strided_slice %157 {offsets = [0, 80], sizes = [24, 16], strides = [1, 1]} : vector<24x128xf32> to vector<24x16xf32>
    %286 = arith.truncf %285 : vector<24x16xf32> to vector<24x16xbf16>
    %287 = vector.extract_strided_slice %160 {offsets = [0, 80], sizes = [24, 16], strides = [1, 1]} : vector<24x128xf32> to vector<24x16xf32>
    %288 = arith.truncf %287 : vector<24x16xf32> to vector<24x16xbf16>
    %289 = vector.extract_strided_slice %163 {offsets = [0, 80], sizes = [24, 16], strides = [1, 1]} : vector<24x128xf32> to vector<24x16xf32>
    %290 = arith.truncf %289 : vector<24x16xf32> to vector<24x16xbf16>
    %cst_126 = arith.constant dense<0.000000e+00> : vector<24x24xf32>
    %291 = tpu.matmul %286, %288, %cst_126 {dimension_numbers = #tpu.dot_dimension_numbers<[1], [1], [0], [0], [0, 0, 1, 0], [], []>} : vector<24x16xbf16>, vector<24x16xbf16>, vector<24x24xf32> -> vector<24x24xf32>
    %292 = arith.addf %291, %118 : vector<24x24xf32>
    %cst_127 = arith.constant dense<0xFF800000> : vector<24xf32>
    %293 = vector.multi_reduction <maximumf>, %292, %cst_127 [1] : vector<24x24xf32> to vector<24xf32>
    %294 = vector.shape_cast %293 : vector<24xf32> to vector<24x1xf32>
    %295 = vector.broadcast %294 : vector<24x1xf32> to vector<24x24xf32>
    %296 = arith.subf %292, %295 : vector<24x24xf32>
    %297 = math.exp %296 : vector<24x24xf32>
    %cst_128 = arith.constant dense<0.000000e+00> : vector<24xf32>
    %298 = vector.multi_reduction <add>, %297, %cst_128 [1] : vector<24x24xf32> to vector<24xf32>
    %299 = vector.shape_cast %298 : vector<24xf32> to vector<24x1xf32>
    %300 = vector.broadcast %299 : vector<24x1xf32> to vector<24x24xf32>
    %301 = arith.divf %297, %300 : vector<24x24xf32>
    %302 = arith.truncf %301 : vector<24x24xf32> to vector<24x24xbf16>
    %cst_129 = arith.constant dense<0.000000e+00> : vector<24x16xf32>
    %303 = tpu.matmul %302, %290, %cst_129 {dimension_numbers = #tpu.dot_dimension_numbers<[1], [0], [0], [1], [0, 0, 1, 1], [], []>} : vector<24x24xbf16>, vector<24x16xbf16>, vector<24x16xf32> -> vector<24x16xf32>
    %304 = arith.truncf %303 : vector<24x16xf32> to vector<24x16xbf16>
    %305 = vector.extract_strided_slice %133 {offsets = [5, 0, 0], sizes = [1, 16, 128], strides = [1, 1, 1]} : vector<8x16x128xbf16> to vector<1x16x128xbf16>
    %306 = vector.shape_cast %305 : vector<1x16x128xbf16> to vector<16x128xbf16>
    %cst_130 = arith.constant dense<0.000000e+00> : vector<24x128xf32>
    %307 = tpu.matmul %304, %306, %cst_130 {dimension_numbers = #tpu.dot_dimension_numbers<[1], [0], [0], [1], [0, 0, 1, 1], [], []>} : vector<24x16xbf16>, vector<16x128xbf16>, vector<24x128xf32> -> vector<24x128xf32>
    %308 = arith.addf %284, %307 : vector<24x128xf32>
    %309 = vector.extract_strided_slice %157 {offsets = [0, 96], sizes = [24, 16], strides = [1, 1]} : vector<24x128xf32> to vector<24x16xf32>
    %310 = arith.truncf %309 : vector<24x16xf32> to vector<24x16xbf16>
    %311 = vector.extract_strided_slice %160 {offsets = [0, 96], sizes = [24, 16], strides = [1, 1]} : vector<24x128xf32> to vector<24x16xf32>
    %312 = arith.truncf %311 : vector<24x16xf32> to vector<24x16xbf16>
    %313 = vector.extract_strided_slice %163 {offsets = [0, 96], sizes = [24, 16], strides = [1, 1]} : vector<24x128xf32> to vector<24x16xf32>
    %314 = arith.truncf %313 : vector<24x16xf32> to vector<24x16xbf16>
    %cst_131 = arith.constant dense<0.000000e+00> : vector<24x24xf32>
    %315 = tpu.matmul %310, %312, %cst_131 {dimension_numbers = #tpu.dot_dimension_numbers<[1], [1], [0], [0], [0, 0, 1, 0], [], []>} : vector<24x16xbf16>, vector<24x16xbf16>, vector<24x24xf32> -> vector<24x24xf32>
    %316 = arith.addf %315, %118 : vector<24x24xf32>
    %cst_132 = arith.constant dense<0xFF800000> : vector<24xf32>
    %317 = vector.multi_reduction <maximumf>, %316, %cst_132 [1] : vector<24x24xf32> to vector<24xf32>
    %318 = vector.shape_cast %317 : vector<24xf32> to vector<24x1xf32>
    %319 = vector.broadcast %318 : vector<24x1xf32> to vector<24x24xf32>
    %320 = arith.subf %316, %319 : vector<24x24xf32>
    %321 = math.exp %320 : vector<24x24xf32>
    %cst_133 = arith.constant dense<0.000000e+00> : vector<24xf32>
    %322 = vector.multi_reduction <add>, %321, %cst_133 [1] : vector<24x24xf32> to vector<24xf32>
    %323 = vector.shape_cast %322 : vector<24xf32> to vector<24x1xf32>
    %324 = vector.broadcast %323 : vector<24x1xf32> to vector<24x24xf32>
    %325 = arith.divf %321, %324 : vector<24x24xf32>
    %326 = arith.truncf %325 : vector<24x24xf32> to vector<24x24xbf16>
    %cst_134 = arith.constant dense<0.000000e+00> : vector<24x16xf32>
    %327 = tpu.matmul %326, %314, %cst_134 {dimension_numbers = #tpu.dot_dimension_numbers<[1], [0], [0], [1], [0, 0, 1, 1], [], []>} : vector<24x24xbf16>, vector<24x16xbf16>, vector<24x16xf32> -> vector<24x16xf32>
    %328 = arith.truncf %327 : vector<24x16xf32> to vector<24x16xbf16>
    %329 = vector.extract_strided_slice %133 {offsets = [6, 0, 0], sizes = [1, 16, 128], strides = [1, 1, 1]} : vector<8x16x128xbf16> to vector<1x16x128xbf16>
    %330 = vector.shape_cast %329 : vector<1x16x128xbf16> to vector<16x128xbf16>
    %cst_135 = arith.constant dense<0.000000e+00> : vector<24x128xf32>
    %331 = tpu.matmul %328, %330, %cst_135 {dimension_numbers = #tpu.dot_dimension_numbers<[1], [0], [0], [1], [0, 0, 1, 1], [], []>} : vector<24x16xbf16>, vector<16x128xbf16>, vector<24x128xf32> -> vector<24x128xf32>
    %332 = arith.addf %308, %331 : vector<24x128xf32>
    %333 = vector.extract_strided_slice %157 {offsets = [0, 112], sizes = [24, 16], strides = [1, 1]} : vector<24x128xf32> to vector<24x16xf32>
    %334 = arith.truncf %333 : vector<24x16xf32> to vector<24x16xbf16>
    %335 = vector.extract_strided_slice %160 {offsets = [0, 112], sizes = [24, 16], strides = [1, 1]} : vector<24x128xf32> to vector<24x16xf32>
    %336 = arith.truncf %335 : vector<24x16xf32> to vector<24x16xbf16>
    %337 = vector.extract_strided_slice %163 {offsets = [0, 112], sizes = [24, 16], strides = [1, 1]} : vector<24x128xf32> to vector<24x16xf32>
    %338 = arith.truncf %337 : vector<24x16xf32> to vector<24x16xbf16>
    %cst_136 = arith.constant dense<0.000000e+00> : vector<24x24xf32>
    %339 = tpu.matmul %334, %336, %cst_136 {dimension_numbers = #tpu.dot_dimension_numbers<[1], [1], [0], [0], [0, 0, 1, 0], [], []>} : vector<24x16xbf16>, vector<24x16xbf16>, vector<24x24xf32> -> vector<24x24xf32>
    %340 = arith.addf %339, %118 : vector<24x24xf32>
    %cst_137 = arith.constant dense<0xFF800000> : vector<24xf32>
    %341 = vector.multi_reduction <maximumf>, %340, %cst_137 [1] : vector<24x24xf32> to vector<24xf32>
    %342 = vector.shape_cast %341 : vector<24xf32> to vector<24x1xf32>
    %343 = vector.broadcast %342 : vector<24x1xf32> to vector<24x24xf32>
    %344 = arith.subf %340, %343 : vector<24x24xf32>
    %345 = math.exp %344 : vector<24x24xf32>
    %cst_138 = arith.constant dense<0.000000e+00> : vector<24xf32>
    %346 = vector.multi_reduction <add>, %345, %cst_138 [1] : vector<24x24xf32> to vector<24xf32>
    %347 = vector.shape_cast %346 : vector<24xf32> to vector<24x1xf32>
    %348 = vector.broadcast %347 : vector<24x1xf32> to vector<24x24xf32>
    %349 = arith.divf %345, %348 : vector<24x24xf32>
    %350 = arith.truncf %349 : vector<24x24xf32> to vector<24x24xbf16>
    %cst_139 = arith.constant dense<0.000000e+00> : vector<24x16xf32>
    %351 = tpu.matmul %350, %338, %cst_139 {dimension_numbers = #tpu.dot_dimension_numbers<[1], [0], [0], [1], [0, 0, 1, 1], [], []>} : vector<24x24xbf16>, vector<24x16xbf16>, vector<24x16xf32> -> vector<24x16xf32>
    %352 = arith.truncf %351 : vector<24x16xf32> to vector<24x16xbf16>
    %353 = vector.extract_strided_slice %133 {offsets = [7, 0, 0], sizes = [1, 16, 128], strides = [1, 1, 1]} : vector<8x16x128xbf16> to vector<1x16x128xbf16>
    %354 = vector.shape_cast %353 : vector<1x16x128xbf16> to vector<16x128xbf16>
    %cst_140 = arith.constant dense<0.000000e+00> : vector<24x128xf32>
    %355 = tpu.matmul %352, %354, %cst_140 {dimension_numbers = #tpu.dot_dimension_numbers<[1], [0], [0], [1], [0, 0, 1, 1], [], []>} : vector<24x16xbf16>, vector<16x128xbf16>, vector<24x128xf32> -> vector<24x128xf32>
    %356 = arith.addf %332, %355 : vector<24x128xf32>
    %357 = vector.broadcast %135 : vector<1x128xf32> to vector<24x128xf32>
    %358 = arith.addf %356, %357 : vector<24x128xf32>
    %359 = arith.addf %119, %358 : vector<24x128xf32>
    %cst_141 = arith.constant dense<0.000000e+00> : vector<24xf32>
    %360 = vector.multi_reduction <add>, %359, %cst_141 [1] : vector<24x128xf32> to vector<24xf32>
    %361 = vector.shape_cast %360 : vector<24xf32> to vector<24x1xf32>
    %cst_142 = arith.constant 1.280000e+02 : f32
    %362 = vector.broadcast %cst_142 : f32 to vector<24x1xf32>
    %363 = arith.divf %361, %362 : vector<24x1xf32>
    %364 = vector.broadcast %363 : vector<24x1xf32> to vector<24x128xf32>
    %365 = arith.subf %359, %364 : vector<24x128xf32>
    %366 = arith.mulf %365, %365 : vector<24x128xf32>
    %cst_143 = arith.constant dense<0.000000e+00> : vector<24xf32>
    %367 = vector.multi_reduction <add>, %366, %cst_143 [1] : vector<24x128xf32> to vector<24xf32>
    %368 = vector.shape_cast %367 : vector<24xf32> to vector<24x1xf32>
    %cst_144 = arith.constant 1.280000e+02 : f32
    %369 = vector.broadcast %cst_144 : f32 to vector<24x1xf32>
    %370 = arith.divf %368, %369 : vector<24x1xf32>
    %cst_145 = arith.constant 9.99999974E-6 : f32
    %371 = vector.broadcast %cst_145 : f32 to vector<24x1xf32>
    %372 = arith.addf %370, %371 : vector<24x1xf32>
    %373 = math.rsqrt %372 : vector<24x1xf32>
    %374 = vector.broadcast %373 : vector<24x1xf32> to vector<24x128xf32>
    %375 = arith.mulf %365, %374 : vector<24x128xf32>
    %376 = vector.broadcast %137 : vector<1x128xf32> to vector<24x128xf32>
    %377 = arith.mulf %375, %376 : vector<24x128xf32>
    %378 = vector.broadcast %139 : vector<1x128xf32> to vector<24x128xf32>
    %379 = arith.addf %377, %378 : vector<24x128xf32>
    %380 = arith.truncf %379 : vector<24x128xf32> to vector<24x128xbf16>
    %cst_146 = arith.constant dense<0.000000e+00> : vector<24x256xf32>
    %381 = tpu.matmul %380, %141, %cst_146 {dimension_numbers = #tpu.dot_dimension_numbers<[1], [0], [0], [1], [0, 0, 1, 1], [], []>} : vector<24x128xbf16>, vector<128x256xbf16>, vector<24x256xf32> -> vector<24x256xf32>
    %382 = vector.broadcast %143 : vector<1x256xf32> to vector<24x256xf32>
    %383 = arith.addf %381, %382 : vector<24x256xf32>
    %cst_147 = arith.constant 0.000000e+00 : f32
    %384 = vector.broadcast %cst_147 : f32 to vector<24x256xf32>
    %385 = arith.maximumf %383, %384 : vector<24x256xf32>
    %386 = arith.truncf %385 : vector<24x256xf32> to vector<24x256xbf16>
    %cst_148 = arith.constant dense<0.000000e+00> : vector<24x128xf32>
    %387 = tpu.matmul %386, %145, %cst_148 {dimension_numbers = #tpu.dot_dimension_numbers<[1], [0], [0], [1], [0, 0, 1, 1], [], []>} : vector<24x256xbf16>, vector<256x128xbf16>, vector<24x128xf32> -> vector<24x128xf32>
    %388 = vector.broadcast %147 : vector<1x128xf32> to vector<24x128xf32>
    %389 = arith.addf %387, %388 : vector<24x128xf32>
    %390 = arith.addf %379, %389 : vector<24x128xf32>
    %cst_149 = arith.constant dense<0.000000e+00> : vector<24xf32>
    %391 = vector.multi_reduction <add>, %390, %cst_149 [1] : vector<24x128xf32> to vector<24xf32>
    %392 = vector.shape_cast %391 : vector<24xf32> to vector<24x1xf32>
    %cst_150 = arith.constant 1.280000e+02 : f32
    %393 = vector.broadcast %cst_150 : f32 to vector<24x1xf32>
    %394 = arith.divf %392, %393 : vector<24x1xf32>
    %395 = vector.broadcast %394 : vector<24x1xf32> to vector<24x128xf32>
    %396 = arith.subf %390, %395 : vector<24x128xf32>
    %397 = arith.mulf %396, %396 : vector<24x128xf32>
    %cst_151 = arith.constant dense<0.000000e+00> : vector<24xf32>
    %398 = vector.multi_reduction <add>, %397, %cst_151 [1] : vector<24x128xf32> to vector<24xf32>
    %399 = vector.shape_cast %398 : vector<24xf32> to vector<24x1xf32>
    %cst_152 = arith.constant 1.280000e+02 : f32
    %400 = vector.broadcast %cst_152 : f32 to vector<24x1xf32>
    %401 = arith.divf %399, %400 : vector<24x1xf32>
    %cst_153 = arith.constant 9.99999974E-6 : f32
    %402 = vector.broadcast %cst_153 : f32 to vector<24x1xf32>
    %403 = arith.addf %401, %402 : vector<24x1xf32>
    %404 = math.rsqrt %403 : vector<24x1xf32>
    %405 = vector.broadcast %404 : vector<24x1xf32> to vector<24x128xf32>
    %406 = arith.mulf %396, %405 : vector<24x128xf32>
    %407 = vector.broadcast %149 : vector<1x128xf32> to vector<24x128xf32>
    %408 = arith.mulf %406, %407 : vector<24x128xf32>
    %409 = vector.broadcast %151 : vector<1x128xf32> to vector<24x128xf32>
    %410 = arith.addf %408, %409 : vector<24x128xf32>
    %c1 = arith.constant 1 : index
    %c0_154 = arith.constant 0 : index
    %c0_155 = arith.constant 0 : index
    %411 = vector.load %arg11[%c1, %c0_154, %c0_155] : memref<3x128x128xbf16, #tpu.memory_space<vmem>>, vector<1x128x128xbf16>
    %412 = vector.shape_cast %411 : vector<1x128x128xbf16> to vector<128x128xbf16>
    %c1_156 = arith.constant 1 : index
    %c0_157 = arith.constant 0 : index
    %c0_158 = arith.constant 0 : index
    %413 = vector.load %arg12[%c1_156, %c0_157, %c0_158] : memref<3x1x128xf32, #tpu.memory_space<vmem>>, vector<1x1x128xf32>
    %414 = vector.shape_cast %413 : vector<1x1x128xf32> to vector<1x128xf32>
    %c1_159 = arith.constant 1 : index
    %c0_160 = arith.constant 0 : index
    %c0_161 = arith.constant 0 : index
    %415 = vector.load %arg13[%c1_159, %c0_160, %c0_161] : memref<3x128x128xbf16, #tpu.memory_space<vmem>>, vector<1x128x128xbf16>
    %416 = vector.shape_cast %415 : vector<1x128x128xbf16> to vector<128x128xbf16>
    %c1_162 = arith.constant 1 : index
    %c0_163 = arith.constant 0 : index
    %c0_164 = arith.constant 0 : index
    %417 = vector.load %arg14[%c1_162, %c0_163, %c0_164] : memref<3x1x128xf32, #tpu.memory_space<vmem>>, vector<1x1x128xf32>
    %418 = vector.shape_cast %417 : vector<1x1x128xf32> to vector<1x128xf32>
    %c1_165 = arith.constant 1 : index
    %c0_166 = arith.constant 0 : index
    %c0_167 = arith.constant 0 : index
    %419 = vector.load %arg15[%c1_165, %c0_166, %c0_167] : memref<3x128x128xbf16, #tpu.memory_space<vmem>>, vector<1x128x128xbf16>
    %420 = vector.shape_cast %419 : vector<1x128x128xbf16> to vector<128x128xbf16>
    %c1_168 = arith.constant 1 : index
    %c0_169 = arith.constant 0 : index
    %c0_170 = arith.constant 0 : index
    %421 = vector.load %arg16[%c1_168, %c0_169, %c0_170] : memref<3x1x128xf32, #tpu.memory_space<vmem>>, vector<1x1x128xf32>
    %422 = vector.shape_cast %421 : vector<1x1x128xf32> to vector<1x128xf32>
    %c1_171 = arith.constant 1 : index
    %c0_172 = arith.constant 0 : index
    %c0_173 = arith.constant 0 : index
    %c0_174 = arith.constant 0 : index
    %423 = vector.load %arg17[%c1_171, %c0_172, %c0_173, %c0_174] : memref<3x8x16x128xbf16, #tpu.memory_space<vmem>>, vector<1x8x16x128xbf16>
    %424 = vector.shape_cast %423 : vector<1x8x16x128xbf16> to vector<8x16x128xbf16>
    %c1_175 = arith.constant 1 : index
    %c0_176 = arith.constant 0 : index
    %c0_177 = arith.constant 0 : index
    %425 = vector.load %arg18[%c1_175, %c0_176, %c0_177] : memref<3x1x128xf32, #tpu.memory_space<vmem>>, vector<1x1x128xf32>
    %426 = vector.shape_cast %425 : vector<1x1x128xf32> to vector<1x128xf32>
    %c1_178 = arith.constant 1 : index
    %c0_179 = arith.constant 0 : index
    %c0_180 = arith.constant 0 : index
    %427 = vector.load %arg19[%c1_178, %c0_179, %c0_180] : memref<3x1x128xf32, #tpu.memory_space<vmem>>, vector<1x1x128xf32>
    %428 = vector.shape_cast %427 : vector<1x1x128xf32> to vector<1x128xf32>
    %c1_181 = arith.constant 1 : index
    %c0_182 = arith.constant 0 : index
    %c0_183 = arith.constant 0 : index
    %429 = vector.load %arg20[%c1_181, %c0_182, %c0_183] : memref<3x1x128xf32, #tpu.memory_space<vmem>>, vector<1x1x128xf32>
    %430 = vector.shape_cast %429 : vector<1x1x128xf32> to vector<1x128xf32>
    %c1_184 = arith.constant 1 : index
    %c0_185 = arith.constant 0 : index
    %c0_186 = arith.constant 0 : index
    %431 = vector.load %arg21[%c1_184, %c0_185, %c0_186] : memref<3x128x256xbf16, #tpu.memory_space<vmem>>, vector<1x128x256xbf16>
    %432 = vector.shape_cast %431 : vector<1x128x256xbf16> to vector<128x256xbf16>
    %c1_187 = arith.constant 1 : index
    %c0_188 = arith.constant 0 : index
    %c0_189 = arith.constant 0 : index
    %433 = vector.load %arg22[%c1_187, %c0_188, %c0_189] : memref<3x1x256xf32, #tpu.memory_space<vmem>>, vector<1x1x256xf32>
    %434 = vector.shape_cast %433 : vector<1x1x256xf32> to vector<1x256xf32>
    %c1_190 = arith.constant 1 : index
    %c0_191 = arith.constant 0 : index
    %c0_192 = arith.constant 0 : index
    %435 = vector.load %arg23[%c1_190, %c0_191, %c0_192] : memref<3x256x128xbf16, #tpu.memory_space<vmem>>, vector<1x256x128xbf16>
    %436 = vector.shape_cast %435 : vector<1x256x128xbf16> to vector<256x128xbf16>
    %c1_193 = arith.constant 1 : index
    %c0_194 = arith.constant 0 : index
    %c0_195 = arith.constant 0 : index
    %437 = vector.load %arg24[%c1_193, %c0_194, %c0_195] : memref<3x1x128xf32, #tpu.memory_space<vmem>>, vector<1x1x128xf32>
    %438 = vector.shape_cast %437 : vector<1x1x128xf32> to vector<1x128xf32>
    %c1_196 = arith.constant 1 : index
    %c0_197 = arith.constant 0 : index
    %c0_198 = arith.constant 0 : index
    %439 = vector.load %arg25[%c1_196, %c0_197, %c0_198] : memref<3x1x128xf32, #tpu.memory_space<vmem>>, vector<1x1x128xf32>
    %440 = vector.shape_cast %439 : vector<1x1x128xf32> to vector<1x128xf32>
    %c1_199 = arith.constant 1 : index
    %c0_200 = arith.constant 0 : index
    %c0_201 = arith.constant 0 : index
    %441 = vector.load %arg26[%c1_199, %c0_200, %c0_201] : memref<3x1x128xf32, #tpu.memory_space<vmem>>, vector<1x1x128xf32>
    %442 = vector.shape_cast %441 : vector<1x1x128xf32> to vector<1x128xf32>
    %443 = arith.truncf %410 : vector<24x128xf32> to vector<24x128xbf16>
    %cst_202 = arith.constant dense<0.000000e+00> : vector<24x128xf32>
    %444 = tpu.matmul %443, %412, %cst_202 {dimension_numbers = #tpu.dot_dimension_numbers<[1], [0], [0], [1], [0, 0, 1, 1], [], []>} : vector<24x128xbf16>, vector<128x128xbf16>, vector<24x128xf32> -> vector<24x128xf32>
    %445 = vector.broadcast %414 : vector<1x128xf32> to vector<24x128xf32>
    %446 = arith.addf %444, %445 : vector<24x128xf32>
    %cst_203 = arith.constant 2.500000e-01 : f32
    %447 = vector.broadcast %cst_203 : f32 to vector<24x128xf32>
    %448 = arith.mulf %446, %447 : vector<24x128xf32>
    %cst_204 = arith.constant dense<0.000000e+00> : vector<24x128xf32>
    %449 = tpu.matmul %443, %416, %cst_204 {dimension_numbers = #tpu.dot_dimension_numbers<[1], [0], [0], [1], [0, 0, 1, 1], [], []>} : vector<24x128xbf16>, vector<128x128xbf16>, vector<24x128xf32> -> vector<24x128xf32>
    %450 = vector.broadcast %418 : vector<1x128xf32> to vector<24x128xf32>
    %451 = arith.addf %449, %450 : vector<24x128xf32>
    %cst_205 = arith.constant dense<0.000000e+00> : vector<24x128xf32>
    %452 = tpu.matmul %443, %420, %cst_205 {dimension_numbers = #tpu.dot_dimension_numbers<[1], [0], [0], [1], [0, 0, 1, 1], [], []>} : vector<24x128xbf16>, vector<128x128xbf16>, vector<24x128xf32> -> vector<24x128xf32>
    %453 = vector.broadcast %422 : vector<1x128xf32> to vector<24x128xf32>
    %454 = arith.addf %452, %453 : vector<24x128xf32>
    %cst_206 = arith.constant 0.000000e+00 : f32
    %455 = vector.broadcast %cst_206 : f32 to vector<24x128xf32>
    %456 = vector.extract_strided_slice %448 {offsets = [0, 0], sizes = [24, 16], strides = [1, 1]} : vector<24x128xf32> to vector<24x16xf32>
    %457 = arith.truncf %456 : vector<24x16xf32> to vector<24x16xbf16>
    %458 = vector.extract_strided_slice %451 {offsets = [0, 0], sizes = [24, 16], strides = [1, 1]} : vector<24x128xf32> to vector<24x16xf32>
    %459 = arith.truncf %458 : vector<24x16xf32> to vector<24x16xbf16>
    %460 = vector.extract_strided_slice %454 {offsets = [0, 0], sizes = [24, 16], strides = [1, 1]} : vector<24x128xf32> to vector<24x16xf32>
    %461 = arith.truncf %460 : vector<24x16xf32> to vector<24x16xbf16>
    %cst_207 = arith.constant dense<0.000000e+00> : vector<24x24xf32>
    %462 = tpu.matmul %457, %459, %cst_207 {dimension_numbers = #tpu.dot_dimension_numbers<[1], [1], [0], [0], [0, 0, 1, 0], [], []>} : vector<24x16xbf16>, vector<24x16xbf16>, vector<24x24xf32> -> vector<24x24xf32>
    %463 = arith.addf %462, %118 : vector<24x24xf32>
    %cst_208 = arith.constant dense<0xFF800000> : vector<24xf32>
    %464 = vector.multi_reduction <maximumf>, %463, %cst_208 [1] : vector<24x24xf32> to vector<24xf32>
    %465 = vector.shape_cast %464 : vector<24xf32> to vector<24x1xf32>
    %466 = vector.broadcast %465 : vector<24x1xf32> to vector<24x24xf32>
    %467 = arith.subf %463, %466 : vector<24x24xf32>
    %468 = math.exp %467 : vector<24x24xf32>
    %cst_209 = arith.constant dense<0.000000e+00> : vector<24xf32>
    %469 = vector.multi_reduction <add>, %468, %cst_209 [1] : vector<24x24xf32> to vector<24xf32>
    %470 = vector.shape_cast %469 : vector<24xf32> to vector<24x1xf32>
    %471 = vector.broadcast %470 : vector<24x1xf32> to vector<24x24xf32>
    %472 = arith.divf %468, %471 : vector<24x24xf32>
    %473 = arith.truncf %472 : vector<24x24xf32> to vector<24x24xbf16>
    %cst_210 = arith.constant dense<0.000000e+00> : vector<24x16xf32>
    %474 = tpu.matmul %473, %461, %cst_210 {dimension_numbers = #tpu.dot_dimension_numbers<[1], [0], [0], [1], [0, 0, 1, 1], [], []>} : vector<24x24xbf16>, vector<24x16xbf16>, vector<24x16xf32> -> vector<24x16xf32>
    %475 = arith.truncf %474 : vector<24x16xf32> to vector<24x16xbf16>
    %476 = vector.extract_strided_slice %424 {offsets = [0, 0, 0], sizes = [1, 16, 128], strides = [1, 1, 1]} : vector<8x16x128xbf16> to vector<1x16x128xbf16>
    %477 = vector.shape_cast %476 : vector<1x16x128xbf16> to vector<16x128xbf16>
    %cst_211 = arith.constant dense<0.000000e+00> : vector<24x128xf32>
    %478 = tpu.matmul %475, %477, %cst_211 {dimension_numbers = #tpu.dot_dimension_numbers<[1], [0], [0], [1], [0, 0, 1, 1], [], []>} : vector<24x16xbf16>, vector<16x128xbf16>, vector<24x128xf32> -> vector<24x128xf32>
    %479 = arith.addf %455, %478 : vector<24x128xf32>
    %480 = vector.extract_strided_slice %448 {offsets = [0, 16], sizes = [24, 16], strides = [1, 1]} : vector<24x128xf32> to vector<24x16xf32>
    %481 = arith.truncf %480 : vector<24x16xf32> to vector<24x16xbf16>
    %482 = vector.extract_strided_slice %451 {offsets = [0, 16], sizes = [24, 16], strides = [1, 1]} : vector<24x128xf32> to vector<24x16xf32>
    %483 = arith.truncf %482 : vector<24x16xf32> to vector<24x16xbf16>
    %484 = vector.extract_strided_slice %454 {offsets = [0, 16], sizes = [24, 16], strides = [1, 1]} : vector<24x128xf32> to vector<24x16xf32>
    %485 = arith.truncf %484 : vector<24x16xf32> to vector<24x16xbf16>
    %cst_212 = arith.constant dense<0.000000e+00> : vector<24x24xf32>
    %486 = tpu.matmul %481, %483, %cst_212 {dimension_numbers = #tpu.dot_dimension_numbers<[1], [1], [0], [0], [0, 0, 1, 0], [], []>} : vector<24x16xbf16>, vector<24x16xbf16>, vector<24x24xf32> -> vector<24x24xf32>
    %487 = arith.addf %486, %118 : vector<24x24xf32>
    %cst_213 = arith.constant dense<0xFF800000> : vector<24xf32>
    %488 = vector.multi_reduction <maximumf>, %487, %cst_213 [1] : vector<24x24xf32> to vector<24xf32>
    %489 = vector.shape_cast %488 : vector<24xf32> to vector<24x1xf32>
    %490 = vector.broadcast %489 : vector<24x1xf32> to vector<24x24xf32>
    %491 = arith.subf %487, %490 : vector<24x24xf32>
    %492 = math.exp %491 : vector<24x24xf32>
    %cst_214 = arith.constant dense<0.000000e+00> : vector<24xf32>
    %493 = vector.multi_reduction <add>, %492, %cst_214 [1] : vector<24x24xf32> to vector<24xf32>
    %494 = vector.shape_cast %493 : vector<24xf32> to vector<24x1xf32>
    %495 = vector.broadcast %494 : vector<24x1xf32> to vector<24x24xf32>
    %496 = arith.divf %492, %495 : vector<24x24xf32>
    %497 = arith.truncf %496 : vector<24x24xf32> to vector<24x24xbf16>
    %cst_215 = arith.constant dense<0.000000e+00> : vector<24x16xf32>
    %498 = tpu.matmul %497, %485, %cst_215 {dimension_numbers = #tpu.dot_dimension_numbers<[1], [0], [0], [1], [0, 0, 1, 1], [], []>} : vector<24x24xbf16>, vector<24x16xbf16>, vector<24x16xf32> -> vector<24x16xf32>
    %499 = arith.truncf %498 : vector<24x16xf32> to vector<24x16xbf16>
    %500 = vector.extract_strided_slice %424 {offsets = [1, 0, 0], sizes = [1, 16, 128], strides = [1, 1, 1]} : vector<8x16x128xbf16> to vector<1x16x128xbf16>
    %501 = vector.shape_cast %500 : vector<1x16x128xbf16> to vector<16x128xbf16>
    %cst_216 = arith.constant dense<0.000000e+00> : vector<24x128xf32>
    %502 = tpu.matmul %499, %501, %cst_216 {dimension_numbers = #tpu.dot_dimension_numbers<[1], [0], [0], [1], [0, 0, 1, 1], [], []>} : vector<24x16xbf16>, vector<16x128xbf16>, vector<24x128xf32> -> vector<24x128xf32>
    %503 = arith.addf %479, %502 : vector<24x128xf32>
    %504 = vector.extract_strided_slice %448 {offsets = [0, 32], sizes = [24, 16], strides = [1, 1]} : vector<24x128xf32> to vector<24x16xf32>
    %505 = arith.truncf %504 : vector<24x16xf32> to vector<24x16xbf16>
    %506 = vector.extract_strided_slice %451 {offsets = [0, 32], sizes = [24, 16], strides = [1, 1]} : vector<24x128xf32> to vector<24x16xf32>
    %507 = arith.truncf %506 : vector<24x16xf32> to vector<24x16xbf16>
    %508 = vector.extract_strided_slice %454 {offsets = [0, 32], sizes = [24, 16], strides = [1, 1]} : vector<24x128xf32> to vector<24x16xf32>
    %509 = arith.truncf %508 : vector<24x16xf32> to vector<24x16xbf16>
    %cst_217 = arith.constant dense<0.000000e+00> : vector<24x24xf32>
    %510 = tpu.matmul %505, %507, %cst_217 {dimension_numbers = #tpu.dot_dimension_numbers<[1], [1], [0], [0], [0, 0, 1, 0], [], []>} : vector<24x16xbf16>, vector<24x16xbf16>, vector<24x24xf32> -> vector<24x24xf32>
    %511 = arith.addf %510, %118 : vector<24x24xf32>
    %cst_218 = arith.constant dense<0xFF800000> : vector<24xf32>
    %512 = vector.multi_reduction <maximumf>, %511, %cst_218 [1] : vector<24x24xf32> to vector<24xf32>
    %513 = vector.shape_cast %512 : vector<24xf32> to vector<24x1xf32>
    %514 = vector.broadcast %513 : vector<24x1xf32> to vector<24x24xf32>
    %515 = arith.subf %511, %514 : vector<24x24xf32>
    %516 = math.exp %515 : vector<24x24xf32>
    %cst_219 = arith.constant dense<0.000000e+00> : vector<24xf32>
    %517 = vector.multi_reduction <add>, %516, %cst_219 [1] : vector<24x24xf32> to vector<24xf32>
    %518 = vector.shape_cast %517 : vector<24xf32> to vector<24x1xf32>
    %519 = vector.broadcast %518 : vector<24x1xf32> to vector<24x24xf32>
    %520 = arith.divf %516, %519 : vector<24x24xf32>
    %521 = arith.truncf %520 : vector<24x24xf32> to vector<24x24xbf16>
    %cst_220 = arith.constant dense<0.000000e+00> : vector<24x16xf32>
    %522 = tpu.matmul %521, %509, %cst_220 {dimension_numbers = #tpu.dot_dimension_numbers<[1], [0], [0], [1], [0, 0, 1, 1], [], []>} : vector<24x24xbf16>, vector<24x16xbf16>, vector<24x16xf32> -> vector<24x16xf32>
    %523 = arith.truncf %522 : vector<24x16xf32> to vector<24x16xbf16>
    %524 = vector.extract_strided_slice %424 {offsets = [2, 0, 0], sizes = [1, 16, 128], strides = [1, 1, 1]} : vector<8x16x128xbf16> to vector<1x16x128xbf16>
    %525 = vector.shape_cast %524 : vector<1x16x128xbf16> to vector<16x128xbf16>
    %cst_221 = arith.constant dense<0.000000e+00> : vector<24x128xf32>
    %526 = tpu.matmul %523, %525, %cst_221 {dimension_numbers = #tpu.dot_dimension_numbers<[1], [0], [0], [1], [0, 0, 1, 1], [], []>} : vector<24x16xbf16>, vector<16x128xbf16>, vector<24x128xf32> -> vector<24x128xf32>
    %527 = arith.addf %503, %526 : vector<24x128xf32>
    %528 = vector.extract_strided_slice %448 {offsets = [0, 48], sizes = [24, 16], strides = [1, 1]} : vector<24x128xf32> to vector<24x16xf32>
    %529 = arith.truncf %528 : vector<24x16xf32> to vector<24x16xbf16>
    %530 = vector.extract_strided_slice %451 {offsets = [0, 48], sizes = [24, 16], strides = [1, 1]} : vector<24x128xf32> to vector<24x16xf32>
    %531 = arith.truncf %530 : vector<24x16xf32> to vector<24x16xbf16>
    %532 = vector.extract_strided_slice %454 {offsets = [0, 48], sizes = [24, 16], strides = [1, 1]} : vector<24x128xf32> to vector<24x16xf32>
    %533 = arith.truncf %532 : vector<24x16xf32> to vector<24x16xbf16>
    %cst_222 = arith.constant dense<0.000000e+00> : vector<24x24xf32>
    %534 = tpu.matmul %529, %531, %cst_222 {dimension_numbers = #tpu.dot_dimension_numbers<[1], [1], [0], [0], [0, 0, 1, 0], [], []>} : vector<24x16xbf16>, vector<24x16xbf16>, vector<24x24xf32> -> vector<24x24xf32>
    %535 = arith.addf %534, %118 : vector<24x24xf32>
    %cst_223 = arith.constant dense<0xFF800000> : vector<24xf32>
    %536 = vector.multi_reduction <maximumf>, %535, %cst_223 [1] : vector<24x24xf32> to vector<24xf32>
    %537 = vector.shape_cast %536 : vector<24xf32> to vector<24x1xf32>
    %538 = vector.broadcast %537 : vector<24x1xf32> to vector<24x24xf32>
    %539 = arith.subf %535, %538 : vector<24x24xf32>
    %540 = math.exp %539 : vector<24x24xf32>
    %cst_224 = arith.constant dense<0.000000e+00> : vector<24xf32>
    %541 = vector.multi_reduction <add>, %540, %cst_224 [1] : vector<24x24xf32> to vector<24xf32>
    %542 = vector.shape_cast %541 : vector<24xf32> to vector<24x1xf32>
    %543 = vector.broadcast %542 : vector<24x1xf32> to vector<24x24xf32>
    %544 = arith.divf %540, %543 : vector<24x24xf32>
    %545 = arith.truncf %544 : vector<24x24xf32> to vector<24x24xbf16>
    %cst_225 = arith.constant dense<0.000000e+00> : vector<24x16xf32>
    %546 = tpu.matmul %545, %533, %cst_225 {dimension_numbers = #tpu.dot_dimension_numbers<[1], [0], [0], [1], [0, 0, 1, 1], [], []>} : vector<24x24xbf16>, vector<24x16xbf16>, vector<24x16xf32> -> vector<24x16xf32>
    %547 = arith.truncf %546 : vector<24x16xf32> to vector<24x16xbf16>
    %548 = vector.extract_strided_slice %424 {offsets = [3, 0, 0], sizes = [1, 16, 128], strides = [1, 1, 1]} : vector<8x16x128xbf16> to vector<1x16x128xbf16>
    %549 = vector.shape_cast %548 : vector<1x16x128xbf16> to vector<16x128xbf16>
    %cst_226 = arith.constant dense<0.000000e+00> : vector<24x128xf32>
    %550 = tpu.matmul %547, %549, %cst_226 {dimension_numbers = #tpu.dot_dimension_numbers<[1], [0], [0], [1], [0, 0, 1, 1], [], []>} : vector<24x16xbf16>, vector<16x128xbf16>, vector<24x128xf32> -> vector<24x128xf32>
    %551 = arith.addf %527, %550 : vector<24x128xf32>
    %552 = vector.extract_strided_slice %448 {offsets = [0, 64], sizes = [24, 16], strides = [1, 1]} : vector<24x128xf32> to vector<24x16xf32>
    %553 = arith.truncf %552 : vector<24x16xf32> to vector<24x16xbf16>
    %554 = vector.extract_strided_slice %451 {offsets = [0, 64], sizes = [24, 16], strides = [1, 1]} : vector<24x128xf32> to vector<24x16xf32>
    %555 = arith.truncf %554 : vector<24x16xf32> to vector<24x16xbf16>
    %556 = vector.extract_strided_slice %454 {offsets = [0, 64], sizes = [24, 16], strides = [1, 1]} : vector<24x128xf32> to vector<24x16xf32>
    %557 = arith.truncf %556 : vector<24x16xf32> to vector<24x16xbf16>
    %cst_227 = arith.constant dense<0.000000e+00> : vector<24x24xf32>
    %558 = tpu.matmul %553, %555, %cst_227 {dimension_numbers = #tpu.dot_dimension_numbers<[1], [1], [0], [0], [0, 0, 1, 0], [], []>} : vector<24x16xbf16>, vector<24x16xbf16>, vector<24x24xf32> -> vector<24x24xf32>
    %559 = arith.addf %558, %118 : vector<24x24xf32>
    %cst_228 = arith.constant dense<0xFF800000> : vector<24xf32>
    %560 = vector.multi_reduction <maximumf>, %559, %cst_228 [1] : vector<24x24xf32> to vector<24xf32>
    %561 = vector.shape_cast %560 : vector<24xf32> to vector<24x1xf32>
    %562 = vector.broadcast %561 : vector<24x1xf32> to vector<24x24xf32>
    %563 = arith.subf %559, %562 : vector<24x24xf32>
    %564 = math.exp %563 : vector<24x24xf32>
    %cst_229 = arith.constant dense<0.000000e+00> : vector<24xf32>
    %565 = vector.multi_reduction <add>, %564, %cst_229 [1] : vector<24x24xf32> to vector<24xf32>
    %566 = vector.shape_cast %565 : vector<24xf32> to vector<24x1xf32>
    %567 = vector.broadcast %566 : vector<24x1xf32> to vector<24x24xf32>
    %568 = arith.divf %564, %567 : vector<24x24xf32>
    %569 = arith.truncf %568 : vector<24x24xf32> to vector<24x24xbf16>
    %cst_230 = arith.constant dense<0.000000e+00> : vector<24x16xf32>
    %570 = tpu.matmul %569, %557, %cst_230 {dimension_numbers = #tpu.dot_dimension_numbers<[1], [0], [0], [1], [0, 0, 1, 1], [], []>} : vector<24x24xbf16>, vector<24x16xbf16>, vector<24x16xf32> -> vector<24x16xf32>
    %571 = arith.truncf %570 : vector<24x16xf32> to vector<24x16xbf16>
    %572 = vector.extract_strided_slice %424 {offsets = [4, 0, 0], sizes = [1, 16, 128], strides = [1, 1, 1]} : vector<8x16x128xbf16> to vector<1x16x128xbf16>
    %573 = vector.shape_cast %572 : vector<1x16x128xbf16> to vector<16x128xbf16>
    %cst_231 = arith.constant dense<0.000000e+00> : vector<24x128xf32>
    %574 = tpu.matmul %571, %573, %cst_231 {dimension_numbers = #tpu.dot_dimension_numbers<[1], [0], [0], [1], [0, 0, 1, 1], [], []>} : vector<24x16xbf16>, vector<16x128xbf16>, vector<24x128xf32> -> vector<24x128xf32>
    %575 = arith.addf %551, %574 : vector<24x128xf32>
    %576 = vector.extract_strided_slice %448 {offsets = [0, 80], sizes = [24, 16], strides = [1, 1]} : vector<24x128xf32> to vector<24x16xf32>
    %577 = arith.truncf %576 : vector<24x16xf32> to vector<24x16xbf16>
    %578 = vector.extract_strided_slice %451 {offsets = [0, 80], sizes = [24, 16], strides = [1, 1]} : vector<24x128xf32> to vector<24x16xf32>
    %579 = arith.truncf %578 : vector<24x16xf32> to vector<24x16xbf16>
    %580 = vector.extract_strided_slice %454 {offsets = [0, 80], sizes = [24, 16], strides = [1, 1]} : vector<24x128xf32> to vector<24x16xf32>
    %581 = arith.truncf %580 : vector<24x16xf32> to vector<24x16xbf16>
    %cst_232 = arith.constant dense<0.000000e+00> : vector<24x24xf32>
    %582 = tpu.matmul %577, %579, %cst_232 {dimension_numbers = #tpu.dot_dimension_numbers<[1], [1], [0], [0], [0, 0, 1, 0], [], []>} : vector<24x16xbf16>, vector<24x16xbf16>, vector<24x24xf32> -> vector<24x24xf32>
    %583 = arith.addf %582, %118 : vector<24x24xf32>
    %cst_233 = arith.constant dense<0xFF800000> : vector<24xf32>
    %584 = vector.multi_reduction <maximumf>, %583, %cst_233 [1] : vector<24x24xf32> to vector<24xf32>
    %585 = vector.shape_cast %584 : vector<24xf32> to vector<24x1xf32>
    %586 = vector.broadcast %585 : vector<24x1xf32> to vector<24x24xf32>
    %587 = arith.subf %583, %586 : vector<24x24xf32>
    %588 = math.exp %587 : vector<24x24xf32>
    %cst_234 = arith.constant dense<0.000000e+00> : vector<24xf32>
    %589 = vector.multi_reduction <add>, %588, %cst_234 [1] : vector<24x24xf32> to vector<24xf32>
    %590 = vector.shape_cast %589 : vector<24xf32> to vector<24x1xf32>
    %591 = vector.broadcast %590 : vector<24x1xf32> to vector<24x24xf32>
    %592 = arith.divf %588, %591 : vector<24x24xf32>
    %593 = arith.truncf %592 : vector<24x24xf32> to vector<24x24xbf16>
    %cst_235 = arith.constant dense<0.000000e+00> : vector<24x16xf32>
    %594 = tpu.matmul %593, %581, %cst_235 {dimension_numbers = #tpu.dot_dimension_numbers<[1], [0], [0], [1], [0, 0, 1, 1], [], []>} : vector<24x24xbf16>, vector<24x16xbf16>, vector<24x16xf32> -> vector<24x16xf32>
    %595 = arith.truncf %594 : vector<24x16xf32> to vector<24x16xbf16>
    %596 = vector.extract_strided_slice %424 {offsets = [5, 0, 0], sizes = [1, 16, 128], strides = [1, 1, 1]} : vector<8x16x128xbf16> to vector<1x16x128xbf16>
    %597 = vector.shape_cast %596 : vector<1x16x128xbf16> to vector<16x128xbf16>
    %cst_236 = arith.constant dense<0.000000e+00> : vector<24x128xf32>
    %598 = tpu.matmul %595, %597, %cst_236 {dimension_numbers = #tpu.dot_dimension_numbers<[1], [0], [0], [1], [0, 0, 1, 1], [], []>} : vector<24x16xbf16>, vector<16x128xbf16>, vector<24x128xf32> -> vector<24x128xf32>
    %599 = arith.addf %575, %598 : vector<24x128xf32>
    %600 = vector.extract_strided_slice %448 {offsets = [0, 96], sizes = [24, 16], strides = [1, 1]} : vector<24x128xf32> to vector<24x16xf32>
    %601 = arith.truncf %600 : vector<24x16xf32> to vector<24x16xbf16>
    %602 = vector.extract_strided_slice %451 {offsets = [0, 96], sizes = [24, 16], strides = [1, 1]} : vector<24x128xf32> to vector<24x16xf32>
    %603 = arith.truncf %602 : vector<24x16xf32> to vector<24x16xbf16>
    %604 = vector.extract_strided_slice %454 {offsets = [0, 96], sizes = [24, 16], strides = [1, 1]} : vector<24x128xf32> to vector<24x16xf32>
    %605 = arith.truncf %604 : vector<24x16xf32> to vector<24x16xbf16>
    %cst_237 = arith.constant dense<0.000000e+00> : vector<24x24xf32>
    %606 = tpu.matmul %601, %603, %cst_237 {dimension_numbers = #tpu.dot_dimension_numbers<[1], [1], [0], [0], [0, 0, 1, 0], [], []>} : vector<24x16xbf16>, vector<24x16xbf16>, vector<24x24xf32> -> vector<24x24xf32>
    %607 = arith.addf %606, %118 : vector<24x24xf32>
    %cst_238 = arith.constant dense<0xFF800000> : vector<24xf32>
    %608 = vector.multi_reduction <maximumf>, %607, %cst_238 [1] : vector<24x24xf32> to vector<24xf32>
    %609 = vector.shape_cast %608 : vector<24xf32> to vector<24x1xf32>
    %610 = vector.broadcast %609 : vector<24x1xf32> to vector<24x24xf32>
    %611 = arith.subf %607, %610 : vector<24x24xf32>
    %612 = math.exp %611 : vector<24x24xf32>
    %cst_239 = arith.constant dense<0.000000e+00> : vector<24xf32>
    %613 = vector.multi_reduction <add>, %612, %cst_239 [1] : vector<24x24xf32> to vector<24xf32>
    %614 = vector.shape_cast %613 : vector<24xf32> to vector<24x1xf32>
    %615 = vector.broadcast %614 : vector<24x1xf32> to vector<24x24xf32>
    %616 = arith.divf %612, %615 : vector<24x24xf32>
    %617 = arith.truncf %616 : vector<24x24xf32> to vector<24x24xbf16>
    %cst_240 = arith.constant dense<0.000000e+00> : vector<24x16xf32>
    %618 = tpu.matmul %617, %605, %cst_240 {dimension_numbers = #tpu.dot_dimension_numbers<[1], [0], [0], [1], [0, 0, 1, 1], [], []>} : vector<24x24xbf16>, vector<24x16xbf16>, vector<24x16xf32> -> vector<24x16xf32>
    %619 = arith.truncf %618 : vector<24x16xf32> to vector<24x16xbf16>
    %620 = vector.extract_strided_slice %424 {offsets = [6, 0, 0], sizes = [1, 16, 128], strides = [1, 1, 1]} : vector<8x16x128xbf16> to vector<1x16x128xbf16>
    %621 = vector.shape_cast %620 : vector<1x16x128xbf16> to vector<16x128xbf16>
    %cst_241 = arith.constant dense<0.000000e+00> : vector<24x128xf32>
    %622 = tpu.matmul %619, %621, %cst_241 {dimension_numbers = #tpu.dot_dimension_numbers<[1], [0], [0], [1], [0, 0, 1, 1], [], []>} : vector<24x16xbf16>, vector<16x128xbf16>, vector<24x128xf32> -> vector<24x128xf32>
    %623 = arith.addf %599, %622 : vector<24x128xf32>
    %624 = vector.extract_strided_slice %448 {offsets = [0, 112], sizes = [24, 16], strides = [1, 1]} : vector<24x128xf32> to vector<24x16xf32>
    %625 = arith.truncf %624 : vector<24x16xf32> to vector<24x16xbf16>
    %626 = vector.extract_strided_slice %451 {offsets = [0, 112], sizes = [24, 16], strides = [1, 1]} : vector<24x128xf32> to vector<24x16xf32>
    %627 = arith.truncf %626 : vector<24x16xf32> to vector<24x16xbf16>
    %628 = vector.extract_strided_slice %454 {offsets = [0, 112], sizes = [24, 16], strides = [1, 1]} : vector<24x128xf32> to vector<24x16xf32>
    %629 = arith.truncf %628 : vector<24x16xf32> to vector<24x16xbf16>
    %cst_242 = arith.constant dense<0.000000e+00> : vector<24x24xf32>
    %630 = tpu.matmul %625, %627, %cst_242 {dimension_numbers = #tpu.dot_dimension_numbers<[1], [1], [0], [0], [0, 0, 1, 0], [], []>} : vector<24x16xbf16>, vector<24x16xbf16>, vector<24x24xf32> -> vector<24x24xf32>
    %631 = arith.addf %630, %118 : vector<24x24xf32>
    %cst_243 = arith.constant dense<0xFF800000> : vector<24xf32>
    %632 = vector.multi_reduction <maximumf>, %631, %cst_243 [1] : vector<24x24xf32> to vector<24xf32>
    %633 = vector.shape_cast %632 : vector<24xf32> to vector<24x1xf32>
    %634 = vector.broadcast %633 : vector<24x1xf32> to vector<24x24xf32>
    %635 = arith.subf %631, %634 : vector<24x24xf32>
    %636 = math.exp %635 : vector<24x24xf32>
    %cst_244 = arith.constant dense<0.000000e+00> : vector<24xf32>
    %637 = vector.multi_reduction <add>, %636, %cst_244 [1] : vector<24x24xf32> to vector<24xf32>
    %638 = vector.shape_cast %637 : vector<24xf32> to vector<24x1xf32>
    %639 = vector.broadcast %638 : vector<24x1xf32> to vector<24x24xf32>
    %640 = arith.divf %636, %639 : vector<24x24xf32>
    %641 = arith.truncf %640 : vector<24x24xf32> to vector<24x24xbf16>
    %cst_245 = arith.constant dense<0.000000e+00> : vector<24x16xf32>
    %642 = tpu.matmul %641, %629, %cst_245 {dimension_numbers = #tpu.dot_dimension_numbers<[1], [0], [0], [1], [0, 0, 1, 1], [], []>} : vector<24x24xbf16>, vector<24x16xbf16>, vector<24x16xf32> -> vector<24x16xf32>
    %643 = arith.truncf %642 : vector<24x16xf32> to vector<24x16xbf16>
    %644 = vector.extract_strided_slice %424 {offsets = [7, 0, 0], sizes = [1, 16, 128], strides = [1, 1, 1]} : vector<8x16x128xbf16> to vector<1x16x128xbf16>
    %645 = vector.shape_cast %644 : vector<1x16x128xbf16> to vector<16x128xbf16>
    %cst_246 = arith.constant dense<0.000000e+00> : vector<24x128xf32>
    %646 = tpu.matmul %643, %645, %cst_246 {dimension_numbers = #tpu.dot_dimension_numbers<[1], [0], [0], [1], [0, 0, 1, 1], [], []>} : vector<24x16xbf16>, vector<16x128xbf16>, vector<24x128xf32> -> vector<24x128xf32>
    %647 = arith.addf %623, %646 : vector<24x128xf32>
    %648 = vector.broadcast %426 : vector<1x128xf32> to vector<24x128xf32>
    %649 = arith.addf %647, %648 : vector<24x128xf32>
    %650 = arith.addf %410, %649 : vector<24x128xf32>
    %cst_247 = arith.constant dense<0.000000e+00> : vector<24xf32>
    %651 = vector.multi_reduction <add>, %650, %cst_247 [1] : vector<24x128xf32> to vector<24xf32>
    %652 = vector.shape_cast %651 : vector<24xf32> to vector<24x1xf32>
    %cst_248 = arith.constant 1.280000e+02 : f32
    %653 = vector.broadcast %cst_248 : f32 to vector<24x1xf32>
    %654 = arith.divf %652, %653 : vector<24x1xf32>
    %655 = vector.broadcast %654 : vector<24x1xf32> to vector<24x128xf32>
    %656 = arith.subf %650, %655 : vector<24x128xf32>
    %657 = arith.mulf %656, %656 : vector<24x128xf32>
    %cst_249 = arith.constant dense<0.000000e+00> : vector<24xf32>
    %658 = vector.multi_reduction <add>, %657, %cst_249 [1] : vector<24x128xf32> to vector<24xf32>
    %659 = vector.shape_cast %658 : vector<24xf32> to vector<24x1xf32>
    %cst_250 = arith.constant 1.280000e+02 : f32
    %660 = vector.broadcast %cst_250 : f32 to vector<24x1xf32>
    %661 = arith.divf %659, %660 : vector<24x1xf32>
    %cst_251 = arith.constant 9.99999974E-6 : f32
    %662 = vector.broadcast %cst_251 : f32 to vector<24x1xf32>
    %663 = arith.addf %661, %662 : vector<24x1xf32>
    %664 = math.rsqrt %663 : vector<24x1xf32>
    %665 = vector.broadcast %664 : vector<24x1xf32> to vector<24x128xf32>
    %666 = arith.mulf %656, %665 : vector<24x128xf32>
    %667 = vector.broadcast %428 : vector<1x128xf32> to vector<24x128xf32>
    %668 = arith.mulf %666, %667 : vector<24x128xf32>
    %669 = vector.broadcast %430 : vector<1x128xf32> to vector<24x128xf32>
    %670 = arith.addf %668, %669 : vector<24x128xf32>
    %671 = arith.truncf %670 : vector<24x128xf32> to vector<24x128xbf16>
    %cst_252 = arith.constant dense<0.000000e+00> : vector<24x256xf32>
    %672 = tpu.matmul %671, %432, %cst_252 {dimension_numbers = #tpu.dot_dimension_numbers<[1], [0], [0], [1], [0, 0, 1, 1], [], []>} : vector<24x128xbf16>, vector<128x256xbf16>, vector<24x256xf32> -> vector<24x256xf32>
    %673 = vector.broadcast %434 : vector<1x256xf32> to vector<24x256xf32>
    %674 = arith.addf %672, %673 : vector<24x256xf32>
    %cst_253 = arith.constant 0.000000e+00 : f32
    %675 = vector.broadcast %cst_253 : f32 to vector<24x256xf32>
    %676 = arith.maximumf %674, %675 : vector<24x256xf32>
    %677 = arith.truncf %676 : vector<24x256xf32> to vector<24x256xbf16>
    %cst_254 = arith.constant dense<0.000000e+00> : vector<24x128xf32>
    %678 = tpu.matmul %677, %436, %cst_254 {dimension_numbers = #tpu.dot_dimension_numbers<[1], [0], [0], [1], [0, 0, 1, 1], [], []>} : vector<24x256xbf16>, vector<256x128xbf16>, vector<24x128xf32> -> vector<24x128xf32>
    %679 = vector.broadcast %438 : vector<1x128xf32> to vector<24x128xf32>
    %680 = arith.addf %678, %679 : vector<24x128xf32>
    %681 = arith.addf %670, %680 : vector<24x128xf32>
    %cst_255 = arith.constant dense<0.000000e+00> : vector<24xf32>
    %682 = vector.multi_reduction <add>, %681, %cst_255 [1] : vector<24x128xf32> to vector<24xf32>
    %683 = vector.shape_cast %682 : vector<24xf32> to vector<24x1xf32>
    %cst_256 = arith.constant 1.280000e+02 : f32
    %684 = vector.broadcast %cst_256 : f32 to vector<24x1xf32>
    %685 = arith.divf %683, %684 : vector<24x1xf32>
    %686 = vector.broadcast %685 : vector<24x1xf32> to vector<24x128xf32>
    %687 = arith.subf %681, %686 : vector<24x128xf32>
    %688 = arith.mulf %687, %687 : vector<24x128xf32>
    %cst_257 = arith.constant dense<0.000000e+00> : vector<24xf32>
    %689 = vector.multi_reduction <add>, %688, %cst_257 [1] : vector<24x128xf32> to vector<24xf32>
    %690 = vector.shape_cast %689 : vector<24xf32> to vector<24x1xf32>
    %cst_258 = arith.constant 1.280000e+02 : f32
    %691 = vector.broadcast %cst_258 : f32 to vector<24x1xf32>
    %692 = arith.divf %690, %691 : vector<24x1xf32>
    %cst_259 = arith.constant 9.99999974E-6 : f32
    %693 = vector.broadcast %cst_259 : f32 to vector<24x1xf32>
    %694 = arith.addf %692, %693 : vector<24x1xf32>
    %695 = math.rsqrt %694 : vector<24x1xf32>
    %696 = vector.broadcast %695 : vector<24x1xf32> to vector<24x128xf32>
    %697 = arith.mulf %687, %696 : vector<24x128xf32>
    %698 = vector.broadcast %440 : vector<1x128xf32> to vector<24x128xf32>
    %699 = arith.mulf %697, %698 : vector<24x128xf32>
    %700 = vector.broadcast %442 : vector<1x128xf32> to vector<24x128xf32>
    %701 = arith.addf %699, %700 : vector<24x128xf32>
    %c2 = arith.constant 2 : index
    %c0_260 = arith.constant 0 : index
    %c0_261 = arith.constant 0 : index
    %702 = vector.load %arg11[%c2, %c0_260, %c0_261] : memref<3x128x128xbf16, #tpu.memory_space<vmem>>, vector<1x128x128xbf16>
    %703 = vector.shape_cast %702 : vector<1x128x128xbf16> to vector<128x128xbf16>
    %c2_262 = arith.constant 2 : index
    %c0_263 = arith.constant 0 : index
    %c0_264 = arith.constant 0 : index
    %704 = vector.load %arg12[%c2_262, %c0_263, %c0_264] : memref<3x1x128xf32, #tpu.memory_space<vmem>>, vector<1x1x128xf32>
    %705 = vector.shape_cast %704 : vector<1x1x128xf32> to vector<1x128xf32>
    %c2_265 = arith.constant 2 : index
    %c0_266 = arith.constant 0 : index
    %c0_267 = arith.constant 0 : index
    %706 = vector.load %arg13[%c2_265, %c0_266, %c0_267] : memref<3x128x128xbf16, #tpu.memory_space<vmem>>, vector<1x128x128xbf16>
    %707 = vector.shape_cast %706 : vector<1x128x128xbf16> to vector<128x128xbf16>
    %c2_268 = arith.constant 2 : index
    %c0_269 = arith.constant 0 : index
    %c0_270 = arith.constant 0 : index
    %708 = vector.load %arg14[%c2_268, %c0_269, %c0_270] : memref<3x1x128xf32, #tpu.memory_space<vmem>>, vector<1x1x128xf32>
    %709 = vector.shape_cast %708 : vector<1x1x128xf32> to vector<1x128xf32>
    %c2_271 = arith.constant 2 : index
    %c0_272 = arith.constant 0 : index
    %c0_273 = arith.constant 0 : index
    %710 = vector.load %arg15[%c2_271, %c0_272, %c0_273] : memref<3x128x128xbf16, #tpu.memory_space<vmem>>, vector<1x128x128xbf16>
    %711 = vector.shape_cast %710 : vector<1x128x128xbf16> to vector<128x128xbf16>
    %c2_274 = arith.constant 2 : index
    %c0_275 = arith.constant 0 : index
    %c0_276 = arith.constant 0 : index
    %712 = vector.load %arg16[%c2_274, %c0_275, %c0_276] : memref<3x1x128xf32, #tpu.memory_space<vmem>>, vector<1x1x128xf32>
    %713 = vector.shape_cast %712 : vector<1x1x128xf32> to vector<1x128xf32>
    %c2_277 = arith.constant 2 : index
    %c0_278 = arith.constant 0 : index
    %c0_279 = arith.constant 0 : index
    %c0_280 = arith.constant 0 : index
    %714 = vector.load %arg17[%c2_277, %c0_278, %c0_279, %c0_280] : memref<3x8x16x128xbf16, #tpu.memory_space<vmem>>, vector<1x8x16x128xbf16>
    %715 = vector.shape_cast %714 : vector<1x8x16x128xbf16> to vector<8x16x128xbf16>
    %c2_281 = arith.constant 2 : index
    %c0_282 = arith.constant 0 : index
    %c0_283 = arith.constant 0 : index
    %716 = vector.load %arg18[%c2_281, %c0_282, %c0_283] : memref<3x1x128xf32, #tpu.memory_space<vmem>>, vector<1x1x128xf32>
    %717 = vector.shape_cast %716 : vector<1x1x128xf32> to vector<1x128xf32>
    %c2_284 = arith.constant 2 : index
    %c0_285 = arith.constant 0 : index
    %c0_286 = arith.constant 0 : index
    %718 = vector.load %arg19[%c2_284, %c0_285, %c0_286] : memref<3x1x128xf32, #tpu.memory_space<vmem>>, vector<1x1x128xf32>
    %719 = vector.shape_cast %718 : vector<1x1x128xf32> to vector<1x128xf32>
    %c2_287 = arith.constant 2 : index
    %c0_288 = arith.constant 0 : index
    %c0_289 = arith.constant 0 : index
    %720 = vector.load %arg20[%c2_287, %c0_288, %c0_289] : memref<3x1x128xf32, #tpu.memory_space<vmem>>, vector<1x1x128xf32>
    %721 = vector.shape_cast %720 : vector<1x1x128xf32> to vector<1x128xf32>
    %c2_290 = arith.constant 2 : index
    %c0_291 = arith.constant 0 : index
    %c0_292 = arith.constant 0 : index
    %722 = vector.load %arg21[%c2_290, %c0_291, %c0_292] : memref<3x128x256xbf16, #tpu.memory_space<vmem>>, vector<1x128x256xbf16>
    %723 = vector.shape_cast %722 : vector<1x128x256xbf16> to vector<128x256xbf16>
    %c2_293 = arith.constant 2 : index
    %c0_294 = arith.constant 0 : index
    %c0_295 = arith.constant 0 : index
    %724 = vector.load %arg22[%c2_293, %c0_294, %c0_295] : memref<3x1x256xf32, #tpu.memory_space<vmem>>, vector<1x1x256xf32>
    %725 = vector.shape_cast %724 : vector<1x1x256xf32> to vector<1x256xf32>
    %c2_296 = arith.constant 2 : index
    %c0_297 = arith.constant 0 : index
    %c0_298 = arith.constant 0 : index
    %726 = vector.load %arg23[%c2_296, %c0_297, %c0_298] : memref<3x256x128xbf16, #tpu.memory_space<vmem>>, vector<1x256x128xbf16>
    %727 = vector.shape_cast %726 : vector<1x256x128xbf16> to vector<256x128xbf16>
    %c2_299 = arith.constant 2 : index
    %c0_300 = arith.constant 0 : index
    %c0_301 = arith.constant 0 : index
    %728 = vector.load %arg24[%c2_299, %c0_300, %c0_301] : memref<3x1x128xf32, #tpu.memory_space<vmem>>, vector<1x1x128xf32>
    %729 = vector.shape_cast %728 : vector<1x1x128xf32> to vector<1x128xf32>
    %c2_302 = arith.constant 2 : index
    %c0_303 = arith.constant 0 : index
    %c0_304 = arith.constant 0 : index
    %730 = vector.load %arg25[%c2_302, %c0_303, %c0_304] : memref<3x1x128xf32, #tpu.memory_space<vmem>>, vector<1x1x128xf32>
    %731 = vector.shape_cast %730 : vector<1x1x128xf32> to vector<1x128xf32>
    %c2_305 = arith.constant 2 : index
    %c0_306 = arith.constant 0 : index
    %c0_307 = arith.constant 0 : index
    %732 = vector.load %arg26[%c2_305, %c0_306, %c0_307] : memref<3x1x128xf32, #tpu.memory_space<vmem>>, vector<1x1x128xf32>
    %733 = vector.shape_cast %732 : vector<1x1x128xf32> to vector<1x128xf32>
    %734 = arith.truncf %701 : vector<24x128xf32> to vector<24x128xbf16>
    %cst_308 = arith.constant dense<0.000000e+00> : vector<24x128xf32>
    %735 = tpu.matmul %734, %703, %cst_308 {dimension_numbers = #tpu.dot_dimension_numbers<[1], [0], [0], [1], [0, 0, 1, 1], [], []>} : vector<24x128xbf16>, vector<128x128xbf16>, vector<24x128xf32> -> vector<24x128xf32>
    %736 = vector.broadcast %705 : vector<1x128xf32> to vector<24x128xf32>
    %737 = arith.addf %735, %736 : vector<24x128xf32>
    %cst_309 = arith.constant 2.500000e-01 : f32
    %738 = vector.broadcast %cst_309 : f32 to vector<24x128xf32>
    %739 = arith.mulf %737, %738 : vector<24x128xf32>
    %cst_310 = arith.constant dense<0.000000e+00> : vector<24x128xf32>
    %740 = tpu.matmul %734, %707, %cst_310 {dimension_numbers = #tpu.dot_dimension_numbers<[1], [0], [0], [1], [0, 0, 1, 1], [], []>} : vector<24x128xbf16>, vector<128x128xbf16>, vector<24x128xf32> -> vector<24x128xf32>
    %741 = vector.broadcast %709 : vector<1x128xf32> to vector<24x128xf32>
    %742 = arith.addf %740, %741 : vector<24x128xf32>
    %cst_311 = arith.constant dense<0.000000e+00> : vector<24x128xf32>
    %743 = tpu.matmul %734, %711, %cst_311 {dimension_numbers = #tpu.dot_dimension_numbers<[1], [0], [0], [1], [0, 0, 1, 1], [], []>} : vector<24x128xbf16>, vector<128x128xbf16>, vector<24x128xf32> -> vector<24x128xf32>
    %744 = vector.broadcast %713 : vector<1x128xf32> to vector<24x128xf32>
    %745 = arith.addf %743, %744 : vector<24x128xf32>
    %cst_312 = arith.constant 0.000000e+00 : f32
    %746 = vector.broadcast %cst_312 : f32 to vector<24x128xf32>
    %747 = vector.extract_strided_slice %739 {offsets = [0, 0], sizes = [24, 16], strides = [1, 1]} : vector<24x128xf32> to vector<24x16xf32>
    %748 = arith.truncf %747 : vector<24x16xf32> to vector<24x16xbf16>
    %749 = vector.extract_strided_slice %742 {offsets = [0, 0], sizes = [24, 16], strides = [1, 1]} : vector<24x128xf32> to vector<24x16xf32>
    %750 = arith.truncf %749 : vector<24x16xf32> to vector<24x16xbf16>
    %751 = vector.extract_strided_slice %745 {offsets = [0, 0], sizes = [24, 16], strides = [1, 1]} : vector<24x128xf32> to vector<24x16xf32>
    %752 = arith.truncf %751 : vector<24x16xf32> to vector<24x16xbf16>
    %cst_313 = arith.constant dense<0.000000e+00> : vector<24x24xf32>
    %753 = tpu.matmul %748, %750, %cst_313 {dimension_numbers = #tpu.dot_dimension_numbers<[1], [1], [0], [0], [0, 0, 1, 0], [], []>} : vector<24x16xbf16>, vector<24x16xbf16>, vector<24x24xf32> -> vector<24x24xf32>
    %754 = arith.addf %753, %118 : vector<24x24xf32>
    %cst_314 = arith.constant dense<0xFF800000> : vector<24xf32>
    %755 = vector.multi_reduction <maximumf>, %754, %cst_314 [1] : vector<24x24xf32> to vector<24xf32>
    %756 = vector.shape_cast %755 : vector<24xf32> to vector<24x1xf32>
    %757 = vector.broadcast %756 : vector<24x1xf32> to vector<24x24xf32>
    %758 = arith.subf %754, %757 : vector<24x24xf32>
    %759 = math.exp %758 : vector<24x24xf32>
    %cst_315 = arith.constant dense<0.000000e+00> : vector<24xf32>
    %760 = vector.multi_reduction <add>, %759, %cst_315 [1] : vector<24x24xf32> to vector<24xf32>
    %761 = vector.shape_cast %760 : vector<24xf32> to vector<24x1xf32>
    %762 = vector.broadcast %761 : vector<24x1xf32> to vector<24x24xf32>
    %763 = arith.divf %759, %762 : vector<24x24xf32>
    %764 = arith.truncf %763 : vector<24x24xf32> to vector<24x24xbf16>
    %cst_316 = arith.constant dense<0.000000e+00> : vector<24x16xf32>
    %765 = tpu.matmul %764, %752, %cst_316 {dimension_numbers = #tpu.dot_dimension_numbers<[1], [0], [0], [1], [0, 0, 1, 1], [], []>} : vector<24x24xbf16>, vector<24x16xbf16>, vector<24x16xf32> -> vector<24x16xf32>
    %766 = arith.truncf %765 : vector<24x16xf32> to vector<24x16xbf16>
    %767 = vector.extract_strided_slice %715 {offsets = [0, 0, 0], sizes = [1, 16, 128], strides = [1, 1, 1]} : vector<8x16x128xbf16> to vector<1x16x128xbf16>
    %768 = vector.shape_cast %767 : vector<1x16x128xbf16> to vector<16x128xbf16>
    %cst_317 = arith.constant dense<0.000000e+00> : vector<24x128xf32>
    %769 = tpu.matmul %766, %768, %cst_317 {dimension_numbers = #tpu.dot_dimension_numbers<[1], [0], [0], [1], [0, 0, 1, 1], [], []>} : vector<24x16xbf16>, vector<16x128xbf16>, vector<24x128xf32> -> vector<24x128xf32>
    %770 = arith.addf %746, %769 : vector<24x128xf32>
    %771 = vector.extract_strided_slice %739 {offsets = [0, 16], sizes = [24, 16], strides = [1, 1]} : vector<24x128xf32> to vector<24x16xf32>
    %772 = arith.truncf %771 : vector<24x16xf32> to vector<24x16xbf16>
    %773 = vector.extract_strided_slice %742 {offsets = [0, 16], sizes = [24, 16], strides = [1, 1]} : vector<24x128xf32> to vector<24x16xf32>
    %774 = arith.truncf %773 : vector<24x16xf32> to vector<24x16xbf16>
    %775 = vector.extract_strided_slice %745 {offsets = [0, 16], sizes = [24, 16], strides = [1, 1]} : vector<24x128xf32> to vector<24x16xf32>
    %776 = arith.truncf %775 : vector<24x16xf32> to vector<24x16xbf16>
    %cst_318 = arith.constant dense<0.000000e+00> : vector<24x24xf32>
    %777 = tpu.matmul %772, %774, %cst_318 {dimension_numbers = #tpu.dot_dimension_numbers<[1], [1], [0], [0], [0, 0, 1, 0], [], []>} : vector<24x16xbf16>, vector<24x16xbf16>, vector<24x24xf32> -> vector<24x24xf32>
    %778 = arith.addf %777, %118 : vector<24x24xf32>
    %cst_319 = arith.constant dense<0xFF800000> : vector<24xf32>
    %779 = vector.multi_reduction <maximumf>, %778, %cst_319 [1] : vector<24x24xf32> to vector<24xf32>
    %780 = vector.shape_cast %779 : vector<24xf32> to vector<24x1xf32>
    %781 = vector.broadcast %780 : vector<24x1xf32> to vector<24x24xf32>
    %782 = arith.subf %778, %781 : vector<24x24xf32>
    %783 = math.exp %782 : vector<24x24xf32>
    %cst_320 = arith.constant dense<0.000000e+00> : vector<24xf32>
    %784 = vector.multi_reduction <add>, %783, %cst_320 [1] : vector<24x24xf32> to vector<24xf32>
    %785 = vector.shape_cast %784 : vector<24xf32> to vector<24x1xf32>
    %786 = vector.broadcast %785 : vector<24x1xf32> to vector<24x24xf32>
    %787 = arith.divf %783, %786 : vector<24x24xf32>
    %788 = arith.truncf %787 : vector<24x24xf32> to vector<24x24xbf16>
    %cst_321 = arith.constant dense<0.000000e+00> : vector<24x16xf32>
    %789 = tpu.matmul %788, %776, %cst_321 {dimension_numbers = #tpu.dot_dimension_numbers<[1], [0], [0], [1], [0, 0, 1, 1], [], []>} : vector<24x24xbf16>, vector<24x16xbf16>, vector<24x16xf32> -> vector<24x16xf32>
    %790 = arith.truncf %789 : vector<24x16xf32> to vector<24x16xbf16>
    %791 = vector.extract_strided_slice %715 {offsets = [1, 0, 0], sizes = [1, 16, 128], strides = [1, 1, 1]} : vector<8x16x128xbf16> to vector<1x16x128xbf16>
    %792 = vector.shape_cast %791 : vector<1x16x128xbf16> to vector<16x128xbf16>
    %cst_322 = arith.constant dense<0.000000e+00> : vector<24x128xf32>
    %793 = tpu.matmul %790, %792, %cst_322 {dimension_numbers = #tpu.dot_dimension_numbers<[1], [0], [0], [1], [0, 0, 1, 1], [], []>} : vector<24x16xbf16>, vector<16x128xbf16>, vector<24x128xf32> -> vector<24x128xf32>
    %794 = arith.addf %770, %793 : vector<24x128xf32>
    %795 = vector.extract_strided_slice %739 {offsets = [0, 32], sizes = [24, 16], strides = [1, 1]} : vector<24x128xf32> to vector<24x16xf32>
    %796 = arith.truncf %795 : vector<24x16xf32> to vector<24x16xbf16>
    %797 = vector.extract_strided_slice %742 {offsets = [0, 32], sizes = [24, 16], strides = [1, 1]} : vector<24x128xf32> to vector<24x16xf32>
    %798 = arith.truncf %797 : vector<24x16xf32> to vector<24x16xbf16>
    %799 = vector.extract_strided_slice %745 {offsets = [0, 32], sizes = [24, 16], strides = [1, 1]} : vector<24x128xf32> to vector<24x16xf32>
    %800 = arith.truncf %799 : vector<24x16xf32> to vector<24x16xbf16>
    %cst_323 = arith.constant dense<0.000000e+00> : vector<24x24xf32>
    %801 = tpu.matmul %796, %798, %cst_323 {dimension_numbers = #tpu.dot_dimension_numbers<[1], [1], [0], [0], [0, 0, 1, 0], [], []>} : vector<24x16xbf16>, vector<24x16xbf16>, vector<24x24xf32> -> vector<24x24xf32>
    %802 = arith.addf %801, %118 : vector<24x24xf32>
    %cst_324 = arith.constant dense<0xFF800000> : vector<24xf32>
    %803 = vector.multi_reduction <maximumf>, %802, %cst_324 [1] : vector<24x24xf32> to vector<24xf32>
    %804 = vector.shape_cast %803 : vector<24xf32> to vector<24x1xf32>
    %805 = vector.broadcast %804 : vector<24x1xf32> to vector<24x24xf32>
    %806 = arith.subf %802, %805 : vector<24x24xf32>
    %807 = math.exp %806 : vector<24x24xf32>
    %cst_325 = arith.constant dense<0.000000e+00> : vector<24xf32>
    %808 = vector.multi_reduction <add>, %807, %cst_325 [1] : vector<24x24xf32> to vector<24xf32>
    %809 = vector.shape_cast %808 : vector<24xf32> to vector<24x1xf32>
    %810 = vector.broadcast %809 : vector<24x1xf32> to vector<24x24xf32>
    %811 = arith.divf %807, %810 : vector<24x24xf32>
    %812 = arith.truncf %811 : vector<24x24xf32> to vector<24x24xbf16>
    %cst_326 = arith.constant dense<0.000000e+00> : vector<24x16xf32>
    %813 = tpu.matmul %812, %800, %cst_326 {dimension_numbers = #tpu.dot_dimension_numbers<[1], [0], [0], [1], [0, 0, 1, 1], [], []>} : vector<24x24xbf16>, vector<24x16xbf16>, vector<24x16xf32> -> vector<24x16xf32>
    %814 = arith.truncf %813 : vector<24x16xf32> to vector<24x16xbf16>
    %815 = vector.extract_strided_slice %715 {offsets = [2, 0, 0], sizes = [1, 16, 128], strides = [1, 1, 1]} : vector<8x16x128xbf16> to vector<1x16x128xbf16>
    %816 = vector.shape_cast %815 : vector<1x16x128xbf16> to vector<16x128xbf16>
    %cst_327 = arith.constant dense<0.000000e+00> : vector<24x128xf32>
    %817 = tpu.matmul %814, %816, %cst_327 {dimension_numbers = #tpu.dot_dimension_numbers<[1], [0], [0], [1], [0, 0, 1, 1], [], []>} : vector<24x16xbf16>, vector<16x128xbf16>, vector<24x128xf32> -> vector<24x128xf32>
    %818 = arith.addf %794, %817 : vector<24x128xf32>
    %819 = vector.extract_strided_slice %739 {offsets = [0, 48], sizes = [24, 16], strides = [1, 1]} : vector<24x128xf32> to vector<24x16xf32>
    %820 = arith.truncf %819 : vector<24x16xf32> to vector<24x16xbf16>
    %821 = vector.extract_strided_slice %742 {offsets = [0, 48], sizes = [24, 16], strides = [1, 1]} : vector<24x128xf32> to vector<24x16xf32>
    %822 = arith.truncf %821 : vector<24x16xf32> to vector<24x16xbf16>
    %823 = vector.extract_strided_slice %745 {offsets = [0, 48], sizes = [24, 16], strides = [1, 1]} : vector<24x128xf32> to vector<24x16xf32>
    %824 = arith.truncf %823 : vector<24x16xf32> to vector<24x16xbf16>
    %cst_328 = arith.constant dense<0.000000e+00> : vector<24x24xf32>
    %825 = tpu.matmul %820, %822, %cst_328 {dimension_numbers = #tpu.dot_dimension_numbers<[1], [1], [0], [0], [0, 0, 1, 0], [], []>} : vector<24x16xbf16>, vector<24x16xbf16>, vector<24x24xf32> -> vector<24x24xf32>
    %826 = arith.addf %825, %118 : vector<24x24xf32>
    %cst_329 = arith.constant dense<0xFF800000> : vector<24xf32>
    %827 = vector.multi_reduction <maximumf>, %826, %cst_329 [1] : vector<24x24xf32> to vector<24xf32>
    %828 = vector.shape_cast %827 : vector<24xf32> to vector<24x1xf32>
    %829 = vector.broadcast %828 : vector<24x1xf32> to vector<24x24xf32>
    %830 = arith.subf %826, %829 : vector<24x24xf32>
    %831 = math.exp %830 : vector<24x24xf32>
    %cst_330 = arith.constant dense<0.000000e+00> : vector<24xf32>
    %832 = vector.multi_reduction <add>, %831, %cst_330 [1] : vector<24x24xf32> to vector<24xf32>
    %833 = vector.shape_cast %832 : vector<24xf32> to vector<24x1xf32>
    %834 = vector.broadcast %833 : vector<24x1xf32> to vector<24x24xf32>
    %835 = arith.divf %831, %834 : vector<24x24xf32>
    %836 = arith.truncf %835 : vector<24x24xf32> to vector<24x24xbf16>
    %cst_331 = arith.constant dense<0.000000e+00> : vector<24x16xf32>
    %837 = tpu.matmul %836, %824, %cst_331 {dimension_numbers = #tpu.dot_dimension_numbers<[1], [0], [0], [1], [0, 0, 1, 1], [], []>} : vector<24x24xbf16>, vector<24x16xbf16>, vector<24x16xf32> -> vector<24x16xf32>
    %838 = arith.truncf %837 : vector<24x16xf32> to vector<24x16xbf16>
    %839 = vector.extract_strided_slice %715 {offsets = [3, 0, 0], sizes = [1, 16, 128], strides = [1, 1, 1]} : vector<8x16x128xbf16> to vector<1x16x128xbf16>
    %840 = vector.shape_cast %839 : vector<1x16x128xbf16> to vector<16x128xbf16>
    %cst_332 = arith.constant dense<0.000000e+00> : vector<24x128xf32>
    %841 = tpu.matmul %838, %840, %cst_332 {dimension_numbers = #tpu.dot_dimension_numbers<[1], [0], [0], [1], [0, 0, 1, 1], [], []>} : vector<24x16xbf16>, vector<16x128xbf16>, vector<24x128xf32> -> vector<24x128xf32>
    %842 = arith.addf %818, %841 : vector<24x128xf32>
    %843 = vector.extract_strided_slice %739 {offsets = [0, 64], sizes = [24, 16], strides = [1, 1]} : vector<24x128xf32> to vector<24x16xf32>
    %844 = arith.truncf %843 : vector<24x16xf32> to vector<24x16xbf16>
    %845 = vector.extract_strided_slice %742 {offsets = [0, 64], sizes = [24, 16], strides = [1, 1]} : vector<24x128xf32> to vector<24x16xf32>
    %846 = arith.truncf %845 : vector<24x16xf32> to vector<24x16xbf16>
    %847 = vector.extract_strided_slice %745 {offsets = [0, 64], sizes = [24, 16], strides = [1, 1]} : vector<24x128xf32> to vector<24x16xf32>
    %848 = arith.truncf %847 : vector<24x16xf32> to vector<24x16xbf16>
    %cst_333 = arith.constant dense<0.000000e+00> : vector<24x24xf32>
    %849 = tpu.matmul %844, %846, %cst_333 {dimension_numbers = #tpu.dot_dimension_numbers<[1], [1], [0], [0], [0, 0, 1, 0], [], []>} : vector<24x16xbf16>, vector<24x16xbf16>, vector<24x24xf32> -> vector<24x24xf32>
    %850 = arith.addf %849, %118 : vector<24x24xf32>
    %cst_334 = arith.constant dense<0xFF800000> : vector<24xf32>
    %851 = vector.multi_reduction <maximumf>, %850, %cst_334 [1] : vector<24x24xf32> to vector<24xf32>
    %852 = vector.shape_cast %851 : vector<24xf32> to vector<24x1xf32>
    %853 = vector.broadcast %852 : vector<24x1xf32> to vector<24x24xf32>
    %854 = arith.subf %850, %853 : vector<24x24xf32>
    %855 = math.exp %854 : vector<24x24xf32>
    %cst_335 = arith.constant dense<0.000000e+00> : vector<24xf32>
    %856 = vector.multi_reduction <add>, %855, %cst_335 [1] : vector<24x24xf32> to vector<24xf32>
    %857 = vector.shape_cast %856 : vector<24xf32> to vector<24x1xf32>
    %858 = vector.broadcast %857 : vector<24x1xf32> to vector<24x24xf32>
    %859 = arith.divf %855, %858 : vector<24x24xf32>
    %860 = arith.truncf %859 : vector<24x24xf32> to vector<24x24xbf16>
    %cst_336 = arith.constant dense<0.000000e+00> : vector<24x16xf32>
    %861 = tpu.matmul %860, %848, %cst_336 {dimension_numbers = #tpu.dot_dimension_numbers<[1], [0], [0], [1], [0, 0, 1, 1], [], []>} : vector<24x24xbf16>, vector<24x16xbf16>, vector<24x16xf32> -> vector<24x16xf32>
    %862 = arith.truncf %861 : vector<24x16xf32> to vector<24x16xbf16>
    %863 = vector.extract_strided_slice %715 {offsets = [4, 0, 0], sizes = [1, 16, 128], strides = [1, 1, 1]} : vector<8x16x128xbf16> to vector<1x16x128xbf16>
    %864 = vector.shape_cast %863 : vector<1x16x128xbf16> to vector<16x128xbf16>
    %cst_337 = arith.constant dense<0.000000e+00> : vector<24x128xf32>
    %865 = tpu.matmul %862, %864, %cst_337 {dimension_numbers = #tpu.dot_dimension_numbers<[1], [0], [0], [1], [0, 0, 1, 1], [], []>} : vector<24x16xbf16>, vector<16x128xbf16>, vector<24x128xf32> -> vector<24x128xf32>
    %866 = arith.addf %842, %865 : vector<24x128xf32>
    %867 = vector.extract_strided_slice %739 {offsets = [0, 80], sizes = [24, 16], strides = [1, 1]} : vector<24x128xf32> to vector<24x16xf32>
    %868 = arith.truncf %867 : vector<24x16xf32> to vector<24x16xbf16>
    %869 = vector.extract_strided_slice %742 {offsets = [0, 80], sizes = [24, 16], strides = [1, 1]} : vector<24x128xf32> to vector<24x16xf32>
    %870 = arith.truncf %869 : vector<24x16xf32> to vector<24x16xbf16>
    %871 = vector.extract_strided_slice %745 {offsets = [0, 80], sizes = [24, 16], strides = [1, 1]} : vector<24x128xf32> to vector<24x16xf32>
    %872 = arith.truncf %871 : vector<24x16xf32> to vector<24x16xbf16>
    %cst_338 = arith.constant dense<0.000000e+00> : vector<24x24xf32>
    %873 = tpu.matmul %868, %870, %cst_338 {dimension_numbers = #tpu.dot_dimension_numbers<[1], [1], [0], [0], [0, 0, 1, 0], [], []>} : vector<24x16xbf16>, vector<24x16xbf16>, vector<24x24xf32> -> vector<24x24xf32>
    %874 = arith.addf %873, %118 : vector<24x24xf32>
    %cst_339 = arith.constant dense<0xFF800000> : vector<24xf32>
    %875 = vector.multi_reduction <maximumf>, %874, %cst_339 [1] : vector<24x24xf32> to vector<24xf32>
    %876 = vector.shape_cast %875 : vector<24xf32> to vector<24x1xf32>
    %877 = vector.broadcast %876 : vector<24x1xf32> to vector<24x24xf32>
    %878 = arith.subf %874, %877 : vector<24x24xf32>
    %879 = math.exp %878 : vector<24x24xf32>
    %cst_340 = arith.constant dense<0.000000e+00> : vector<24xf32>
    %880 = vector.multi_reduction <add>, %879, %cst_340 [1] : vector<24x24xf32> to vector<24xf32>
    %881 = vector.shape_cast %880 : vector<24xf32> to vector<24x1xf32>
    %882 = vector.broadcast %881 : vector<24x1xf32> to vector<24x24xf32>
    %883 = arith.divf %879, %882 : vector<24x24xf32>
    %884 = arith.truncf %883 : vector<24x24xf32> to vector<24x24xbf16>
    %cst_341 = arith.constant dense<0.000000e+00> : vector<24x16xf32>
    %885 = tpu.matmul %884, %872, %cst_341 {dimension_numbers = #tpu.dot_dimension_numbers<[1], [0], [0], [1], [0, 0, 1, 1], [], []>} : vector<24x24xbf16>, vector<24x16xbf16>, vector<24x16xf32> -> vector<24x16xf32>
    %886 = arith.truncf %885 : vector<24x16xf32> to vector<24x16xbf16>
    %887 = vector.extract_strided_slice %715 {offsets = [5, 0, 0], sizes = [1, 16, 128], strides = [1, 1, 1]} : vector<8x16x128xbf16> to vector<1x16x128xbf16>
    %888 = vector.shape_cast %887 : vector<1x16x128xbf16> to vector<16x128xbf16>
    %cst_342 = arith.constant dense<0.000000e+00> : vector<24x128xf32>
    %889 = tpu.matmul %886, %888, %cst_342 {dimension_numbers = #tpu.dot_dimension_numbers<[1], [0], [0], [1], [0, 0, 1, 1], [], []>} : vector<24x16xbf16>, vector<16x128xbf16>, vector<24x128xf32> -> vector<24x128xf32>
    %890 = arith.addf %866, %889 : vector<24x128xf32>
    %891 = vector.extract_strided_slice %739 {offsets = [0, 96], sizes = [24, 16], strides = [1, 1]} : vector<24x128xf32> to vector<24x16xf32>
    %892 = arith.truncf %891 : vector<24x16xf32> to vector<24x16xbf16>
    %893 = vector.extract_strided_slice %742 {offsets = [0, 96], sizes = [24, 16], strides = [1, 1]} : vector<24x128xf32> to vector<24x16xf32>
    %894 = arith.truncf %893 : vector<24x16xf32> to vector<24x16xbf16>
    %895 = vector.extract_strided_slice %745 {offsets = [0, 96], sizes = [24, 16], strides = [1, 1]} : vector<24x128xf32> to vector<24x16xf32>
    %896 = arith.truncf %895 : vector<24x16xf32> to vector<24x16xbf16>
    %cst_343 = arith.constant dense<0.000000e+00> : vector<24x24xf32>
    %897 = tpu.matmul %892, %894, %cst_343 {dimension_numbers = #tpu.dot_dimension_numbers<[1], [1], [0], [0], [0, 0, 1, 0], [], []>} : vector<24x16xbf16>, vector<24x16xbf16>, vector<24x24xf32> -> vector<24x24xf32>
    %898 = arith.addf %897, %118 : vector<24x24xf32>
    %cst_344 = arith.constant dense<0xFF800000> : vector<24xf32>
    %899 = vector.multi_reduction <maximumf>, %898, %cst_344 [1] : vector<24x24xf32> to vector<24xf32>
    %900 = vector.shape_cast %899 : vector<24xf32> to vector<24x1xf32>
    %901 = vector.broadcast %900 : vector<24x1xf32> to vector<24x24xf32>
    %902 = arith.subf %898, %901 : vector<24x24xf32>
    %903 = math.exp %902 : vector<24x24xf32>
    %cst_345 = arith.constant dense<0.000000e+00> : vector<24xf32>
    %904 = vector.multi_reduction <add>, %903, %cst_345 [1] : vector<24x24xf32> to vector<24xf32>
    %905 = vector.shape_cast %904 : vector<24xf32> to vector<24x1xf32>
    %906 = vector.broadcast %905 : vector<24x1xf32> to vector<24x24xf32>
    %907 = arith.divf %903, %906 : vector<24x24xf32>
    %908 = arith.truncf %907 : vector<24x24xf32> to vector<24x24xbf16>
    %cst_346 = arith.constant dense<0.000000e+00> : vector<24x16xf32>
    %909 = tpu.matmul %908, %896, %cst_346 {dimension_numbers = #tpu.dot_dimension_numbers<[1], [0], [0], [1], [0, 0, 1, 1], [], []>} : vector<24x24xbf16>, vector<24x16xbf16>, vector<24x16xf32> -> vector<24x16xf32>
    %910 = arith.truncf %909 : vector<24x16xf32> to vector<24x16xbf16>
    %911 = vector.extract_strided_slice %715 {offsets = [6, 0, 0], sizes = [1, 16, 128], strides = [1, 1, 1]} : vector<8x16x128xbf16> to vector<1x16x128xbf16>
    %912 = vector.shape_cast %911 : vector<1x16x128xbf16> to vector<16x128xbf16>
    %cst_347 = arith.constant dense<0.000000e+00> : vector<24x128xf32>
    %913 = tpu.matmul %910, %912, %cst_347 {dimension_numbers = #tpu.dot_dimension_numbers<[1], [0], [0], [1], [0, 0, 1, 1], [], []>} : vector<24x16xbf16>, vector<16x128xbf16>, vector<24x128xf32> -> vector<24x128xf32>
    %914 = arith.addf %890, %913 : vector<24x128xf32>
    %915 = vector.extract_strided_slice %739 {offsets = [0, 112], sizes = [24, 16], strides = [1, 1]} : vector<24x128xf32> to vector<24x16xf32>
    %916 = arith.truncf %915 : vector<24x16xf32> to vector<24x16xbf16>
    %917 = vector.extract_strided_slice %742 {offsets = [0, 112], sizes = [24, 16], strides = [1, 1]} : vector<24x128xf32> to vector<24x16xf32>
    %918 = arith.truncf %917 : vector<24x16xf32> to vector<24x16xbf16>
    %919 = vector.extract_strided_slice %745 {offsets = [0, 112], sizes = [24, 16], strides = [1, 1]} : vector<24x128xf32> to vector<24x16xf32>
    %920 = arith.truncf %919 : vector<24x16xf32> to vector<24x16xbf16>
    %cst_348 = arith.constant dense<0.000000e+00> : vector<24x24xf32>
    %921 = tpu.matmul %916, %918, %cst_348 {dimension_numbers = #tpu.dot_dimension_numbers<[1], [1], [0], [0], [0, 0, 1, 0], [], []>} : vector<24x16xbf16>, vector<24x16xbf16>, vector<24x24xf32> -> vector<24x24xf32>
    %922 = arith.addf %921, %118 : vector<24x24xf32>
    %cst_349 = arith.constant dense<0xFF800000> : vector<24xf32>
    %923 = vector.multi_reduction <maximumf>, %922, %cst_349 [1] : vector<24x24xf32> to vector<24xf32>
    %924 = vector.shape_cast %923 : vector<24xf32> to vector<24x1xf32>
    %925 = vector.broadcast %924 : vector<24x1xf32> to vector<24x24xf32>
    %926 = arith.subf %922, %925 : vector<24x24xf32>
    %927 = math.exp %926 : vector<24x24xf32>
    %cst_350 = arith.constant dense<0.000000e+00> : vector<24xf32>
    %928 = vector.multi_reduction <add>, %927, %cst_350 [1] : vector<24x24xf32> to vector<24xf32>
    %929 = vector.shape_cast %928 : vector<24xf32> to vector<24x1xf32>
    %930 = vector.broadcast %929 : vector<24x1xf32> to vector<24x24xf32>
    %931 = arith.divf %927, %930 : vector<24x24xf32>
    %932 = arith.truncf %931 : vector<24x24xf32> to vector<24x24xbf16>
    %cst_351 = arith.constant dense<0.000000e+00> : vector<24x16xf32>
    %933 = tpu.matmul %932, %920, %cst_351 {dimension_numbers = #tpu.dot_dimension_numbers<[1], [0], [0], [1], [0, 0, 1, 1], [], []>} : vector<24x24xbf16>, vector<24x16xbf16>, vector<24x16xf32> -> vector<24x16xf32>
    %934 = arith.truncf %933 : vector<24x16xf32> to vector<24x16xbf16>
    %935 = vector.extract_strided_slice %715 {offsets = [7, 0, 0], sizes = [1, 16, 128], strides = [1, 1, 1]} : vector<8x16x128xbf16> to vector<1x16x128xbf16>
    %936 = vector.shape_cast %935 : vector<1x16x128xbf16> to vector<16x128xbf16>
    %cst_352 = arith.constant dense<0.000000e+00> : vector<24x128xf32>
    %937 = tpu.matmul %934, %936, %cst_352 {dimension_numbers = #tpu.dot_dimension_numbers<[1], [0], [0], [1], [0, 0, 1, 1], [], []>} : vector<24x16xbf16>, vector<16x128xbf16>, vector<24x128xf32> -> vector<24x128xf32>
    %938 = arith.addf %914, %937 : vector<24x128xf32>
    %939 = vector.broadcast %717 : vector<1x128xf32> to vector<24x128xf32>
    %940 = arith.addf %938, %939 : vector<24x128xf32>
    %941 = arith.addf %701, %940 : vector<24x128xf32>
    %cst_353 = arith.constant dense<0.000000e+00> : vector<24xf32>
    %942 = vector.multi_reduction <add>, %941, %cst_353 [1] : vector<24x128xf32> to vector<24xf32>
    %943 = vector.shape_cast %942 : vector<24xf32> to vector<24x1xf32>
    %cst_354 = arith.constant 1.280000e+02 : f32
    %944 = vector.broadcast %cst_354 : f32 to vector<24x1xf32>
    %945 = arith.divf %943, %944 : vector<24x1xf32>
    %946 = vector.broadcast %945 : vector<24x1xf32> to vector<24x128xf32>
    %947 = arith.subf %941, %946 : vector<24x128xf32>
    %948 = arith.mulf %947, %947 : vector<24x128xf32>
    %cst_355 = arith.constant dense<0.000000e+00> : vector<24xf32>
    %949 = vector.multi_reduction <add>, %948, %cst_355 [1] : vector<24x128xf32> to vector<24xf32>
    %950 = vector.shape_cast %949 : vector<24xf32> to vector<24x1xf32>
    %cst_356 = arith.constant 1.280000e+02 : f32
    %951 = vector.broadcast %cst_356 : f32 to vector<24x1xf32>
    %952 = arith.divf %950, %951 : vector<24x1xf32>
    %cst_357 = arith.constant 9.99999974E-6 : f32
    %953 = vector.broadcast %cst_357 : f32 to vector<24x1xf32>
    %954 = arith.addf %952, %953 : vector<24x1xf32>
    %955 = math.rsqrt %954 : vector<24x1xf32>
    %956 = vector.broadcast %955 : vector<24x1xf32> to vector<24x128xf32>
    %957 = arith.mulf %947, %956 : vector<24x128xf32>
    %958 = vector.broadcast %719 : vector<1x128xf32> to vector<24x128xf32>
    %959 = arith.mulf %957, %958 : vector<24x128xf32>
    %960 = vector.broadcast %721 : vector<1x128xf32> to vector<24x128xf32>
    %961 = arith.addf %959, %960 : vector<24x128xf32>
    %962 = arith.truncf %961 : vector<24x128xf32> to vector<24x128xbf16>
    %cst_358 = arith.constant dense<0.000000e+00> : vector<24x256xf32>
    %963 = tpu.matmul %962, %723, %cst_358 {dimension_numbers = #tpu.dot_dimension_numbers<[1], [0], [0], [1], [0, 0, 1, 1], [], []>} : vector<24x128xbf16>, vector<128x256xbf16>, vector<24x256xf32> -> vector<24x256xf32>
    %964 = vector.broadcast %725 : vector<1x256xf32> to vector<24x256xf32>
    %965 = arith.addf %963, %964 : vector<24x256xf32>
    %cst_359 = arith.constant 0.000000e+00 : f32
    %966 = vector.broadcast %cst_359 : f32 to vector<24x256xf32>
    %967 = arith.maximumf %965, %966 : vector<24x256xf32>
    %968 = arith.truncf %967 : vector<24x256xf32> to vector<24x256xbf16>
    %cst_360 = arith.constant dense<0.000000e+00> : vector<24x128xf32>
    %969 = tpu.matmul %968, %727, %cst_360 {dimension_numbers = #tpu.dot_dimension_numbers<[1], [0], [0], [1], [0, 0, 1, 1], [], []>} : vector<24x256xbf16>, vector<256x128xbf16>, vector<24x128xf32> -> vector<24x128xf32>
    %970 = vector.broadcast %729 : vector<1x128xf32> to vector<24x128xf32>
    %971 = arith.addf %969, %970 : vector<24x128xf32>
    %972 = arith.addf %961, %971 : vector<24x128xf32>
    %cst_361 = arith.constant dense<0.000000e+00> : vector<24xf32>
    %973 = vector.multi_reduction <add>, %972, %cst_361 [1] : vector<24x128xf32> to vector<24xf32>
    %974 = vector.shape_cast %973 : vector<24xf32> to vector<24x1xf32>
    %cst_362 = arith.constant 1.280000e+02 : f32
    %975 = vector.broadcast %cst_362 : f32 to vector<24x1xf32>
    %976 = arith.divf %974, %975 : vector<24x1xf32>
    %977 = vector.broadcast %976 : vector<24x1xf32> to vector<24x128xf32>
    %978 = arith.subf %972, %977 : vector<24x128xf32>
    %979 = arith.mulf %978, %978 : vector<24x128xf32>
    %cst_363 = arith.constant dense<0.000000e+00> : vector<24xf32>
    %980 = vector.multi_reduction <add>, %979, %cst_363 [1] : vector<24x128xf32> to vector<24xf32>
    %981 = vector.shape_cast %980 : vector<24xf32> to vector<24x1xf32>
    %cst_364 = arith.constant 1.280000e+02 : f32
    %982 = vector.broadcast %cst_364 : f32 to vector<24x1xf32>
    %983 = arith.divf %981, %982 : vector<24x1xf32>
    %cst_365 = arith.constant 9.99999974E-6 : f32
    %984 = vector.broadcast %cst_365 : f32 to vector<24x1xf32>
    %985 = arith.addf %983, %984 : vector<24x1xf32>
    %986 = math.rsqrt %985 : vector<24x1xf32>
    %987 = vector.broadcast %986 : vector<24x1xf32> to vector<24x128xf32>
    %988 = arith.mulf %978, %987 : vector<24x128xf32>
    %989 = vector.broadcast %731 : vector<1x128xf32> to vector<24x128xf32>
    %990 = arith.mulf %988, %989 : vector<24x128xf32>
    %991 = vector.broadcast %733 : vector<1x128xf32> to vector<24x128xf32>
    %992 = arith.addf %990, %991 : vector<24x128xf32>
    %993 = tpu.iota {dimensions = array<i32: 0>} : vector<4x24xi32>
    %994 = tpu.iota {dimensions = array<i32: 1>} : vector<4x24xi32>
    %c0_i32_366 = arith.constant 0 : i32
    %995 = vector.broadcast %c0_i32_366 : i32 to vector<4x24xi32>
    %c6_i32_367 = arith.constant 6 : i32
    %996 = vector.broadcast %c6_i32_367 : i32 to vector<4x24xi32>
    %997 = arith.cmpi sge, %994, %996 : vector<4x24xi32>
    %998 = arith.extui %997 : vector<4x24xi1> to vector<4x24xi32>
    %999 = arith.addi %995, %998 : vector<4x24xi32>
    %c12_i32_368 = arith.constant 12 : i32
    %1000 = vector.broadcast %c12_i32_368 : i32 to vector<4x24xi32>
    %1001 = arith.cmpi sge, %994, %1000 : vector<4x24xi32>
    %1002 = arith.extui %1001 : vector<4x24xi1> to vector<4x24xi32>
    %1003 = arith.addi %999, %1002 : vector<4x24xi32>
    %c18_i32_369 = arith.constant 18 : i32
    %1004 = vector.broadcast %c18_i32_369 : i32 to vector<4x24xi32>
    %1005 = arith.cmpi sge, %994, %1004 : vector<4x24xi32>
    %1006 = arith.extui %1005 : vector<4x24xi1> to vector<4x24xi32>
    %1007 = arith.addi %1003, %1006 : vector<4x24xi32>
    %1008 = arith.cmpi eq, %993, %1007 : vector<4x24xi32>
    %1009 = arith.extui %1008 : vector<4x24xi1> to vector<4x24xi32>
    %1010 = arith.sitofp %1009 : vector<4x24xi32> to vector<4x24xf32>
    %c0_370 = arith.constant 0 : index
    %c0_371 = arith.constant 0 : index
    %1011 = vector.load %arg27[%c0_370, %c0_371] : memref<1x128xf32, #tpu.memory_space<vmem>>, vector<1x128xf32>
    %c0_372 = arith.constant 0 : index
    %c0_373 = arith.constant 0 : index
    %1012 = vector.load %arg28[%c0_372, %c0_373] : memref<1x128xf32, #tpu.memory_space<vmem>>, vector<1x128xf32>
    %c0_374 = arith.constant 0 : index
    %c0_375 = arith.constant 0 : index
    %1013 = vector.load %arg29[%c0_374, %c0_375] : memref<128x128xbf16, #tpu.memory_space<vmem>>, vector<128x128xbf16>
    %c0_376 = arith.constant 0 : index
    %c0_377 = arith.constant 0 : index
    %1014 = vector.load %arg30[%c0_376, %c0_377] : memref<1x128xf32, #tpu.memory_space<vmem>>, vector<1x128xf32>
    %c0_378 = arith.constant 0 : index
    %c0_379 = arith.constant 0 : index
    %1015 = vector.load %arg31[%c0_378, %c0_379] : memref<128x128xbf16, #tpu.memory_space<vmem>>, vector<128x128xbf16>
    %c0_380 = arith.constant 0 : index
    %c0_381 = arith.constant 0 : index
    %1016 = vector.load %arg32[%c0_380, %c0_381] : memref<1x128xf32, #tpu.memory_space<vmem>>, vector<1x128xf32>
    %cst_382 = arith.constant dense<0.000000e+00> : vector<4x128xf32>
    %1017 = tpu.matmul %1010, %992, %cst_382 {dimension_numbers = #tpu.dot_dimension_numbers<[1], [0], [0], [1], [0, 0, 1, 1], [], []>} : vector<4x24xf32>, vector<24x128xf32>, vector<4x128xf32> -> vector<4x128xf32>
    %cst_383 = arith.constant 0.166666672 : f32
    %1018 = vector.broadcast %cst_383 : f32 to vector<4x128xf32>
    %1019 = arith.mulf %1017, %1018 : vector<4x128xf32>
    %1020 = arith.addf %1019, %86 : vector<4x128xf32>
    %cst_384 = arith.constant dense<0.000000e+00> : vector<4xf32>
    %1021 = vector.multi_reduction <add>, %1020, %cst_384 [1] : vector<4x128xf32> to vector<4xf32>
    %1022 = vector.shape_cast %1021 : vector<4xf32> to vector<4x1xf32>
    %cst_385 = arith.constant 1.280000e+02 : f32
    %1023 = vector.broadcast %cst_385 : f32 to vector<4x1xf32>
    %1024 = arith.divf %1022, %1023 : vector<4x1xf32>
    %1025 = vector.broadcast %1024 : vector<4x1xf32> to vector<4x128xf32>
    %1026 = arith.subf %1020, %1025 : vector<4x128xf32>
    %1027 = arith.mulf %1026, %1026 : vector<4x128xf32>
    %cst_386 = arith.constant dense<0.000000e+00> : vector<4xf32>
    %1028 = vector.multi_reduction <add>, %1027, %cst_386 [1] : vector<4x128xf32> to vector<4xf32>
    %1029 = vector.shape_cast %1028 : vector<4xf32> to vector<4x1xf32>
    %cst_387 = arith.constant 1.280000e+02 : f32
    %1030 = vector.broadcast %cst_387 : f32 to vector<4x1xf32>
    %1031 = arith.divf %1029, %1030 : vector<4x1xf32>
    %cst_388 = arith.constant 9.99999974E-6 : f32
    %1032 = vector.broadcast %cst_388 : f32 to vector<4x1xf32>
    %1033 = arith.addf %1031, %1032 : vector<4x1xf32>
    %1034 = math.rsqrt %1033 : vector<4x1xf32>
    %1035 = vector.broadcast %1034 : vector<4x1xf32> to vector<4x128xf32>
    %1036 = arith.mulf %1026, %1035 : vector<4x128xf32>
    %1037 = vector.broadcast %1011 : vector<1x128xf32> to vector<4x128xf32>
    %1038 = arith.mulf %1036, %1037 : vector<4x128xf32>
    %1039 = vector.broadcast %1012 : vector<1x128xf32> to vector<4x128xf32>
    %1040 = arith.addf %1038, %1039 : vector<4x128xf32>
    %1041 = arith.truncf %1040 : vector<4x128xf32> to vector<4x128xbf16>
    %cst_389 = arith.constant dense<0.000000e+00> : vector<4x128xf32>
    %1042 = tpu.matmul %1041, %1013, %cst_389 {dimension_numbers = #tpu.dot_dimension_numbers<[1], [0], [0], [1], [0, 0, 1, 1], [], []>} : vector<4x128xbf16>, vector<128x128xbf16>, vector<4x128xf32> -> vector<4x128xf32>
    %1043 = vector.broadcast %1014 : vector<1x128xf32> to vector<4x128xf32>
    %1044 = arith.addf %1042, %1043 : vector<4x128xf32>
    %cst_390 = arith.constant 0.000000e+00 : f32
    %1045 = vector.broadcast %cst_390 : f32 to vector<4x128xf32>
    %1046 = arith.maximumf %1044, %1045 : vector<4x128xf32>
    %1047 = arith.truncf %1046 : vector<4x128xf32> to vector<4x128xbf16>
    %cst_391 = arith.constant dense<0.000000e+00> : vector<4x128xf32>
    %1048 = tpu.matmul %1047, %1015, %cst_391 {dimension_numbers = #tpu.dot_dimension_numbers<[1], [0], [0], [1], [0, 0, 1, 1], [], []>} : vector<4x128xbf16>, vector<128x128xbf16>, vector<4x128xf32> -> vector<4x128xf32>
    %1049 = vector.broadcast %1016 : vector<1x128xf32> to vector<4x128xf32>
    %1050 = arith.addf %1048, %1049 : vector<4x128xf32>
    %1051 = arith.mulf %1050, %1050 : vector<4x128xf32>
    %cst_392 = arith.constant dense<0.000000e+00> : vector<4xf32>
    %1052 = vector.multi_reduction <add>, %1051, %cst_392 [1] : vector<4x128xf32> to vector<4xf32>
    %1053 = vector.shape_cast %1052 : vector<4xf32> to vector<4x1xf32>
    %cst_393 = arith.constant 1.000000e-24 : f32
    %1054 = vector.broadcast %cst_393 : f32 to vector<4x1xf32>
    %1055 = arith.maximumf %1053, %1054 : vector<4x1xf32>
    %1056 = math.rsqrt %1055 : vector<4x1xf32>
    %1057 = vector.broadcast %1056 : vector<4x1xf32> to vector<4x128xf32>
    %1058 = arith.mulf %1050, %1057 : vector<4x128xf32>
    %c0_394 = arith.constant 0 : index
    %c0_395 = arith.constant 0 : index
    %1059 = memref.load %arg33[%c0_394, %c0_395] : memref<1x1xf32, #tpu.memory_space<smem>>
    %cst_396 = arith.constant dense<0.000000e+00> : vector<4x4xf32>
    %1060 = tpu.matmul %1058, %14, %cst_396 {dimension_numbers = #tpu.dot_dimension_numbers<[1], [1], [0], [0], [0, 0, 1, 0], [], []>} : vector<4x128xf32>, vector<4x128xf32>, vector<4x4xf32> -> vector<4x4xf32>
    %cst_397 = arith.constant 1.000000e+00 : f32
    %1061 = arith.divf %cst_397, %1059 : f32
    %1062 = vector.broadcast %1061 : f32 to vector<4x4xf32>
    %1063 = arith.mulf %1060, %1062 : vector<4x4xf32>
    %1064 = tpu.iota {dimensions = array<i32: 0>} : vector<4x4xi32>
    %1065 = tpu.iota {dimensions = array<i32: 1>} : vector<4x4xi32>
    %1066 = arith.cmpi eq, %1064, %1065 : vector<4x4xi32>
    %cst_398 = arith.constant 0.000000e+00 : f32
    %1067 = vector.broadcast %cst_398 : f32 to vector<4x4xf32>
    %1068 = arith.select %1066, %1063, %1067 : vector<4x4xi1>, vector<4x4xf32>
    %cst_399 = arith.constant dense<0.000000e+00> : vector<4xf32>
    %1069 = vector.multi_reduction <add>, %1068, %cst_399 [1] : vector<4x4xf32> to vector<4xf32>
    %1070 = vector.shape_cast %1069 : vector<4xf32> to vector<4x1xf32>
    %cst_400 = arith.constant dense<0.000000e+00> : vector<4xf32>
    %1071 = vector.multi_reduction <add>, %1068, %cst_400 [0] : vector<4x4xf32> to vector<4xf32>
    %1072 = vector.shape_cast %1071 : vector<4xf32> to vector<1x4xf32>
    %cst_401 = arith.constant dense<0xFF800000> : vector<4xf32>
    %1073 = vector.multi_reduction <maximumf>, %1063, %cst_401 [1] : vector<4x4xf32> to vector<4xf32>
    %1074 = vector.shape_cast %1073 : vector<4xf32> to vector<4x1xf32>
    %1075 = vector.broadcast %1074 : vector<4x1xf32> to vector<4x4xf32>
    %1076 = arith.subf %1063, %1075 : vector<4x4xf32>
    %1077 = math.exp %1076 : vector<4x4xf32>
    %cst_402 = arith.constant dense<0.000000e+00> : vector<4xf32>
    %1078 = vector.multi_reduction <add>, %1077, %cst_402 [1] : vector<4x4xf32> to vector<4xf32>
    %1079 = vector.shape_cast %1078 : vector<4xf32> to vector<4x1xf32>
    %1080 = math.log %1079 : vector<4x1xf32>
    %1081 = arith.addf %1074, %1080 : vector<4x1xf32>
    %cst_403 = arith.constant dense<0xFF800000> : vector<4xf32>
    %1082 = vector.multi_reduction <maximumf>, %1063, %cst_403 [0] : vector<4x4xf32> to vector<4xf32>
    %1083 = vector.shape_cast %1082 : vector<4xf32> to vector<1x4xf32>
    %1084 = vector.broadcast %1083 : vector<1x4xf32> to vector<4x4xf32>
    %1085 = arith.subf %1063, %1084 : vector<4x4xf32>
    %1086 = math.exp %1085 : vector<4x4xf32>
    %cst_404 = arith.constant dense<0.000000e+00> : vector<4xf32>
    %1087 = vector.multi_reduction <add>, %1086, %cst_404 [0] : vector<4x4xf32> to vector<4xf32>
    %1088 = vector.shape_cast %1087 : vector<4xf32> to vector<1x4xf32>
    %1089 = math.log %1088 : vector<1x4xf32>
    %1090 = arith.addf %1083, %1089 : vector<1x4xf32>
    %1091 = arith.subf %1081, %1070 : vector<4x1xf32>
    %cst_405 = arith.constant dense<0.000000e+00> : vector<1xf32>
    %1092 = vector.multi_reduction <add>, %1091, %cst_405 [0] : vector<4x1xf32> to vector<1xf32>
    %1093 = vector.shape_cast %1092 : vector<1xf32> to vector<1x1xf32>
    %cst_406 = arith.constant 2.500000e-01 : f32
    %1094 = vector.broadcast %cst_406 : f32 to vector<1x1xf32>
    %1095 = arith.mulf %1093, %1094 : vector<1x1xf32>
    %1096 = arith.subf %1090, %1072 : vector<1x4xf32>
    %cst_407 = arith.constant dense<0.000000e+00> : vector<1xf32>
    %1097 = vector.multi_reduction <add>, %1096, %cst_407 [1] : vector<1x4xf32> to vector<1xf32>
    %1098 = vector.shape_cast %1097 : vector<1xf32> to vector<1x1xf32>
    %cst_408 = arith.constant 2.500000e-01 : f32
    %1099 = vector.broadcast %cst_408 : f32 to vector<1x1xf32>
    %1100 = arith.mulf %1098, %1099 : vector<1x1xf32>
    %1101 = arith.addf %1095, %1100 : vector<1x1xf32>
    %cst_409 = arith.constant 5.000000e-01 : f32
    %1102 = vector.broadcast %cst_409 : f32 to vector<1x1xf32>
    %1103 = arith.mulf %1102, %1101 : vector<1x1xf32>
    %c0_410 = arith.constant 0 : index
    %c0_411 = arith.constant 0 : index
    %1104 = vector.load %arg34[%c0_410, %c0_411] : memref<4x128xf32, #tpu.memory_space<vmem>>, vector<4x128xf32>
    tpu.vector_store %arg34[%c0_410, %c0_411], %14 {strides = array<i32>} : memref<4x128xf32, #tpu.memory_space<vmem>>, vector<4x128xf32>,
    %c0_412 = arith.constant 0 : index
    %c0_413 = arith.constant 0 : index
    %1105 = vector.load %arg35[%c0_412, %c0_413] : memref<4x128xf32, #tpu.memory_space<vmem>>, vector<4x128xf32>
    tpu.vector_store %arg35[%c0_412, %c0_413], %1058 {strides = array<i32>} : memref<4x128xf32, #tpu.memory_space<vmem>>, vector<4x128xf32>,
    %1106 = vector.shape_cast %51 : vector<4x1xf32> to vector<4x1xf32>
    %1107 = vector.broadcast %1106 : vector<4x1xf32> to vector<4x128xf32>
    %c0_414 = arith.constant 0 : index
    %c0_415 = arith.constant 0 : index
    %1108 = vector.load %arg36[%c0_414, %c0_415] : memref<4x128xf32, #tpu.memory_space<vmem>>, vector<4x128xf32>
    tpu.vector_store %arg36[%c0_414, %c0_415], %1107 {strides = array<i32>} : memref<4x128xf32, #tpu.memory_space<vmem>>, vector<4x128xf32>,
    %1109 = vector.shape_cast %1103 : vector<1x1xf32> to vector<1x1xf32>
    %1110 = vector.broadcast %1109 : vector<1x1xf32> to vector<1x128xf32>
    %c0_416 = arith.constant 0 : index
    %c0_417 = arith.constant 0 : index
    %1111 = vector.load %arg37[%c0_416, %c0_417] : memref<1x128xf32, #tpu.memory_space<vmem>>, vector<1x128xf32>
    tpu.vector_store %arg37[%c0_416, %c0_417], %1110 {strides = array<i32>} : memref<1x128xf32, #tpu.memory_space<vmem>>, vector<1x128xf32>,
    return
  }
}

</mosaic_0001>

<bundles_post_ra>
// kernel: full_model_forward.1
= control target key start
LH: loop header
LB: loop body
LE: loop exit
PB: predicated region body
PF: predicated region fallthrough
CT: control target
= control target key end

     0   :  { %s10847_s6 = smov 1   ;;  %s10848_s10 = smov 2   ;;  %s12972_s0 = inlined_call_operand.smem [shape: u32[38], index: -1, kind: input, shape index: {}] }
   0x1   :  { %s10929_s5 = sld [smem:[%s12972_s0]]   ;;  %s10849_s14 = smov 3  }
   0x2   :  { %s10934_s9 = sld [smem:[%s12972_s0 + %s10847_s6]]   ;;  %s10850_s18 = smov 4  }
   0x3   :  { %s10939_s13 = sld [smem:[%s12972_s0 + %s10848_s10]]   ;;  %s10851_s22 = smov 5  }
   0x4   :  { %s10944_s17 = sld [smem:[%s12972_s0 + %s10849_s14]]   ;;  %s10852_s26 = smov 6  }
   0x5   :  { %s10949_s21 = sld [smem:[%s12972_s0 + %s10850_s18]]   ;;  %s10853_s30 = smov 7  }
   0x6   :  { %s10954_s25 = sld [smem:[%s12972_s0 + %s10851_s22]]   ;;  %s10854_s4 = smov 8  }
   0x7   :  { %12990 = sst [smem:[#allocation50_spill]] %s10929_s5  ;;  %s10855_s10 = smov 9  }
   0x8   :  { %s10959_s29 = sld [smem:[%s12972_s0 + %s10852_s26]]   ;;  %s10856_s15 = smov 10  }
   0x9   :  { %12991 = sst [smem:[#allocation51_spill]] %s10939_s13  ;;  %s10857_s20 = smov 11  }
   0xa   :  { %12992 = sst [smem:[#allocation52_spill]] %s10944_s17  ;;  %s10858_s26 = smov 12  }
   0xb   :  { %12993 = sst [smem:[#allocation53_spill]] %s10949_s21  ;;  %s10859_s1 = smov 13  }
   0xc   :  { %s10964_s3 = sld [smem:[%s12972_s0 + %s10853_s30]]   ;;  %s10860_s7 = smov 14  }
   0xd   :  { %s10969_s8 = sld [smem:[%s12972_s0 + %s10854_s4]]   ;;  %s10862_s22 = smov 16  }
   0xe   :  { %s10974_s14 = sld [smem:[%s12972_s0 + %s10855_s10]]   ;;  %s10863_s28 = smov 17  }
   0xf   :  { %s10979_s19 = sld [smem:[%s12972_s0 + %s10856_s15]]   ;;  %s10861_s15 = smov 15  }
  0x10   :  { %s10984_s24 = sld [smem:[%s12972_s0 + %s10857_s20]]  }
  0x11   :  { %s10989_s30 = sld [smem:[%s12972_s0 + %s10858_s26]]  }
  0x12   :  { %s10994_s6 = sld [smem:[%s12972_s0 + %s10859_s1]]  }
  0x13   :  { %s10999_s12 = sld [smem:[%s12972_s0 + %s10860_s7]]   ;;  %s10864_s7 = smov 18  }
  0x14   :  { %12994 = sst [smem:[#allocation54_spill]] %s10974_s14 }
  0x15   :  { %12995 = sst [smem:[#allocation55_spill]] %s10979_s19 }
  0x16   :  { %12996 = sst [smem:[#allocation56_spill]] %s10984_s24 }
  0x17   :  { %12997 = sst [smem:[#allocation57_spill]] %s10989_s30 }
  0x18   :  { %s11004_s20 = sld [smem:[%s12972_s0 + %s10861_s15]]   ;;  %s10865_s15 = smov 19  }
  0x19   :  { %12998 = sst [smem:[#allocation58_spill]] %s10999_s12 }
  0x1a   :  { %s11009_s27 = sld [smem:[%s12972_s0 + %s10862_s22]]   ;;  %s10866_s22 = smov 20  }
  0x1b   :  { %s11014_s4 = sld [smem:[%s12972_s0 + %s10863_s28]]   ;;  %s10867_s28 = smov 21  }
  0x1c   :  { %s11019_s14 = sld [smem:[%s12972_s0 + %s10864_s7]]   ;;  %s10868_s7 = smov 22  }
  0x1d   :  { %s11024_s30 = sld [smem:[%s12972_s0 + %s10865_s15]]   ;;  %s10869_s15 = smov 23  }
  0x1e   :  { %s11034_s12 = sld [smem:[%s12972_s0 + %s10867_s28]]   ;;  %s10871_s28 = smov 25  }
  0x1f   :  { %s11054_s21 = sld [smem:[%s12972_s0 + %s10871_s28]]   ;;  %s10875_s28 = smov 29  }
  0x20   :  { %12999 = sst [smem:[#allocation59_spill]] %s11009_s27 }
  0x21   :  { %s11029_s27 = sld [smem:[%s12972_s0 + %s10866_s22]]   ;;  %s10870_s22 = smov 24  }
  0x22   :  { %13000 = sst [smem:[#allocation60_spill]] %s11019_s14 }
  0x23   :  { %13001 = sst [smem:[#allocation61_spill]] %s11024_s30 }
  0x24   :  { %s11039_s14 = sld [smem:[%s12972_s0 + %s10868_s7]]   ;;  %s10872_s7 = smov 26  }
  0x25   :  { %s11044_s30 = sld [smem:[%s12972_s0 + %s10869_s15]]   ;;  %s10873_s15 = smov 27  }
  0x26   :  { %s11064_s17 = sld [smem:[%s12972_s0 + %s10873_s15]]   ;;  %s10877_s15 = smov 31  }
  0x27   :  { %13002 = sst [smem:[#allocation62_spill]] %s11029_s27 }
  0x28   :  { %s11049_s27 = sld [smem:[%s12972_s0 + %s10870_s22]]   ;;  %s10874_s22 = smov 28  }
  0x29   :  { %s11069_s13 = sld [smem:[%s12972_s0 + %s10874_s22]]   ;;  %s10878_s22 = smov 32  }
  0x2a   :  { %13003 = sst [smem:[#allocation63_spill]] %s11039_s14 }
  0x2b   :  { %s11059_s14 = sld [smem:[%s12972_s0 + %s10872_s7]]   ;;  %s10876_s7 = smov 30  }
  0x2c   :  { %s11074_s19 = sld [smem:[%s12972_s0 + %s10875_s28]]   ;;  %s10879_s28 = smov 33  }
  0x2d   :  { %s11079_s24 = sld [smem:[%s12972_s0 + %s10876_s7]]   ;;  %s10880_s7 = smov 34  }
  0x2e   :  { %13004 = sst [smem:[#allocation64_spill]] %s11049_s27 }
  0x2f   :  { %13006 = sst [smem:[#allocation66_spill]] %s11069_s13 }
  0x30   :  { %s11084_s5 = sld [smem:[%s12972_s0 + %s10877_s15]]   ;;  %s10881_s15 = smov 35  }
  0x31   :  { %13005 = sst [smem:[#allocation65_spill]] %s11059_s14 }
  0x32   :  { %s11089_s13 = sld [smem:[%s12972_s0 + %s10878_s22]]   ;;  %s10882_s22 = smov 36  }
  0x33   :  { %13007 = sst [smem:[#allocation67_spill]] %s11079_s24 }
  0x34   :  { %s11094_s14 = sld [smem:[%s12972_s0 + %s10879_s28]]   ;;  %s10883_s28 = smov 37  }
  0x35   :  { %s11099_s24 = sld [smem:[%s12972_s0 + %s10880_s7]]  }
  0x36   :  { %s11104_s27 = sld [smem:[%s12972_s0 + %s10881_s15]]  }
  0x38   :  { %13008 = sst [smem:[#allocation68_spill]] %s11089_s13 }
  0x39   :  { %s11109_s13 = sld [smem:[%s12972_s0 + %s10882_s22]]  }
  0x3a   :  { %13009 = sst [smem:[#allocation69_spill]] %s11094_s14 }
  0x3b   :  { %s11114_s14 = sld [smem:[%s12972_s0 + %s10883_s28]]  }
  0x3c   :  { %83 = vsyncpa [#allocation5], 0 }
  0x3d   :  { %84 = vsyncpa [#allocation8], 0 }
  0x3e   :  { %85 = vsyncpa [#allocation11], 0 }
  0x3f   :  { %86 = vsyncpa [#allocation14], 0 }
  0x40   :  { %87 = vsyncpa [#allocation17], 0 }
  0x41   :  { %88 = vsyncpa [#allocation20], 0 }
  0x42   :  { %89 = vsyncpa [#allocation23], 0 }
  0x43   :  { %90 = vsyncpa [#allocation26], 0 }
  0x44   :  { %91 = vsyncpa [#allocation29], 0 }
  0x45   :  { %92 = vsyncpa [#allocation32], 0 }
  0x46   :  { %93 = vsyncpa [#allocation6], 0 }
  0x47   :  { %94 = vsyncpa [#allocation36], 0  ;;  %s120_s7 = sshll.u32 %s10954_s25, 4  ;;  %s10884_s0 = smov [#allocation7]   ;;  %s121_s7 = int_to_ptr.hbm [resolvable:$true] %s120_s7 }
  0x48   :  { %s122_s10 = sshll.u32 %s10884_s0, 4  ;;  %s147_s11 = sshll.u32 %s10964_s3, 4  ;;  %s123_s10 = int_to_ptr.vmem [resolvable:$true] %s122_s10  ;;  %s148_s11 = int_to_ptr.hbm [resolvable:$true] %s147_s11 }
  0x49   :  { %s10295_s15 = sshra.s32 %s121_s7, 4  ;;  %s10299_s18 = scalar_lea.hbm %s10954_s25, 64  ;;  %s10296_s15 = int_to_ptr.hbm [resolvable:$true] %s10295_s15 }
  0x4a   :  { %s10297_s16 = scalar_lea.hbm %s10296_s15, 64  ;;  %p10300_p1 = scmp.lt.s32.totalorder %s10296_s15, %s10954_s25 }
  0x4b   :  { %p10298_p0 = scmp.ne.s32.totalorder %s10296_s15, %s10297_s16  ;;  %p10301_p2 = scmp.lt.s32.totalorder %s10299_s18, %s10297_s16 }
  0x4d   :  { %p10302_p3 = por %p10301_p2, %p10300_p1 }
  0x4f   :  { %p10303_p4 = pnand %p10302_p3, %p10298_p0 }
  0x51   :  { %10306 = shalt.err (!%p10303_p4)
}
  0x52   :  { %s10885_s22 = smov 64   ;;  %s10886_s23 = smov 4  }
  0x53   :  { %128 = dma.hbm_to_vmem [thread:$0]  %s121_s7, 1024, %s123_s10, [#allocation8], %s10885_s22, %s10885_s22, %s10886_s23  }
  0x54   :  { %s10887_s26 = smov [#allocation10]   ;;  %s176_s1 = sshll.u32 %s10994_s6, 4  ;;  %s11124_s1 = int_to_ptr.hbm [resolvable:$true] %s176_s1 }
  0x55   :  { %s149_s28 = sshll.u32 %s10887_s26, 4  ;;  %s10319_s25 = sshra.s32 %s148_s11, 4  ;;  %s150_s28 = int_to_ptr.vmem [resolvable:$true] %s149_s28  ;;  %s10320_s25 = int_to_ptr.hbm [resolvable:$true] %s10319_s25 }
  0x56   :  { %s10321_s2 = scalar_lea.hbm %s10320_s25, 1  ;;  %s10323_s0 = scalar_lea.hbm %s10964_s3, 1 }
  0x57   :  { %p10322_p5 = scmp.ne.s32.totalorder %s10320_s25, %s10321_s2  ;;  %p10324_p6 = scmp.lt.s32.totalorder %s10320_s25, %s10964_s3 }
  0x58   :  { %p10325_p7 = scmp.lt.s32.totalorder %s10323_s0, %s10321_s2 }
  0x5a   :  { %p10326_p8 = por %p10325_p7, %p10324_p6 }
  0x5c   :  { %p10327_p9 = pnand %p10326_p8, %p10322_p5 }
  0x5e   :  { %10330 = shalt.err (!%p10327_p9)
}
  0x5f   :  { %152 = dma.hbm_to_vmem [thread:$0]  %s148_s11, 16, %s150_s28, [#allocation11]  }
  0x60   :  { %s206_s7 = sshll.u32 %s11014_s4, 4  ;;  %s10888_s10 = smov [#allocation13]   ;;  %s11129_s7 = int_to_ptr.hbm [resolvable:$true] %s206_s7 }
  0x61   :  { %s178_s15 = sshll.u32 %s10888_s10, 4  ;;  %s10343_s16 = sshra.s32 %s11124_s1, 4  ;;  %s179_s15 = int_to_ptr.vmem [resolvable:$true] %s178_s15  ;;  %s10344_s16 = int_to_ptr.hbm [resolvable:$true] %s10343_s16 }
  0x62   :  { %s10345_s18 = scalar_lea.hbm %s10344_s16, 192  ;;  %s10347_s3 = scalar_lea.hbm %s10994_s6, 192 }
  0x63   :  { %p10346_p10 = scmp.ne.s32.totalorder %s10344_s16, %s10345_s18  ;;  %p10348_p11 = scmp.lt.s32.totalorder %s10344_s16, %s10994_s6 }
  0x64   :  { %p10349_p12 = scmp.lt.s32.totalorder %s10347_s3, %s10345_s18 }
  0x66   :  { %p10350_p13 = por %p10349_p12, %p10348_p11 }
  0x68   :  { %p10351_p0 = pnand %p10350_p13, %p10346_p10 }
  0x6a   :  { %10354 = shalt.err (!%p10351_p0)
}
  0x6b   :  { %184 = dma.hbm_to_vmem [thread:$0]  %s11124_s1, 3072, %s179_s15, [#allocation14], %s10885_s22, %s10885_s22, %s10886_s23  }
  0x6c   :  { %s10889_s11 = smov [#allocation16]   ;;  %s240_s28 = sshll.u32 %s11044_s30, 4  ;;  %s11139_s28 = int_to_ptr.hbm [resolvable:$true] %s240_s28 }
  0x6d   :  { %s208_s26 = sshll.u32 %s10889_s11, 4  ;;  %s10367_s6 = sshra.s32 %s11129_s7, 4  ;;  %s209_s26 = int_to_ptr.vmem [resolvable:$true] %s208_s26  ;;  %s10368_s6 = int_to_ptr.hbm [resolvable:$true] %s10367_s6 }
  0x6e   :  { %s10369_s25 = scalar_lea.hbm %s10368_s6, 192  ;;  %s10371_s2 = scalar_lea.hbm %s11014_s4, 192 }
  0x6f   :  { %p10370_p1 = scmp.ne.s32.totalorder %s10368_s6, %s10369_s25  ;;  %p10372_p2 = scmp.lt.s32.totalorder %s10368_s6, %s11014_s4 }
  0x70   :  { %p10373_p3 = scmp.lt.s32.totalorder %s10371_s2, %s10369_s25 }
  0x72   :  { %p10374_p4 = por %p10373_p3, %p10372_p2 }
  0x74   :  { %p10375_p5 = pnand %p10374_p4, %p10370_p1 }
  0x76   :  { %10378 = shalt.err (!%p10375_p5)
}
  0x77   :  { %214 = dma.hbm_to_vmem [thread:$0]  %s11129_s7, 3072, %s209_s26, [#allocation17], %s10885_s22, %s10885_s22, %s10886_s23  }
  0x78   :  { %s10890_s1 = smov [#allocation19]   ;;  %s266_s10 = sshll.u32 %s11054_s21, 4  ;;  %s267_s10 = int_to_ptr.hbm [resolvable:$true] %s266_s10 }
  0x79   :  { %s242_s0 = sshll.u32 %s10890_s1, 4  ;;  %s10391_s15 = sshra.s32 %s11139_s28, 4  ;;  %s243_s0 = int_to_ptr.vmem [resolvable:$true] %s242_s0  ;;  %s10392_s15 = int_to_ptr.hbm [resolvable:$true] %s10391_s15 }
  0x7a   :  { %s10393_s4 = scalar_lea.hbm %s10392_s15, 384  ;;  %s10395_s16 = scalar_lea.hbm %s11044_s30, 384 }
  0x7b   :  { %p10394_p6 = scmp.ne.s32.totalorder %s10392_s15, %s10393_s4  ;;  %p10396_p7 = scmp.lt.s32.totalorder %s10392_s15, %s11044_s30 }
  0x7c   :  { %p10397_p8 = scmp.lt.s32.totalorder %s10395_s16, %s10393_s4 }
  0x7e   :  { %p10398_p9 = por %p10397_p8, %p10396_p7 }
  0x80   :  { %p10399_p10 = pnand %p10398_p9, %p10394_p6 }
  0x82   :  { %10402 = shalt.err (!%p10399_p10)
}
  0x83   :  { %248 = dma.hbm_to_vmem [thread:$0]  %s11139_s28, 6144, %s243_s0, [#allocation20], %s10885_s22, %s10885_s22, %s10886_s23  }
  0x84   :  { %s10891_s7 = smov [#allocation22]   ;;  %s293_s3 = sshll.u32 %s11064_s17, 4  ;;  %s11157_s3 = int_to_ptr.hbm [resolvable:$true] %s293_s3 }
  0x85   :  { %s268_s18 = sshll.u32 %s10891_s7, 4  ;;  %s10415_s30 = sshra.s32 %s267_s10, 4  ;;  %s269_s18 = int_to_ptr.vmem [resolvable:$true] %s268_s18  ;;  %s10416_s30 = int_to_ptr.hbm [resolvable:$true] %s10415_s30 }
  0x86   :  { %s10417_s11 = scalar_lea.hbm %s10416_s30, 3  ;;  %s10419_s26 = scalar_lea.hbm %s11054_s21, 3 }
  0x87   :  { %p10418_p11 = scmp.ne.s32.totalorder %s10416_s30, %s10417_s11  ;;  %p10420_p12 = scmp.lt.s32.totalorder %s10416_s30, %s11054_s21 }
  0x88   :  { %p10421_p13 = scmp.lt.s32.totalorder %s10419_s26, %s10417_s11 }
  0x8a   :  { %p10422_p0 = por %p10421_p13, %p10420_p12 }
  0x8c   :  { %p10423_p1 = pnand %p10422_p0, %p10418_p11 }
  0x8e   :  { %10426 = shalt.err (!%p10423_p1)
}
  0x8f   :  { %s10892_s6 = smov 16   ;;  %s10893_s28 = smov 1  }
  0x90   :  { %274 = dma.hbm_to_vmem [thread:$0]  %s267_s10, 48, %s269_s18, [#allocation23], %s10892_s6, %s10892_s6, %s10893_s28  }
  0x91   :  { %s314_s25 = sshll.u32 %s11074_s19, 4  ;;  %s10894_s2 = smov [#allocation25]   ;;  %s11165_s25 = int_to_ptr.hbm [resolvable:$true] %s314_s25 }
  0x92   :  { %s295_s1 = sshll.u32 %s10894_s2, 4  ;;  %s10439_s21 = sshra.s32 %s11157_s3, 4  ;;  %s296_s1 = int_to_ptr.vmem [resolvable:$true] %s295_s1  ;;  %s10440_s21 = int_to_ptr.hbm [resolvable:$true] %s10439_s21 }
  0x93   :  { %s10441_s0 = scalar_lea.hbm %s10440_s21, 1  ;;  %s10443_s15 = scalar_lea.hbm %s11064_s17, 1 }
  0x94   :  { %p10442_p2 = scmp.ne.s32.totalorder %s10440_s21, %s10441_s0  ;;  %p10444_p3 = scmp.lt.s32.totalorder %s10440_s21, %s11064_s17 }
  0x95   :  { %p10445_p4 = scmp.lt.s32.totalorder %s10443_s15, %s10441_s0 }
  0x97   :  { %p10446_p5 = por %p10445_p4, %p10444_p3 }
  0x99   :  { %p10447_p6 = pnand %p10446_p5, %p10442_p2 }
  0x9b   :  { %10450 = shalt.err (!%p10447_p6)
}
  0x9c   :  { %298 = dma.hbm_to_vmem [thread:$0]  %s11157_s3, 16, %s296_s1, [#allocation26]  }
  0x9d   :  { %s10895_s10 = smov [#allocation28]   ;;  %s338_s16 = sshll.u32 %s11084_s5, 4  ;;  %s11172_s16 = int_to_ptr.hbm [resolvable:$true] %s338_s16 }
  0x9e   :  { %s316_s4 = sshll.u32 %s10895_s10, 4  ;;  %s10463_s7 = sshra.s32 %s11165_s25, 4  ;;  %s317_s4 = int_to_ptr.vmem [resolvable:$true] %s316_s4  ;;  %s10464_s7 = int_to_ptr.hbm [resolvable:$true] %s10463_s7 }
  0x9f   :  { %s10465_s18 = scalar_lea.hbm %s10464_s7, 64  ;;  %s10467_s17 = scalar_lea.hbm %s11074_s19, 64 }
  0xa0   :  { %p10466_p7 = scmp.ne.s32.totalorder %s10464_s7, %s10465_s18  ;;  %p10468_p8 = scmp.lt.s32.totalorder %s10464_s7, %s11074_s19 }
  0xa1   :  { %p10469_p9 = scmp.lt.s32.totalorder %s10467_s17, %s10465_s18 }
  0xa3   :  { %p10470_p10 = por %p10469_p9, %p10468_p8 }
  0xa5   :  { %p10471_p11 = pnand %p10470_p10, %p10466_p7 }
  0xa7   :  { %10474 = shalt.err (!%p10471_p11)
}
  0xa8   :  { %322 = dma.hbm_to_vmem [thread:$0]  %s11165_s25, 1024, %s317_s4, [#allocation29], %s10885_s22, %s10885_s22, %s10886_s23  }
  0xa9   :  { %s101_s3 = sshll.u32 %s10934_s9, 4  ;;  %s10896_s30 = smov [#allocation31]   ;;  %s11182_s3 = int_to_ptr.hbm [resolvable:$true] %s101_s3 }
  0xaa   :  { %s340_s11 = sshll.u32 %s10896_s30, 4  ;;  %s10487_s19 = sshra.s32 %s11172_s16, 4  ;;  %s341_s11 = int_to_ptr.vmem [resolvable:$true] %s340_s11  ;;  %s10488_s19 = int_to_ptr.hbm [resolvable:$true] %s10487_s19 }
  0xab   :  { %s10489_s26 = scalar_lea.hbm %s10488_s19, 64  ;;  %s10491_s2 = scalar_lea.hbm %s11084_s5, 64 }
  0xac   :  { %p10490_p12 = scmp.ne.s32.totalorder %s10488_s19, %s10489_s26  ;;  %p10492_p13 = scmp.lt.s32.totalorder %s10488_s19, %s11084_s5 }
  0xad   :  { %p10493_p0 = scmp.lt.s32.totalorder %s10491_s2, %s10489_s26 }
  0xaf   :  { %p10494_p1 = por %p10493_p0, %p10492_p13 }
  0xb1   :  { %p10495_p2 = pnand %p10494_p1, %p10490_p12 }
  0xb3   :  { %10498 = shalt.err (!%p10495_p2)
}
  0xb4   :  { %346 = dma.hbm_to_vmem [thread:$0]  %s11172_s16, 1024, %s341_s11, [#allocation32], %s10885_s22, %s10885_s22, %s10886_s23  }
  0xb5   :  { %s10897_s25 = smov [#allocation4]   ;;  %s133_s21 = sshll.u32 %s10959_s29, 4  ;;  %s11192_s21 = int_to_ptr.hbm [resolvable:$true] %s133_s21 }
  0xb6   :  { %s103_s1 = sshll.u32 %s10897_s25, 4  ;;  %s10511_s5 = sshra.s32 %s11182_s3, 4  ;;  %s104_s1 = int_to_ptr.vmem [resolvable:$true] %s103_s1  ;;  %s10512_s5 = int_to_ptr.hbm [resolvable:$true] %s10511_s5 }
  0xb7   :  { %s10513_s0 = scalar_lea.hbm %s10512_s5, 384  ;;  %s10515_s15 = scalar_lea.hbm %s10934_s9, 384 }
  0xb8   :  { %p10514_p3 = scmp.ne.s32.totalorder %s10512_s5, %s10513_s0  ;;  %p10516_p4 = scmp.lt.s32.totalorder %s10512_s5, %s10934_s9 }
  0xb9   :  { %p10517_p5 = scmp.lt.s32.totalorder %s10515_s15, %s10513_s0 }
  0xbb   :  { %p10518_p6 = por %p10517_p5, %p10516_p4 }
  0xbd   :  { %p10519_p7 = pnand %p10518_p6, %p10514_p3 }
  0xbf   :  { %10522 = shalt.err (!%p10519_p7)
}
  0xc0   :  { %109 = dma.hbm_to_vmem [thread:$0]  %s11182_s3, 6144, %s104_s1, [#allocation5], %s10885_s22, %s10885_s22, %s10886_s23  }
  0xc1   :  { %s158_s10 = sshll.u32 %s10969_s8, 4  ;;  %s10898_s4 = smov [#allocation9]   ;;  %s159_s10 = int_to_ptr.hbm [resolvable:$true] %s158_s10 }
  0xc2   :  { %s135_s16 = sshll.u32 %s10898_s4, 4  ;;  %s10535_s7 = sshra.s32 %s11192_s21, 4  ;;  %s136_s16 = int_to_ptr.vmem [resolvable:$true] %s135_s16  ;;  %s10536_s7 = int_to_ptr.hbm [resolvable:$true] %s10535_s7 }
  0xc3   :  { %s10537_s9 = scalar_lea.hbm %s10536_s7, 64  ;;  %s10539_s18 = scalar_lea.hbm %s10959_s29, 64 }
  0xc4   :  { %p10538_p8 = scmp.ne.s32.totalorder %s10536_s7, %s10537_s9  ;;  %p10540_p9 = scmp.lt.s32.totalorder %s10536_s7, %s10959_s29 }
  0xc5   :  { %p10541_p10 = scmp.lt.s32.totalorder %s10539_s18, %s10537_s9 }
  0xc7   :  { %p10542_p11 = por %p10541_p10, %p10540_p9 }
  0xc9   :  { %p10543_p12 = pnand %p10542_p11, %p10538_p8 }
  0xcb   :  { %10546 = shalt.err (!%p10543_p12)
}
  0xcc   :  { %141 = dma.hbm_to_vmem [thread:$0]  %s11192_s21, 1024, %s136_s16, [#allocation8], %s10885_s22, %s10885_s22, %s10886_s23  }
  0xcd   :  { %s10899_s17 = smov [#allocation12]   ;;  %s191_s30 = sshll.u32 %s11004_s20, 4  ;;  %s11210_s30 = int_to_ptr.hbm [resolvable:$true] %s191_s30 }
  0xce   :  { %s160_s3 = sshll.u32 %s10899_s17, 4  ;;  %s10559_s11 = sshra.s32 %s159_s10, 4  ;;  %s161_s3 = int_to_ptr.vmem [resolvable:$true] %s160_s3  ;;  %s10560_s11 = int_to_ptr.hbm [resolvable:$true] %s10559_s11 }
  0xcf   :  { %s10561_s29 = scalar_lea.hbm %s10560_s11, 1  ;;  %s10563_s19 = scalar_lea.hbm %s10969_s8, 1 }
  0xd0   :  { %p10562_p13 = scmp.ne.s32.totalorder %s10560_s11, %s10561_s29  ;;  %p10564_p0 = scmp.lt.s32.totalorder %s10560_s11, %s10969_s8 }
  0xd1   :  { %p10565_p1 = scmp.lt.s32.totalorder %s10563_s19, %s10561_s29 }
  0xd3   :  { %p10566_p2 = por %p10565_p1, %p10564_p0 }
  0xd5   :  { %p10567_p3 = pnand %p10566_p2, %p10562_p13 }
  0xd7   :  { %10570 = shalt.err (!%p10567_p3)
}
  0xd8   :  { %163 = dma.hbm_to_vmem [thread:$0]  %s159_s10, 16, %s161_s3, [#allocation11]  }
  0xd9   :  { %s225_s26 = sshll.u32 %s11034_s12, 4  ;;  %s10900_s2 = smov [#allocation15]   ;;  %s11215_s26 = int_to_ptr.hbm [resolvable:$true] %s225_s26 }
  0xda   :  { %s193_s25 = sshll.u32 %s10900_s2, 4  ;;  %s10583_s1 = sshra.s32 %s11210_s30, 4  ;;  %s194_s25 = int_to_ptr.vmem [resolvable:$true] %s193_s25  ;;  %s10584_s1 = int_to_ptr.hbm [resolvable:$true] %s10583_s1 }
  0xdb   :  { %s10585_s21 = scalar_lea.hbm %s10584_s1, 192  ;;  %s10587_s8 = scalar_lea.hbm %s11004_s20, 192 }
  0xdc   :  { %p10586_p4 = scmp.ne.s32.totalorder %s10584_s1, %s10585_s21  ;;  %p10588_p5 = scmp.lt.s32.totalorder %s10584_s1, %s11004_s20 }
  0xdd   :  { %p10589_p6 = scmp.lt.s32.totalorder %s10587_s8, %s10585_s21 }
  0xdf   :  { %p10590_p7 = por %p10589_p6, %p10588_p5 }
  0xe1   :  { %p10591_p8 = pnand %p10590_p7, %p10586_p4 }
  0xe3   :  { %10594 = shalt.err (!%p10591_p8)
}
  0xe4   :  { %199 = dma.hbm_to_vmem [thread:$0]  %s11210_s30, 3072, %s194_s25, [#allocation14], %s10885_s22, %s10885_s22, %s10886_s23  }
  0xe5   :  { %s10901_s5 = smov [#allocation18]   ;;  %s10607_s15 = sshra.s32 %s11215_s26, 4  ;;  %s10608_s15 = int_to_ptr.hbm [resolvable:$true] %s10607_s15 }
  0xe6   :  { %s227_s0 = sshll.u32 %s10901_s5, 4  ;;  %s10609_s10 = scalar_lea.hbm %s10608_s15, 384  ;;  %s228_s0 = int_to_ptr.vmem [resolvable:$true] %s227_s0 }
  0xe7   :  { %p10610_p9 = scmp.ne.s32.totalorder %s10608_s15, %s10609_s10  ;;  %s10611_s20 = scalar_lea.hbm %s11034_s12, 384 }
  0xe8   :  { %p10612_p10 = scmp.lt.s32.totalorder %s10608_s15, %s11034_s12  ;;  %p10613_p11 = scmp.lt.s32.totalorder %s10611_s20, %s10609_s10 }
  0xea   :  { %p10614_p12 = por %p10613_p11, %p10612_p10 }
  0xec   :  { %p10615_p13 = pnand %p10614_p12, %p10610_p9 }
  0xee   :  { %10618 = shalt.err (!%p10615_p13)
}
  0xef   :  { %s10902_s4 = smov 128   ;;  %s13010_s16 = sld [smem:[#allocation64_spill]] }
  0xf0   :  { %s13011_s7 = sld [smem:[#allocation65_spill]]  ;;  %s10903_s23 = smov 8  }
  0xf1   :  { %233 = dma.hbm_to_vmem [thread:$0]  %s11215_s26, 6144, %s228_s0, [#allocation17], %s10902_s4, %s10902_s4, %s10903_s23  }
  0xf2   :  { %s10904_s18 = smov [#allocation21]  }
  0xf3   :  { %s255_s17 = sshll.u32 %s10904_s18, 4  ;;  %s256_s17 = int_to_ptr.vmem [resolvable:$true] %s255_s17 }
  0xf5   :  { %s253_s9 = sshll.u32 %s13010_s16, 4  ;;  %s10635_s11 = scalar_lea.hbm %s13010_s16, 3  ;;  %s254_s9 = int_to_ptr.hbm [resolvable:$true] %s253_s9 }
  0xf6   :  { %s279_s3 = sshll.u32 %s13011_s7, 4  ;;  %s10631_s30 = sshra.s32 %s254_s9, 4  ;;  %s10632_s30 = int_to_ptr.hbm [resolvable:$true] %s10631_s30  ;;  %s280_s3 = int_to_ptr.hbm [resolvable:$true] %s279_s3 }
  0xf7   :  { %s10633_s12 = scalar_lea.hbm %s10632_s30, 3  ;;  %p10636_p1 = scmp.lt.s32.totalorder %s10632_s30, %s13010_s16 }
  0xf8   :  { %p10634_p0 = scmp.ne.s32.totalorder %s10632_s30, %s10633_s12  ;;  %p10637_p2 = scmp.lt.s32.totalorder %s10635_s11, %s10633_s12 }
  0xfa   :  { %p10638_p3 = por %p10637_p2, %p10636_p1 }
  0xfc   :  { %p10639_p4 = pnand %p10638_p3, %p10634_p0 }
  0xfe   :  { %10642 = shalt.err (!%p10639_p4)
}
  0xff   :  { %s13012_s29 = sld [smem:[#allocation66_spill]]  ;;  %s10905_s19 = smov [#allocation24]  }
 0x100   :  { %261 = dma.hbm_to_vmem [thread:$0]  %s254_s9, 48, %s256_s17, [#allocation20], %s10892_s6, %s10892_s6, %s10893_s28  }
 0x101   :  { %s281_s26 = sshll.u32 %s10905_s19, 4  ;;  %s10655_s25 = sshra.s32 %s280_s3, 4  ;;  %s282_s26 = int_to_ptr.vmem [resolvable:$true] %s281_s26  ;;  %s10656_s25 = int_to_ptr.hbm [resolvable:$true] %s10655_s25 }
 0x102   :  { %s10657_s1 = scalar_lea.hbm %s10656_s25, 3  ;;  %s10659_s21 = scalar_lea.hbm %s13011_s7, 3 }
 0x103   :  { %p10658_p5 = scmp.ne.s32.totalorder %s10656_s25, %s10657_s1  ;;  %p10660_p6 = scmp.lt.s32.totalorder %s10656_s25, %s13011_s7 }
 0x104   :  { %p10661_p7 = scmp.lt.s32.totalorder %s10659_s21, %s10657_s1 }
 0x105   :  { %s304_s2 = sshll.u32 %s13012_s29, 4  ;;  %s305_s2 = int_to_ptr.hbm [resolvable:$true] %s304_s2 }
 0x106   :  { %p10662_p8 = por %p10661_p7, %p10660_p6 }
 0x108   :  { %p10663_p9 = pnand %p10662_p8, %p10658_p5 }
 0x10a   :  { %10666 = shalt.err (!%p10663_p9)
}
 0x10b   :  { %s13013_s8 = sld [smem:[#allocation67_spill]]  ;;  %s10906_s0 = smov [#allocation27]  }
 0x10c   :  { %287 = dma.hbm_to_vmem [thread:$0]  %s280_s3, 48, %s282_s26, [#allocation23], %s10892_s6, %s10892_s6, %s10893_s28  }
 0x10d   :  { %s306_s15 = sshll.u32 %s10906_s0, 4  ;;  %s10679_s10 = sshra.s32 %s305_s2, 4  ;;  %s307_s15 = int_to_ptr.vmem [resolvable:$true] %s306_s15  ;;  %s10680_s10 = int_to_ptr.hbm [resolvable:$true] %s10679_s10 }
 0x10e   :  { %s10681_s20 = scalar_lea.hbm %s10680_s10, 1  ;;  %s10683_s4 = scalar_lea.hbm %s13012_s29, 1 }
 0x10f   :  { %p10682_p10 = scmp.ne.s32.totalorder %s10680_s10, %s10681_s20  ;;  %p10684_p11 = scmp.lt.s32.totalorder %s10680_s10, %s13012_s29 }
 0x110   :  { %p10685_p12 = scmp.lt.s32.totalorder %s10683_s4, %s10681_s20 }
 0x111   :  { %s328_s5 = sshll.u32 %s13013_s8, 4  ;;  %s329_s5 = int_to_ptr.hbm [resolvable:$true] %s328_s5 }
 0x112   :  { %p10686_p13 = por %p10685_p12, %p10684_p11 }
 0x114   :  { %p10687_p0 = pnand %p10686_p13, %p10682_p10 }
 0x116   :  { %10690 = shalt.err (!%p10687_p0)
}
 0x117   :  { %309 = dma.hbm_to_vmem [thread:$0]  %s305_s2, 16, %s307_s15, [#allocation26]  }
 0x118   :  { %s13014_s16 = sld [smem:[#allocation68_spill]]  ;;  %s10907_s28 = smov [#allocation30]  }
 0x119   :  { %s330_s7 = sshll.u32 %s10907_s28, 4  ;;  %s10703_s9 = sshra.s32 %s329_s5, 4  ;;  %s331_s7 = int_to_ptr.vmem [resolvable:$true] %s330_s7  ;;  %s10704_s9 = int_to_ptr.hbm [resolvable:$true] %s10703_s9 }
 0x11a   :  { %s10705_s18 = scalar_lea.hbm %s10704_s9, 1  ;;  %s10707_s17 = scalar_lea.hbm %s13013_s8, 1 }
 0x11b   :  { %p10706_p1 = scmp.ne.s32.totalorder %s10704_s9, %s10705_s18  ;;  %p10708_p2 = scmp.lt.s32.totalorder %s10704_s9, %s13013_s8 }
 0x11c   :  { %p10709_p3 = scmp.lt.s32.totalorder %s10707_s17, %s10705_s18 }
 0x11e   :  { %s352_s23 = sshll.u32 %s13014_s16, 4  ;;  %p10710_p4 = por %p10709_p3, %p10708_p2  ;;  %s353_s23 = int_to_ptr.hbm [resolvable:$true] %s352_s23 }
 0x120   :  { %p10711_p5 = pnand %p10710_p4, %p10706_p1 }
 0x122   :  { %10714 = shalt.err (!%p10711_p5)
}
 0x123   :  { %333 = dma.hbm_to_vmem [thread:$0]  %s329_s5, 16, %s331_s7, [#allocation29]  }
 0x124   :  { %s10908_s3 = smov [#allocation33]   ;;  %s10727_s12 = sshra.s32 %s353_s23, 4  ;;  %s10728_s12 = int_to_ptr.hbm [resolvable:$true] %s10727_s12 }
 0x125   :  { %s354_s30 = sshll.u32 %s10908_s3, 4  ;;  %s10729_s11 = scalar_lea.hbm %s10728_s12, 1  ;;  %s355_s30 = int_to_ptr.vmem [resolvable:$true] %s354_s30 }
 0x126   :  { %p10730_p6 = scmp.ne.s32.totalorder %s10728_s12, %s10729_s11  ;;  %s10731_s29 = scalar_lea.hbm %s13014_s16, 1 }
 0x127   :  { %p10732_p7 = scmp.lt.s32.totalorder %s10728_s12, %s13014_s16  ;;  %p10733_p8 = scmp.lt.s32.totalorder %s10731_s29, %s10729_s11 }
 0x129   :  { %p10734_p9 = por %p10733_p8, %p10732_p7 }
 0x12b   :  { %p10735_p10 = pnand %p10734_p9, %p10730_p6 }
 0x12d   :  { %10738 = shalt.err (!%p10735_p10)
}
 0x12e   :  { %357 = dma.hbm_to_vmem [thread:$0]  %s353_s23, 16, %s355_s30, [#allocation32]  }
 0x12f   :  { %10823 = dma.done.wait [#allocation5], 6144  }
 0x130   :  { %10824 = vsyncadd [#allocation5], 4294961152 }
 0x131   :  { %10825 = dma.done.wait [#allocation8], 2048  }
 0x132   :  { %10826 = vsyncadd [#allocation8], 4294965248 }
 0x133   :  { %10827 = dma.done.wait [#allocation11], 32  }
 0x134   :  { %10828 = vsyncadd [#allocation11], 4294967264 }
 0x135   :  { %10829 = dma.done.wait [#allocation14], 6144  }
 0x136   :  { %10830 = vsyncadd [#allocation14], 4294961152 }
 0x137   :  { %10831 = dma.done.wait [#allocation17], 9216  }
 0x138   :  { %10832 = vsyncadd [#allocation17], 4294958080 }
 0x139   :  { %10833 = dma.done.wait [#allocation20], 6192  }
 0x13a   :  { %10834 = vsyncadd [#allocation20], 4294961104 }
 0x13b   :  { %10835 = dma.done.wait [#allocation23], 96  }
 0x13c   :  { %10836 = vsyncadd [#allocation23], 4294967200 }
 0x13d   :  { %10837 = dma.done.wait [#allocation26], 32  }
 0x13e   :  { %10838 = vsyncadd [#allocation26], 4294967264 }
 0x13f   :  { %10839 = dma.done.wait [#allocation29], 1040  }
 0x140   :  { %10840 = vsyncadd [#allocation29], 4294966256 }
 0x141   :  { %10841 = dma.done.wait [#allocation32], 1040  }
 0x142   :  { %10842 = vsyncadd [#allocation32], 4294966256  ;;  %v9573_v0 = vld [vmem:[#allocation4 + $0x78] sm:$0xff]  ;;  %v9572_v2 = vld [vmem:[#allocation4 + $0x70] sm:$0xff]  ;;  %s13015_s19 = sld [smem:[#allocation50_spill]]  ;;  %vm1586_vm0 = vcmask 130048  }
 0x143   :  { %v9565_v1 = vld [vmem:[#allocation4 + $0x38] sm:$0xff]  ;;  %867 = vmatpush.bf16.msra.mxu1 %v9573_v0  ;;  %v9564_v3 = vld [vmem:[#allocation4 + $0x30] sm:$0xff]  ;;  %v9571_v7 = vld [vmem:[#allocation4 + $0x68] sm:$0xff]  ;;  %s13016_s26 = sld [smem:[#allocation56_spill]]  ;;  %vm1617_vm7 = vcmask 195584   ;;  %s10911_s0 = smov 112  }
 0x144   :  { %854 = vmatpush.bf16.msra.mxu0 %v9565_v1  ;;  %v9581_v4 = vld [vmem:[#allocation4 + $0xb8] sm:$0xff]  ;;  %v9580_v6 = vld [vmem:[#allocation4 + $0xb0] sm:$0xff]  ;;  %v9563_v8 = vld [vmem:[#allocation4 + $0x28] sm:$0xff]  ;;  %s13017_s2 = sld [smem:[#allocation55_spill]]  ;;  %s10912_s15 = smov 96   ;;  %vm933_vm11 = vcmask 1043456  }
 0x145   :  { %v9589_v5 = vld [vmem:[#allocation4 + $0xf8] sm:$0xff]  ;;  %880 = vmatpush.bf16.msra.mxu2 %v9581_v4  ;;  %v9588_v9 = vld [vmem:[#allocation4 + $0xf0] sm:$0xff]  ;;  %v9579_v10 = vld [vmem:[#allocation4 + $0xa8] sm:$0xff]  ;;  %s13018_s25 = sld [smem:[#allocation51_spill]]  ;;  %s10913_s10 = smov 80  }
 0x146   :  { %893 = vmatpush.bf16.msra.mxu3 %v9589_v5  ;;  %v9570_v11 = vld [vmem:[#allocation4 + $0x60] sm:$0xff]  ;;  %v9587_v13 = vld [vmem:[#allocation4 + $0xe8] sm:$0xff]  ;;  %v9569_v17 = vld [vmem:[#allocation4 + $0x58] sm:$0xff]  ;;  %s13019_s1 = sld [smem:[#allocation52_spill]]  ;;  %s10914_s4 = smov 48  }
 0x147   :  { %868 = vmatpush.bf16.msra.mxu1 %v9572_v2  ;;  %v9562_v12 = vld [vmem:[#allocation4 + $0x20] sm:$0xff]  ;;  %v9561_v18 = vld [vmem:[#allocation4 + $0x18] sm:$0xff]  ;;  %v9568_v21 = vld [vmem:[#allocation4 + $0x50] sm:$0xff]  ;;  %s13020_s21 = sld [smem:[#allocation53_spill]]  ;;  %s10915_s16 = smov 32  }
 0x148   :  { %855 = vmatpush.bf16.msra.mxu0 %v9564_v3  ;;  %v9578_v14 = vld [vmem:[#allocation4 + $0xa0] sm:$0xff]  ;;  %v437_v15 = vld [vmem:[%s13015_s19] sm:$0xff]  ;;  %v9560_v22 = vld [vmem:[#allocation4 + $0x10] sm:$0xff]  ;;  %s13021_s8 = sld [smem:[#allocation58_spill]]  ;;  %s10918_s17 = smov [#allocation35]  }
 0x149   :  { %881 = vmatpush.bf16.msra.mxu2 %v9580_v6  ;;  %v438_v16 = vld [vmem:[%s13015_s19 + $0x8] sm:$0xff]  ;;  %540 = vst [vmem:[#allocation1] ss:$2 sm:$0xff] %v437_v15  ;;  %v9577_v20 = vld [vmem:[#allocation4 + $0x98] sm:$0xff]  ;;  %v9567_v24 = vld [vmem:[#allocation4 + $0x48] sm:$0xff]  ;;  %s13022_s5 = sld [smem:[#allocation57_spill]] }
 0x14a   :  { %894 = vmatpush.bf16.msra.mxu3 %v9588_v9  ;;  %542 = vst [vmem:[#allocation1 + $0x10] ss:$2 sm:$0xff] %v438_v16  ;;  %v9586_v19 = vld [vmem:[#allocation4 + $0xe0] sm:$0xff]  ;;  %v9585_v23 = vld [vmem:[#allocation4 + $0xd8] sm:$0xff]  ;;  %v9576_v25 = vld [vmem:[#allocation4 + $0x90] sm:$0xff]  ;;  %s13023_s20 = sld [smem:[#allocation59_spill]] }
 0x14b   :  { %869 = vmatpush.bf16.msra.mxu1 %v9571_v7  ;;  %v9559_v26 = vld [vmem:[#allocation4 + $0x8] sm:$0xff]  ;;  %v9584_v28 = vld [vmem:[#allocation4 + $0xd0] sm:$0xff]  ;;  %v9566_v30 = vld [vmem:[#allocation4 + $0x40] sm:$0xff]  ;;  %s13026_s28 = sld [smem:[#allocation60_spill]]  ;;  %s8196_s3 = sshll.u32 %s10918_s17, 4  ;;  %s8197_s3 = int_to_ptr.vmem [resolvable:$true] %s8196_s3 }
 0x14c   :  { %856 = vmatpush.bf16.msra.mxu0 %v9563_v8  ;;  %v439_v27 = vld [vmem:[%s13015_s19 + $0x10] sm:$0xff]  ;;  %v9558_v31 = vld [vmem:[#allocation4] sm:$0xff]  ;;  %v9605_v34 = vld [vmem:[#allocation4 + $0x178] sm:$0xff]  ;;  %s13027_s7 = sld [smem:[#allocation61_spill]]  ;;  %s8198_s30 = sshll.u32 %s11104_s27, 4  ;;  %s8199_s30 = int_to_ptr.hbm [resolvable:$true] %s8198_s30 }
 0x14d   :  { %882 = vmatpush.bf16.msra.mxu2 %v9579_v10  ;;  %v9575_v29 = vld [vmem:[#allocation4 + $0x88] sm:$0xff]  ;;  %544 = vst [vmem:[#allocation1 + $0x20] ss:$2 sm:$0xff] %v439_v27  ;;  %v9597_v35 = vld [vmem:[#allocation4 + $0x138] sm:$0xff]  ;;  %v9604_v37 = vld [vmem:[#allocation4 + $0x170] sm:$0xff]  ;;  %s13028_s23 = sld [smem:[#allocation62_spill]] }
 0x14e   :  { %895 = vmatpush.bf16.msra.mxu3 %v9587_v13  ;;  %v9583_v36 = vld [vmem:[#allocation4 + $0xc8] sm:$0xff]  ;;  %v9596_v38 = vld [vmem:[#allocation4 + $0x130] sm:$0xff]  ;;  %v9574_v41 = vld [vmem:[#allocation4 + $0x80] sm:$0xff]  ;;  %s13029_s9 = sld [smem:[#allocation63_spill]]  ;;  %s10763_s12 = sshra.s32 %s8199_s30, 4  ;;  %s10764_s12 = int_to_ptr.hbm [resolvable:$true] %s10763_s12 }
 0x14f   :  { %870 = vmatpush.bf16.msra.mxu1 %v9570_v11  ;;  %v9582_v43 = vld [vmem:[#allocation4 + $0xc0] sm:$0xff]  ;;  %v9603_v46 = vld [vmem:[#allocation4 + $0x168] sm:$0xff]  ;;  %v9601_v51 = vld [vmem:[#allocation4 + $0x158] sm:$0xff]  ;;  %s10765_s11 = scalar_lea.hbm %s10764_s12, 4  ;;  %s10767_s29 = scalar_lea.hbm %s11104_s27, 4 }
 0x150   :  { %857 = vmatpush.bf16.msra.mxu0 %v9562_v12  ;;  %v545_v32 = vld.sshfl [vmem:[#allocation1] sm:$0xff pattern:$0x75316420]  ;;  %v546_v33 = vld.sshfl [vmem:[#allocation1 + $0x8] sm:$0xff pattern:$0x75316420]  ;;  %p10766_p11 = scmp.ne.s32.totalorder %s10764_s12, %s10765_s11  ;;  %p10768_p12 = scmp.lt.s32.totalorder %s10764_s12, %s11104_s27 }
 0x151   :  { %883 = vmatpush.bf16.msra.mxu2 %v9578_v14  ;;  %v557_v39 = vpack.c.bf16 %v545_v32, %v545_v32  ;;  %v558_v40 = vpack.c.bf16 %v546_v33, %v546_v33  ;;  %v547_v42 = vld.sshfl [vmem:[#allocation1 + $0x10] sm:$0xff pattern:$0x75316420]  ;;  %v548_v45 = vld.sshfl [vmem:[#allocation1 + $0x18] sm:$0xff pattern:$0x75316420]  ;;  %p10769_p13 = scmp.lt.s32.totalorder %s10767_s29, %s10765_s11 }
 0x152   :  { %896 = vmatpush.bf16.msra.mxu3 %v9586_v19  ;;  %v559_v44 = vpack.c.bf16 %v547_v42, %v547_v42  ;;  %v9595_v47 = vld [vmem:[#allocation4 + $0x128] sm:$0xff]  ;;  %v560_v48 = vpack.c.bf16 %v548_v45, %v548_v45  ;;  %v9602_v49 = vld [vmem:[#allocation4 + $0x160] sm:$0xff]  ;;  %v9593_v52 = vld [vmem:[#allocation4 + $0x118] sm:$0xff] }
 0x153   :  { %871 = vmatpush.bf16.msra.mxu1 %v9569_v17  ;;  %v9594_v50 = vld [vmem:[#allocation4 + $0x120] sm:$0xff]  ;;  %v9600_v53 = vld [vmem:[#allocation4 + $0x150] sm:$0xff]  ;;  %v9599_v55 = vld [vmem:[#allocation4 + $0x148] sm:$0xff]  ;;  %p10770_p0 = por %p10769_p13, %p10768_p12 }
 0x154   :  { %858 = vmatpush.bf16.msra.mxu0 %v9561_v18  ;;  %v9592_v54 = vld [vmem:[#allocation4 + $0x110] sm:$0xff]  ;;  %v9591_v56 = vld [vmem:[#allocation4 + $0x108] sm:$0xff]  ;;  %v9598_v57 = vld [vmem:[#allocation4 + $0x140] sm:$0xff] }
 0x155   :  { %884 = vmatpush.bf16.msra.mxu2 %v9577_v20  ;;  %v9590_v58 = vld [vmem:[#allocation4 + $0x100] sm:$0xff]  ;;  %v549_v59 = vld.sshfl [vmem:[#allocation1 + $0x20] sm:$0xff pattern:$0x75316420]  ;;  %v9629_v62 = vld [vmem:[%s13016_s26 + $0x38] sm:$0xff]  ;;  %p10771_p1 = pnand %p10770_p0, %p10766_p11 }
 0x156   :  { %897 = vmatpush.bf16.msra.mxu3 %v9585_v23  ;;  %v550_v60 = vld.sshfl [vmem:[#allocation1 + $0x28] sm:$0xff pattern:$0x75316420]  ;;  %v561_v63 = vpack.c.bf16 %v549_v59, %v549_v59  ;;  %v9636_v1 = vld [vmem:[#allocation13 + $0x30] sm:$0xff]  ;;  %v9628_v2 = vld [vmem:[%s13016_s26 + $0x30] sm:$0xff] }
 0x157   :  { %872 = vmatpush.bf16.msra.mxu1 %v9568_v21  ;;  %v9637_v61 = vld [vmem:[#allocation13 + $0x38] sm:$0xff]  ;;  %v562_v0 = vpack.c.bf16 %v550_v60, %v550_v60  ;;  %v9635_v3 = vld [vmem:[#allocation13 + $0x28] sm:$0xff]  ;;  %v9634_v5 = vld [vmem:[#allocation13 + $0x20] sm:$0xff] }
 0x158   :  { %859 = vmatpush.bf16.msra.mxu0 %v9560_v22  ;;  %v9627_v4 = vld [vmem:[%s13016_s26 + $0x28] sm:$0xff]  ;;  %v9626_v6 = vld [vmem:[%s13016_s26 + $0x20] sm:$0xff]  ;;  %v9625_v8 = vld [vmem:[%s13016_s26 + $0x18] sm:$0xff] }
 0x159   :  { %885 = vmatpush.bf16.msra.mxu2 %v9576_v25  ;;  %v9633_v7 = vld [vmem:[#allocation13 + $0x18] sm:$0xff]  ;;  %v9632_v9 = vld [vmem:[#allocation13 + $0x10] sm:$0xff]  ;;  %v9624_v10 = vld [vmem:[%s13016_s26 + $0x10] sm:$0xff] }
 0x15a   :  { %898 = vmatpush.bf16.msra.mxu3 %v9584_v28  ;;  %v9631_v11 = vld [vmem:[#allocation13 + $0x8] sm:$0xff]  ;;  %v9623_v12 = vld [vmem:[%s13016_s26 + $0x8] sm:$0xff]  ;;  %v1243_v14 = vld [vmem:[%s13017_s2] sm:$0xff] }
 0x15b   :  { %873 = vmatpush.bf16.msra.mxu1 %v9567_v24  ;;  %v9630_v13 = vld [vmem:[#allocation13] sm:$0xff]  ;;  %v9622_v16 = vld [vmem:[%s13016_s26] sm:$0xff]  ;;  %v9620_v28 = vld [vmem:[#allocation9 + $0x30] sm:$0xff] }
 0x15c   :  { %860 = vmatpush.bf16.msra.mxu0 %v9559_v26  ;;  %v1244_v15 = vld [vmem:[%s13017_s2 + $0x8] sm:$0xff]  ;;  %v1245_v18 = vld [vmem:[%s13017_s2 + $0x10] sm:$0xff]  ;;  %v9906_v20 = vld [vmem:[%s13018_s25] ss:$0 sm:$0xff] }
 0x15d   :  { %886 = vmatpush.bf16.msra.mxu2 %v9575_v29  ;;  %v11262_v17 = vpack.c.bf16 %v1244_v15, %v1243_v14  ;;  %v11267_v19 = vpack.c.bf16 %v1245_v18, %v1245_v18  ;;  %v9613_v24 = vld [vmem:[#allocation7 + $0x38] sm:$0xff]  ;;  %v9612_v26 = vld [vmem:[#allocation7 + $0x30] sm:$0xff] }
 0x15e   :  { %899 = vmatpush.bf16.msra.mxu3 %v9583_v36  ;;  %v9621_v27 = vld [vmem:[#allocation9 + $0x38] sm:$0xff]  ;;  %v9608_v42 = vld [vmem:[#allocation7 + $0x10] sm:$0xff] }
 0x15f   :  { %874 = vmatpush.bf16.msra.mxu1 %v9566_v30 }
 0x160   :  { %861 = vmatpush.bf16.msra.mxu0 %v9558_v31  ;;  %v9611_v31 = vld [vmem:[#allocation7 + $0x28] sm:$0xff] }
 0x161   :  { %887 = vmatpush.bf16.msra.mxu2 %v9574_v41  ;;  %v9618_v41 = vld [vmem:[#allocation9 + $0x20] sm:$0xff] }
 0x162   :  { %875 = vmatmul.bf16.vlgmr.msra.gmra.mxu1 %v558_v40  ;;  %900 = vmatpush.bf16.msra.mxu3 %v9582_v43  ;;  %v9617_v43 = vld [vmem:[#allocation9 + $0x18] sm:$0xff] }
 0x163   :  { %919 = vmatpush.bf16.msrb.mxu1 %v9605_v34  ;;  %862 = vmatmul.bf16.vlgmr.msra.gmra.mxu0 %v557_v39  ;;  %v9619_v34 = vld [vmem:[#allocation9 + $0x28] sm:$0xff] }
 0x164   :  { %906 = vmatpush.bf16.msrb.mxu0 %v9597_v35  ;;  %888 = vmatmul.bf16.vlgmr.msra.gmra.mxu2 %v559_v44  ;;  %v9610_v35 = vld [vmem:[#allocation7 + $0x20] sm:$0xff]  ;;  %v9607_v44 = vld [vmem:[#allocation7 + $0x8] sm:$0xff] }
 0x165   :  { %901 = vmatmul.bf16.vlgmr.msra.gmra.mxu3 %v560_v48  ;;  %1084 = vmatpush.bf16.msrb.mxu2 %v9621_v27  ;;  %v1199_v27 = vlaneseq }
 0x166   :  { %1145 = vmatpush.bf16.msrb.mxu3 %v9613_v24 }
 0x167   :  { %920 = vmatpush.bf16.msrb.mxu1 %v9604_v37 }
 0x168   :  { %907 = vmatpush.bf16.msrb.mxu0 %v9596_v38  ;;  %v9609_v38 = vld [vmem:[#allocation7 + $0x18] sm:$0xff] }
 0x169   :  { %1085 = vmatpush.bf16.msrb.mxu2 %v9620_v28  ;;  %v11296_v28 = vand.u32 127, %v1199_v27 }
 0x16a   :  { %1146 = vmatpush.bf16.msrb.mxu3 %v9612_v26 }
 0x16b   :  { %921 = vmatpush.bf16.msrb.mxu1 %v9603_v46  ;;  %vm1229_vm1 = vcmp.ge.s32.totalorder %v11296_v28, 6  ;;  %vm1231_vm2 = vcmp.ge.s32.totalorder %v11296_v28, 12  ;;  %vm1234_vm3 = vcmp.ge.s32.totalorder %v11296_v28, 18 }
 0x16c   :  { %908 = vmatpush.bf16.msrb.mxu0 %v9595_v47 }
 0x16d   :  { %1086 = vmatpush.bf16.msrb.mxu2 %v9619_v34 }
 0x16e   :  { %1147 = vmatpush.bf16.msrb.mxu3 %v9611_v31 }
 0x16f   :  { %922 = vmatpush.bf16.msrb.mxu1 %v9602_v49  ;;  %v9616_v49 = vld [vmem:[#allocation9 + $0x10] sm:$0xff] }
 0x170   :  { %909 = vmatpush.bf16.msrb.mxu0 %v9594_v50  ;;  %v9606_v50 = vld [vmem:[#allocation7] sm:$0xff] }
 0x171   :  { %1087 = vmatpush.bf16.msrb.mxu2 %v9618_v41 }
 0x172   :  { %1148 = vmatpush.bf16.msrb.mxu3 %v9610_v35 }
 0x173   :  { %923 = vmatpush.bf16.msrb.mxu1 %v9601_v51  ;;  %v949_v51 = vld [vmem:[%s13019_s1] sm:$0xf] }
 0x174   :  { %910 = vmatpush.bf16.msrb.mxu0 %v9593_v52 }
 0x175   :  { %1088 = vmatpush.bf16.msrb.mxu2 %v9617_v43 }
 0x176   :  { %1149 = vmatpush.bf16.msrb.mxu3 %v9609_v38 }
 0x177   :  { %924 = vmatpush.bf16.msrb.mxu1 %v9600_v53 }
 0x178   :  { %911 = vmatpush.bf16.msrb.mxu0 %v9592_v54  ;;  %v1034_v54 = vpack.c.bf16 %v949_v51, %v949_v51 }
 0x179   :  { %1089 = vmatpush.bf16.msrb.mxu2 %v9616_v49 }
 0x17a   :  { %1150 = vmatpush.bf16.msrb.mxu3 %v9608_v42 }
 0x17b   :  { %925 = vmatpush.bf16.msrb.mxu1 %v9599_v55  ;;  %v9615_v55 = vld [vmem:[#allocation9 + $0x8] sm:$0xff] }
 0x17c   :  { %912 = vmatpush.bf16.msrb.mxu0 %v9591_v56  ;;  %v9614_v56 = vld [vmem:[#allocation9] sm:$0xff] }
 0x17d   :  { %1090 = vmatpush.bf16.msrb.mxu2 %v9615_v55 }
 0x17e   :  { %1151 = vmatpush.bf16.msrb.mxu3 %v9607_v44 }
 0x17f   :  { %926 = vmatpush.bf16.msrb.mxu1 %v9598_v57  ;;  %v950_v57 = vld [vmem:[%s13020_s21] sm:$0xf] }
 0x180   :  { %913 = vmatpush.bf16.msrb.mxu0 %v9590_v58  ;;  %v1035_v58 = vpack.c.bf16 %v950_v57, %v950_v57 }
 0x181   :  { %1091 = vmatpush.bf16.msrb.mxu2 %v9614_v56 }
 0x182   :  { %927 = vmatmul.bf16.vlgmr.msrb.gmra.mxu1 %v562_v0  ;;  %1152 = vmatpush.bf16.msrb.mxu3 %v9606_v50 }
 0x183   :  { %1493 = vmatpush.bf16.msra.mxu1 %v9637_v61  ;;  %914 = vmatmul.bf16.vlgmr.msrb.gmra.mxu0 %v561_v63  ;;  %v9907_v63 = vld [vmem:[%s13021_s8] ss:$0 sm:$0xff] }
 0x184   :  { %1421 = vmatpush.bf16.msra.mxu0 %v9629_v62  ;;  %1092 = vmatmul.bf16.vlgmr.msrb.gmra.mxu2 %v1035_v58  ;;  %v9645_v58 = vld [vmem:[#allocation15 + $0x38] sm:$0xff] }
 0x185   :  { %1153 = vmatmul.bf16.vlgmr.msrb.gmra.mxu3 %v1034_v54  ;;  %1562 = vmatpush.bf16.msra.mxu2 %v9645_v58 }
 0x187   :  { %1494 = vmatpush.bf16.msra.mxu1 %v9636_v1 }
 0x188   :  { %1422 = vmatpush.bf16.msra.mxu0 %v9628_v2 }
 0x18b   :  { %1495 = vmatpush.bf16.msra.mxu1 %v9635_v3 }
 0x18c   :  { %1423 = vmatpush.bf16.msra.mxu0 %v9627_v4 }
 0x18f   :  { %1496 = vmatpush.bf16.msra.mxu1 %v9634_v5 }
 0x190   :  { %1424 = vmatpush.bf16.msra.mxu0 %v9626_v6 }
 0x193   :  { %1497 = vmatpush.bf16.msra.mxu1 %v9633_v7  ;;  %v9908_v7 = vld [vmem:[%s13022_s5] ss:$0 sm:$0xff] }
 0x194   :  { %1425 = vmatpush.bf16.msra.mxu0 %v9625_v8 }
 0x197   :  { %1498 = vmatpush.bf16.msra.mxu1 %v9632_v9 }
 0x198   :  { %1426 = vmatpush.bf16.msra.mxu0 %v9624_v10 }
 0x19b   :  { %1499 = vmatpush.bf16.msra.mxu1 %v9631_v11 }
 0x19c   :  { %1427 = vmatpush.bf16.msra.mxu0 %v9623_v12 }
 0x19f   :  { %1500 = vmatpush.bf16.msra.mxu1 %v9630_v13 }
 0x1a0   :  { %1428 = vmatpush.bf16.msra.mxu0 %v9622_v16 }
 0x1a2   :  { %1501 = vmatmul.bf16.vlgmr.msra.gmra.mxu1 %v11262_v17 }
 0x1a3   :  { %1429 = vmatmul.bf16.vlgmr.msra.gmra.mxu0 %v11262_v17 }
 0x1b2   :  { %1506 = vmatmul.bf16.gmra.mxu1 %v11267_v19 }
 0x1b3   :  { %1434 = vmatmul.bf16.gmra.mxu0 %v11267_v19 }
 0x1df   :  { %v876_v22 = vpop.f32.mrf.mxu1 }
 0x1e0   :  { %v863_v21 = vpop.f32.mrf.mxu0 }
 0x1e1   :  { %v864_v23 = vadd.f32 %v9906_v20, %v863_v21 }
 0x1e3   :  { %v877_v25 = vadd.f32 %v876_v22, %v864_v23 }
 0x1e7   :  { %v878_v30 = vpop.f32.mrf.mxu1  ;;  %v889_v32 = vpop.f32.mrf.mxu2 }
 0x1e8   :  { %v865_v29 = vpop.f32.mrf.mxu0  ;;  %v890_v33 = vadd.f32 %v889_v32, %v877_v25  ;;  %v902_v36 = vpop.f32.mrf.mxu3  ;;  %v11300_v32 = vshrl.u32 %v1199_v27, 7 }
 0x1e9   :  { %v10909_v29 = vmov 0  }
 0x1ea   :  { %v903_v37 = vadd.f32 %v902_v36, %v890_v33  ;;  %v1230_v30 = vsel %vm1229_vm1, 1, %v10909_v29  ;;  %v1232_v31 = vsel %vm1231_vm2, 1, %v10909_v29  ;;  %v1235_v34 = vsel %vm1234_vm3, 1, %v10909_v29 }
 0x1eb   :  { %v1233_v33 = vadd.s32 %v1232_v31, %v1230_v30  ;;  %vm1205_vm4 = vcmp.ge.s32.totalorder %v11300_v32, 6  ;;  %v1201_v35 = vadd.s32 8, %v11300_v32 }
 0x1ed   :  { %v11305_v36 = vadd.s32 %v1235_v34, %v1233_v33  ;;  %vm1212_vm5 = vcmp.ge.s32.totalorder %v1201_v35, 12 }
 0x1ee   :  { %v1215_v38 = vsel %vm1212_vm5, 1, %v10909_v29 }
 0x1ef   :  { %v891_v39 = vpop.f32.mrf.mxu2  ;;  %v1218_v42 = vadd.s32 1, %v1215_v38  ;;  %v9646_v38 = vld [vmem:[#allocation16] sm:$0xff] }
 0x1f0   :  { %v904_v40 = vpop.f32.mrf.mxu3  ;;  %v1202_v39 = vadd.s32 16, %v11300_v32 }
 0x1f1   :  { %v10910_v40 = vmov -1e+30   ;;  %vm1238_vm9 = vcmp.eq.s32.totalorder %v1218_v42, %v11305_v36 }
 0x1f2   :  { %vm1222_vm8 = vcmp.ge.s32.totalorder %v1202_v39, 18 }
 0x1ff   :  { %v928_v46 = vpop.f32.mrf.mxu1 }
 0x200   :  { %v915_v45 = vpop.f32.mrf.mxu0 }
 0x201   :  { %v916_v47 = vadd.f32 %v915_v45, %v903_v37  ;;  %v1208_v37 = vsel %vm1205_vm4, 1, %v10909_v29 }
 0x202   :  { %vm1237_vm6 = vcmp.eq.s32.totalorder %v1208_v37, %v11305_v36 }
 0x203   :  { %v11272_v48 = vadd.f32 %v928_v46, %v916_v47  ;;  %v11309_v41 = vsel %vm1237_vm6, 0.0, %v10910_v40  ;;  %v1225_v46 = vsel %vm1222_vm8, 1, %v10909_v29  ;;  %v11314_v47 = vsel %vm1238_vm9, 0.0, %v10910_v40 }
 0x204   :  { %v1228_v49 = vadd.s32 2, %v1225_v46 }
 0x206   :  { %vm1239_vm10 = vcmp.eq.s32.totalorder %v1228_v49, %v11305_v36 }
 0x207   :  { %v930_v52 = vpop.f32.mrf.mxu1  ;;  %v1093_v23 = vpop.f32.mrf.mxu2 }
 0x208   :  { %v917_v53 = vpop.f32.mrf.mxu0  ;;  %v1154_v22 = vpop.f32.mrf.mxu3 }
 0x209   :  { %v11294_v25 = vadd.f32 %v1154_v22, %v1093_v23  ;;  %v11319_v53 = vsel %vm1239_vm10, 0.0, %v10910_v40 }
 0x20f   :  { %v1095_v26 = vpop.f32.mrf.mxu2 }
 0x210   :  { %v1156_v24 = vpop.f32.mrf.mxu3  ;;  %v9910_v26 = vld [vmem:[%s13023_s20] ss:$0 sm:$0xff] }
 0x21f   :  { %v1502_v59 = vpop.f32.mrf.mxu1 }
 0x220   :  { %v1430_v60 = vpop.f32.mrf.mxu0  ;;  %v1503_v6 = vadd.f32 %v9907_v63, %v1502_v59  ;;  %v9644_v59 = vld [vmem:[#allocation15 + $0x30] sm:$0xff] }
 0x221   :  { %v1431_v11 = vadd.f32 %v9908_v7, %v1430_v60  ;;  %1563 = vmatpush.bf16.msra.mxu2 %v9644_v59  ;;  %v9643_v60 = vld [vmem:[#allocation15 + $0x28] sm:$0xff] }
 0x223   :  { %v1439_v14 = vmul.f32 0.25, %v1431_v11 }
 0x225   :  { %1564 = vmatpush.bf16.msra.mxu2 %v9643_v60 }
 0x227   :  { %v1504_v61 = vpop.f32.mrf.mxu1 }
 0x228   :  { %v1432_v62 = vpop.f32.mrf.mxu0  ;;  %v1505_v4 = vadd.f32 %v9907_v63, %v1504_v61  ;;  %v9642_v61 = vld [vmem:[#allocation15 + $0x20] sm:$0xff] }
 0x229   :  { %v1433_v12 = vadd.f32 %v9908_v7, %v1432_v62  ;;  %1565 = vmatpush.bf16.msra.mxu2 %v9642_v61  ;;  %v9641_v62 = vld [vmem:[#allocation15 + $0x18] sm:$0xff] }
 0x22a   :  { %v11282_v10 = vpack.c.bf16 %v1505_v4, %v1503_v6 }
 0x22b   :  { %v1440_v15 = vmul.f32 0.25, %v1433_v12 }
 0x22c   :  { %v1594_v13 = vsel %vm1586_vm0, %v11282_v10, 0 }
 0x22d   :  { %v11286_v16 = vpack.c.bf16 %v1440_v15, %v1439_v14  ;;  %1566 = vmatpush.bf16.msra.mxu2 %v9641_v62 }
 0x22f   :  { %v1507_v0 = vpop.f32.mrf.mxu1 }
 0x230   :  { %v1435_v1 = vpop.f32.mrf.mxu0  ;;  %v1508_v2 = vadd.f32 %v9907_v63, %v1507_v0  ;;  %v9640_v63 = vld [vmem:[#allocation15 + $0x10] sm:$0xff]  ;;  %v9639_v0 = vld [vmem:[#allocation15 + $0x8] sm:$0xff] }
 0x231   :  { %v1436_v18 = vadd.f32 %v9908_v7, %v1435_v1  ;;  %1567 = vmatpush.bf16.msra.mxu2 %v9640_v63  ;;  %v9638_v1 = vld [vmem:[#allocation15] sm:$0xff] }
 0x232   :  { %v11277_v3 = vpack.c.bf16 %v1508_v2, %v1508_v2 }
 0x233   :  { %v1441_v20 = vmul.f32 0.25, %v1436_v18 }
 0x234   :  { %v1597_v5 = vsel %vm1586_vm0, %v11277_v3, 0 }
 0x235   :  { %1605 = vmatpush.bf16.xpose.msra.mxu3 %v1597_v5  ;;  %v11290_v21 = vpack.c.bf16 %v1441_v20, %v1441_v20  ;;  %1568 = vmatpush.bf16.msra.mxu2 %v9639_v0 }
 0x237   :  { %v1509_v8 = vpop.f32.mrf.mxu1 }
 0x238   :  { %v1437_v9 = vpop.f32.mrf.mxu0 }
 0x239   :  { %1569 = vmatpush.bf16.msra.mxu2 %v9638_v1 }
 0x23c   :  { %1570 = vmatmul.bf16.vlgmr.msra.gmra.mxu2 %v11262_v17 }
 0x23d   :  { %1606 = vmatpush.bf16.xpose.msra.mxu3 %v1594_v13 }
 0x244   :  { %8630 = vmatmul.msk.bf16.vlgmr.msra.gmra.mxu3 %vm1586_vm0, %v11286_v16 }
 0x24c   :  { %1575 = vmatmul.bf16.gmra.mxu2 %v11267_v19 }
 0x254   :  { %8631 = vmatmul.msk.bf16.gmra.mxu3 %vm1586_vm0, %v11290_v21 }
 0x2bf   :  { %v1571_v23 = vpop.f32.mrf.mxu2 }
 0x2c0   :  { %v1572_v33 = vadd.f32 %v9910_v26, %v1571_v23 }
 0x2c7   :  { %v1608_v43 = vpop.f32.mrf.mxu3  ;;  %v1573_v24 = vpop.f32.mrf.mxu2 }
 0x2c8   :  { %v1609_v44 = vadd.f32 %v1608_v43, %v11309_v41  ;;  %v1574_v34 = vadd.f32 %v9910_v26, %v1573_v24 }
 0x2ca   :  { %v1618_v45 = vsel %vm1617_vm7, %v1609_v44, -inf  ;;  %v11367_v37 = vpack.c.bf16 %v1574_v34, %v1572_v33 }
 0x2cb   :  { %1619 = vmax.xlane.f32.xlu0 %v1618_v45 }
 0x2cf   :  { %v1610_v50 = vpop.f32.mrf.mxu3  ;;  %v1576_v27 = vpop.f32.mrf.mxu2 }
 0x2d0   :  { %v1611_v51 = vadd.f32 %v1610_v50, %v11314_v47  ;;  %v1577_v29 = vadd.f32 %v9910_v26, %v1576_v27 }
 0x2d2   :  { %v1621_v52 = vsel %vm1617_vm7, %v1611_v51, -inf  ;;  %v11363_v30 = vpack.c.bf16 %v1577_v29, %v1577_v29 }
 0x2d3   :  { %1622 = vmax.xlane.f32.xlu0 %v1621_v52 }
 0x2d4   :  { %v1699_v35 = vsel %vm933_vm11, %v11363_v30, 0 }
 0x2d5   :  { %1707 = vmatpush.bf16.msrb.mxu3 %v1699_v35 }
 0x2d7   :  { %v1613_v54 = vpop.f32.mrf.mxu3  ;;  %v1578_v31 = vpop.f32.mrf.mxu2 }
 0x2d8   :  { %v1614_v55 = vadd.f32 %v1613_v54, %v11319_v53 }
 0x2d9   :  { %1708 = vmatpush.bf16.msrb.mxu3 %v11367_v37 }
 0x2da   :  { %v1624_v56 = vsel %vm1617_vm7, %v1614_v55, -inf }
 0x2db   :  { %1625 = vmax.xlane.f32.xlu1 %v1624_v56 }
 0x2dd   :  { %1922 = vmatpush.bf16.msra.mxu3 %v9646_v38 }
 0x2df   :  { %v1615_v57 = vpop.f32.mrf.mxu3 }
 0x2e7   :  { %1731 = vrot.lane.b32.xlu0 %v11277_v3, %s10911_s0 }
 0x2ef   :  { %1725 = vrot.lane.b32.xlu0 %v11290_v21, %s10911_s0 }
 0x2f7   :  { %1937 = vrot.lane.b32.xlu0 %v11282_v10, %s10912_s15 }
 0x2ff   :  { %2112 = vrot.lane.b32.xlu0 %v11286_v16, %s10913_s10 }
 0x33e   :  { %v1620_v2 = vpop.xlane.xlu0 %1619 }
 0x33f   :  { %v1627_v4 = vsub.f32 %v1609_v44, %v1620_v2 }
 0x341   :  { %v1630_v5 = vmul.f32 1.442695, %v1627_v4 }
 0x343   :  { %9940 = vpow2.f32 %v1630_v5 }
 0x346   :  { %v1623_v6 = vpop.xlane.xlu0 %1622 }
 0x347   :  { %v1628_v7 = vsub.f32 %v1611_v51, %v1623_v6 }
 0x349   :  { %v11333_v8 = vpop.eup %9940  ;;  %v1632_v9 = vmul.f32 1.442695, %v1628_v7 }
 0x34a   :  { %v1636_v11 = vsel %vm1617_vm7, %v11333_v8, 0.0 }
 0x34b   :  { %9942 = vpow2.f32 %v1632_v9  ;;  %1637 = vadd.xlane.f32.xlu1 %v1636_v11 }
 0x34e   :  { %v1626_v12 = vpop.xlane.xlu1 %1625 }
 0x34f   :  { %v1629_v13 = vsub.f32 %v1614_v55, %v1626_v12 }
 0x351   :  { %v11337_v14 = vpop.eup %9942  ;;  %v1634_v17 = vmul.f32 1.442695, %v1629_v13 }
 0x352   :  { %v1639_v19 = vsel %vm1617_vm7, %v11337_v14, 0.0 }
 0x353   :  { %9944 = vpow2.f32 %v1634_v17  ;;  %1640 = vadd.xlane.f32.xlu2 %v1639_v19 }
 0x359   :  { %v11341_v15 = vpop.eup %9944  ;;  %v1732_v18 = vpop.permute.xlu0 %1731 }
 0x35a   :  { %v1743_v20 = vsel %vm1586_vm0, %v1732_v18, 0  ;;  %v1642_v22 = vsel %vm1617_vm7, %v11341_v15, 0.0 }
 0x35b   :  { %1643 = vadd.xlane.f32.xlu2 %v1642_v22  ;;  %1751 = vmatpush.bf16.xpose.msrb.mxu0 %v1743_v20 }
 0x361   :  { %v1726_v13 = vpop.permute.xlu0 %1725 }
 0x364   :  { %1729 = vrot.lane.b32.xlu1 %v11282_v10, %s10911_s0 }
 0x369   :  { %v1938_v31 = vpop.permute.xlu0 %1937 }
 0x36a   :  { %v1948_v35 = vsel %vm1586_vm0, %v1938_v31, 0 }
 0x36c   :  { %2118 = vrot.lane.b32.xlu1 %v11277_v3, %s10913_s10 }
 0x373   :  { %1723 = vrot.lane.b32.xlu2 %v11286_v16, %s10911_s0 }
 0x374   :  { %1933 = vrot.lane.b32.xlu1 %v11286_v16, %s10912_s15 }
 0x37b   :  { %1939 = vrot.lane.b32.xlu2 %v11277_v3, %s10912_s15 }
 0x37c   :  { %2114 = vrot.lane.b32.xlu1 %v11290_v21, %s10913_s10 }
 0x383   :  { %2116 = vrot.lane.b32.xlu2 %v11282_v10, %s10913_s10 }
 0x38b   :  { %1935 = vrot.lane.b32.xlu2 %v11290_v21, %s10912_s15 }
 0x3be   :  { %v1638_v39 = vpop.xlane.xlu1 %1637 }
 0x3bf   :  { %9946 = vrcp.f32 %v1638_v39  ;;  %v1656_v52 = vand.u32 2147483648, %v1638_v39  ;;  %vm1650_vm13 = vweird.f32 %v1638_v39  ;;  %v1654_v54 = vand.u32 2147483647, %v1638_v39 }
 0x3c1   :  { %v1657_v60 = vor.u32 1.1754944e-38, %v1656_v52  ;;  %vm1655_vm1 = vcmp.eq.f32.partialorder %v1654_v54, 8.507059e+37 }
 0x3c5   :  { %v9947_v40 = vpop.eup %9946 }
 0x3c6   :  { %v1646_v42 = vmul.f32 %v9947_v40, %v1638_v39  ;;  %v1641_v43 = vpop.xlane.xlu2 %1640  ;;  %vm1651_vm12 = vweird.f32 %v9947_v40 }
 0x3c7   :  { %9948 = vrcp.f32 %v1641_v43  ;;  %vm1652_vm14 = vmor %vm1650_vm13, %vm1651_vm12  ;;  %v1671_v56 = vand.u32 2147483648, %v1641_v43  ;;  %v1669_v59 = vand.u32 2147483647, %v1641_v43  ;;  %vm1665_vm2 = vweird.f32 %v1641_v43 }
 0x3c8   :  { %v1647_v44 = vsub.f32 1.0, %v1646_v42 }
 0x3c9   :  { %v1672_v0 = vor.u32 1.1754944e-38, %v1671_v56  ;;  %vm1670_vm4 = vcmp.eq.f32.partialorder %v1669_v59, 8.507059e+37 }
 0x3ca   :  { %v1648_v45 = vmul.f32 %v9947_v40, %v1647_v44 }
 0x3cc   :  { %v1649_v49 = vadd.f32 %v9947_v40, %v1648_v45 }
 0x3cd   :  { %v9949_v46 = vpop.eup %9948 }
 0x3ce   :  { %v1661_v50 = vmul.f32 %v9949_v46, %v1641_v43  ;;  %v1644_v51 = vpop.xlane.xlu2 %1643  ;;  %v1653_v57 = vsel %vm1652_vm14, %v9947_v40, %v1649_v49  ;;  %vm1666_vm15 = vweird.f32 %v9949_v46 }
 0x3cf   :  { %9950 = vrcp.f32 %v1644_v51  ;;  %v1658_v63 = vsel %vm1655_vm1, %v1657_v60, %v1653_v57  ;;  %vm1667_vm3 = vmor %vm1665_vm2, %vm1666_vm15  ;;  %v1686_v20 = vand.u32 2147483648, %v1644_v51  ;;  %vm1680_vm6 = vweird.f32 %v1644_v51 }
 0x3d0   :  { %v1662_v55 = vsub.f32 1.0, %v1661_v50  ;;  %v1659_v11 = vmul.f32 %v11333_v8, %v1658_v63  ;;  %v1684_v24 = vand.u32 2147483647, %v1644_v51 }
 0x3d2   :  { %v1663_v58 = vmul.f32 %v9949_v46, %v1662_v55  ;;  %vm1685_vm9 = vcmp.eq.f32.partialorder %v1684_v24, 8.507059e+37 }
 0x3d4   :  { %v1664_v61 = vadd.f32 %v9949_v46, %v1663_v58 }
 0x3d5   :  { %v9951_v62 = vpop.eup %9950 }
 0x3d6   :  { %v1668_v1 = vsel %vm1667_vm3, %v9949_v46, %v1664_v61  ;;  %v1676_v2 = vmul.f32 %v9951_v62, %v1644_v51  ;;  %v1730_v4 = vpop.permute.xlu1 %1729  ;;  %v1724_v5 = vpop.permute.xlu2 %1723  ;;  %vm1681_vm5 = vweird.f32 %v9951_v62 }
 0x3d7   :  { %v1673_v6 = vsel %vm1670_vm4, %v1672_v0, %v1668_v1  ;;  %v1740_v7 = vsel %vm1586_vm0, %v1730_v4, 0  ;;  %vm1682_vm8 = vmor %vm1680_vm6, %vm1681_vm5  ;;  %v2113_v4 = vpop.permute.xlu0 %2112 }
 0x3d8   :  { %v1677_v9 = vsub.f32 1.0, %v1676_v2  ;;  %1752 = vmatpush.bf16.xpose.msrb.mxu0 %v1740_v7  ;;  %v1674_v12 = vmul.f32 %v11337_v14, %v1673_v6  ;;  %v1687_v14 = vor.u32 1.1754944e-38, %v1686_v20 }
 0x3da   :  { %v1690_v17 = vpack.c.bf16 %v1674_v12, %v1659_v11  ;;  %v1678_v19 = vmul.f32 %v9951_v62, %v1677_v9 }
 0x3dc   :  { %8632 = vmatmul.msk.bf16.vlgmr.msrb.gmra.mxu3 %vm1617_vm7, %v1690_v17  ;;  %v1679_v18 = vadd.f32 %v9951_v62, %v1678_v19 }
 0x3de   :  { %v2119_v22 = vpop.permute.xlu1 %2118  ;;  %v1940_v23 = vpop.permute.xlu2 %1939  ;;  %v1683_v8 = vsel %vm1682_vm8, %v9951_v62, %v1679_v18 }
 0x3df   :  { %v2130_v26 = vsel %vm1586_vm0, %v2119_v22, 0  ;;  %v1951_v27 = vsel %vm1586_vm0, %v1940_v23, 0  ;;  %8634 = vmatmul.msk.bf16.vlgmr.msrb.gmra.mxu0 %vm1586_vm0, %v1724_v5  ;;  %v1688_v29 = vsel %vm1685_vm9, %v1687_v14, %v1683_v8 }
 0x3e0   :  { %1959 = vmatpush.bf16.xpose.msra.mxu0 %v1951_v27  ;;  %2138 = vmatpush.bf16.xpose.msrb.mxu3 %v2130_v26  ;;  %v1689_v34 = vmul.f32 %v11341_v15, %v1688_v29 }
 0x3e2   :  { %v1691_v39 = vpack.c.bf16 %v1689_v34, %v1689_v34 }
 0x3e6   :  { %v2117_v33 = vpop.permute.xlu2 %2116  ;;  %v1934_v40 = vpop.permute.xlu1 %1933 }
 0x3e7   :  { %v2127_v38 = vsel %vm1586_vm0, %v2117_v33, 0 }
 0x3e8   :  { %1960 = vmatpush.bf16.xpose.msra.mxu0 %v1948_v35  ;;  %2139 = vmatpush.bf16.xpose.msrb.mxu3 %v2127_v38 }
 0x3ec   :  { %8633 = vmatmul.msk.bf16.gmra.mxu3 %vm1617_vm7, %v1691_v39 }
 0x3ee   :  { %v1936_v42 = vpop.permute.xlu2 %1935  ;;  %v2115_v11 = vpop.permute.xlu1 %2114 }
 0x3ef   :  { %8635 = vmatmul.msk.bf16.gmra.mxu0 %vm1586_vm0, %v1726_v13 }
 0x3ff   :  { %8650 = vmatmul.msk.bf16.vlgmr.msra.gmra.mxu0 %vm1586_vm0, %v1934_v40 }
 0x40f   :  { %8651 = vmatmul.msk.bf16.gmra.mxu0 %vm1586_vm0, %v1936_v42 }
 0x45c   :  { %v1754_v43 = vpop.f32.mrf.mxu0 }
 0x45d   :  { %v1755_v15 = vadd.f32 %v1754_v43, %v11309_v41 }
 0x45f   :  { %v1710_v44 = vpop.f32.mrf.mxu3  ;;  %v1763_v45 = vsel %vm1617_vm7, %v1755_v15, -inf }
 0x460   :  { %1764 = vmax.xlane.f32.xlu0 %v1763_v45 }
 0x464   :  { %v1756_v46 = vpop.f32.mrf.mxu0 }
 0x465   :  { %v1757_v49 = vadd.f32 %v1756_v46, %v11314_v47 }
 0x467   :  { %v1712_v50 = vpop.f32.mrf.mxu3  ;;  %v1766_v51 = vsel %vm1617_vm7, %v1757_v49, -inf }
 0x468   :  { %v1719_v52 = vpack.c.bf16 %v1712_v50, %v1710_v44  ;;  %1767 = vmax.xlane.f32.xlu2 %v1766_v51 }
 0x46a   :  { %8648 = vmatmul.msk.bf16.vlgmr.msra.gmra.mxu3 %vm1586_vm0, %v1719_v52 }
 0x46c   :  { %v1759_v54 = vpop.f32.mrf.mxu0 }
 0x46d   :  { %v1760_v55 = vadd.f32 %v1759_v54, %v11319_v53 }
 0x46f   :  { %v1715_v56 = vpop.f32.mrf.mxu3  ;;  %v1769_v57 = vsel %vm1617_vm7, %v1760_v55, -inf }
 0x470   :  { %1770 = vmax.xlane.f32.xlu1 %v1769_v57  ;;  %v1720_v60 = vpack.c.bf16 %v1715_v56, %v1715_v56 }
 0x474   :  { %v1761_v58 = vpop.f32.mrf.mxu0 }
 0x477   :  { %v1717_v59 = vpop.f32.mrf.mxu3 }
 0x47a   :  { %8649 = vmatmul.msk.bf16.gmra.mxu3 %vm1586_vm0, %v1720_v60 }
 0x47c   :  { %v1962_v61 = vpop.f32.mrf.mxu0 }
 0x47d   :  { %v1963_v62 = vadd.f32 %v1962_v61, %v11309_v41 }
 0x47f   :  { %v1971_v63 = vsel %vm1617_vm7, %v1963_v62, -inf }
 0x480   :  { %1972 = vmax.xlane.f32.xlu0 %v1971_v63 }
 0x484   :  { %v1964_v0 = vpop.f32.mrf.mxu0 }
 0x485   :  { %v1965_v1 = vadd.f32 %v1964_v0, %v11314_v47 }
 0x487   :  { %v1974_v2 = vsel %vm1617_vm7, %v1965_v1, -inf }
 0x488   :  { %1975 = vmax.xlane.f32.xlu2 %v1974_v2 }
 0x48a   :  { %8660 = vmatmul.msk.bf16.vlgmr.msrb.gmra.mxu3 %vm1586_vm0, %v2113_v4 }
 0x48c   :  { %v1967_v5 = vpop.f32.mrf.mxu0 }
 0x48d   :  { %v11398_v6 = vadd.f32 %v1967_v5, %v11319_v53 }
 0x48f   :  { %v1977_v7 = vsel %vm1617_vm7, %v11398_v6, -inf }
 0x490   :  { %1978 = vmax.xlane.f32.xlu0 %v1977_v7 }
 0x494   :  { %v1969_v9 = vpop.f32.mrf.mxu0 }
 0x49a   :  { %8661 = vmatmul.msk.bf16.gmra.mxu3 %vm1586_vm0, %v2115_v11 }
 0x4d3   :  { %v1765_v12 = vpop.xlane.xlu0 %1764 }
 0x4d4   :  { %v1772_v13 = vsub.f32 %v1755_v15, %v1765_v12 }
 0x4d6   :  { %v1775_v17 = vmul.f32 1.442695, %v1772_v13 }
 0x4d8   :  { %9952 = vpow2.f32 %v1775_v17 }
 0x4db   :  { %v1768_v19 = vpop.xlane.xlu2 %1767 }
 0x4dc   :  { %v1773_v18 = vsub.f32 %v1757_v49, %v1768_v19 }
 0x4de   :  { %v11403_v20 = vpop.eup %9952  ;;  %v1777_v22 = vmul.f32 1.442695, %v1773_v18 }
 0x4df   :  { %v1781_v23 = vsel %vm1617_vm7, %v11403_v20, 0.0 }
 0x4e0   :  { %9954 = vpow2.f32 %v1777_v22  ;;  %1782 = vadd.xlane.f32.xlu2 %v1781_v23 }
 0x4e3   :  { %v1771_v24 = vpop.xlane.xlu1 %1770 }
 0x4e4   :  { %v1774_v26 = vsub.f32 %v1760_v55, %v1771_v24 }
 0x4e6   :  { %v11407_v27 = vpop.eup %9954  ;;  %v1779_v8 = vmul.f32 1.442695, %v1774_v26 }
 0x4e7   :  { %v1784_v14 = vsel %vm1617_vm7, %v11407_v27, 0.0 }
 0x4e8   :  { %9956 = vpow2.f32 %v1779_v8  ;;  %1785 = vadd.xlane.f32.xlu1 %v1784_v14 }
 0x4ed   :  { %v11411_v29 = vpop.f32.mrf.mxu3 }
 0x4ee   :  { %v11413_v31 = vpop.eup %9956 }
 0x4ef   :  { %v1787_v33 = vsel %vm1617_vm7, %v11413_v31, 0.0 }
 0x4f0   :  { %1788 = vadd.xlane.f32.xlu0 %v1787_v33 }
 0x4f3   :  { %v1973_v34 = vpop.xlane.xlu0 %1972 }
 0x4f4   :  { %v1980_v35 = vsub.f32 %v1963_v62, %v1973_v34 }
 0x4f5   :  { %v11417_v38 = vpop.f32.mrf.mxu3 }
 0x4f6   :  { %v1983_v39 = vmul.f32 1.442695, %v1980_v35 }
 0x4f8   :  { %9958 = vpow2.f32 %v1983_v39  ;;  %1839 = vrot.lane.b32.xlu2 %v11367_v37, %s10911_s0 }
 0x4fb   :  { %v1976_v40 = vpop.xlane.xlu2 %1975 }
 0x4fc   :  { %v1981_v42 = vsub.f32 %v1965_v1, %v1976_v40 }
 0x4fd   :  { %v11421_v43 = vpop.f32.mrf.mxu3 }
 0x4fe   :  { %v11423_v15 = vpop.eup %9958  ;;  %v1985_v44 = vmul.f32 1.442695, %v1981_v42 }
 0x4ff   :  { %v1989_v45 = vsel %vm1617_vm7, %v11423_v15, 0.0 }
 0x500   :  { %9960 = vpow2.f32 %v1985_v44  ;;  %1990 = vadd.xlane.f32.xlu0 %v1989_v45 }
 0x503   :  { %v1979_v62 = vpop.xlane.xlu0 %1978 }
 0x504   :  { %v1982_v63 = vsub.f32 %v11398_v6, %v1979_v62 }
 0x505   :  { %v1931_v46 = vpop.f32.mrf.mxu3 }
 0x506   :  { %v11427_v49 = vpop.eup %9960  ;;  %v1987_v0 = vmul.f32 1.442695, %v1982_v63 }
 0x507   :  { %v1992_v50 = vsel %vm1617_vm7, %v11427_v49, 0.0 }
 0x508   :  { %1993 = vadd.xlane.f32.xlu0 %v1992_v50  ;;  %9962 = vpow2.f32 %v1987_v0 }
 0x50d   :  { %v2141_v51 = vpop.f32.mrf.mxu3 }
 0x50e   :  { %v2142_v52 = vadd.f32 %v2141_v51, %v11309_v41  ;;  %v11449_v1 = vpop.eup %9962 }
 0x50f   :  { %v1995_v2 = vsel %vm1617_vm7, %v11449_v1, 0.0 }
 0x510   :  { %v2150_v54 = vsel %vm1617_vm7, %v2142_v52, -inf }
 0x511   :  { %2151 = vmax.xlane.f32.xlu1 %v2150_v54 }
 0x515   :  { %v2143_v55 = vpop.f32.mrf.mxu3 }
 0x516   :  { %v2144_v56 = vadd.f32 %v2143_v55, %v11314_v47 }
 0x518   :  { %v2153_v57 = vsel %vm1617_vm7, %v2144_v56, -inf }
 0x519   :  { %2154 = vmax.xlane.f32.xlu0 %v2153_v57 }
 0x51d   :  { %v2146_v58 = vpop.f32.mrf.mxu3 }
 0x51e   :  { %v11436_v59 = vadd.f32 %v2146_v58, %v11319_v53 }
 0x520   :  { %v2156_v60 = vsel %vm1617_vm7, %v11436_v59, -inf }
 0x521   :  { %2157 = vmax.xlane.f32.xlu2 %v2156_v60 }
 0x525   :  { %v2148_v61 = vpop.f32.mrf.mxu3 }
 0x52a   :  { %1841 = vrot.lane.b32.xlu1 %v11363_v30, %s10911_s0 }
 0x52d   :  { %2045 = vrot.lane.b32.xlu0 %v11367_v37, %s10912_s15 }
 0x539   :  { %2047 = vrot.lane.b32.xlu2 %v11363_v30, %s10912_s15 }
 0x541   :  { %2226 = vrot.lane.b32.xlu2 %v11363_v30, %s10913_s10 }
 0x553   :  { %v1783_v9 = vpop.xlane.xlu2 %1782 }
 0x554   :  { %v1801_v54 = vand.u32 2147483648, %v1783_v9  ;;  %vm1795_vm15 = vweird.f32 %v1783_v9 }
 0x556   :  { %v1802_v62 = vor.u32 1.1754944e-38, %v1801_v54 }
 0x55b   :  { %v1786_v7 = vpop.xlane.xlu1 %1785  ;;  %v1840_v23 = vpop.permute.xlu2 %1839 }
 0x55c   :  { %9964 = vrcp.f32 %v1786_v7  ;;  %v1816_v46 = vand.u32 2147483648, %v1786_v7  ;;  %vm1810_vm13 = vweird.f32 %v1786_v7 }
 0x55d   :  { %9966 = vrcp.f32 %v1783_v9 }
 0x55e   :  { %v1817_v60 = vor.u32 1.1754944e-38, %v1816_v46 }
 0x562   :  { %v9965_v13 = vpop.eup %9964 }
 0x563   :  { %v11453_v4 = vpop.xlane.xlu0 %1788  ;;  %v9967_v19 = vpop.eup %9966  ;;  %v1806_v18 = vmul.f32 %v9965_v13, %v1786_v7  ;;  %vm1811_vm10 = vweird.f32 %v9965_v13 }
 0x564   :  { %v1791_v22 = vmul.f32 %v9967_v19, %v1783_v9  ;;  %vm1796_vm12 = vweird.f32 %v9967_v19  ;;  %vm1812_vm14 = vmor %vm1810_vm13, %vm1811_vm10  ;;  %vm1825_vm5 = vweird.f32 %v11453_v4 }
 0x565   :  { %v1807_v26 = vsub.f32 1.0, %v1806_v18  ;;  %vm1797_vm1 = vmor %vm1795_vm15, %vm1796_vm12 }
 0x566   :  { %v1792_v33 = vsub.f32 1.0, %v1791_v22 }
 0x567   :  { %v1808_v39 = vmul.f32 %v9965_v13, %v1807_v26 }
 0x568   :  { %v1793_v40 = vmul.f32 %v9967_v19, %v1792_v33  ;;  %v1829_v33 = vand.u32 2147483647, %v11453_v4 }
 0x569   :  { %v1809_v44 = vadd.f32 %v9965_v13, %v1808_v39 }
 0x56a   :  { %1996 = vadd.xlane.f32.xlu2 %v1995_v2  ;;  %v1794_v51 = vadd.f32 %v9967_v19, %v1793_v40  ;;  %vm1830_vm8 = vcmp.eq.f32.partialorder %v1829_v33, 8.507059e+37 }
 0x56b   :  { %v1813_v57 = vsel %vm1812_vm14, %v9965_v13, %v1809_v44 }
 0x56c   :  { %v1798_v61 = vsel %vm1797_vm1, %v9967_v19, %v1794_v51 }
 0x573   :  { %v11455_v5 = vpop.xlane.xlu0 %1990 }
 0x574   :  { %vm2003_vm14 = vweird.f32 %v11455_v5 }
 0x57b   :  { %v11459_v6 = vpop.xlane.xlu0 %1993 }
 0x57c   :  { %vm2018_vm12 = vweird.f32 %v11459_v6 }
 0x582   :  { %2295 = vrot.lane.b32.xlu2 %v11282_v10, %s10885_s22 }
 0x584   :  { %v2152_v11 = vpop.xlane.xlu1 %2151 }
 0x585   :  { %v2159_v12 = vsub.f32 %v2142_v52, %v2152_v11  ;;  %v1814_v52 = vand.u32 2147483647, %v1786_v7 }
 0x587   :  { %v2162_v17 = vmul.f32 1.442695, %v2159_v12  ;;  %vm1815_vm2 = vcmp.eq.f32.partialorder %v1814_v52, 8.507059e+37 }
 0x588   :  { %v1818_v63 = vsel %vm1815_vm2, %v1817_v60, %v1813_v57  ;;  %v2007_v60 = vand.u32 2147483647, %v11455_v5 }
 0x589   :  { %9968 = vpow2.f32 %v2162_v17 }
 0x58a   :  { %2293 = vrot.lane.b32.xlu2 %v11290_v21, %s10885_s22  ;;  %9970 = vrcp.f32 %v11453_v4  ;;  %vm2008_vm2 = vcmp.eq.f32.partialorder %v2007_v60, 8.507059e+37 }
 0x58c   :  { %v2155_v24 = vpop.xlane.xlu0 %2154 }
 0x58d   :  { %v2160_v8 = vsub.f32 %v2144_v56, %v2155_v24  ;;  %v1799_v56 = vand.u32 2147483647, %v1783_v9  ;;  %v1819_v9 = vmul.f32 %v11407_v27, %v1818_v63 }
 0x58f   :  { %v11463_v14 = vpop.eup %9968  ;;  %v2164_v34 = vmul.f32 1.442695, %v2160_v8  ;;  %vm1800_vm3 = vcmp.eq.f32.partialorder %v1799_v56, 8.507059e+37  ;;  %v2024_v56 = vand.u32 2147483648, %v11459_v6 }
 0x590   :  { %v2168_v35 = vsel %vm1617_vm7, %v11463_v14, 0.0  ;;  %v9971_v45 = vpop.eup %9970  ;;  %v1803_v12 = vsel %vm1800_vm3, %v1802_v62, %v1798_v61 }
 0x591   :  { %9972 = vpow2.f32 %v2164_v34  ;;  %2169 = vadd.xlane.f32.xlu1 %v2168_v35  ;;  %v1821_v58 = vmul.f32 %v9971_v45, %v11453_v4  ;;  %v1804_v13 = vmul.f32 %v11403_v20, %v1803_v12  ;;  %vm1826_vm4 = vweird.f32 %v9971_v45 }
 0x592   :  { %9974 = vrcp.f32 %v11459_v6  ;;  %v1831_v20 = vand.u32 2147483648, %v11453_v4  ;;  %vm1827_vm6 = vmor %vm1825_vm5, %vm1826_vm4  ;;  %v2025_v62 = vor.u32 1.1754944e-38, %v2024_v56 }
 0x593   :  { %v1822_v7 = vsub.f32 1.0, %v1821_v58  ;;  %9976 = vrcp.f32 %v11455_v5  ;;  %v1835_v18 = vpack.c.bf16 %v1819_v9, %v1804_v13  ;;  %v2022_v58 = vand.u32 2147483647, %v11459_v6 }
 0x594   :  { %v11468_v42 = vpop.xlane.xlu2 %2157  ;;  %v1832_v39 = vor.u32 1.1754944e-38, %v1831_v20 }
 0x595   :  { %v1823_v17 = vmul.f32 %v9971_v45, %v1822_v7  ;;  %vm2023_vm1 = vcmp.eq.f32.partialorder %v2022_v58, 8.507059e+37  ;;  %v2161_v12 = vsub.f32 %v11436_v59, %v11468_v42 }
 0x597   :  { %v11470_v50 = vpop.eup %9972  ;;  %v1824_v26 = vadd.f32 %v9971_v45, %v1823_v17  ;;  %v2166_v9 = vmul.f32 1.442695, %v2161_v12 }
 0x598   :  { %v2171_v55 = vsel %vm1617_vm7, %v11470_v50, 0.0  ;;  %v9975_v27 = vpop.eup %9974 }
 0x599   :  { %2172 = vadd.xlane.f32.xlu0 %v2171_v55  ;;  %v2014_v34 = vmul.f32 %v9975_v27, %v11459_v6  ;;  %v1828_v35 = vsel %vm1827_vm6, %v9971_v45, %v1824_v26  ;;  %vm2019_vm9 = vweird.f32 %v9975_v27  ;;  %9978 = vpow2.f32 %v2166_v9 }
 0x59a   :  { %v1833_v44 = vsel %vm1830_vm8, %v1832_v39, %v1828_v35  ;;  %vm2020_vm13 = vmor %vm2018_vm12, %vm2019_vm9  ;;  %v9647_v35 = vld [vmem:[#allocation16 + $0x8] sm:$0xff] }
 0x59b   :  { %v2015_v46 = vsub.f32 1.0, %v2014_v34  ;;  %v1834_v4 = vmul.f32 %v11413_v31, %v1833_v44  ;;  %v2009_v31 = vand.u32 2147483648, %v11455_v5  ;;  %v9649_v34 = vld [vmem:[#allocation16 + $0x18] sm:$0xff]  ;;  %1892 = vmatpush.bf16.msrb.mxu2 %v9647_v35 }
 0x59c   :  { %v1842_v0 = vpop.permute.xlu1 %1841  ;;  %v2048_v2 = vpop.permute.xlu2 %2047 }
 0x59d   :  { %v1851_v11 = vsel %vm933_vm11, %v1842_v0, 0  ;;  %v2057_v19 = vsel %vm933_vm11, %v2048_v2, 0  ;;  %v2016_v52 = vmul.f32 %v9975_v27, %v2015_v46  ;;  %v1836_v54 = vpack.c.bf16 %v1834_v4, %v1834_v4 }
 0x59e   :  { %1859 = vmatpush.bf16.msrb.mxu1 %v1851_v11  ;;  %v2010_v0 = vor.u32 1.1754944e-38, %v2009_v31 }
 0x59f   :  { %v2046_v8 = vpop.permute.xlu0 %2045  ;;  %v2017_v55 = vadd.f32 %v9975_v27, %v2016_v52 }
 0x5a1   :  { %v2021_v61 = vsel %vm2020_vm13, %v9975_v27, %v2017_v55 }
 0x5a2   :  { %1860 = vmatpush.bf16.msrb.mxu1 %v1840_v23  ;;  %v9977_v23 = vpop.eup %9976  ;;  %v2026_v2 = vsel %vm2023_vm1, %v2025_v62, %v2021_v61 }
 0x5a3   :  { %v1999_v40 = vmul.f32 %v9977_v23, %v11455_v5  ;;  %vm2004_vm10 = vweird.f32 %v9977_v23  ;;  %v2027_v6 = vmul.f32 %v11427_v49, %v2026_v2  ;;  %v11513_v13 = vpop.eup %9978 }
 0x5a4   :  { %v2227_v22 = vpop.permute.xlu2 %2226  ;;  %vm2005_vm15 = vmor %vm2003_vm14, %vm2004_vm10  ;;  %v2174_v49 = vsel %vm1617_vm7, %v11513_v13, 0.0 }
 0x5a5   :  { %v2236_v24 = vsel %vm933_vm11, %v2227_v22, 0  ;;  %8636 = vmatmul.msk.bf16.vlgmr.msrb.gmra.mxu1 %vm1617_vm7, %v1835_v18  ;;  %v2000_v51 = vsub.f32 1.0, %v1999_v40  ;;  %v9648_v40 = vld [vmem:[#allocation16 + $0x10] sm:$0xff] }
 0x5a6   :  { %2065 = vmatpush.bf16.msra.mxu1 %v2057_v19  ;;  %2244 = vmatpush.bf16.msrb.mxu0 %v2236_v24 }
 0x5a7   :  { %v2001_v45 = vmul.f32 %v9977_v23, %v2000_v51  ;;  %2098 = vmatpush.bf16.msra.mxu2 %v9648_v40 }
 0x5a9   :  { %v2002_v57 = vadd.f32 %v9977_v23, %v2001_v45 }
 0x5aa   :  { %2066 = vmatpush.bf16.msra.mxu1 %v2046_v8  ;;  %2297 = vrot.lane.b32.xlu1 %v11277_v3, %s10885_s22 }
 0x5ab   :  { %v2006_v63 = vsel %vm2005_vm15, %v9977_v23, %v2002_v57 }
 0x5ac   :  { %v2011_v7 = vsel %vm2008_vm2, %v2010_v0, %v2006_v63 }
 0x5ad   :  { %2224 = vrot.lane.b32.xlu0 %v11367_v37, %s10913_s10  ;;  %v2012_v11 = vmul.f32 %v11423_v15, %v2011_v7 }
 0x5ae   :  { %2277 = vmatpush.bf16.msrb.mxu1 %v9649_v34 }
 0x5af   :  { %v2043_v5 = vpack.c.bf16 %v2027_v6, %v2012_v11 }
 0x5b2   :  { %2476 = vrot.lane.b32.xlu1 %v11277_v3, %s10914_s4 }
 0x5b5   :  { %8637 = vmatmul.msk.bf16.gmra.mxu1 %vm1617_vm7, %v1836_v54 }
 0x5ba   :  { %2291 = vrot.lane.b32.xlu1 %v11286_v16, %s10885_s22 }
 0x5c2   :  { %2470 = vrot.lane.b32.xlu1 %v11286_v16, %s10914_s4 }
 0x5c5   :  { %8652 = vmatmul.msk.bf16.vlgmr.msra.gmra.mxu1 %vm1617_vm7, %v2043_v5 }
 0x5ca   :  { %2472 = vrot.lane.b32.xlu1 %v11290_v21, %s10914_s4 }
 0x5d7   :  { %2175 = vadd.xlane.f32.xlu0 %v2174_v49 }
 0x5dd   :  { %v1997_v15 = vpop.xlane.xlu2 %1996 }
 0x5de   :  { %9980 = vrcp.f32 %v1997_v15  ;;  %v2039_v22 = vand.u32 2147483648, %v1997_v15  ;;  %v2037_v42 = vand.u32 2147483647, %v1997_v15  ;;  %vm2033_vm4 = vweird.f32 %v1997_v15 }
 0x5e0   :  { %v2040_v26 = vor.u32 1.1754944e-38, %v2039_v22  ;;  %vm2038_vm6 = vcmp.eq.f32.partialorder %v2037_v42, 8.507059e+37 }
 0x5e4   :  { %v9981_v17 = vpop.eup %9980 }
 0x5e5   :  { %v2029_v19 = vmul.f32 %v9981_v17, %v1997_v15  ;;  %vm2034_vm3 = vweird.f32 %v9981_v17 }
 0x5e6   :  { %vm2035_vm5 = vmor %vm2033_vm4, %vm2034_vm3 }
 0x5e7   :  { %v2030_v18 = vsub.f32 1.0, %v2029_v19 }
 0x5e9   :  { %v2031_v59 = vmul.f32 %v9981_v17, %v2030_v18 }
 0x5eb   :  { %2474 = vrot.lane.b32.xlu0 %v11282_v10, %s10914_s4  ;;  %v2032_v24 = vadd.f32 %v9981_v17, %v2031_v59 }
 0x5ed   :  { %v2036_v27 = vsel %vm2035_vm5, %v9981_v17, %v2032_v24 }
 0x5ee   :  { %v2041_v8 = vsel %vm2038_vm6, %v2040_v26, %v2036_v27 }
 0x5ef   :  { %v2042_v20 = vmul.f32 %v11449_v1, %v2041_v8 }
 0x5f1   :  { %v2044_v33 = vpack.c.bf16 %v2042_v20, %v2042_v20 }
 0x5f3   :  { %8653 = vmatmul.msk.bf16.gmra.mxu1 %vm1617_vm7, %v2044_v33 }
 0x604   :  { %v2170_v23 = vpop.xlane.xlu1 %2169 }
 0x605   :  { %9982 = vrcp.f32 %v2170_v23  ;;  %v2188_v54 = vand.u32 2147483648, %v2170_v23  ;;  %vm2182_vm9 = vweird.f32 %v2170_v23  ;;  %v2186_v55 = vand.u32 2147483647, %v2170_v23 }
 0x607   :  { %v2189_v61 = vor.u32 1.1754944e-38, %v2188_v54  ;;  %vm2187_vm13 = vcmp.eq.f32.partialorder %v2186_v55, 8.507059e+37 }
 0x60b   :  { %v9983_v39 = vpop.eup %9982 }
 0x60c   :  { %v2178_v44 = vmul.f32 %v9983_v39, %v2170_v23  ;;  %v2173_v46 = vpop.xlane.xlu0 %2172  ;;  %vm2183_vm8 = vweird.f32 %v9983_v39 }
 0x60d   :  { %9984 = vrcp.f32 %v2173_v46  ;;  %vm2184_vm10 = vmor %vm2182_vm9, %vm2183_vm8  ;;  %v2203_v57 = vand.u32 2147483648, %v2173_v46  ;;  %v2201_v60 = vand.u32 2147483647, %v2173_v46  ;;  %vm2197_vm14 = vweird.f32 %v2173_v46 }
 0x60e   :  { %v2179_v51 = vsub.f32 1.0, %v2178_v44 }
 0x60f   :  { %v2204_v0 = vor.u32 1.1754944e-38, %v2203_v57  ;;  %vm2202_vm1 = vcmp.eq.f32.partialorder %v2201_v60, 8.507059e+37 }
 0x610   :  { %v2180_v4 = vmul.f32 %v9983_v39, %v2179_v51 }
 0x612   :  { %v2181_v45 = vadd.f32 %v9983_v39, %v2180_v4 }
 0x613   :  { %v9985_v52 = vpop.eup %9984 }
 0x614   :  { %v2193_v1 = vmul.f32 %v9985_v52, %v2173_v46  ;;  %v2185_v58 = vsel %vm2184_vm10, %v9983_v39, %v2181_v45  ;;  %vm2198_vm12 = vweird.f32 %v9985_v52 }
 0x615   :  { %v2190_v63 = vsel %vm2187_vm13, %v2189_v61, %v2185_v58  ;;  %vm2199_vm15 = vmor %vm2197_vm14, %vm2198_vm12 }
 0x616   :  { %v2194_v56 = vsub.f32 1.0, %v2193_v1  ;;  %v2191_v11 = vmul.f32 %v11463_v14, %v2190_v63  ;;  %v2296_v14 = vpop.permute.xlu2 %2295 }
 0x618   :  { %v2195_v31 = vmul.f32 %v9985_v52, %v2194_v56 }
 0x61a   :  { %v2196_v62 = vadd.f32 %v9985_v52, %v2195_v31 }
 0x61c   :  { %v2200_v2 = vsel %vm2199_vm15, %v9985_v52, %v2196_v62  ;;  %v2298_v7 = vpop.permute.xlu1 %2297 }
 0x61d   :  { %v2205_v6 = vsel %vm2202_vm1, %v2204_v0, %v2200_v2  ;;  %v2309_v22 = vsel %vm1586_vm0, %v2298_v7, 0 }
 0x61e   :  { %v2206_v5 = vmul.f32 %v11470_v50, %v2205_v6  ;;  %v2306_v50 = vsel %vm1586_vm0, %v2296_v14, 0  ;;  %v2294_v31 = vpop.permute.xlu2 %2293 }
 0x61f   :  { %v2225_v12 = vpop.permute.xlu0 %2224 }
 0x620   :  { %2245 = vmatpush.bf16.msrb.mxu0 %v2225_v12  ;;  %v2222_v9 = vpack.c.bf16 %v2206_v5, %v2191_v11 }
 0x622   :  { %v1862_v49 = vpop.f32.mrf.mxu1 }
 0x623   :  { %8662 = vmatmul.msk.bf16.vlgmr.msrb.gmra.mxu0 %vm1617_vm7, %v2222_v9 }
 0x624   :  { %v2477_v15 = vpop.permute.xlu1 %2476 }
 0x625   :  { %v2488_v17 = vsel %vm1586_vm0, %v2477_v15, 0 }
 0x626   :  { %2496 = vmatpush.bf16.xpose.msra.mxu1 %v2488_v17 }
 0x62a   :  { %v1864_v19 = vpop.f32.mrf.mxu1 }
 0x62b   :  { %v1871_v18 = vpack.c.bf16 %v1864_v19, %v1862_v49 }
 0x62c   :  { %v2292_v58 = vpop.permute.xlu1 %2291 }
 0x62d   :  { %8642 = vmatmul.msk.bf16.vlgmr.msrb.gmra.mxu2 %vm1586_vm0, %v1871_v18 }
 0x62e   :  { %2317 = vmatpush.bf16.xpose.msrb.mxu2 %v2309_v22 }
 0x632   :  { %v1867_v59 = vpop.f32.mrf.mxu1 }
 0x633   :  { %v1872_v24 = vpack.c.bf16 %v1867_v59, %v1867_v59 }
 0x634   :  { %v2471_v15 = vpop.permute.xlu1 %2470 }
 0x636   :  { %2318 = vmatpush.bf16.xpose.msrb.mxu2 %v2306_v50 }
 0x63a   :  { %v1869_v42 = vpop.f32.mrf.mxu1 }
 0x63c   :  { %v2473_v14 = vpop.permute.xlu1 %2472 }
 0x63d   :  { %8643 = vmatmul.msk.bf16.gmra.mxu2 %vm1586_vm0, %v1872_v24 }
 0x642   :  { %v2068_v26 = vpop.f32.mrf.mxu1 }
 0x64a   :  { %v2070_v27 = vpop.f32.mrf.mxu1  ;;  %v2176_v8 = vpop.xlane.xlu0 %2175 }
 0x64b   :  { %v2077_v20 = vpack.c.bf16 %v2070_v27, %v2068_v26  ;;  %9986 = vrcp.f32 %v2176_v8  ;;  %v2218_v35 = vand.u32 2147483648, %v2176_v8  ;;  %v2216_v40 = vand.u32 2147483647, %v2176_v8 }
 0x64c   :  { %vm2212_vm3 = vweird.f32 %v2176_v8 }
 0x64d   :  { %8658 = vmatmul.msk.bf16.vlgmr.msra.gmra.mxu2 %vm1586_vm0, %v2077_v20  ;;  %v2219_v46 = vor.u32 1.1754944e-38, %v2218_v35  ;;  %vm2217_vm5 = vcmp.eq.f32.partialorder %v2216_v40, 8.507059e+37 }
 0x651   :  { %v9987_v33 = vpop.eup %9986 }
 0x652   :  { %v2208_v23 = vmul.f32 %v9987_v33, %v2176_v8  ;;  %vm2213_vm2 = vweird.f32 %v9987_v33 }
 0x653   :  { %vm2214_vm4 = vmor %vm2212_vm3, %vm2213_vm2 }
 0x654   :  { %v2209_v34 = vsub.f32 1.0, %v2208_v23 }
 0x656   :  { %v2210_v39 = vmul.f32 %v9987_v33, %v2209_v34 }
 0x658   :  { %v2211_v44 = vadd.f32 %v9987_v33, %v2210_v39 }
 0x65a   :  { %v2215_v51 = vsel %vm2214_vm4, %v9987_v33, %v2211_v44 }
 0x65b   :  { %v2220_v4 = vsel %vm2217_vm5, %v2219_v46, %v2215_v51 }
 0x65c   :  { %v2221_v52 = vmul.f32 %v11513_v13, %v2220_v4 }
 0x65d   :  { %v2475_v45 = vpop.permute.xlu0 %2474 }
 0x65e   :  { %v2485_v1 = vsel %vm1586_vm0, %v2475_v45, 0  ;;  %v2223_v54 = vpack.c.bf16 %v2221_v52, %v2221_v52 }
 0x65f   :  { %2497 = vmatpush.bf16.xpose.msra.mxu1 %v2485_v1 }
 0x660   :  { %8663 = vmatmul.msk.bf16.gmra.mxu0 %vm1617_vm7, %v2223_v54 }
 0x670   :  { %v2073_v55 = vpop.f32.mrf.mxu1 }
 0x671   :  { %v2078_v56 = vpack.c.bf16 %v2073_v55, %v2073_v55 }
 0x673   :  { %8659 = vmatmul.msk.bf16.gmra.mxu2 %vm1586_vm0, %v2078_v56 }
 0x678   :  { %v2075_v57 = vpop.f32.mrf.mxu1 }
 0x683   :  { %8670 = vmatmul.msk.bf16.vlgmr.msrb.gmra.mxu2 %vm1586_vm0, %v2292_v58 }
 0x693   :  { %8671 = vmatmul.msk.bf16.gmra.mxu2 %vm1586_vm0, %v2294_v31 }
 0x6a0   :  { %v2247_v60 = vpop.f32.mrf.mxu0 }
 0x6a8   :  { %v2249_v13 = vpop.f32.mrf.mxu0 }
 0x6a9   :  { %v2256_v61 = vpack.c.bf16 %v2249_v13, %v2247_v60 }
 0x6ab   :  { %8668 = vmatmul.msk.bf16.vlgmr.msrb.gmra.mxu1 %vm1586_vm0, %v2256_v61 }
 0x6b0   :  { %v1894_v62 = vpop.f32.mrf.mxu2 }
 0x6b1   :  { %v1925_v7 = vadd.f32 %v11411_v29, %v1894_v62 }
 0x6b8   :  { %v11537_v63 = vpop.f32.mrf.mxu2 }
 0x6c0   :  { %v1899_v0 = vpop.f32.mrf.mxu2 }
 0x6c1   :  { %v1930_v17 = vadd.f32 %v11421_v43, %v1899_v0 }
 0x6c8   :  { %v1901_v2 = vpop.f32.mrf.mxu2 }
 0x6d0   :  { %v2100_v6 = vpop.f32.mrf.mxu2 }
 0x6d1   :  { %v2109_v11 = vadd.f32 %v2100_v6, %v1925_v7 }
 0x6d8   :  { %v11541_v49 = vpop.f32.mrf.mxu2 }
 0x6dd   :  { %v2252_v5 = vpop.f32.mrf.mxu0 }
 0x6de   :  { %v2257_v12 = vpack.c.bf16 %v2252_v5, %v2252_v5 }
 0x6e0   :  { %8669 = vmatmul.msk.bf16.gmra.mxu1 %vm1586_vm0, %v2257_v12 }
 0x6e5   :  { %v2254_v9 = vpop.f32.mrf.mxu0 }
 0x6f0   :  { %8680 = vmatmul.msk.bf16.vlgmr.msra.gmra.mxu1 %vm1586_vm0, %v2471_v15 }
 0x6f6   :  { %v2105_v19 = vpop.f32.mrf.mxu2 }
 0x6f7   :  { %v2111_v18 = vadd.f32 %v2105_v19, %v1930_v17 }
 0x6fe   :  { %v2107_v22 = vpop.f32.mrf.mxu2 }
 0x700   :  { %8681 = vmatmul.msk.bf16.gmra.mxu1 %vm1586_vm0, %v2473_v14 }
 0x706   :  { %v2320_v29 = vpop.f32.mrf.mxu2 }
 0x707   :  { %v2321_v59 = vadd.f32 %v2320_v29, %v11309_v41 }
 0x709   :  { %v2329_v50 = vsel %vm1617_vm7, %v2321_v59, -inf }
 0x70a   :  { %2330 = vmax.xlane.f32.xlu2 %v2329_v50 }
 0x70e   :  { %v2322_v42 = vpop.f32.mrf.mxu2 }
 0x70f   :  { %v2323_v24 = vadd.f32 %v2322_v42, %v11314_v47 }
 0x711   :  { %v2332_v26 = vsel %vm1617_vm7, %v2323_v24, -inf }
 0x712   :  { %2333 = vmax.xlane.f32.xlu1 %v2332_v26 }
 0x716   :  { %v2325_v27 = vpop.f32.mrf.mxu2 }
 0x717   :  { %v2326_v43 = vadd.f32 %v2325_v27, %v11319_v53 }
 0x719   :  { %v2335_v8 = vsel %vm1617_vm7, %v2326_v43, -inf }
 0x71a   :  { %2336 = vmax.xlane.f32.xlu1 %v2335_v8 }
 0x71e   :  { %v2327_v20 = vpop.f32.mrf.mxu2 }
 0x728   :  { %v2279_v33 = vpop.f32.mrf.mxu1 }
 0x729   :  { %v11552_v23 = vadd.f32 %v2279_v33, %v2109_v11 }
 0x730   :  { %v11554_v34 = vpop.f32.mrf.mxu1 }
 0x75d   :  { %v2284_v35 = vpop.f32.mrf.mxu1 }
 0x75e   :  { %v11556_v39 = vadd.f32 %v2284_v35, %v2111_v18 }
 0x765   :  { %v2286_v40 = vpop.f32.mrf.mxu1 }
 0x76d   :  { %v2499_v44 = vpop.f32.mrf.mxu1 }
 0x76e   :  { %v2500_v46 = vadd.f32 %v2499_v44, %v11309_v41 }
 0x770   :  { %v2508_v51 = vsel %vm1617_vm7, %v2500_v46, -inf }
 0x771   :  { %2509 = vmax.xlane.f32.xlu0 %v2508_v51 }
 0x775   :  { %v2501_v4 = vpop.f32.mrf.mxu1 }
 0x776   :  { %v2502_v52 = vadd.f32 %v2501_v4, %v11314_v47 }
 0x778   :  { %v2511_v45 = vsel %vm1617_vm7, %v2502_v52, -inf }
 0x779   :  { %2512 = vmax.xlane.f32.xlu2 %v2511_v45 }
 0x77d   :  { %v2331_v1 = vpop.xlane.xlu2 %2330  ;;  %v2504_v54 = vpop.f32.mrf.mxu1 }
 0x77e   :  { %v2338_v55 = vsub.f32 %v2321_v59, %v2331_v1  ;;  %v2505_v2 = vadd.f32 %v2504_v54, %v11319_v53 }
 0x780   :  { %v2341_v56 = vmul.f32 1.442695, %v2338_v55  ;;  %v2514_v7 = vsel %vm1617_vm7, %v2505_v2, -inf }
 0x782   :  { %9988 = vpow2.f32 %v2341_v56 }
 0x785   :  { %v2334_v57 = vpop.xlane.xlu1 %2333  ;;  %v2506_v58 = vpop.f32.mrf.mxu1  ;;  %2584 = vrot.lane.b32.xlu0 %v11363_v30, %s10914_s4 }
 0x786   :  { %v2339_v31 = vsub.f32 %v2323_v24, %v2334_v57 }
 0x788   :  { %v11564_v60 = vpop.eup %9988  ;;  %v2343_v13 = vmul.f32 1.442695, %v2339_v31 }
 0x789   :  { %v2347_v61 = vsel %vm1617_vm7, %v11564_v60, 0.0 }
 0x78a   :  { %9990 = vpow2.f32 %v2343_v13  ;;  %2348 = vadd.xlane.f32.xlu2 %v2347_v61 }
 0x78d   :  { %v2337_v6 = vpop.xlane.xlu1 %2336 }
 0x78e   :  { %v2340_v11 = vsub.f32 %v2326_v43, %v2337_v6 }
 0x790   :  { %v11568_v62 = vpop.eup %9990  ;;  %v2345_v5 = vmul.f32 1.442695, %v2340_v11 }
 0x791   :  { %v2350_v0 = vsel %vm1617_vm7, %v11568_v62, 0.0 }
 0x792   :  { %2351 = vadd.xlane.f32.xlu1 %v2350_v0  ;;  %9992 = vpow2.f32 %v2345_v5 }
 0x798   :  { %v11576_v12 = vpop.eup %9992 }
 0x799   :  { %v2353_v9 = vsel %vm1617_vm7, %v11576_v12, 0.0 }
 0x7ab   :  { %2405 = vrot.lane.b32.xlu1 %v11363_v30, %s10885_s22 }
 0x7af   :  { %2515 = vmax.xlane.f32.xlu0 %v2514_v7 }
 0x7d5   :  { %2354 = vadd.xlane.f32.xlu1 %v2353_v9 }
 0x7e4   :  { %v2510_v15 = vpop.xlane.xlu0 %2509 }
 0x7e5   :  { %v2517_v17 = vsub.f32 %v2500_v46, %v2510_v15 }
 0x7e7   :  { %v2520_v19 = vmul.f32 1.442695, %v2517_v17 }
 0x7e9   :  { %9994 = vpow2.f32 %v2520_v19 }
 0x7ec   :  { %v2513_v18 = vpop.xlane.xlu2 %2512 }
 0x7ed   :  { %v2518_v22 = vsub.f32 %v2502_v52, %v2513_v18  ;;  %v9650_v52 = vld [vmem:[#allocation16 + $0x20] sm:$0xff] }
 0x7ee   :  { %2828 = vrot.lane.b32.xlu1 %v11286_v16, %s10892_s6  ;;  %2456 = vmatpush.bf16.msra.mxu0 %v9650_v52 }
 0x7ef   :  { %v11582_v14 = vpop.eup %9994  ;;  %v2522_v29 = vmul.f32 1.442695, %v2518_v22 }
 0x7f0   :  { %v2526_v59 = vsel %vm1617_vm7, %v11582_v14, 0.0 }
 0x7f1   :  { %9996 = vpow2.f32 %v2522_v29  ;;  %2527 = vadd.xlane.f32.xlu0 %v2526_v59 }
 0x7f7   :  { %v11586_v50 = vpop.eup %9996  ;;  %v2585_v42 = vpop.permute.xlu0 %2584 }
 0x7f8   :  { %v2594_v24 = vsel %vm933_vm11, %v2585_v42, 0  ;;  %v2529_v26 = vsel %vm1617_vm7, %v11586_v50, 0.0 }
 0x7f9   :  { %2530 = vadd.xlane.f32.xlu2 %v2529_v26  ;;  %2602 = vmatpush.bf16.msra.mxu2 %v2594_v24  ;;  %v9651_v24 = vld [vmem:[#allocation16 + $0x28] sm:$0xff] }
 0x7fd   :  { %v2349_v44 = vpop.xlane.xlu2 %2348 }
 0x7fe   :  { %v2367_v0 = vand.u32 2147483648, %v2349_v44  ;;  %vm2361_vm12 = vweird.f32 %v2349_v44  ;;  %v2365_v7 = vand.u32 2147483647, %v2349_v44 }
 0x800   :  { %v2368_v19 = vor.u32 1.1754944e-38, %v2367_v0  ;;  %vm2366_vm15 = vcmp.eq.f32.partialorder %v2365_v7, 8.507059e+37 }
 0x805   :  { %2582 = vrot.lane.b32.xlu0 %v11367_v37, %s10914_s4  ;;  %v2352_v27 = vpop.xlane.xlu1 %2351 }
 0x806   :  { %v2382_v58 = vand.u32 2147483648, %v2352_v27  ;;  %vm2376_vm9 = vweird.f32 %v2352_v27  ;;  %v2380_v13 = vand.u32 2147483647, %v2352_v27 }
 0x808   :  { %v2383_v9 = vor.u32 1.1754944e-38, %v2382_v58  ;;  %vm2381_vm14 = vcmp.eq.f32.partialorder %v2380_v13, 8.507059e+37 }
 0x80d   :  { %2655 = vrot.lane.b32.xlu0 %v11277_v3, %s10915_s16 }
 0x811   :  { %2403 = vrot.lane.b32.xlu2 %v11367_v37, %s10885_s22 }
 0x815   :  { %2834 = vrot.lane.b32.xlu0 %v11277_v3, %s10892_s6 }
 0x81d   :  { %v2406_v43 = vpop.permute.xlu1 %2405  ;;  %2653 = vrot.lane.b32.xlu0 %v11282_v10, %s10915_s16 }
 0x81e   :  { %v2415_v8 = vsel %vm933_vm11, %v2406_v43, 0 }
 0x81f   :  { %2423 = vmatpush.bf16.msra.mxu3 %v2415_v8 }
 0x822   :  { %v2516_v20 = vpop.xlane.xlu0 %2515 }
 0x823   :  { %v2519_v33 = vsub.f32 %v2505_v2, %v2516_v20 }
 0x825   :  { %2832 = vrot.lane.b32.xlu0 %v11282_v10, %s10892_s6  ;;  %v2524_v35 = vmul.f32 1.442695, %v2519_v33 }
 0x827   :  { %9998 = vpow2.f32 %v2524_v35 }
 0x828   :  { %10000 = vrcp.f32 %v2352_v27 }
 0x829   :  { %10002 = vrcp.f32 %v2349_v44 }
 0x82d   :  { %2649 = vrot.lane.b32.xlu0 %v11286_v16, %s10915_s16  ;;  %v11608_v3 = vpop.eup %9998 }
 0x82e   :  { %v2532_v40 = vsel %vm1617_vm7, %v11608_v3, 0.0  ;;  %v10001_v10 = vpop.eup %10000 }
 0x82f   :  { %v10003_v46 = vpop.eup %10002  ;;  %v2372_v51 = vmul.f32 %v10001_v10, %v2352_v27  ;;  %vm2377_vm6 = vweird.f32 %v10001_v10 }
 0x830   :  { %v2357_v16 = vmul.f32 %v10003_v46, %v2349_v44  ;;  %vm2362_vm8 = vweird.f32 %v10003_v46  ;;  %vm2378_vm10 = vmor %vm2376_vm9, %vm2377_vm6 }
 0x831   :  { %v2373_v45 = vsub.f32 1.0, %v2372_v51  ;;  %vm2363_vm13 = vmor %vm2361_vm12, %vm2362_vm8 }
 0x832   :  { %v2358_v1 = vsub.f32 1.0, %v2357_v16 }
 0x833   :  { %v2374_v54 = vmul.f32 %v10001_v10, %v2373_v45 }
 0x834   :  { %v2359_v56 = vmul.f32 %v10003_v46, %v2358_v1 }
 0x835   :  { %2830 = vrot.lane.b32.xlu0 %v11290_v21, %s10892_s6 }
 0x836   :  { %v2360_v31 = vadd.f32 %v10003_v46, %v2359_v56 }
 0x838   :  { %v2364_v15 = vsel %vm2363_vm13, %v10003_v46, %v2360_v31 }
 0x839   :  { %v2369_v59 = vsel %vm2366_vm15, %v2368_v19, %v2364_v15 }
 0x83a   :  { %2533 = vadd.xlane.f32.xlu2 %v2532_v40  ;;  %v2370_v33 = vmul.f32 %v11564_v60, %v2369_v59 }
 0x848   :  { %v11614_v4 = vpop.xlane.xlu1 %2354 }
 0x849   :  { %10004 = vrcp.f32 %v11614_v4  ;;  %vm2391_vm6 = vweird.f32 %v11614_v4  ;;  %v2395_v56 = vand.u32 2147483647, %v11614_v4 }
 0x84f   :  { %v11617_v57 = vpop.eup %10004 }
 0x850   :  { %v2387_v2 = vmul.f32 %v11617_v57, %v11614_v4  ;;  %vm2392_vm4 = vweird.f32 %v11617_v57 }
 0x852   :  { %2651 = vrot.lane.b32.xlu2 %v11290_v21, %s10915_s16  ;;  %v2375_v21 = vadd.f32 %v10001_v10, %v2374_v54  ;;  %v2388_v22 = vsub.f32 1.0, %v2387_v2  ;;  %v2397_v54 = vand.u32 2147483648, %v11614_v4 }
 0x854   :  { %v2379_v6 = vsel %vm2378_vm10, %v10001_v10, %v2375_v21  ;;  %v2389_v27 = vmul.f32 %v11617_v57, %v2388_v22  ;;  %vm2393_vm10 = vmor %vm2391_vm6, %vm2392_vm4  ;;  %v2398_v0 = vor.u32 1.1754944e-38, %v2397_v54 }
 0x855   :  { %v2384_v18 = vsel %vm2381_vm14, %v2383_v9, %v2379_v6  ;;  %vm2396_vm14 = vcmp.eq.f32.partialorder %v2395_v56, 8.507059e+37 }
 0x856   :  { %v2385_v42 = vmul.f32 %v11568_v62, %v2384_v18  ;;  %v2390_v16 = vadd.f32 %v11617_v57, %v2389_v27 }
 0x858   :  { %v2401_v10 = vpack.c.bf16 %v2385_v42, %v2370_v33  ;;  %v2394_v13 = vsel %vm2393_vm10, %v11617_v57, %v2390_v16 }
 0x860   :  { %v2829_v56 = vpop.permute.xlu1 %2828 }
 0x864   :  { %v2528_v55 = vpop.xlane.xlu0 %2527 }
 0x865   :  { %10006 = vrcp.f32 %v2528_v55  ;;  %v2546_v35 = vand.u32 2147483648, %v2528_v55  ;;  %vm2540_vm2 = vweird.f32 %v2528_v55  ;;  %v2544_v40 = vand.u32 2147483647, %v2528_v55 }
 0x867   :  { %v2547_v1 = vor.u32 1.1754944e-38, %v2546_v35  ;;  %vm2545_vm8 = vcmp.eq.f32.partialorder %v2544_v40, 8.507059e+37 }
 0x86b   :  { %v10007_v61 = vpop.eup %10006 }
 0x86c   :  { %v2536_v11 = vmul.f32 %v10007_v61, %v2528_v55  ;;  %v2531_v5 = vpop.xlane.xlu2 %2530  ;;  %vm2541_vm1 = vweird.f32 %v10007_v61 }
 0x86d   :  { %10008 = vrcp.f32 %v2531_v5  ;;  %vm11624_vm3 = vmor %vm2540_vm2, %vm2541_vm1  ;;  %v2561_v62 = vand.u32 2147483648, %v2531_v5  ;;  %v2559_v45 = vand.u32 2147483647, %v2531_v5  ;;  %vm2555_vm9 = vweird.f32 %v2531_v5 }
 0x86e   :  { %v2537_v17 = vsub.f32 1.0, %v2536_v11  ;;  %v2399_v11 = vsel %vm2396_vm14, %v2398_v0, %v2394_v13 }
 0x86f   :  { %v2562_v58 = vor.u32 1.1754944e-38, %v2561_v62  ;;  %vm2560_vm13 = vcmp.eq.f32.partialorder %v2559_v45, 8.507059e+37  ;;  %v2400_v4 = vmul.f32 %v11576_v12, %v2399_v11 }
 0x870   :  { %v2538_v29 = vmul.f32 %v10007_v61, %v2537_v17 }
 0x871   :  { %v2402_v15 = vpack.c.bf16 %v2400_v4, %v2400_v4 }
 0x872   :  { %v2539_v43 = vadd.f32 %v10007_v61, %v2538_v29 }
 0x873   :  { %v10009_v26 = vpop.eup %10008 }
 0x874   :  { %v2551_v8 = vmul.f32 %v10009_v26, %v2531_v5  ;;  %v2404_v20 = vpop.permute.xlu2 %2403  ;;  %v2543_v60 = vsel %vm11624_vm3, %v10007_v61, %v2539_v43  ;;  %vm2556_vm5 = vweird.f32 %v10009_v26 }
 0x875   :  { %2424 = vmatpush.bf16.msra.mxu3 %v2404_v20  ;;  %v2548_v21 = vsel %vm2545_vm8, %v2547_v1, %v2543_v60  ;;  %vm2557_vm12 = vmor %vm2555_vm9, %vm2556_vm5 }
 0x876   :  { %v2552_v44 = vsub.f32 1.0, %v2551_v8  ;;  %v2549_v2 = vmul.f32 %v11582_v14, %v2548_v21 }
 0x877   :  { %v2583_v51 = vpop.permute.xlu0 %2582 }
 0x878   :  { %v2553_v52 = vmul.f32 %v10009_v26, %v2552_v44  ;;  %8672 = vmatmul.msk.bf16.vlgmr.msra.gmra.mxu3 %vm1617_vm7, %v2401_v10  ;;  %2603 = vmatpush.bf16.msra.mxu2 %v2583_v51 }
 0x879   :  { %2635 = vmatpush.bf16.msrb.mxu3 %v9651_v24 }
 0x87a   :  { %v2554_v55 = vadd.f32 %v10009_v26, %v2553_v52 }
 0x87c   :  { %v2558_v31 = vsel %vm2557_vm12, %v10009_v26, %v2554_v55 }
 0x87d   :  { %v2563_v61 = vsel %vm2560_vm13, %v2562_v58, %v2558_v31 }
 0x87e   :  { %v2564_v7 = vmul.f32 %v11586_v50, %v2563_v61 }
 0x87f   :  { %v2656_v6 = vpop.permute.xlu0 %2655 }
 0x880   :  { %v2667_v5 = vsel %vm1586_vm0, %v2656_v6, 0  ;;  %v2580_v9 = vpack.c.bf16 %v2564_v7, %v2549_v2 }
 0x881   :  { %2675 = vmatpush.bf16.xpose.msrb.mxu0 %v2667_v5 }
 0x882   :  { %8682 = vmatmul.msk.bf16.vlgmr.msra.gmra.mxu2 %vm1617_vm7, %v2580_v9 }
 0x887   :  { %v2835_v17 = vpop.permute.xlu0 %2834 }
 0x888   :  { %v2846_v57 = vsel %vm1586_vm0, %v2835_v17, 0  ;;  %8673 = vmatmul.msk.bf16.gmra.mxu3 %vm1617_vm7, %v2402_v15 }
 0x889   :  { %2854 = vmatpush.bf16.xpose.msra.mxu3 %v2846_v57 }
 0x88f   :  { %v2654_v14 = vpop.permute.xlu0 %2653 }
 0x890   :  { %v2664_v50 = vsel %vm1586_vm0, %v2654_v14, 0 }
 0x891   :  { %2676 = vmatpush.bf16.xpose.msrb.mxu0 %v2664_v50 }
 0x897   :  { %v2833_v19 = vpop.permute.xlu0 %2832 }
 0x898   :  { %v2843_v18 = vsel %vm1586_vm0, %v2833_v19, 0 }
 0x899   :  { %2855 = vmatpush.bf16.xpose.msra.mxu3 %v2843_v18 }
 0x89f   :  { %v2650_v45 = vpop.permute.xlu0 %2649 }
 0x8a7   :  { %v2831_v21 = vpop.permute.xlu0 %2830 }
 0x8ad   :  { %v2534_v22 = vpop.xlane.xlu2 %2533 }
 0x8ae   :  { %10010 = vrcp.f32 %v2534_v22  ;;  %v2576_v42 = vand.u32 2147483648, %v2534_v22  ;;  %v2574_v26 = vand.u32 2147483647, %v2534_v22  ;;  %vm2570_vm1 = vweird.f32 %v2534_v22 }
 0x8b0   :  { %v2577_v43 = vor.u32 1.1754944e-38, %v2576_v42  ;;  %vm2575_vm3 = vcmp.eq.f32.partialorder %v2574_v26, 8.507059e+37 }
 0x8b4   :  { %v10011_v29 = vpop.eup %10010 }
 0x8b5   :  { %v2566_v59 = vmul.f32 %v10011_v29, %v2534_v22  ;;  %vm2571_vm15 = vweird.f32 %v10011_v29 }
 0x8b6   :  { %vm2572_vm2 = vmor %vm2570_vm1, %vm2571_vm15 }
 0x8b7   :  { %v2567_v12 = vsub.f32 1.0, %v2566_v59 }
 0x8b9   :  { %v2568_v24 = vmul.f32 %v10011_v29, %v2567_v12 }
 0x8bb   :  { %v2569_v27 = vadd.f32 %v10011_v29, %v2568_v24 }
 0x8bd   :  { %v2573_v8 = vsel %vm2572_vm2, %v10011_v29, %v2569_v27 }
 0x8be   :  { %v2578_v20 = vsel %vm2575_vm3, %v2577_v43, %v2573_v8 }
 0x8bf   :  { %v2579_v33 = vmul.f32 %v11608_v3, %v2578_v20  ;;  %v2652_v3 = vpop.permute.xlu2 %2651 }
 0x8c1   :  { %v2581_v35 = vpack.c.bf16 %v2579_v33, %v2579_v33 }
 0x8c3   :  { %8683 = vmatmul.msk.bf16.gmra.mxu2 %vm1617_vm7, %v2581_v35 }
 0x8fb   :  { %v2426_v40 = vpop.f32.mrf.mxu3 }
 0x903   :  { %v2428_v44 = vpop.f32.mrf.mxu3 }
 0x904   :  { %v2435_v10 = vpack.c.bf16 %v2428_v44, %v2426_v40 }
 0x905   :  { %v2605_v46 = vpop.f32.mrf.mxu2 }
 0x906   :  { %8678 = vmatmul.msk.bf16.vlgmr.msra.gmra.mxu0 %vm1586_vm0, %v2435_v10 }
 0x90b   :  { %v2431_v62 = vpop.f32.mrf.mxu3 }
 0x90c   :  { %v2436_v52 = vpack.c.bf16 %v2431_v62, %v2431_v62 }
 0x90d   :  { %v2607_v51 = vpop.f32.mrf.mxu2 }
 0x90e   :  { %v2614_v16 = vpack.c.bf16 %v2607_v51, %v2605_v46 }
 0x910   :  { %8688 = vmatmul.msk.bf16.vlgmr.msrb.gmra.mxu3 %vm1586_vm0, %v2614_v16 }
 0x913   :  { %v2433_v60 = vpop.f32.mrf.mxu3 }
 0x916   :  { %8679 = vmatmul.msk.bf16.gmra.mxu0 %vm1586_vm0, %v2436_v52 }
 0x926   :  { %8690 = vmatmul.msk.bf16.vlgmr.msrb.gmra.mxu0 %vm1586_vm0, %v2650_v45 }
 0x936   :  { %8691 = vmatmul.msk.bf16.gmra.mxu0 %vm1586_vm0, %v2652_v3 }
 0x946   :  { %v2610_v1 = vpop.f32.mrf.mxu2 }
 0x947   :  { %v2615_v54 = vpack.c.bf16 %v2610_v1, %v2610_v1 }
 0x949   :  { %8689 = vmatmul.msk.bf16.gmra.mxu3 %vm1586_vm0, %v2615_v54 }
 0x94e   :  { %v2612_v55 = vpop.f32.mrf.mxu2 }
 0x959   :  { %8700 = vmatmul.msk.bf16.vlgmr.msra.gmra.mxu3 %vm1586_vm0, %v2829_v56 }
 0x969   :  { %8701 = vmatmul.msk.bf16.gmra.mxu3 %vm1586_vm0, %v2831_v21 }
 0x983   :  { %v2458_v58 = vpop.f32.mrf.mxu0 }
 0x984   :  { %v2467_v31 = vadd.f32 %v2458_v58, %v11552_v23 }
 0x98b   :  { %v11657_v13 = vpop.f32.mrf.mxu0 }
 0x993   :  { %v2463_v61 = vpop.f32.mrf.mxu0  ;;  %v2637_v0 = vpop.f32.mrf.mxu3 }
 0x994   :  { %v2469_v2 = vadd.f32 %v2463_v61, %v11556_v39  ;;  %v11660_v7 = vadd.f32 %v2637_v0, %v2467_v31 }
 0x99b   :  { %v2465_v6 = vpop.f32.mrf.mxu0  ;;  %v11668_v50 = vpop.f32.mrf.mxu3 }
 0x9a3   :  { %v2678_v11 = vpop.f32.mrf.mxu0 }
 0x9a4   :  { %v2679_v5 = vadd.f32 %v2678_v11, %v11309_v41 }
 0x9a6   :  { %v2687_v9 = vsel %vm1617_vm7, %v2679_v5, -inf }
 0x9a7   :  { %2688 = vmax.xlane.f32.xlu0 %v2687_v9 }
 0x9ab   :  { %v2680_v4 = vpop.f32.mrf.mxu0 }
 0x9ac   :  { %v2681_v15 = vadd.f32 %v2680_v4, %v11314_v47 }
 0x9ae   :  { %v2690_v23 = vsel %vm1617_vm7, %v2681_v15, -inf }
 0x9af   :  { %2691 = vmax.xlane.f32.xlu2 %v2690_v23 }
 0x9b3   :  { %v2683_v17 = vpop.f32.mrf.mxu0 }
 0x9b4   :  { %v2684_v57 = vadd.f32 %v2683_v17, %v11319_v53 }
 0x9b6   :  { %v2693_v39 = vsel %vm1617_vm7, %v2684_v57, -inf }
 0x9b7   :  { %2694 = vmax.xlane.f32.xlu0 %v2693_v39 }
 0x9bb   :  { %v2685_v14 = vpop.f32.mrf.mxu0 }
 0x9cc   :  { %v2642_v19 = vpop.f32.mrf.mxu3 }
 0x9cd   :  { %v11670_v18 = vadd.f32 %v2642_v19, %v2469_v2 }
 0x9d4   :  { %v2644_v22 = vpop.f32.mrf.mxu3 }
 0x9dc   :  { %v2857_v29 = vpop.f32.mrf.mxu3 }
 0x9dd   :  { %v2858_v59 = vadd.f32 %v2857_v29, %v11309_v41 }
 0x9df   :  { %v2866_v12 = vsel %vm1617_vm7, %v2858_v59, -inf }
 0x9e0   :  { %2867 = vmax.xlane.f32.xlu1 %v2866_v12 }
 0x9e4   :  { %v2859_v42 = vpop.f32.mrf.mxu3 }
 0x9e5   :  { %v2860_v24 = vadd.f32 %v2859_v42, %v11314_v47 }
 0x9e7   :  { %v2869_v26 = vsel %vm1617_vm7, %v2860_v24, -inf }
 0x9e8   :  { %2870 = vmax.xlane.f32.xlu0 %v2869_v26 }
 0x9ec   :  { %v2862_v27 = vpop.f32.mrf.mxu3 }
 0x9ed   :  { %v2863_v35 = vadd.f32 %v2862_v27, %v11319_v53 }
 0x9ef   :  { %v2872_v62 = vsel %vm1617_vm7, %v2863_v35, -inf }
 0x9f4   :  { %v2864_v43 = vpop.f32.mrf.mxu3 }
 0x9fc   :  { %2763 = vrot.lane.b32.xlu0 %v11363_v30, %s10915_s16 }
 0xa1a   :  { %v2689_v8 = vpop.xlane.xlu0 %2688 }
 0xa1b   :  { %v2696_v20 = vsub.f32 %v2679_v5, %v2689_v8 }
 0xa1d   :  { %v2699_v33 = vmul.f32 1.442695, %v2696_v20 }
 0xa1f   :  { %10012 = vpow2.f32 %v2699_v33 }
 0xa22   :  { %v2692_v40 = vpop.xlane.xlu2 %2691 }
 0xa23   :  { %v2697_v44 = vsub.f32 %v2681_v15, %v2692_v40 }
 0xa25   :  { %v11679_v10 = vpop.eup %10012  ;;  %v2701_v46 = vmul.f32 1.442695, %v2697_v44 }
 0xa26   :  { %2873 = vmax.xlane.f32.xlu0 %v2872_v62  ;;  %v2705_v51 = vsel %vm1617_vm7, %v11679_v10, 0.0 }
 0xa27   :  { %10014 = vpow2.f32 %v2701_v46  ;;  %2706 = vadd.xlane.f32.xlu2 %v2705_v51 }
 0xa2a   :  { %v2695_v52 = vpop.xlane.xlu0 %2694 }
 0xa2b   :  { %v2698_v45 = vsub.f32 %v2684_v57, %v2695_v52 }
 0xa2d   :  { %v11684_v16 = vpop.eup %10014  ;;  %v2703_v54 = vmul.f32 1.442695, %v2698_v45 }
 0xa2e   :  { %v2708_v60 = vsel %vm1617_vm7, %v11684_v16, 0.0 }
 0xa2f   :  { %2709 = vadd.xlane.f32.xlu1 %v2708_v60 }
 0xa3a   :  { %2940 = vrot.lane.b32.xlu0 %v11367_v37, %s10892_s6 }
 0xa53   :  { %v2868_v3 = vpop.xlane.xlu1 %2867 }
 0xa54   :  { %v2875_v1 = vsub.f32 %v2858_v59, %v2868_v3 }
 0xa56   :  { %v2878_v55 = vmul.f32 1.442695, %v2875_v1 }
 0xa58   :  { %10016 = vpow2.f32 %v2878_v55 }
 0xa59   :  { %10018 = vpow2.f32 %v2703_v54 }
 0xa5b   :  { %v2871_v56 = vpop.xlane.xlu0 %2870 }
 0xa5c   :  { %v2876_v21 = vsub.f32 %v2860_v24, %v2871_v56 }
 0xa5e   :  { %v11690_v58 = vpop.eup %10016  ;;  %v2880_v31 = vmul.f32 1.442695, %v2876_v21 }
 0xa5f   :  { %v2884_v61 = vsel %vm1617_vm7, %v11690_v58, 0.0  ;;  %v11694_v0 = vpop.eup %10018 }
 0xa60   :  { %10020 = vpow2.f32 %v2880_v31  ;;  %2885 = vadd.xlane.f32.xlu2 %v2884_v61  ;;  %v2711_v2 = vsel %vm1617_vm7, %v11694_v0, 0.0 }
 0xa64   :  { %2712 = vadd.xlane.f32.xlu0 %v2711_v2 }
 0xa66   :  { %v11698_v6 = vpop.eup %10020 }
 0xa67   :  { %v2887_v11 = vsel %vm1617_vm7, %v11698_v6, 0.0 }
 0xa68   :  { %2888 = vadd.xlane.f32.xlu1 %v2887_v11 }
 0xa6e   :  { %v2764_v5 = vpop.permute.xlu0 %2763 }
 0xa6f   :  { %v2773_v9 = vsel %vm933_vm11, %v2764_v5, 0 }
 0xa70   :  { %2781 = vmatpush.bf16.msrb.mxu1 %v2773_v9 }
 0xa78   :  { %2761 = vrot.lane.b32.xlu2 %v11367_v37, %s10915_s16 }
 0xa81   :  { %2942 = vrot.lane.b32.xlu1 %v11363_v30, %s10892_s6 }
 0xa99   :  { %v2874_v4 = vpop.xlane.xlu0 %2873 }
 0xa9a   :  { %v2877_v15 = vsub.f32 %v2863_v35, %v2874_v4  ;;  %v2707_v14 = vpop.xlane.xlu2 %2706 }
 0xa9b   :  { %v2725_v20 = vand.u32 2147483648, %v2707_v14  ;;  %vm2719_vm9 = vweird.f32 %v2707_v14  ;;  %v2723_v33 = vand.u32 2147483647, %v2707_v14 }
 0xa9c   :  { %v2882_v23 = vmul.f32 1.442695, %v2877_v15 }
 0xa9d   :  { %v2726_v62 = vor.u32 1.1754944e-38, %v2725_v20  ;;  %vm2724_vm13 = vcmp.eq.f32.partialorder %v2723_v33, 8.507059e+37 }
 0xa9e   :  { %10022 = vpow2.f32 %v2882_v23 }
 0xaa2   :  { %v2710_v39 = vpop.xlane.xlu1 %2709 }
 0xaa3   :  { %10024 = vrcp.f32 %v2710_v39  ;;  %v2740_v27 = vand.u32 2147483648, %v2710_v39  ;;  %vm2734_vm6 = vweird.f32 %v2710_v39  ;;  %v2738_v8 = vand.u32 2147483647, %v2710_v39 }
 0xaa4   :  { %v11707_v17 = vpop.eup %10022  ;;  %10026 = vrcp.f32 %v2707_v14 }
 0xaa5   :  { %v2890_v57 = vsel %vm1617_vm7, %v11707_v17, 0.0  ;;  %v2741_v44 = vor.u32 1.1754944e-38, %v2740_v27  ;;  %vm2739_vm12 = vcmp.eq.f32.partialorder %v2738_v8, 8.507059e+37 }
 0xaa6   :  { %2891 = vadd.xlane.f32.xlu2 %v2890_v57 }
 0xaa9   :  { %v10025_v19 = vpop.eup %10024 }
 0xaaa   :  { %v10027_v22 = vpop.eup %10026  ;;  %v2730_v37 = vmul.f32 %v10025_v19, %v2710_v39  ;;  %vm2735_vm4 = vweird.f32 %v10025_v19 }
 0xaab   :  { %v2715_v29 = vmul.f32 %v10027_v22, %v2707_v14  ;;  %vm2720_vm5 = vweird.f32 %v10027_v22  ;;  %vm2736_vm8 = vmor %vm2734_vm6, %vm2735_vm4 }
 0xaac   :  { %v2731_v59 = vsub.f32 1.0, %v2730_v37  ;;  %v11711_v26 = vpop.permute.xlu0 %2940  ;;  %vm2721_vm10 = vmor %vm2719_vm9, %vm2720_vm5 }
 0xaad   :  { %v2716_v30 = vsub.f32 1.0, %v2715_v29 }
 0xaae   :  { %v2732_v12 = vmul.f32 %v10025_v19, %v2731_v59 }
 0xaaf   :  { %v2717_v42 = vmul.f32 %v10027_v22, %v2716_v30 }
 0xab0   :  { %v2733_v24 = vadd.f32 %v10025_v19, %v2732_v12 }
 0xab1   :  { %v2718_v43 = vadd.f32 %v10027_v22, %v2717_v42 }
 0xab2   :  { %v2737_v35 = vsel %vm2736_vm8, %v10025_v19, %v2733_v24 }
 0xab3   :  { %v2722_v46 = vsel %vm2721_vm10, %v10027_v22, %v2718_v43  ;;  %v2742_v51 = vsel %vm2739_vm12, %v2741_v44, %v2737_v35 }
 0xab4   :  { %v2727_v52 = vsel %vm2724_vm13, %v2726_v62, %v2722_v46  ;;  %v2743_v45 = vmul.f32 %v11684_v16, %v2742_v51 }
 0xab5   :  { %v2728_v3 = vmul.f32 %v11679_v10, %v2727_v52 }
 0xab7   :  { %v2759_v55 = vpack.c.bf16 %v2743_v45, %v2728_v3 }
 0xad3   :  { %v11713_v40 = vpop.xlane.xlu2 %2885 }
 0xad4   :  { %v2904_v24 = vand.u32 2147483648, %v11713_v40  ;;  %vm2898_vm8 = vweird.f32 %v11713_v40  ;;  %v2902_v27 = vand.u32 2147483647, %v11713_v40 }
 0xad6   :  { %v2905_v20 = vor.u32 1.1754944e-38, %v2904_v24  ;;  %vm2903_vm12 = vcmp.eq.f32.partialorder %v2902_v27, 8.507059e+37 }
 0xad7   :  { %v2713_v60 = vpop.xlane.xlu0 %2712 }
 0xad8   :  { %10028 = vrcp.f32 %v2713_v60  ;;  %v2755_v5 = vand.u32 2147483648, %v2713_v60  ;;  %v2753_v4 = vand.u32 2147483647, %v2713_v60  ;;  %vm2749_vm15 = vweird.f32 %v2713_v60 }
 0xad9   :  { %10030 = vrcp.f32 %v11713_v40 }
 0xada   :  { %v2756_v57 = vor.u32 1.1754944e-38, %v2755_v5  ;;  %vm2754_vm2 = vcmp.eq.f32.partialorder %v2753_v4, 8.507059e+37 }
 0xadb   :  { %v2762_v1 = vpop.permute.xlu2 %2761  ;;  %v2889_v54 = vpop.xlane.xlu1 %2888 }
 0xadc   :  { %10032 = vrcp.f32 %v2889_v54  ;;  %2782 = vmatpush.bf16.msrb.mxu1 %v2762_v1  ;;  %v2919_v59 = vand.u32 2147483648, %v2889_v54  ;;  %vm2913_vm5 = vweird.f32 %v2889_v54  ;;  %v2917_v42 = vand.u32 2147483647, %v2889_v54 }
 0xade   :  { %v10029_v56 = vpop.eup %10028  ;;  %vm2918_vm10 = vcmp.eq.f32.partialorder %v2917_v42, 8.507059e+37 }
 0xadf   :  { %v10031_v21 = vpop.eup %10030  ;;  %v2745_v31 = vmul.f32 %v10029_v56, %v2713_v60  ;;  %8692 = vmatmul.msk.bf16.vlgmr.msrb.gmra.mxu1 %vm1617_vm7, %v2759_v55  ;;  %vm2750_vm14 = vweird.f32 %v10029_v56 }
 0xae0   :  { %v2894_v11 = vmul.f32 %v10031_v21, %v11713_v40  ;;  %vm2751_vm1 = vmor %vm2749_vm15, %vm2750_vm14  ;;  %vm2899_vm4 = vweird.f32 %v10031_v21 }
 0xae1   :  { %v2746_v61 = vsub.f32 1.0, %v2745_v31  ;;  %vm2900_vm9 = vmor %vm2898_vm8, %vm2899_vm4 }
 0xae2   :  { %v10033_v2 = vpop.eup %10032  ;;  %v2895_v23 = vsub.f32 1.0, %v2894_v11  ;;  %v9653_v11 = vld [vmem:[#allocation16 + $0x38] sm:$0xff] }
 0xae3   :  { %v2747_v16 = vmul.f32 %v10029_v56, %v2746_v61  ;;  %v2909_v9 = vmul.f32 %v10033_v2, %v2889_v54  ;;  %vm2914_vm3 = vweird.f32 %v10033_v2  ;;  %v9652_v61 = vld [vmem:[#allocation16 + $0x30] sm:$0xff]  ;;  %2993 = vmatpush.bf16.msra.mxu1 %v9653_v11 }
 0xae4   :  { %v2896_v37 = vmul.f32 %v10031_v21, %v2895_v23  ;;  %vm2915_vm6 = vmor %vm2913_vm5, %vm2914_vm3  ;;  %2814 = vmatpush.bf16.msrb.mxu2 %v9652_v61 }
 0xae5   :  { %v2910_v10 = vsub.f32 1.0, %v2909_v9  ;;  %v2748_v15 = vadd.f32 %v10029_v56, %v2747_v16 }
 0xae6   :  { %v2897_v12 = vadd.f32 %v10031_v21, %v2896_v37 }
 0xae7   :  { %v2752_v39 = vsel %vm2751_vm1, %v10029_v56, %v2748_v15  ;;  %v2911_v14 = vmul.f32 %v10033_v2, %v2910_v10 }
 0xae8   :  { %v2757_v19 = vsel %vm2754_vm2, %v2756_v57, %v2752_v39  ;;  %v2901_v8 = vsel %vm2900_vm9, %v10031_v21, %v2897_v12  ;;  %v9911_v12 = vld [vmem:[%s13026_s28] ss:$0 sm:$0xff] }
 0xae9   :  { %v2758_v22 = vmul.f32 %v11694_v0, %v2757_v19  ;;  %v2912_v29 = vadd.f32 %v10033_v2, %v2911_v14  ;;  %v2920_v0 = vor.u32 1.1754944e-38, %v2919_v59  ;;  %v2906_v46 = vsel %vm2903_vm12, %v2905_v20, %v2901_v8 }
 0xaea   :  { %v2907_v51 = vmul.f32 %v11690_v58, %v2906_v46 }
 0xaeb   :  { %v2760_v30 = vpack.c.bf16 %v2758_v22, %v2758_v22  ;;  %v2916_v43 = vsel %vm2915_vm6, %v10033_v2, %v2912_v29  ;;  %v1927_v29 = vadd.f32 %v11417_v38, %v11537_v63 }
 0xaec   :  { %v2921_v33 = vsel %vm2918_vm10, %v2920_v0, %v2916_v43 }
 0xaed   :  { %v2922_v62 = vmul.f32 %v11698_v6, %v2921_v33  ;;  %v2110_v59 = vadd.f32 %v11541_v49, %v1927_v29  ;;  %v10290_v33 = vld [vmem:[%s13017_s2] sm:$0xff] }
 0xaef   :  { %8693 = vmatmul.msk.bf16.gmra.mxu1 %vm1617_vm7, %v2760_v30  ;;  %v2938_v40 = vpack.c.bf16 %v2922_v62, %v2907_v51  ;;  %v2289_v24 = vadd.f32 %v11554_v34, %v2110_v59  ;;  %v8752_v59 = vld [vmem:[#allocation18 + $0x50] sm:$0xf] }
 0xaf1   :  { %v2468_v0 = vadd.f32 %v11657_v13, %v2289_v24  ;;  %v10292_v13 = vld [vmem:[%s13017_s2 + $0x10] sm:$0xff]  ;;  %v8754_v24 = vld [vmem:[#allocation18 + $0x58] sm:$0xf0] }
 0xaf3   :  { %v2943_v35 = vpop.permute.xlu1 %2942  ;;  %v2647_v20 = vadd.f32 %v11668_v50, %v2468_v0  ;;  %v10916_v50 = vmov 128.0   ;;  %v9663_v0 = vld [vmem:[#allocation18 + $0x44] sm:$0xf0] }
 0xaf4   :  { %v2952_v44 = vsel %vm933_vm11, %v2943_v35, 0 }
 0xaf5   :  { %2960 = vmatpush.bf16.msra.mxu0 %v2952_v44  ;;  %v10291_v44 = vld [vmem:[%s13017_s2 + $0x8] sm:$0xff] }
 0xaf9   :  { %2961 = vmatpush.bf16.msra.mxu0 %v11711_v26 }
 0xafc   :  { %8702 = vmatmul.msk.bf16.vlgmr.msra.gmra.mxu0 %vm1617_vm7, %v2938_v40 }
 0xb19   :  { %v2892_v60 = vpop.xlane.xlu2 %2891 }
 0xb1a   :  { %10034 = vrcp.f32 %v2892_v60  ;;  %v2934_v1 = vand.u32 2147483648, %v2892_v60  ;;  %v2932_v55 = vand.u32 2147483647, %v2892_v60  ;;  %vm2928_vm14 = vweird.f32 %v2892_v60 }
 0xb1b   :  { %10036 = vrcp.f32 %v10916_v50  ;;  %v9657_v50 = vld [vmem:[#allocation18 + $0x14] sm:$0xf0] }
 0xb1c   :  { %v2935_v6 = vor.u32 1.1754944e-38, %v2934_v1  ;;  %vm2933_vm1 = vcmp.eq.f32.partialorder %v2932_v55, 8.507059e+37 }
 0xb20   :  { %v10035_v52 = vpop.eup %10034 }
 0xb21   :  { %v2924_v45 = vmul.f32 %v10035_v52, %v2892_v60  ;;  %vm2929_vm13 = vweird.f32 %v10035_v52 }
 0xb22   :  { %vm2930_vm15 = vmor %vm2928_vm14, %vm2929_vm13 }
 0xb23   :  { %v2925_v3 = vsub.f32 1.0, %v2924_v45  ;;  %v10037_v45 = vpop.eup %10036 }
 0xb24   :  { %vm3027_vm2 = vweird.f32 %v10037_v45 }
 0xb25   :  { %v2926_v54 = vmul.f32 %v10035_v52, %v2925_v3  ;;  %v3023_v3 = vmul.f32 128.0, %v10037_v45 }
 0xb27   :  { %v2927_v56 = vadd.f32 %v10035_v52, %v2926_v54  ;;  %v3024_v1 = vsub.f32 1.0, %v3023_v3 }
 0xb29   :  { %v2931_v21 = vsel %vm2930_vm15, %v10035_v52, %v2927_v56  ;;  %v3025_v54 = vmul.f32 %v10037_v45, %v3024_v1  ;;  %v8722_v1 = vld [vmem:[#allocation18 + $0x18] sm:$0xf0] }
 0xb2a   :  { %v2936_v58 = vsel %vm2933_vm1, %v2935_v6, %v2931_v21 }
 0xb2b   :  { %v2937_v26 = vmul.f32 %v11707_v17, %v2936_v58  ;;  %v3026_v55 = vadd.f32 %v10037_v45, %v3025_v54 }
 0xb2d   :  { %v2939_v31 = vpack.c.bf16 %v2937_v26, %v2937_v26  ;;  %v11748_v56 = vsel %vm3027_vm2, %v10037_v45, %v3026_v55  ;;  %v9656_v45 = vld [vmem:[#allocation18 + $0x14] sm:$0xf] }
 0xb2e   :  { %v8725_v55 = vor.u32 %v9656_v45, %v8722_v1 }
 0xb2f   :  { %8703 = vmatmul.msk.bf16.gmra.mxu0 %vm1617_vm7, %v2939_v31 }
 0xb5c   :  { %v2784_v2 = vpop.f32.mrf.mxu1 }
 0xb64   :  { %v2786_v5 = vpop.f32.mrf.mxu1 }
 0xb65   :  { %v2793_v16 = vpack.c.bf16 %v2786_v5, %v2784_v2 }
 0xb67   :  { %8698 = vmatmul.msk.bf16.vlgmr.msrb.gmra.mxu2 %vm1586_vm0, %v2793_v16 }
 0xb6c   :  { %v2789_v9 = vpop.f32.mrf.mxu1 }
 0xb6d   :  { %v2794_v10 = vpack.c.bf16 %v2789_v9, %v2789_v9 }
 0xb74   :  { %v2791_v4 = vpop.f32.mrf.mxu1 }
 0xb75   :  { %v8768_v4 = vld [vmem:[#allocation18 + $0x70] sm:$0xf] }
 0xb77   :  { %8699 = vmatmul.msk.bf16.gmra.mxu2 %vm1586_vm0, %v2794_v10  ;;  %v9669_v10 = vld [vmem:[#allocation18 + $0x74] sm:$0xf0] }
 0xb79   :  { %v2963_v15 = vpop.f32.mrf.mxu0 }
 0xb81   :  { %v2965_v17 = vpop.f32.mrf.mxu0 }
 0xb82   :  { %v2972_v23 = vpack.c.bf16 %v2965_v17, %v2963_v15  ;;  %v9668_v15 = vld [vmem:[#allocation18 + $0x74] sm:$0xf]  ;;  %v8769_v17 = vor.u32 %v9669_v10, %v8768_v4 }
 0xb84   :  { %8708 = vmatmul.msk.bf16.vlgmr.msra.gmra.mxu1 %vm1586_vm0, %v2972_v23  ;;  %v8770_v23 = vld [vmem:[#allocation18 + $0x78] sm:$0xf0]  ;;  %3182 = vmatpush.bf16.msra.mxu2 %v8769_v17 }
 0xbac   :  { %v2968_v57 = vpop.f32.mrf.mxu0 }
 0xbad   :  { %v2973_v39 = vpack.c.bf16 %v2968_v57, %v2968_v57  ;;  %v8773_v57 = vor.u32 %v9668_v15, %v8770_v23 }
 0xbaf   :  { %8709 = vmatmul.msk.bf16.gmra.mxu1 %vm1586_vm0, %v2973_v39  ;;  %3200 = vmatpush.bf16.msrb.mxu3 %v8773_v57  ;;  %v8760_v39 = vld [vmem:[#allocation18 + $0x60] sm:$0xf] }
 0xbb4   :  { %v2970_v14 = vpop.f32.mrf.mxu0 }
 0xbb5   :  { %v9667_v14 = vld [vmem:[#allocation18 + $0x64] sm:$0xf0] }
 0xbea   :  { %v2816_v19 = vpop.f32.mrf.mxu2 }
 0xbeb   :  { %v2825_v30 = vadd.f32 %v2816_v19, %v11660_v7  ;;  %v9666_v19 = vld [vmem:[#allocation18 + $0x64] sm:$0xf] }
 0xbf2   :  { %v2818_v22 = vpop.f32.mrf.mxu2 }
 0xbf3   :  { %v2826_v38 = vadd.f32 %v2818_v22, %v2647_v20  ;;  %v8761_v22 = vor.u32 %v9667_v14, %v8760_v39 }
 0xbf5   :  { %3183 = vmatpush.bf16.msra.mxu2 %v8761_v22 }
 0xbfa   :  { %v2821_v37 = vpop.f32.mrf.mxu2 }
 0xbfb   :  { %v2827_v34 = vadd.f32 %v2821_v37, %v11670_v18  ;;  %v8762_v37 = vld [vmem:[#allocation18 + $0x68] sm:$0xf0] }
 0xbfc   :  { %v8765_v29 = vor.u32 %v9666_v19, %v8762_v37 }
 0xbfe   :  { %3201 = vmatpush.bf16.msrb.mxu3 %v8765_v29 }
 0xc01   :  { %v2995_v42 = vpop.f32.mrf.mxu1 }
 0xc02   :  { %v3004_v27 = vadd.f32 %v2995_v42, %v2825_v30  ;;  %v2823_v43 = vpop.f32.mrf.mxu2  ;;  %v9665_v30 = vld [vmem:[#allocation18 + $0x54] sm:$0xf0] }
 0xc03   :  { %v8753_v42 = vor.u32 %v9665_v30, %v8752_v59  ;;  %v8744_v43 = vld [vmem:[#allocation18 + $0x40] sm:$0xf] }
 0xc04   :  { %v3010_v8 = vadd.f32 %v9911_v12, %v3004_v27  ;;  %v8745_v20 = vor.u32 %v9663_v0, %v8744_v43 }
 0xc05   :  { %3184 = vmatpush.bf16.msra.mxu2 %v8753_v42 }
 0xc06   :  { %v3013_v35 = vadd.f32 %v10290_v33, %v3010_v8  ;;  %v9662_v8 = vld [vmem:[#allocation18 + $0x44] sm:$0xf]  ;;  %v8746_v33 = vld [vmem:[#allocation18 + $0x48] sm:$0xf0] }
 0xc08   :  { %3016 = vadd.xlane.f32.xlu1 %v3013_v35 }
 0xc09   :  { %v2997_v63 = vpop.f32.mrf.mxu1  ;;  %3185 = vmatpush.bf16.msra.mxu2 %v8745_v20 }
 0xc0a   :  { %v3005_v49 = vadd.f32 %v2997_v63, %v2826_v38  ;;  %v8736_v38 = vld [vmem:[#allocation18 + $0x30] sm:$0xf]  ;;  %v9661_v63 = vld [vmem:[#allocation18 + $0x34] sm:$0xf0] }
 0xc0c   :  { %v3011_v7 = vadd.f32 %v9911_v12, %v3005_v49  ;;  %v9660_v49 = vld [vmem:[#allocation18 + $0x34] sm:$0xf] }
 0xc0e   :  { %v3014_v46 = vadd.f32 %v10291_v44, %v3011_v7  ;;  %v8737_v7 = vor.u32 %v9661_v63, %v8736_v38  ;;  %v8738_v44 = vld [vmem:[#allocation18 + $0x38] sm:$0xf0] }
 0xc0f   :  { %v9677_v63 = vld [vmem:[#allocation19 + $0x38] sm:$0xff] }
 0xc10   :  { %3018 = vadd.xlane.f32.xlu0 %v3014_v46  ;;  %3186 = vmatpush.bf16.msra.mxu2 %v8737_v7 }
 0xc11   :  { %3327 = vmatpush.bf16.msrb.mxu0 %v9677_v63 }
 0xc2c   :  { %v3000_v62 = vpop.f32.mrf.mxu1 }
 0xc2d   :  { %v3006_v51 = vadd.f32 %v3000_v62, %v2827_v34  ;;  %v8728_v34 = vld [vmem:[#allocation18 + $0x20] sm:$0xf]  ;;  %v9659_v62 = vld [vmem:[#allocation18 + $0x24] sm:$0xf0] }
 0xc2f   :  { %v3012_v40 = vadd.f32 %v9911_v12, %v3006_v51  ;;  %v9664_v12 = vld [vmem:[#allocation18 + $0x54] sm:$0xf]  ;;  %v9658_v51 = vld [vmem:[#allocation18 + $0x24] sm:$0xf] }
 0xc30   :  { %v8757_v27 = vor.u32 %v9664_v12, %v8754_v24  ;;  %v9912_v12 = vld [vmem:[%s13027_s7] ss:$0 sm:$0xff] }
 0xc31   :  { %v3015_v60 = vadd.f32 %v10292_v13, %v3012_v40  ;;  %v8729_v40 = vor.u32 %v9659_v62, %v8728_v34  ;;  %v8730_v13 = vld [vmem:[#allocation18 + $0x28] sm:$0xf0] }
 0xc32   :  { %3202 = vmatpush.bf16.msrb.mxu3 %v8757_v27  ;;  %v9675_v34 = vld [vmem:[#allocation19 + $0x28] sm:$0xff] }
 0xc33   :  { %3020 = vadd.xlane.f32.xlu2 %v3015_v60  ;;  %3187 = vmatpush.bf16.msra.mxu2 %v8729_v40  ;;  %v9683_v62 = vld [vmem:[#allocation19 + $0x68] sm:$0xff]  ;;  %v9682_v40 = vld [vmem:[#allocation19 + $0x60] sm:$0xff] }
 0xc34   :  { %v3002_v52 = vpop.f32.mrf.mxu1 }
 0xc35   :  { %v8720_v52 = vld [vmem:[#allocation18 + $0x10] sm:$0xf] }
 0xc36   :  { %v8721_v3 = vor.u32 %v9657_v50, %v8720_v52 }
 0xc38   :  { %3188 = vmatpush.bf16.msra.mxu2 %v8721_v3 }
 0xc7b   :  { %v3017_v6 = vpop.xlane.xlu1 %3016 }
 0xc7c   :  { %v3029_v18 = vmul.f32 %v11748_v56, %v3017_v6 }
 0xc7e   :  { %v11751_v21 = vsub.f32 %v3013_v35, %v3029_v18  ;;  %v8749_v35 = vor.u32 %v9662_v8, %v8746_v33  ;;  %v8712_v18 = vld [vmem:[#allocation18] sm:$0xf]  ;;  %v9913_v8 = vld [vmem:[%s13028_s23] ss:$0 sm:$0xff] }
 0xc80   :  { %v3035_v58 = vmul.f32 %v11751_v21, %v11751_v21  ;;  %3203 = vmatpush.bf16.msrb.mxu3 %v8749_v35 }
 0xc82   :  { %3038 = vadd.xlane.f32.xlu1 %v3035_v58  ;;  %v9655_v58 = vld [vmem:[#allocation18 + $0x4] sm:$0xf0] }
 0xc83   :  { %v3019_v26 = vpop.xlane.xlu0 %3018 }
 0xc84   :  { %v3030_v31 = vmul.f32 %v11748_v56, %v3019_v26  ;;  %v9654_v26 = vld [vmem:[#allocation18 + $0x4] sm:$0xf] }
 0xc86   :  { %v11756_v61 = vsub.f32 %v3014_v46, %v3030_v31  ;;  %v8741_v46 = vor.u32 %v9660_v49, %v8738_v44  ;;  %v8713_v31 = vor.u32 %v9655_v58, %v8712_v18  ;;  %v9676_v44 = vld [vmem:[#allocation19 + $0x30] sm:$0xff]  ;;  %v9673_v58 = vld [vmem:[#allocation19 + $0x18] sm:$0xff] }
 0xc87   :  { %3328 = vmatpush.bf16.msrb.mxu0 %v9676_v44  ;;  %v9914_v44 = vld [vmem:[#allocation21] ss:$0 sm:$0xff] }
 0xc88   :  { %v3036_v2 = vmul.f32 %v11756_v61, %v11756_v61  ;;  %3204 = vmatpush.bf16.msrb.mxu3 %v8741_v46  ;;  %3189 = vmatpush.bf16.msra.mxu2 %v8713_v31  ;;  %v9672_v31 = vld [vmem:[#allocation19 + $0x10] sm:$0xff] }
 0xc8a   :  { %3040 = vadd.xlane.f32.xlu0 %v3036_v2  ;;  %v8714_v2 = vld [vmem:[#allocation18 + $0x8] sm:$0xf0] }
 0xc8b   :  { %3329 = vmatpush.bf16.msrb.mxu0 %v9675_v34 }
 0xca6   :  { %v3021_v11 = vpop.xlane.xlu2 %3020 }
 0xca7   :  { %v3031_v5 = vmul.f32 %v11748_v56, %v3021_v11 }
 0xca9   :  { %v11761_v16 = vsub.f32 %v3015_v60, %v3031_v5  ;;  %v8733_v60 = vor.u32 %v9658_v51, %v8730_v13  ;;  %v8717_v5 = vor.u32 %v9654_v26, %v8714_v2  ;;  %v9674_v51 = vld [vmem:[#allocation19 + $0x20] sm:$0xff]  ;;  %v9681_v26 = vld [vmem:[#allocation19 + $0x58] sm:$0xff]  ;;  %v9680_v2 = vld [vmem:[#allocation19 + $0x50] sm:$0xff] }
 0xcaa   :  { %3330 = vmatpush.bf16.msrb.mxu0 %v9674_v51 }
 0xcab   :  { %v3037_v9 = vmul.f32 %v11761_v16, %v11761_v16  ;;  %3205 = vmatpush.bf16.msrb.mxu3 %v8733_v60 }
 0xcad   :  { %3042 = vadd.xlane.f32.xlu2 %v3037_v9 }
 0xcae   :  { %3331 = vmatpush.bf16.msrb.mxu0 %v9673_v58 }
 0xcaf   :  { %3206 = vmatpush.bf16.msrb.mxu3 %v8725_v55 }
 0xcb2   :  { %3332 = vmatpush.bf16.msrb.mxu0 %v9672_v31 }
 0xcb3   :  { %3207 = vmatpush.bf16.msrb.mxu3 %v8717_v5  ;;  %v9679_v5 = vld [vmem:[#allocation19 + $0x48] sm:$0xff] }
 0xcf5   :  { %v3039_v54 = vpop.xlane.xlu1 %3038 }
 0xcf6   :  { %v3044_v6 = vmul.f32 %v3039_v54, %v11748_v56 }
 0xcf8   :  { %v3047_v11 = vadd.f32 1e-05, %v3044_v6 }
 0xcfa   :  { %10038 = vrsqrt.f32 %v3047_v11  ;;  %vm3056_vm4 = vweird.f32 %v3047_v11 }
 0xcfd   :  { %v3041_v9 = vpop.xlane.xlu0 %3040 }
 0xcfe   :  { %v3045_v4 = vmul.f32 %v3041_v9, %v11748_v56  ;;  %v9678_v9 = vld [vmem:[#allocation19 + $0x40] sm:$0xff] }
 0xd00   :  { %v10039_v10 = vpop.eup %10038  ;;  %v3048_v15 = vadd.f32 1e-05, %v3045_v4  ;;  %v1332_v4 = vld [vmem:[%s13029_s9] sm:$0x3] }
 0xd01   :  { %v3051_v17 = vmul.f32 %v10039_v10, %v3047_v11  ;;  %vm3057_vm3 = vweird.f32 %v10039_v10  ;;  %v9671_v11 = vld [vmem:[#allocation19 + $0x8] sm:$0xff] }
 0xd02   :  { %10040 = vrsqrt.f32 %v3048_v15  ;;  %vm3058_vm5 = vmor %vm3056_vm4, %vm3057_vm3  ;;  %vm3066_vm8 = vweird.f32 %v3048_v15  ;;  %3333 = vmatpush.bf16.msrb.mxu0 %v9671_v11 }
 0xd03   :  { %v3052_v23 = vmul.f32 %v10039_v10, %v3051_v17  ;;  %v3098_v17 = vperm.slane %v1332_v4, 0 }
 0xd05   :  { %v3053_v57 = vmul.f32 0.5, %v3052_v23  ;;  %v3099_v23 = vperm.slane %v1332_v4, 1 }
 0xd07   :  { %v3054_v39 = vsub.f32 1.5, %v3053_v57 }
 0xd08   :  { %v10041_v14 = vpop.eup %10040 }
 0xd09   :  { %v3055_v19 = vmul.f32 %v10039_v10, %v3054_v39  ;;  %v3061_v22 = vmul.f32 %v10041_v14, %v3048_v15  ;;  %vm3067_vm6 = vweird.f32 %v10041_v14 }
 0xd0a   :  { %vm3068_vm9 = vmor %vm3066_vm8, %vm3067_vm6 }
 0xd0b   :  { %v3062_v37 = vmul.f32 %v10041_v14, %v3061_v22  ;;  %v3059_v29 = vsel %vm3058_vm5, %v10039_v10, %v3055_v19 }
 0xd0c   :  { %v3080_v42 = vmul.f32 %v3059_v29, %v11751_v21  ;;  %v9685_v21 = vld [vmem:[#allocation19 + $0x78] sm:$0xff] }
 0xd0d   :  { %v3063_v59 = vmul.f32 0.5, %v3062_v37  ;;  %3345 = vmatpush.bf16.msrb.mxu1 %v9685_v21 }
 0xd0e   :  { %v3086_v43 = vmul.f32 %v9912_v12, %v3080_v42 }
 0xd0f   :  { %v3064_v30 = vsub.f32 1.5, %v3063_v59 }
 0xd10   :  { %v11771_v33 = vadd.f32 %v9913_v8, %v3086_v43 }
 0xd11   :  { %v3065_v24 = vmul.f32 %v10041_v14, %v3064_v30 }
 0xd13   :  { %v3069_v27 = vsel %vm3068_vm9, %v10041_v14, %v3065_v24 }
 0xd14   :  { %v3081_v0 = vmul.f32 %v3069_v27, %v11756_v61  ;;  %v9684_v61 = vld [vmem:[#allocation19 + $0x70] sm:$0xff] }
 0xd15   :  { %3346 = vmatpush.bf16.msrb.mxu1 %v9684_v61 }
 0xd16   :  { %v3087_v20 = vmul.f32 %v9912_v12, %v3081_v0 }
 0xd18   :  { %v11773_v35 = vadd.f32 %v9913_v8, %v3087_v20 }
 0xd19   :  { %3347 = vmatpush.bf16.msrb.mxu1 %v9683_v62 }
 0xd1a   :  { %v3095_v38 = vpack.c.bf16 %v11773_v35, %v11771_v33 }
 0xd1c   :  { %3190 = vmatmul.bf16.vlgmr.msra.gmra.mxu2 %v3095_v38  ;;  %3208 = vmatmul.bf16.vlgmr.msrb.gmra.mxu3 %v3095_v38 }
 0xd1d   :  { %3348 = vmatpush.bf16.msrb.mxu1 %v9682_v40 }
 0xd20   :  { %v3043_v49 = vpop.xlane.xlu2 %3042 }
 0xd21   :  { %v3046_v7 = vmul.f32 %v3043_v49, %v11748_v56  ;;  %3349 = vmatpush.bf16.msrb.mxu1 %v9681_v26 }
 0xd23   :  { %v3049_v46 = vadd.f32 1e-05, %v3046_v7 }
 0xd25   :  { %10042 = vrsqrt.f32 %v3049_v46  ;;  %vm3076_vm12 = vweird.f32 %v3049_v46  ;;  %3350 = vmatpush.bf16.msrb.mxu1 %v9680_v2 }
 0xd29   :  { %3351 = vmatpush.bf16.msrb.mxu1 %v9679_v5 }
 0xd2b   :  { %v10043_v13 = vpop.eup %10042 }
 0xd2c   :  { %v3071_v60 = vmul.f32 %v10043_v13, %v3049_v46  ;;  %vm3077_vm10 = vweird.f32 %v10043_v13 }
 0xd2d   :  { %vm3078_vm13 = vmor %vm3076_vm12, %vm3077_vm10  ;;  %3352 = vmatpush.bf16.msrb.mxu1 %v9678_v9 }
 0xd2e   :  { %v3072_v52 = vmul.f32 %v10043_v13, %v3071_v60 }
 0xd30   :  { %v3073_v50 = vmul.f32 0.5, %v3072_v52 }
 0xd32   :  { %v3074_v45 = vsub.f32 1.5, %v3073_v50 }
 0xd34   :  { %v3075_v3 = vmul.f32 %v10043_v13, %v3074_v45 }
 0xd36   :  { %v3079_v1 = vsel %vm3078_vm13, %v10043_v13, %v3075_v3 }
 0xd37   :  { %v3082_v54 = vmul.f32 %v3079_v1, %v11761_v16  ;;  %v9670_v16 = vld [vmem:[#allocation19] sm:$0xff] }
 0xd38   :  { %3334 = vmatpush.bf16.msrb.mxu0 %v9670_v16 }
 0xd39   :  { %v3088_v55 = vmul.f32 %v9912_v12, %v3082_v54 }
 0xd3b   :  { %v11779_v6 = vadd.f32 %v9913_v8, %v3088_v55 }
 0xd3d   :  { %v3096_v18 = vpack.c.bf16 %v11779_v6, %v11779_v6 }
 0xd3f   :  { %3195 = vmatmul.bf16.gmra.mxu2 %v3096_v18  ;;  %3213 = vmatmul.bf16.gmra.mxu3 %v3096_v18 }
 0xd9f   :  { %v3191_v10 = vpop.f32.mrf.mxu2  ;;  %v3209_v15 = vpop.f32.mrf.mxu3 }
 0xda0   :  { %v3192_v57 = vadd.f32 %v3191_v10, %v3098_v17  ;;  %v3210_v39 = vadd.f32 %v3209_v15, %v3099_v23  ;;  %v9693_v15 = vld [vmem:[%s13016_s26 + $0x78] sm:$0xff] }
 0xda1   :  { %3629 = vmatpush.bf16.msrb.mxu2 %v9693_v15 }
 0xda2   :  { %v3218_v29 = vmax.f32 %v3192_v57, 0.0  ;;  %v3219_v59 = vmax.f32 %v3210_v39, 0.0  ;;  %v9692_v57 = vld [vmem:[%s13016_s26 + $0x70] sm:$0xff]  ;;  %v9700_v39 = vld [vmem:[#allocation13 + $0x70] sm:$0xff] }
 0xda5   :  { %3630 = vmatpush.bf16.msrb.mxu2 %v9692_v57 }
 0xda7   :  { %v3193_v14 = vpop.f32.mrf.mxu2  ;;  %v3211_v19 = vpop.f32.mrf.mxu3 }
 0xda8   :  { %v3194_v22 = vadd.f32 %v3193_v14, %v3098_v17  ;;  %v3212_v37 = vadd.f32 %v3211_v19, %v3099_v23  ;;  %v9708_v14 = vld [vmem:[#allocation15 + $0x70] sm:$0xff]  ;;  %v9691_v19 = vld [vmem:[%s13016_s26 + $0x68] sm:$0xff] }
 0xda9   :  { %3631 = vmatpush.bf16.msrb.mxu2 %v9691_v19 }
 0xdaa   :  { %v3220_v30 = vmax.f32 %v3194_v22, 0.0  ;;  %v3221_v12 = vmax.f32 %v3212_v37, 0.0  ;;  %v9699_v22 = vld [vmem:[#allocation13 + $0x68] sm:$0xff] }
 0xdab   :  { %v9707_v37 = vld [vmem:[#allocation15 + $0x68] sm:$0xff] }
 0xdac   :  { %v3224_v42 = vpack.c.bf16 %v3220_v30, %v3218_v29  ;;  %v3225_v24 = vpack.c.bf16 %v3221_v12, %v3219_v59  ;;  %v9690_v29 = vld [vmem:[%s13016_s26 + $0x60] sm:$0xff]  ;;  %v9698_v59 = vld [vmem:[#allocation13 + $0x60] sm:$0xff]  ;;  %v9689_v12 = vld [vmem:[%s13016_s26 + $0x58] sm:$0xff] }
 0xdad   :  { %v9706_v30 = vld [vmem:[#allocation15 + $0x60] sm:$0xff]  ;;  %3632 = vmatpush.bf16.msrb.mxu2 %v9690_v29 }
 0xdae   :  { %3335 = vmatmul.bf16.vlgmr.msrb.gmra.mxu0 %v3224_v42  ;;  %3353 = vmatmul.bf16.vlgmr.msrb.gmra.mxu1 %v3225_v24  ;;  %v9697_v42 = vld [vmem:[#allocation13 + $0x58] sm:$0xff] }
 0xdaf   :  { %v9705_v24 = vld [vmem:[#allocation15 + $0x58] sm:$0xff] }
 0xdb1   :  { %3633 = vmatpush.bf16.msrb.mxu2 %v9689_v12 }
 0xdc2   :  { %v3196_v27 = vpop.f32.mrf.mxu2  ;;  %v3214_v43 = vpop.f32.mrf.mxu3 }
 0xdc3   :  { %v3197_v0 = vadd.f32 %v3196_v27, %v3098_v17  ;;  %v3215_v8 = vadd.f32 %v3214_v43, %v3099_v23  ;;  %v9701_v17 = vld [vmem:[#allocation13 + $0x78] sm:$0xff]  ;;  %v9688_v27 = vld [vmem:[%s13016_s26 + $0x50] sm:$0xff]  ;;  %v9696_v43 = vld [vmem:[#allocation13 + $0x50] sm:$0xff] }
 0xdc4   :  { %v9709_v23 = vld [vmem:[#allocation15 + $0x78] sm:$0xff]  ;;  %3701 = vmatpush.bf16.msra.mxu3 %v9701_v17  ;;  %3634 = vmatpush.bf16.msrb.mxu2 %v9688_v27 }
 0xdc5   :  { %v3222_v20 = vmax.f32 %v3197_v0, 0.0  ;;  %v3223_v38 = vmax.f32 %v3215_v8, 0.0  ;;  %3770 = vmatpush.bf16.msra.mxu0 %v9709_v23  ;;  %v9704_v0 = vld [vmem:[#allocation15 + $0x50] sm:$0xff]  ;;  %v9687_v8 = vld [vmem:[%s13016_s26 + $0x48] sm:$0xff] }
 0xdc7   :  { %v3226_v63 = vpack.c.bf16 %v3222_v20, %v3222_v20  ;;  %v3227_v21 = vpack.c.bf16 %v3223_v38, %v3223_v38  ;;  %v9695_v20 = vld [vmem:[#allocation13 + $0x48] sm:$0xff] }
 0xdc8   :  { %3702 = vmatpush.bf16.msra.mxu3 %v9700_v39  ;;  %v9703_v38 = vld [vmem:[#allocation15 + $0x48] sm:$0xff]  ;;  %3635 = vmatpush.bf16.msrb.mxu2 %v9687_v8 }
 0xdc9   :  { %3340 = vmatmul.bf16.gmra.mxu0 %v3226_v63  ;;  %3358 = vmatmul.bf16.gmra.mxu1 %v3227_v21 }
 0xdca   :  { %v3198_v49 = vpop.f32.mrf.mxu2  ;;  %v3216_v7 = vpop.f32.mrf.mxu3  ;;  %3771 = vmatpush.bf16.msra.mxu0 %v9708_v14 }
 0xdcb   :  { %v9686_v7 = vld [vmem:[%s13016_s26 + $0x40] sm:$0xff] }
 0xdcc   :  { %3703 = vmatpush.bf16.msra.mxu3 %v9699_v22  ;;  %3636 = vmatpush.bf16.msrb.mxu2 %v9686_v7 }
 0xdce   :  { %3772 = vmatpush.bf16.msra.mxu0 %v9707_v37 }
 0xdd0   :  { %3704 = vmatpush.bf16.msra.mxu3 %v9698_v59 }
 0xdd2   :  { %3773 = vmatpush.bf16.msra.mxu0 %v9706_v30 }
 0xdd4   :  { %3705 = vmatpush.bf16.msra.mxu3 %v9697_v42 }
 0xdd6   :  { %3774 = vmatpush.bf16.msra.mxu0 %v9705_v24 }
 0xdd8   :  { %3706 = vmatpush.bf16.msra.mxu3 %v9696_v43 }
 0xdda   :  { %3775 = vmatpush.bf16.msra.mxu0 %v9704_v0 }
 0xddc   :  { %3707 = vmatpush.bf16.msra.mxu3 %v9695_v20  ;;  %v9917_v20 = vld [vmem:[%s13023_s20 + $0x1] ss:$0 sm:$0xff] }
 0xdde   :  { %3776 = vmatpush.bf16.msra.mxu0 %v9703_v38 }
 0xe2b   :  { %v3336_v61 = vpop.f32.mrf.mxu0  ;;  %v3354_v46 = vpop.f32.mrf.mxu1 }
 0xe2c   :  { %v3337_v34 = vadd.f32 %v9914_v44, %v3336_v61  ;;  %v9702_v61 = vld [vmem:[#allocation15 + $0x40] sm:$0xff] }
 0xe2d   :  { %3777 = vmatpush.bf16.msra.mxu0 %v9702_v61 }
 0xe2e   :  { %v3355_v62 = vadd.f32 %v3354_v46, %v3337_v34 }
 0xe30   :  { %v3363_v51 = vadd.f32 %v3355_v62, %v11771_v33 }
 0xe32   :  { %3366 = vadd.xlane.f32.xlu1 %v3363_v51 }
 0xe33   :  { %v3338_v40 = vpop.f32.mrf.mxu0  ;;  %v3356_v60 = vpop.f32.mrf.mxu1 }
 0xe34   :  { %v3339_v13 = vadd.f32 %v9914_v44, %v3338_v40 }
 0xe36   :  { %v3357_v52 = vadd.f32 %v3356_v60, %v3339_v13 }
 0xe38   :  { %v3364_v50 = vadd.f32 %v3357_v52, %v11773_v35 }
 0xe3a   :  { %3368 = vadd.xlane.f32.xlu0 %v3364_v50 }
 0xe46   :  { %v3341_v45 = vpop.f32.mrf.mxu0  ;;  %v3359_v3 = vpop.f32.mrf.mxu1 }
 0xe47   :  { %v3342_v1 = vadd.f32 %v9914_v44, %v3341_v45  ;;  %v9694_v44 = vld [vmem:[#allocation13 + $0x40] sm:$0xff] }
 0xe48   :  { %3708 = vmatpush.bf16.msra.mxu3 %v9694_v44 }
 0xe49   :  { %v3360_v54 = vadd.f32 %v3359_v3, %v3342_v1 }
 0xe4b   :  { %v3365_v55 = vadd.f32 %v3360_v54, %v11779_v6 }
 0xe4d   :  { %3370 = vadd.xlane.f32.xlu2 %v3365_v55 }
 0xe4e   :  { %v3343_v18 = vpop.f32.mrf.mxu0  ;;  %v3361_v58 = vpop.f32.mrf.mxu1 }
 0xe4f   :  { %v9915_v58 = vld [vmem:[#allocation22] ss:$0 sm:$0xff] }
 0xea5   :  { %v3367_v26 = vpop.xlane.xlu1 %3366 }
 0xea6   :  { %v3372_v33 = vmul.f32 %v3367_v26, %v11748_v56 }
 0xea8   :  { %v11788_v31 = vsub.f32 %v3363_v51, %v3372_v33 }
 0xeaa   :  { %v3378_v2 = vmul.f32 %v11788_v31, %v11788_v31 }
 0xeac   :  { %3381 = vadd.xlane.f32.xlu1 %v3378_v2 }
 0xead   :  { %v3369_v35 = vpop.xlane.xlu0 %3368 }
 0xeae   :  { %v3373_v11 = vmul.f32 %v3369_v35, %v11748_v56 }
 0xeb0   :  { %v11793_v5 = vsub.f32 %v3364_v50, %v3373_v11 }
 0xeb2   :  { %v3379_v6 = vmul.f32 %v11793_v5, %v11793_v5 }
 0xeb4   :  { %3383 = vadd.xlane.f32.xlu0 %v3379_v6 }
 0xec0   :  { %v3371_v16 = vpop.xlane.xlu2 %3370 }
 0xec1   :  { %v3374_v9 = vmul.f32 %v3371_v16, %v11748_v56 }
 0xec3   :  { %v11798_v4 = vsub.f32 %v3365_v55, %v3374_v9 }
 0xec5   :  { %v3380_v10 = vmul.f32 %v11798_v4, %v11798_v4 }
 0xec7   :  { %3385 = vadd.xlane.f32.xlu2 %v3380_v10  ;;  %v9916_v10 = vld [vmem:[#allocation24] ss:$0 sm:$0xff] }
 0xf1f   :  { %v3382_v63 = vpop.xlane.xlu1 %3381 }
 0xf20   :  { %v3387_v21 = vmul.f32 %v3382_v63, %v11748_v56 }
 0xf22   :  { %v3390_v49 = vadd.f32 1e-05, %v3387_v21  ;;  %v9919_v21 = vld [vmem:[%s13021_s8 + $0x1] ss:$0 sm:$0xff] }
 0xf24   :  { %10044 = vrsqrt.f32 %v3390_v49  ;;  %vm3399_vm15 = vweird.f32 %v3390_v49 }
 0xf27   :  { %v3384_v46 = vpop.xlane.xlu0 %3383 }
 0xf28   :  { %v3388_v34 = vmul.f32 %v3384_v46, %v11748_v56 }
 0xf2a   :  { %v10045_v62 = vpop.eup %10044  ;;  %v3391_v51 = vadd.f32 1e-05, %v3388_v34 }
 0xf2b   :  { %v3394_v40 = vmul.f32 %v10045_v62, %v3390_v49  ;;  %vm3400_vm14 = vweird.f32 %v10045_v62 }
 0xf2c   :  { %10046 = vrsqrt.f32 %v3391_v51  ;;  %vm3401_vm1 = vmor %vm3399_vm15, %vm3400_vm14  ;;  %vm3409_vm3 = vweird.f32 %v3391_v51 }
 0xf2d   :  { %v3395_v13 = vmul.f32 %v10045_v62, %v3394_v40 }
 0xf2f   :  { %v3396_v60 = vmul.f32 0.5, %v3395_v13 }
 0xf31   :  { %v3397_v52 = vsub.f32 1.5, %v3396_v60 }
 0xf32   :  { %v10047_v50 = vpop.eup %10046 }
 0xf33   :  { %v3398_v45 = vmul.f32 %v10045_v62, %v3397_v52  ;;  %v3404_v3 = vmul.f32 %v10047_v50, %v3391_v51  ;;  %vm3410_vm2 = vweird.f32 %v10047_v50 }
 0xf34   :  { %vm3411_vm4 = vmor %vm3409_vm3, %vm3410_vm2 }
 0xf35   :  { %v3405_v1 = vmul.f32 %v10047_v50, %v3404_v3  ;;  %v3402_v54 = vsel %vm3401_vm1, %v10045_v62, %v3398_v45  ;;  %v9918_v3 = vld [vmem:[%s13022_s5 + $0x1] ss:$0 sm:$0xff] }
 0xf36   :  { %v3423_v26 = vmul.f32 %v3402_v54, %v11788_v31 }
 0xf37   :  { %v3406_v55 = vmul.f32 0.5, %v3405_v1 }
 0xf38   :  { %v3429_v16 = vmul.f32 %v9915_v58, %v3423_v26 }
 0xf39   :  { %v3407_v18 = vsub.f32 1.5, %v3406_v55 }
 0xf3a   :  { %v3386_v33 = vpop.xlane.xlu2 %3385  ;;  %v11815_v17 = vadd.f32 %v9916_v10, %v3429_v16 }
 0xf3b   :  { %v3408_v2 = vmul.f32 %v10047_v50, %v3407_v18  ;;  %v3389_v35 = vmul.f32 %v3386_v33, %v11748_v56 }
 0xf3d   :  { %v3412_v11 = vsel %vm3411_vm4, %v10047_v50, %v3408_v2  ;;  %v3392_v6 = vadd.f32 1e-05, %v3389_v35 }
 0xf3e   :  { %v3424_v9 = vmul.f32 %v3412_v11, %v11793_v5 }
 0xf3f   :  { %10048 = vrsqrt.f32 %v3392_v6  ;;  %vm3419_vm6 = vweird.f32 %v3392_v6 }
 0xf40   :  { %v3430_v15 = vmul.f32 %v9915_v58, %v3424_v9 }
 0xf42   :  { %v11817_v23 = vadd.f32 %v9916_v10, %v3430_v15 }
 0xf44   :  { %v3576_v31 = vpack.c.bf16 %v11817_v23, %v11815_v17 }
 0xf45   :  { %v10049_v57 = vpop.eup %10048 }
 0xf46   :  { %v3414_v39 = vmul.f32 %v10049_v57, %v3392_v6  ;;  %3637 = vmatmul.bf16.vlgmr.msrb.gmra.mxu2 %v3576_v31  ;;  %3709 = vmatmul.bf16.vlgmr.msra.gmra.mxu3 %v3576_v31  ;;  %vm3420_vm5 = vweird.f32 %v10049_v57 }
 0xf47   :  { %3778 = vmatmul.bf16.vlgmr.msra.gmra.mxu0 %v3576_v31  ;;  %vm3421_vm8 = vmor %vm3419_vm6, %vm3420_vm5 }
 0xf48   :  { %v3415_v14 = vmul.f32 %v10049_v57, %v3414_v39 }
 0xf4a   :  { %v3416_v19 = vmul.f32 0.5, %v3415_v14 }
 0xf4c   :  { %v3417_v22 = vsub.f32 1.5, %v3416_v19 }
 0xf4e   :  { %v3418_v5 = vmul.f32 %v10049_v57, %v3417_v22 }
 0xf50   :  { %v3422_v37 = vsel %vm3421_vm8, %v10049_v57, %v3418_v5 }
 0xf51   :  { %v3425_v29 = vmul.f32 %v3422_v37, %v11798_v4 }
 0xf53   :  { %v3431_v59 = vmul.f32 %v9915_v58, %v3425_v29 }
 0xf55   :  { %v11822_v30 = vadd.f32 %v9916_v10, %v3431_v59 }
 0xf57   :  { %v3577_v12 = vpack.c.bf16 %v11822_v30, %v11822_v30 }
 0xf59   :  { %3642 = vmatmul.bf16.gmra.mxu2 %v3577_v12  ;;  %3714 = vmatmul.bf16.gmra.mxu3 %v3577_v12 }
 0xf5a   :  { %3783 = vmatmul.bf16.gmra.mxu0 %v3577_v12 }
 0xfc4   :  { %v3779_v42 = vpop.f32.mrf.mxu0 }
 0xfc5   :  { %v3780_v46 = vadd.f32 %v9917_v20, %v3779_v42 }
 0xfc9   :  { %v3638_v24 = vpop.f32.mrf.mxu2  ;;  %v3710_v27 = vpop.f32.mrf.mxu3 }
 0xfca   :  { %v3711_v52 = vadd.f32 %v9919_v21, %v3710_v27  ;;  %v3639_v55 = vadd.f32 %v9918_v3, %v3638_v24 }
 0xfcc   :  { %v3781_v43 = vpop.f32.mrf.mxu0  ;;  %v3647_v26 = vmul.f32 0.25, %v3639_v55 }
 0xfcd   :  { %v3782_v49 = vadd.f32 %v9917_v20, %v3781_v43 }
 0xfcf   :  { %v11832_v62 = vpack.c.bf16 %v3782_v49, %v3780_v46  ;;  %v9710_v49 = vld [vmem:[#allocation16 + $0x40] sm:$0xff] }
 0xfd1   :  { %v3640_v0 = vpop.f32.mrf.mxu2  ;;  %v3712_v8 = vpop.f32.mrf.mxu3 }
 0xfd2   :  { %v3713_v13 = vadd.f32 %v9919_v21, %v3712_v8  ;;  %v3641_v54 = vadd.f32 %v9918_v3, %v3640_v0 }
 0xfd4   :  { %v11840_v1 = vpack.c.bf16 %v3713_v13, %v3711_v52  ;;  %v3648_v58 = vmul.f32 0.25, %v3641_v54 }
 0xfd6   :  { %v3801_v18 = vsel %vm1586_vm0, %v11840_v1, 0  ;;  %v11844_v33 = vpack.c.bf16 %v3648_v58, %v3647_v26 }
 0xfd7   :  { %v3784_v38 = vpop.f32.mrf.mxu0 }
 0xfd8   :  { %v3785_v63 = vadd.f32 %v9917_v20, %v3784_v38 }
 0xfda   :  { %v11827_v4 = vpack.c.bf16 %v3785_v63, %v3785_v63 }
 0xfdc   :  { %v3643_v7 = vpop.f32.mrf.mxu2  ;;  %v3715_v44 = vpop.f32.mrf.mxu3  ;;  %v3905_v61 = vsel %vm933_vm11, %v11827_v4, 0 }
 0xfdd   :  { %v3716_v34 = vadd.f32 %v9919_v21, %v3715_v44  ;;  %3913 = vmatpush.bf16.msra.mxu2 %v3905_v61  ;;  %v3644_v2 = vadd.f32 %v9918_v3, %v3643_v7 }
 0xfdf   :  { %v11834_v51 = vpack.c.bf16 %v3716_v34, %v3716_v34  ;;  %v3786_v40 = vpop.f32.mrf.mxu0  ;;  %v3649_v35 = vmul.f32 0.25, %v3644_v2 }
 0xfe1   :  { %3914 = vmatpush.bf16.msra.mxu2 %v11832_v62  ;;  %v3804_v60 = vsel %vm1586_vm0, %v11834_v51, 0  ;;  %v11848_v11 = vpack.c.bf16 %v3649_v35, %v3649_v35 }
 0xfe2   :  { %3812 = vmatpush.bf16.xpose.msra.mxu1 %v3804_v60 }
 0xfe4   :  { %v3645_v50 = vpop.f32.mrf.mxu2  ;;  %v3717_v45 = vpop.f32.mrf.mxu3 }
 0xfe5   :  { %4128 = vmatpush.bf16.msrb.mxu2 %v9710_v49 }
 0xfea   :  { %3813 = vmatpush.bf16.xpose.msra.mxu1 %v3801_v18 }
 0xff1   :  { %8957 = vmatmul.msk.bf16.vlgmr.msra.gmra.mxu1 %vm1586_vm0, %v11844_v33 }
0x1001   :  { %8958 = vmatmul.msk.bf16.gmra.mxu1 %vm1586_vm0, %v11848_v11 }
0x106e   :  { %v3815_v6 = vpop.f32.mrf.mxu1 }
0x106f   :  { %v3816_v16 = vadd.f32 %v3815_v6, %v11309_v41 }
0x1071   :  { %v3824_v9 = vsel %vm1617_vm7, %v3816_v16, -inf }
0x1072   :  { %3825 = vmax.xlane.f32.xlu1 %v3824_v9 }
0x1076   :  { %v3817_v10 = vpop.f32.mrf.mxu1 }
0x1077   :  { %v3818_v15 = vadd.f32 %v3817_v10, %v11314_v47 }
0x1079   :  { %v3827_v31 = vsel %vm1617_vm7, %v3818_v15, -inf }
0x107a   :  { %3828 = vmax.xlane.f32.xlu0 %v3827_v31 }
0x107e   :  { %v3820_v57 = vpop.f32.mrf.mxu1 }
0x107f   :  { %v3821_v39 = vadd.f32 %v3820_v57, %v11319_v53 }
0x1081   :  { %v3830_v14 = vsel %vm1617_vm7, %v3821_v39, -inf }
0x1082   :  { %3831 = vmax.xlane.f32.xlu2 %v3830_v14 }
0x1086   :  { %v3822_v19 = vpop.f32.mrf.mxu1 }
0x10e5   :  { %v3826_v22 = vpop.xlane.xlu1 %3825 }
0x10e6   :  { %v3833_v5 = vsub.f32 %v3816_v16, %v3826_v22 }
0x10e8   :  { %v3836_v37 = vmul.f32 1.442695, %v3833_v5 }
0x10ea   :  { %10050 = vpow2.f32 %v3836_v37 }
0x10ed   :  { %v3829_v29 = vpop.xlane.xlu0 %3828 }
0x10ee   :  { %v3834_v59 = vsub.f32 %v3818_v15, %v3829_v29 }
0x10f0   :  { %v11858_v12 = vpop.eup %10050  ;;  %v3838_v42 = vmul.f32 1.442695, %v3834_v59 }
0x10f1   :  { %v3842_v24 = vsel %vm1617_vm7, %v11858_v12, 0.0 }
0x10f2   :  { %10052 = vpow2.f32 %v3838_v42  ;;  %3843 = vadd.xlane.f32.xlu1 %v3842_v24 }
0x10f5   :  { %v3832_v27 = vpop.xlane.xlu2 %3831 }
0x10f6   :  { %v3835_v43 = vsub.f32 %v3821_v39, %v3832_v27 }
0x10f8   :  { %v10053_v0 = vpop.eup %10052  ;;  %v3840_v8 = vmul.f32 1.442695, %v3835_v43 }
0x10f9   :  { %v3845_v20 = vsel %vm1617_vm7, %v10053_v0, 0.0 }
0x10fa   :  { %10054 = vpow2.f32 %v3840_v8  ;;  %3846 = vadd.xlane.f32.xlu0 %v3845_v20 }
0x1100   :  { %v11863_v38 = vpop.eup %10054 }
0x1101   :  { %v3848_v63 = vsel %vm1617_vm7, %v11863_v38, 0.0 }
0x1102   :  { %3849 = vadd.xlane.f32.xlu2 %v3848_v63 }
0x110b   :  { %3937 = vrot.lane.b32.xlu1 %v11834_v51, %s10911_s0 }
0x110e   :  { %3935 = vrot.lane.b32.xlu0 %v11840_v1, %s10911_s0 }
0x1113   :  { %3931 = vrot.lane.b32.xlu1 %v11848_v11, %s10911_s0 }
0x1116   :  { %4324 = vrot.lane.b32.xlu0 %v11834_v51, %s10913_s10 }
0x111a   :  { %3929 = vrot.lane.b32.xlu2 %v11844_v33, %s10911_s0 }
0x111b   :  { %4143 = vrot.lane.b32.xlu1 %v11840_v1, %s10912_s15 }
0x111e   :  { %4322 = vrot.lane.b32.xlu0 %v11840_v1, %s10913_s10 }
0x1122   :  { %4145 = vrot.lane.b32.xlu2 %v11834_v51, %s10912_s15 }
0x1123   :  { %4320 = vrot.lane.b32.xlu1 %v11848_v11, %s10913_s10 }
0x1126   :  { %4139 = vrot.lane.b32.xlu0 %v11844_v33, %s10912_s15 }
0x112a   :  { %4318 = vrot.lane.b32.xlu2 %v11844_v33, %s10913_s10 }
0x1132   :  { %4141 = vrot.lane.b32.xlu2 %v11848_v11, %s10912_s15 }
0x1165   :  { %v3844_v21 = vpop.xlane.xlu1 %3843 }
0x1166   :  { %10056 = vrcp.f32 %v3844_v21  ;;  %v3862_v50 = vand.u32 2147483648, %v3844_v21  ;;  %vm3856_vm10 = vweird.f32 %v3844_v21  ;;  %v3860_v45 = vand.u32 2147483647, %v3844_v21 }
0x1168   :  { %v3863_v26 = vor.u32 1.1754944e-38, %v3862_v50  ;;  %vm3861_vm14 = vcmp.eq.f32.partialorder %v3860_v45, 8.507059e+37 }
0x116c   :  { %v10057_v7 = vpop.eup %10056 }
0x116d   :  { %v3852_v44 = vmul.f32 %v10057_v7, %v3844_v21  ;;  %v3847_v61 = vpop.xlane.xlu0 %3846  ;;  %vm3857_vm9 = vweird.f32 %v10057_v7 }
0x116e   :  { %10058 = vrcp.f32 %v3847_v61  ;;  %vm3858_vm12 = vmor %vm3856_vm10, %vm3857_vm9  ;;  %v3877_v54 = vand.u32 2147483648, %v3847_v61  ;;  %v3875_v58 = vand.u32 2147483647, %v3847_v61  ;;  %vm3871_vm15 = vweird.f32 %v3847_v61 }
0x116f   :  { %v3853_v46 = vsub.f32 1.0, %v3852_v44 }
0x1170   :  { %v3878_v16 = vor.u32 1.1754944e-38, %v3877_v54  ;;  %vm3876_vm2 = vcmp.eq.f32.partialorder %v3875_v58, 8.507059e+37 }
0x1171   :  { %v3854_v34 = vmul.f32 %v10057_v7, %v3853_v46 }
0x1173   :  { %v3855_v13 = vadd.f32 %v10057_v7, %v3854_v34 }
0x1174   :  { %v10059_v40 = vpop.eup %10058 }
0x1175   :  { %v3867_v60 = vmul.f32 %v10059_v40, %v3847_v61  ;;  %v3850_v52 = vpop.xlane.xlu2 %3849  ;;  %v3859_v55 = vsel %vm3858_vm12, %v10057_v7, %v3855_v13  ;;  %vm3872_vm13 = vweird.f32 %v10059_v40 }
0x1176   :  { %10060 = vrcp.f32 %v3850_v52  ;;  %v3864_v6 = vsel %vm3861_vm14, %v3863_v26, %v3859_v55  ;;  %vm3873_vm1 = vmor %vm3871_vm15, %vm3872_vm13  ;;  %v3892_v42 = vand.u32 2147483648, %v3850_v52  ;;  %vm3886_vm4 = vweird.f32 %v3850_v52 }
0x1177   :  { %v3868_v3 = vsub.f32 1.0, %v3867_v60  ;;  %v3865_v14 = vmul.f32 %v11858_v12, %v3864_v6  ;;  %v3890_v43 = vand.u32 2147483647, %v3850_v52 }
0x1178   :  { %v3893_v20 = vor.u32 1.1754944e-38, %v3892_v42 }
0x1179   :  { %v3869_v18 = vmul.f32 %v10059_v40, %v3868_v3  ;;  %vm3891_vm6 = vcmp.eq.f32.partialorder %v3890_v43, 8.507059e+37 }
0x117b   :  { %v3870_v2 = vadd.f32 %v10059_v40, %v3869_v18 }
0x117c   :  { %v10061_v35 = vpop.eup %10060 }
0x117d   :  { %v3874_v9 = vsel %vm3873_vm1, %v10059_v40, %v3870_v2  ;;  %v3882_v10 = vmul.f32 %v10061_v35, %v3850_v52  ;;  %v3930_v15 = vpop.permute.xlu2 %3929  ;;  %v3938_v31 = vpop.permute.xlu1 %3937  ;;  %vm3887_vm3 = vweird.f32 %v10061_v35 }
0x117e   :  { %v3879_v57 = vsel %vm3876_vm2, %v3878_v16, %v3874_v9  ;;  %v3949_v39 = vsel %vm1586_vm0, %v3938_v31, 0  ;;  %vm3888_vm5 = vmor %vm3886_vm4, %vm3887_vm3 }
0x117f   :  { %v3880_v19 = vmul.f32 %v10053_v0, %v3879_v57  ;;  %v3883_v22 = vsub.f32 1.0, %v3882_v10  ;;  %3957 = vmatpush.bf16.xpose.msrb.mxu3 %v3949_v39 }
0x1180   :  { %v3936_v5 = vpop.permute.xlu0 %3935 }
0x1181   :  { %v3884_v37 = vmul.f32 %v10061_v35, %v3883_v22  ;;  %v3896_v29 = vpack.c.bf16 %v3880_v19, %v3865_v14  ;;  %v3946_v12 = vsel %vm1586_vm0, %v3936_v5, 0 }
0x1183   :  { %8959 = vmatmul.msk.bf16.vlgmr.msra.gmra.mxu2 %vm1617_vm7, %v3896_v29  ;;  %v3885_v59 = vadd.f32 %v10061_v35, %v3884_v37 }
0x1185   :  { %v4146_v24 = vpop.permute.xlu2 %4145  ;;  %v3932_v27 = vpop.permute.xlu1 %3931  ;;  %v3889_v0 = vsel %vm3888_vm5, %v10061_v35, %v3885_v59 }
0x1186   :  { %v4157_v8 = vsel %vm1586_vm0, %v4146_v24, 0  ;;  %v3894_v49 = vsel %vm3891_vm6, %v3893_v20, %v3889_v0 }
0x1187   :  { %3958 = vmatpush.bf16.xpose.msrb.mxu3 %v3946_v12  ;;  %v3895_v44 = vmul.f32 %v11863_v38, %v3894_v49 }
0x1188   :  { %v4325_v63 = vpop.permute.xlu0 %4324 }
0x1189   :  { %v4336_v21 = vsel %vm1586_vm0, %v4325_v63, 0  ;;  %v3897_v40 = vpack.c.bf16 %v3895_v44, %v3895_v44 }
0x118a   :  { %4344 = vmatpush.bf16.xpose.msra.mxu2 %v4336_v21 }
0x118d   :  { %v4144_v7 = vpop.permute.xlu1 %4143  ;;  %v4319_v60 = vpop.permute.xlu2 %4318 }
0x118e   :  { %8961 = vmatmul.msk.bf16.vlgmr.msrb.gmra.mxu3 %vm1586_vm0, %v3930_v15  ;;  %v4154_v61 = vsel %vm1586_vm0, %v4144_v7, 0 }
0x118f   :  { %4165 = vmatpush.bf16.xpose.msra.mxu3 %v4157_v8 }
0x1190   :  { %v4323_v46 = vpop.permute.xlu0 %4322 }
0x1191   :  { %v4333_v34 = vsel %vm1586_vm0, %v4323_v46, 0 }
0x1192   :  { %4345 = vmatpush.bf16.xpose.msra.mxu2 %v4333_v34 }
0x1193   :  { %8960 = vmatmul.msk.bf16.gmra.mxu2 %vm1617_vm7, %v3897_v40 }
0x1195   :  { %v4142_v52 = vpop.permute.xlu2 %4141  ;;  %v4321_v5 = vpop.permute.xlu1 %4320 }
0x1197   :  { %4166 = vmatpush.bf16.xpose.msra.mxu3 %v4154_v61 }
0x1198   :  { %v4140_v13 = vpop.permute.xlu0 %4139 }
0x119e   :  { %8962 = vmatmul.msk.bf16.gmra.mxu3 %vm1586_vm0, %v3932_v27 }
0x11ae   :  { %8977 = vmatmul.msk.bf16.vlgmr.msra.gmra.mxu3 %vm1586_vm0, %v4140_v13 }
0x11be   :  { %8978 = vmatmul.msk.bf16.gmra.mxu3 %vm1586_vm0, %v4142_v52 }
0x1206   :  { %v3916_v38 = vpop.f32.mrf.mxu2 }
0x120e   :  { %v3918_v50 = vpop.f32.mrf.mxu2 }
0x120f   :  { %v3925_v45 = vpack.c.bf16 %v3918_v50, %v3916_v38 }
0x1211   :  { %v3960_v3 = vpop.f32.mrf.mxu3  ;;  %8975 = vmatmul.msk.bf16.vlgmr.msrb.gmra.mxu2 %vm1586_vm0, %v3925_v45 }
0x1212   :  { %v3961_v54 = vadd.f32 %v3960_v3, %v11309_v41 }
0x1214   :  { %v3969_v55 = vsel %vm1617_vm7, %v3961_v54, -inf }
0x1215   :  { %3970 = vmax.xlane.f32.xlu0 %v3969_v55 }
0x1216   :  { %v3921_v18 = vpop.f32.mrf.mxu2 }
0x1217   :  { %v3926_v6 = vpack.c.bf16 %v3921_v18, %v3921_v18 }
0x1219   :  { %v3962_v58 = vpop.f32.mrf.mxu3 }
0x121a   :  { %v3963_v26 = vadd.f32 %v3962_v58, %v11314_v47 }
0x121c   :  { %v3972_v2 = vsel %vm1617_vm7, %v3963_v26, -inf }
0x121d   :  { %3973 = vmax.xlane.f32.xlu1 %v3972_v2 }
0x121e   :  { %v3923_v35 = vpop.f32.mrf.mxu2 }
0x1221   :  { %v3965_v16 = vpop.f32.mrf.mxu3  ;;  %8976 = vmatmul.msk.bf16.gmra.mxu2 %vm1586_vm0, %v3926_v6 }
0x1222   :  { %v3966_v9 = vadd.f32 %v3965_v16, %v11319_v53 }
0x1224   :  { %v3975_v10 = vsel %vm1617_vm7, %v3966_v9, -inf }
0x1225   :  { %3976 = vmax.xlane.f32.xlu2 %v3975_v10 }
0x1229   :  { %v3967_v15 = vpop.f32.mrf.mxu3 }
0x1231   :  { %v4168_v31 = vpop.f32.mrf.mxu3  ;;  %8987 = vmatmul.msk.bf16.vlgmr.msra.gmra.mxu2 %vm1586_vm0, %v4319_v60 }
0x1232   :  { %v4169_v57 = vadd.f32 %v4168_v31, %v11309_v41 }
0x1234   :  { %v4177_v39 = vsel %vm1617_vm7, %v4169_v57, -inf }
0x1235   :  { %4178 = vmax.xlane.f32.xlu2 %v4177_v39 }
0x1239   :  { %v4170_v14 = vpop.f32.mrf.mxu3 }
0x123a   :  { %v4171_v19 = vadd.f32 %v4170_v14, %v11314_v47 }
0x123c   :  { %v4180_v22 = vsel %vm1617_vm7, %v4171_v19, -inf }
0x123d   :  { %4181 = vmax.xlane.f32.xlu0 %v4180_v22 }
0x1241   :  { %v4173_v37 = vpop.f32.mrf.mxu3  ;;  %8988 = vmatmul.msk.bf16.gmra.mxu2 %vm1586_vm0, %v4321_v5 }
0x1242   :  { %v11920_v29 = vadd.f32 %v4173_v37, %v11319_v53 }
0x1244   :  { %v4183_v59 = vsel %vm1617_vm7, %v11920_v29, -inf }
0x1245   :  { %4184 = vmax.xlane.f32.xlu1 %v4183_v59 }
0x1249   :  { %v4175_v42 = vpop.f32.mrf.mxu3 }
0x1288   :  { %v3971_v24 = vpop.xlane.xlu0 %3970 }
0x1289   :  { %v3978_v27 = vsub.f32 %v3961_v54, %v3971_v24 }
0x128b   :  { %v3981_v43 = vmul.f32 1.442695, %v3978_v27 }
0x128d   :  { %10062 = vpow2.f32 %v3981_v43 }
0x1290   :  { %v3974_v8 = vpop.xlane.xlu1 %3973 }
0x1291   :  { %v3979_v12 = vsub.f32 %v3963_v26, %v3974_v8 }
0x1293   :  { %v11924_v0 = vpop.eup %10062  ;;  %v3983_v20 = vmul.f32 1.442695, %v3979_v12 }
0x1294   :  { %v11926_v63 = vpop.f32.mrf.mxu2  ;;  %v3987_v21 = vsel %vm1617_vm7, %v11924_v0, 0.0 }
0x1295   :  { %10064 = vpow2.f32 %v3983_v20  ;;  %3988 = vadd.xlane.f32.xlu1 %v3987_v21 }
0x1298   :  { %v3977_v49 = vpop.xlane.xlu2 %3976 }
0x1299   :  { %v3980_v7 = vsub.f32 %v3966_v9, %v3977_v49 }
0x129b   :  { %v11930_v44 = vpop.eup %10064  ;;  %v3985_v61 = vmul.f32 1.442695, %v3980_v7 }
0x129c   :  { %v11932_v46 = vpop.f32.mrf.mxu2  ;;  %v3990_v34 = vsel %vm1617_vm7, %v11930_v44, 0.0 }
0x129d   :  { %10066 = vpow2.f32 %v3985_v61  ;;  %3991 = vadd.xlane.f32.xlu2 %v3990_v34 }
0x12a3   :  { %v11936_v40 = vpop.eup %10066 }
0x12a4   :  { %v11938_v13 = vpop.f32.mrf.mxu2  ;;  %v3993_v60 = vsel %vm1617_vm7, %v11936_v40, 0.0 }
0x12a5   :  { %3994 = vadd.xlane.f32.xlu0 %v3993_v60 }
0x12a8   :  { %v4179_v6 = vpop.xlane.xlu2 %4178 }
0x12a9   :  { %v4186_v16 = vsub.f32 %v4169_v57, %v4179_v6 }
0x12ab   :  { %v4189_v15 = vmul.f32 1.442695, %v4186_v16 }
0x12ac   :  { %v4137_v52 = vpop.f32.mrf.mxu2 }
0x12ae   :  { %4045 = vrot.lane.b32.xlu1 %v11832_v62, %s10911_s0 }
0x12b0   :  { %v4182_v38 = vpop.xlane.xlu0 %4181 }
0x12b1   :  { %v4187_v50 = vsub.f32 %v4171_v19, %v4182_v38 }
0x12b3   :  { %v4191_v45 = vmul.f32 1.442695, %v4187_v50 }
0x12b4   :  { %v4347_v3 = vpop.f32.mrf.mxu2 }
0x12b5   :  { %10068 = vpow2.f32 %v4191_v45  ;;  %4047 = vrot.lane.b32.xlu2 %v11827_v4, %s10911_s0  ;;  %v11951_v58 = vadd.f32 %v4347_v3, %v11309_v41 }
0x12b6   :  { %10070 = vpow2.f32 %v4189_v15 }
0x12b7   :  { %v4356_v2 = vsel %vm1617_vm7, %v11951_v58, -inf }
0x12b8   :  { %v11977_v57 = vpop.xlane.xlu1 %4184 }
0x12bb   :  { %v11946_v54 = vpop.eup %10068 }
0x12bc   :  { %v4349_v55 = vpop.f32.mrf.mxu2  ;;  %v4198_v18 = vsel %vm1617_vm7, %v11946_v54, 0.0  ;;  %v11965_v14 = vpop.eup %10070 }
0x12bd   :  { %4199 = vadd.xlane.f32.xlu0 %v4198_v18  ;;  %v11961_v31 = vadd.f32 %v4349_v55, %v11314_v47  ;;  %v4195_v19 = vsel %vm1617_vm7, %v11965_v14, 0.0 }
0x12bf   :  { %v4359_v39 = vsel %vm1617_vm7, %v11961_v31, -inf }
0x12c4   :  { %v4352_v26 = vpop.f32.mrf.mxu2 }
0x12c5   :  { %4357 = vmax.xlane.f32.xlu0 %v4356_v2  ;;  %v11956_v35 = vadd.f32 %v4352_v26, %v11319_v53 }
0x12c7   :  { %v4362_v10 = vsel %vm1617_vm7, %v11956_v35, -inf }
0x12cc   :  { %v4354_v9 = vpop.f32.mrf.mxu2 }
0x12cd   :  { %4363 = vmax.xlane.f32.xlu0 %v4362_v10 }
0x12d8   :  { %4360 = vmax.xlane.f32.xlu1 %v4359_v39 }
0x12de   :  { %4196 = vadd.xlane.f32.xlu2 %v4195_v19 }
0x12f1   :  { %4432 = vrot.lane.b32.xlu1 %v11827_v4, %s10913_s10 }
0x12f6   :  { %4503 = vrot.lane.b32.xlu2 %v11834_v51, %s10885_s22 }
0x12f9   :  { %4430 = vrot.lane.b32.xlu1 %v11832_v62, %s10913_s10 }
0x12fe   :  { %4682 = vrot.lane.b32.xlu2 %v11834_v51, %s10914_s4 }
0x1301   :  { %4251 = vrot.lane.b32.xlu1 %v11832_v62, %s10912_s15 }
0x1306   :  { %4680 = vrot.lane.b32.xlu2 %v11840_v1, %s10914_s4 }
0x1308   :  { %v3989_v22 = vpop.xlane.xlu1 %3988 }
0x1309   :  { %10072 = vrcp.f32 %v3989_v22  ;;  %v4007_v21 = vand.u32 2147483648, %v3989_v22  ;;  %vm4001_vm9 = vweird.f32 %v3989_v22  ;;  %v4005_v49 = vand.u32 2147483647, %v3989_v22 }
0x130b   :  { %v4008_v50 = vor.u32 1.1754944e-38, %v4007_v21  ;;  %vm4006_vm13 = vcmp.eq.f32.partialorder %v4005_v49, 8.507059e+37 }
0x130e   :  { %4676 = vrot.lane.b32.xlu2 %v11844_v33, %s10914_s4 }
0x130f   :  { %v10073_v5 = vpop.eup %10072 }
0x1310   :  { %v3997_v37 = vmul.f32 %v10073_v5, %v3989_v22  ;;  %v3992_v59 = vpop.xlane.xlu2 %3991  ;;  %vm4002_vm8 = vweird.f32 %v10073_v5 }
0x1311   :  { %10074 = vrcp.f32 %v3992_v59  ;;  %vm4003_vm10 = vmor %vm4001_vm9, %vm4002_vm8  ;;  %v4022_v34 = vand.u32 2147483648, %v3992_v59  ;;  %v4020_v38 = vand.u32 2147483647, %v3992_v59  ;;  %vm4016_vm14 = vweird.f32 %v3992_v59 }
0x1312   :  { %v3998_v42 = vsub.f32 1.0, %v3997_v37 }
0x1313   :  { %v4023_v18 = vor.u32 1.1754944e-38, %v4022_v34  ;;  %vm4021_vm1 = vcmp.eq.f32.partialorder %v4020_v38, 8.507059e+37 }
0x1314   :  { %v3999_v24 = vmul.f32 %v10073_v5, %v3998_v42 }
0x1316   :  { %4499 = vrot.lane.b32.xlu2 %v11848_v11, %s10885_s22  ;;  %v4000_v43 = vadd.f32 %v10073_v5, %v3999_v24 }
0x1317   :  { %v10075_v27 = vpop.eup %10074 }
0x1318   :  { %v4012_v8 = vmul.f32 %v10075_v27, %v3992_v59  ;;  %v3995_v12 = vpop.xlane.xlu0 %3994  ;;  %v4048_v20 = vpop.permute.xlu2 %4047  ;;  %v4004_v60 = vsel %vm4003_vm10, %v10073_v5, %v4000_v43  ;;  %vm4017_vm12 = vweird.f32 %v10075_v27 }
0x1319   :  { %10076 = vrcp.f32 %v3995_v12  ;;  %v4057_v61 = vsel %vm933_vm11, %v4048_v20, 0  ;;  %v4009_v55 = vsel %vm4006_vm13, %v4008_v50, %v4004_v60  ;;  %vm4018_vm15 = vmor %vm4016_vm14, %vm4017_vm12  ;;  %v4037_v5 = vand.u32 2147483648, %v3995_v12 }
0x131a   :  { %v4013_v7 = vsub.f32 1.0, %v4012_v8  ;;  %4065 = vmatpush.bf16.msrb.mxu0 %v4057_v61  ;;  %v4010_v9 = vmul.f32 %v11924_v0, %v4009_v55  ;;  %vm4031_vm3 = vweird.f32 %v3995_v12  ;;  %v4035_v37 = vand.u32 2147483647, %v3995_v12 }
0x131b   :  { %v4038_v42 = vor.u32 1.1754944e-38, %v4037_v5  ;;  %v4188_v55 = vsub.f32 %v11920_v29, %v11977_v57 }
0x131c   :  { %v4014_v52 = vmul.f32 %v10075_v27, %v4013_v7  ;;  %vm4036_vm5 = vcmp.eq.f32.partialorder %v4035_v37, 8.507059e+37 }
0x131e   :  { %v4015_v45 = vadd.f32 %v10075_v27, %v4014_v52 }
0x131f   :  { %v10077_v3 = vpop.eup %10076 }
0x1320   :  { %v4019_v26 = vsel %vm4018_vm15, %v10075_v27, %v4015_v45  ;;  %v4027_v2 = vmul.f32 %v10077_v3, %v3995_v12  ;;  %v4046_v6 = vpop.permute.xlu1 %4045  ;;  %vm4032_vm2 = vweird.f32 %v10077_v3 }
0x1321   :  { %v4024_v16 = vsel %vm4021_vm1, %v4023_v18, %v4019_v26  ;;  %4066 = vmatpush.bf16.msrb.mxu0 %v4046_v6  ;;  %vm4033_vm4 = vmor %vm4031_vm3, %vm4032_vm2  ;;  %v4193_v18 = vmul.f32 1.442695, %v4188_v55  ;;  %v9712_v26 = vld [vmem:[#allocation16 + $0x50] sm:$0xff] }
0x1322   :  { %v4025_v10 = vmul.f32 %v11930_v44, %v4024_v16  ;;  %v4028_v15 = vsub.f32 1.0, %v4027_v2 }
0x1324   :  { %v4029_v39 = vmul.f32 %v10077_v3, %v4028_v15  ;;  %v4041_v19 = vpack.c.bf16 %v4025_v10, %v4010_v9 }
0x1326   :  { %8963 = vmatmul.msk.bf16.vlgmr.msrb.gmra.mxu0 %vm1617_vm7, %v4041_v19  ;;  %v4030_v22 = vadd.f32 %v10077_v3, %v4029_v39 }
0x1328   :  { %v4034_v59 = vsel %vm4033_vm4, %v10077_v3, %v4030_v22  ;;  %v9711_v3 = vld [vmem:[#allocation16 + $0x48] sm:$0xff] }
0x1329   :  { %v4039_v24 = vsel %vm4036_vm5, %v4038_v42, %v4034_v59  ;;  %4098 = vmatpush.bf16.msrb.mxu1 %v9711_v3 }
0x132a   :  { %v4040_v0 = vmul.f32 %v11936_v40, %v4039_v24 }
0x132c   :  { %v4042_v44 = vpack.c.bf16 %v4040_v0, %v4040_v0 }
0x132d   :  { %4304 = vmatpush.bf16.msra.mxu1 %v9712_v26 }
0x1330   :  { %v11991_v27 = vpop.xlane.xlu0 %4199 }
0x1331   :  { %vm4224_vm3 = vweird.f32 %v11991_v27 }
0x1336   :  { %8964 = vmatmul.msk.bf16.gmra.mxu0 %vm1617_vm7, %v4042_v44 }
0x1338   :  { %v4358_v43 = vpop.xlane.xlu0 %4357 }
0x1339   :  { %v4365_v8 = vsub.f32 %v11951_v58, %v4358_v43 }
0x133b   :  { %v4368_v20 = vmul.f32 1.442695, %v4365_v8 }
0x133d   :  { %10078 = vpow2.f32 %v4368_v20 }
0x1340   :  { %v4364_v21 = vpop.xlane.xlu0 %4363 }
0x1341   :  { %v4367_v12 = vsub.f32 %v11956_v35, %v4364_v21 }
0x1343   :  { %v11997_v49 = vpop.eup %10078  ;;  %v4372_v7 = vmul.f32 1.442695, %v4367_v12 }
0x1344   :  { %v4374_v61 = vsel %vm1617_vm7, %v11997_v49, 0.0 }
0x1345   :  { %10080 = vpow2.f32 %v4372_v7  ;;  %4375 = vadd.xlane.f32.xlu0 %v4374_v61 }
0x134b   :  { %v12001_v40 = vpop.eup %10080  ;;  %v4361_v34 = vpop.xlane.xlu1 %4360 }
0x134c   :  { %v4366_v60 = vsub.f32 %v11961_v31, %v4361_v34  ;;  %v4380_v58 = vsel %vm1617_vm7, %v12001_v40, 0.0 }
0x134d   :  { %4381 = vadd.xlane.f32.xlu1 %v4380_v58 }
0x134e   :  { %v4370_v52 = vmul.f32 1.442695, %v4366_v60 }
0x1350   :  { %10082 = vpow2.f32 %v4370_v52 }
0x1351   :  { %10084 = vpow2.f32 %v4193_v18  ;;  %v12021_v16 = vpop.xlane.xlu2 %4196 }
0x1352   :  { %vm4209_vm10 = vweird.f32 %v12021_v16 }
0x1356   :  { %v12006_v35 = vpop.eup %10082 }
0x1357   :  { %v4377_v38 = vsel %vm1617_vm7, %v12006_v35, 0.0  ;;  %v12017_v2 = vpop.eup %10084 }
0x1358   :  { %4378 = vadd.xlane.f32.xlu0 %v4377_v38  ;;  %v4201_v6 = vsel %vm1617_vm7, %v12017_v2, 0.0 }
0x1359   :  { %v4504_v10 = vpop.permute.xlu2 %4503 }
0x135a   :  { %v4515_v57 = vsel %vm1586_vm0, %v4504_v10, 0 }
0x1363   :  { %v4433_v50 = vpop.permute.xlu1 %4432 }
0x1364   :  { %v4442_v45 = vsel %vm933_vm11, %v4433_v50, 0 }
0x1365   :  { %4450 = vmatpush.bf16.msrb.mxu3 %v4442_v45 }
0x1366   :  { %4501 = vrot.lane.b32.xlu1 %v11840_v1, %s10885_s22 }
0x136b   :  { %v4431_v31 = vpop.permute.xlu1 %4430 }
0x136c   :  { %4253 = vrot.lane.b32.xlu0 %v11827_v4, %s10912_s15  ;;  %4451 = vmatpush.bf16.msrb.mxu3 %v4431_v31 }
0x1373   :  { %v12031_v37 = vpop.permute.xlu1 %4251 }
0x1396   :  { %4202 = vadd.xlane.f32.xlu0 %v4201_v6  ;;  %v4683_v6 = vpop.permute.xlu2 %4682 }
0x13a3   :  { %v4068_v9 = vpop.f32.mrf.mxu0 }
0x13aa   :  { %4497 = vrot.lane.b32.xlu0 %v11844_v33, %s10885_s22 }
0x13ab   :  { %v4070_v15 = vpop.f32.mrf.mxu0 }
0x13ac   :  { %v4077_v29 = vpack.c.bf16 %v4070_v15, %v4068_v9 }
0x13ae   :  { %8969 = vmatmul.msk.bf16.vlgmr.msrb.gmra.mxu1 %vm1586_vm0, %v4077_v29 }
0x13af   :  { %4523 = vmatpush.bf16.xpose.msrb.mxu1 %v4515_v57  ;;  %v4213_v57 = vand.u32 2147483647, %v12021_v16 }
0x13b2   :  { %4678 = vrot.lane.b32.xlu0 %v11848_v11, %s10914_s4 }
0x13b3   :  { %v4073_v39 = vpop.f32.mrf.mxu0 }
0x13b4   :  { %v4078_v5 = vpack.c.bf16 %v4073_v39, %v4073_v39  ;;  %v4215_v39 = vand.u32 2147483648, %v12021_v16 }
0x13b8   :  { %v4376_v19 = vpop.xlane.xlu0 %4375 }
0x13b9   :  { %10086 = vrcp.f32 %v4376_v19  ;;  %v4392_v45 = vand.u32 2147483647, %v4376_v19  ;;  %v4394_v31 = vand.u32 2147483648, %v4376_v19  ;;  %vm4388_vm9 = vweird.f32 %v4376_v19 }
0x13ba   :  { %10088 = vrcp.f32 %v11991_v27 }
0x13bb   :  { %v4075_v22 = vpop.f32.mrf.mxu0  ;;  %10090 = vrcp.f32 %v12021_v16  ;;  %vm4393_vm15 = vcmp.eq.f32.partialorder %v4392_v45, 8.507059e+37 }
0x13be   :  { %8970 = vmatmul.msk.bf16.gmra.mxu1 %vm1586_vm0, %v4078_v5 }
0x13bf   :  { %v10087_v59 = vpop.eup %10086 }
0x13c0   :  { %v12034_v42 = vpop.eup %10088  ;;  %v4384_v0 = vmul.f32 %v10087_v59, %v4376_v19  ;;  %v12038_v44 = vpop.xlane.xlu1 %4381  ;;  %vm4389_vm6 = vweird.f32 %v10087_v59  ;;  %v4395_v19 = vor.u32 1.1754944e-38, %v4394_v31 }
0x13c1   :  { %v12036_v24 = vpop.eup %10090  ;;  %v4220_v43 = vmul.f32 %v12034_v42, %v11991_v27  ;;  %10092 = vrcp.f32 %v12038_v44  ;;  %vm4225_vm8 = vweird.f32 %v12034_v42  ;;  %vm12056_vm13 = vmor %vm4388_vm9, %vm4389_vm6  ;;  %vm4214_vm9 = vcmp.eq.f32.partialorder %v4213_v57, 8.507059e+37 }
0x13c2   :  { %v4205_v8 = vmul.f32 %v12036_v24, %v12021_v16  ;;  %v4385_v20 = vsub.f32 1.0, %v4384_v0  ;;  %vm4210_vm12 = vweird.f32 %v12036_v24  ;;  %vm12074_vm5 = vmor %vm4224_vm3, %vm4225_vm8  ;;  %v4694_v57 = vsel %vm1586_vm0, %v4683_v6, 0 }
0x13c3   :  { %v4221_v12 = vsub.f32 1.0, %v4220_v43  ;;  %vm12064_vm1 = vmor %vm4209_vm10, %vm4210_vm12  ;;  %vm4418_vm12 = vweird.f32 %v12038_v44 }
0x13c4   :  { %v4206_v7 = vsub.f32 1.0, %v4205_v8  ;;  %v4386_v61 = vmul.f32 %v10087_v59, %v4385_v20 }
0x13c5   :  { %v4222_v60 = vmul.f32 %v12034_v42, %v4221_v12 }
0x13c6   :  { %v4207_v52 = vmul.f32 %v12036_v24, %v4206_v7  ;;  %v4387_v38 = vadd.f32 %v10087_v59, %v4386_v61  ;;  %v4228_v7 = vand.u32 2147483647, %v11991_v27 }
0x13c7   :  { %v12045_v34 = vpop.eup %10092  ;;  %v4223_v3 = vadd.f32 %v12034_v42, %v4222_v60 }
0x13c8   :  { %v4414_v55 = vmul.f32 %v12045_v34, %v12038_v44  ;;  %v4208_v26 = vadd.f32 %v12036_v24, %v4207_v52  ;;  %v4391_v10 = vsel %vm12056_vm13, %v10087_v59, %v4387_v38  ;;  %v4230_v59 = vand.u32 2147483648, %v11991_v27 }
0x13c9   :  { %v4396_v20 = vsel %vm4393_vm15, %v4395_v19, %v4391_v10  ;;  %v4227_v60 = vsel %vm12074_vm5, %v12034_v42, %v4223_v3  ;;  %v4216_v52 = vor.u32 1.1754944e-38, %v4215_v39  ;;  %vm4229_vm8 = vcmp.eq.f32.partialorder %v4228_v7, 8.507059e+37  ;;  %v4681_v19 = vpop.permute.xlu2 %4680 }
0x13ca   :  { %v4415_v0 = vsub.f32 1.0, %v4414_v55  ;;  %v4231_v27 = vor.u32 1.1754944e-38, %v4230_v59  ;;  %vm4419_vm10 = vweird.f32 %v12045_v34  ;;  %v4422_v10 = vand.u32 2147483647, %v12038_v44 }
0x13cb   :  { %v4379_v21 = vpop.xlane.xlu0 %4378  ;;  %vm4420_vm13 = vmor %vm4418_vm12, %vm4419_vm10 }
0x13cc   :  { %10094 = vrcp.f32 %v4379_v21  ;;  %v4409_v9 = vand.u32 2147483648, %v4379_v21  ;;  %v4407_v29 = vand.u32 2147483647, %v4379_v21  ;;  %vm4403_vm2 = vweird.f32 %v4379_v21 }
0x13cd   :  { %v4416_v45 = vmul.f32 %v12045_v34, %v4415_v0 }
0x13ce   :  { %v4410_v16 = vor.u32 1.1754944e-38, %v4409_v9  ;;  %vm4408_vm6 = vcmp.eq.f32.partialorder %v4407_v29, 8.507059e+37 }
0x13cf   :  { %v4417_v3 = vadd.f32 %v12045_v34, %v4416_v45 }
0x13d2   :  { %v10095_v58 = vpop.eup %10094 }
0x13d3   :  { %v4399_v50 = vmul.f32 %v10095_v58, %v4379_v21  ;;  %vm4404_vm14 = vweird.f32 %v10095_v58  ;;  %v4212_v21 = vsel %vm12064_vm1, %v12036_v24, %v4208_v26  ;;  %v4232_v26 = vsel %vm4229_vm8, %v4231_v27, %v4227_v60 }
0x13d4   :  { %vm4405_vm4 = vmor %vm4403_vm2, %vm4404_vm14  ;;  %v4217_v55 = vsel %vm4214_vm9, %v4216_v52, %v4212_v21  ;;  %v4233_v9 = vmul.f32 %v11946_v54, %v4232_v26  ;;  %vm4423_vm14 = vcmp.eq.f32.partialorder %v4422_v10, 8.507059e+37  ;;  %v4677_v26 = vpop.permute.xlu2 %4676 }
0x13d5   :  { %v4400_v18 = vsub.f32 1.0, %v4399_v50  ;;  %v4397_v50 = vmul.f32 %v11997_v49, %v4396_v20  ;;  %v4218_v42 = vmul.f32 %v11965_v14, %v4217_v55  ;;  %v9713_v49 = vld [vmem:[#allocation16 + $0x58] sm:$0xff] }
0x13d7   :  { %v4401_v15 = vmul.f32 %v10095_v58, %v4400_v18  ;;  %v4249_v14 = vpack.c.bf16 %v4233_v9, %v4218_v42 }
0x13d8   :  { %v4502_v22 = vpop.permute.xlu1 %4501 }
0x13d9   :  { %v4402_v43 = vadd.f32 %v10095_v58, %v4401_v15  ;;  %v4512_v8 = vsel %vm1586_vm0, %v4502_v22, 0  ;;  %v4421_v15 = vsel %vm4420_vm13, %v12045_v34, %v4417_v3 }
0x13da   :  { %4524 = vmatpush.bf16.xpose.msrb.mxu1 %v4512_v8 }
0x13db   :  { %v4406_v61 = vsel %vm4405_vm4, %v10095_v58, %v4402_v43 }
0x13dc   :  { %v4411_v38 = vsel %vm4408_vm6, %v4410_v16, %v4406_v61  ;;  %v4500_v9 = vpop.permute.xlu2 %4499 }
0x13dd   :  { %v4412_v31 = vmul.f32 %v12006_v35, %v4411_v38  ;;  %v4424_v35 = vand.u32 2147483648, %v12038_v44  ;;  %v4691_v44 = vsel %vm1586_vm0, %v4681_v19, 0 }
0x13de   :  { %v4254_v18 = vpop.permute.xlu0 %4253 }
0x13df   :  { %v4263_v24 = vsel %vm933_vm11, %v4254_v18, 0  ;;  %v4428_v58 = vpack.c.bf16 %v4412_v31, %v4397_v50  ;;  %v4425_v29 = vor.u32 1.1754944e-38, %v4424_v35 }
0x13e0   :  { %4271 = vmatpush.bf16.msra.mxu0 %v4263_v24 }
0x13e1   :  { %8989 = vmatmul.msk.bf16.vlgmr.msrb.gmra.mxu3 %vm1617_vm7, %v4428_v58  ;;  %v4426_v39 = vsel %vm4423_vm14, %v4425_v29, %v4421_v15 }
0x13e2   :  { %v4427_v54 = vmul.f32 %v12001_v40, %v4426_v39 }
0x13e4   :  { %4272 = vmatpush.bf16.msra.mxu0 %v12031_v37  ;;  %v4429_v22 = vpack.c.bf16 %v4427_v54, %v4427_v54 }
0x13e7   :  { %8979 = vmatmul.msk.bf16.vlgmr.msra.gmra.mxu0 %vm1617_vm7, %v4249_v14 }
0x13e8   :  { %4483 = vmatpush.bf16.msrb.mxu0 %v9713_v49 }
0x13ec   :  { %4702 = vmatpush.bf16.xpose.msra.mxu0 %v4694_v57 }
0x13f1   :  { %8990 = vmatmul.msk.bf16.gmra.mxu3 %vm1617_vm7, %v4429_v22 }
0x13f4   :  { %4703 = vmatpush.bf16.xpose.msra.mxu0 %v4691_v44 }
0x1409   :  { %v4203_v37 = vpop.xlane.xlu0 %4202 }
0x140a   :  { %10096 = vrcp.f32 %v4203_v37  ;;  %v4245_v43 = vand.u32 2147483648, %v4203_v37  ;;  %v4243_v59 = vand.u32 2147483647, %v4203_v37  ;;  %vm4239_vm1 = vweird.f32 %v4203_v37 }
0x140c   :  { %v4246_v40 = vor.u32 1.1754944e-38, %v4245_v43  ;;  %vm4244_vm3 = vcmp.eq.f32.partialorder %v4243_v59, 8.507059e+37 }
0x1410   :  { %v10097_v34 = vpop.eup %10096 }
0x1411   :  { %v4235_v5 = vmul.f32 %v10097_v34, %v4203_v37  ;;  %vm4240_vm15 = vweird.f32 %v10097_v34 }
0x1412   :  { %vm4241_vm2 = vmor %vm4239_vm1, %vm4240_vm15 }
0x1413   :  { %v4236_v0 = vsub.f32 1.0, %v4235_v5 }
0x1415   :  { %v4237_v8 = vmul.f32 %v10097_v34, %v4236_v0 }
0x1417   :  { %v4238_v20 = vadd.f32 %v10097_v34, %v4237_v8 }
0x1419   :  { %v4242_v16 = vsel %vm4241_vm2, %v10097_v34, %v4238_v20 }
0x141a   :  { %v4247_v12 = vsel %vm4244_vm3, %v4246_v40, %v4242_v16 }
0x141b   :  { %v4248_v7 = vmul.f32 %v12017_v2, %v4247_v12 }
0x141c   :  { %v4498_v42 = vpop.permute.xlu0 %4497 }
0x141d   :  { %v4250_v21 = vpack.c.bf16 %v4248_v7, %v4248_v7 }
0x141f   :  { %8980 = vmatmul.msk.bf16.gmra.mxu0 %vm1617_vm7, %v4250_v21 }
0x1424   :  { %v4679_v6 = vpop.permute.xlu0 %4678 }
0x142b   :  { %v4100_v61 = vpop.f32.mrf.mxu1 }
0x142c   :  { %v4131_v10 = vadd.f32 %v11926_v63, %v4100_v61 }
0x1433   :  { %v12106_v60 = vpop.f32.mrf.mxu1 }
0x143b   :  { %v4105_v52 = vpop.f32.mrf.mxu1 }
0x143c   :  { %v4136_v63 = vadd.f32 %v11938_v13, %v4105_v52 }
0x1443   :  { %v4107_v38 = vpop.f32.mrf.mxu1 }
0x1464   :  { %v4274_v50 = vpop.f32.mrf.mxu0  ;;  %v4453_v45 = vpop.f32.mrf.mxu3 }
0x146c   :  { %v4276_v31 = vpop.f32.mrf.mxu0  ;;  %v4455_v27 = vpop.f32.mrf.mxu3 }
0x146d   :  { %v4283_v55 = vpack.c.bf16 %v4276_v31, %v4274_v50  ;;  %v4462_v18 = vpack.c.bf16 %v4455_v27, %v4453_v45 }
0x146f   :  { %8985 = vmatmul.msk.bf16.vlgmr.msra.gmra.mxu1 %vm1586_vm0, %v4283_v55  ;;  %8995 = vmatmul.msk.bf16.vlgmr.msrb.gmra.mxu0 %vm1586_vm0, %v4462_v18 }
0x1474   :  { %v4458_v24 = vpop.f32.mrf.mxu3 }
0x1475   :  { %v4463_v58 = vpack.c.bf16 %v4458_v24, %v4458_v24 }
0x147c   :  { %v4460_v2 = vpop.f32.mrf.mxu3 }
0x147f   :  { %8996 = vmatmul.msk.bf16.gmra.mxu0 %vm1586_vm0, %v4463_v58 }
0x148f   :  { %9007 = vmatmul.msk.bf16.vlgmr.msra.gmra.mxu0 %vm1586_vm0, %v4677_v26 }
0x149c   :  { %v4279_v49 = vpop.f32.mrf.mxu0 }
0x149d   :  { %v4284_v3 = vpack.c.bf16 %v4279_v49, %v4279_v49 }
0x149f   :  { %8986 = vmatmul.msk.bf16.gmra.mxu1 %vm1586_vm0, %v4284_v3  ;;  %9008 = vmatmul.msk.bf16.gmra.mxu0 %vm1586_vm0, %v4679_v6 }
0x14a4   :  { %v4281_v35 = vpop.f32.mrf.mxu0 }
0x14af   :  { %8997 = vmatmul.msk.bf16.vlgmr.msrb.gmra.mxu1 %vm1586_vm0, %v4498_v42 }
0x14bf   :  { %8998 = vmatmul.msk.bf16.gmra.mxu1 %vm1586_vm0, %v4500_v9 }
0x14ec   :  { %v4306_v14 = vpop.f32.mrf.mxu1  ;;  %v4485_v15 = vpop.f32.mrf.mxu0 }
0x14ed   :  { %v4315_v29 = vadd.f32 %v4306_v14, %v4131_v10 }
0x14ef   :  { %v12117_v57 = vadd.f32 %v4485_v15, %v4315_v29 }
0x14f4   :  { %v12119_v39 = vpop.f32.mrf.mxu0  ;;  %v12123_v34 = vpop.f32.mrf.mxu1 }
0x14fc   :  { %v4490_v54 = vpop.f32.mrf.mxu0 }
0x1504   :  { %v4492_v19 = vpop.f32.mrf.mxu0 }
0x150c   :  { %v4705_v44 = vpop.f32.mrf.mxu0 }
0x150d   :  { %v4706_v22 = vadd.f32 %v4705_v44, %v11309_v41 }
0x150f   :  { %v4714_v37 = vsel %vm1617_vm7, %v4706_v22, -inf }
0x1510   :  { %4715 = vmax.xlane.f32.xlu0 %v4714_v37 }
0x1514   :  { %v4707_v5 = vpop.f32.mrf.mxu0 }
0x1515   :  { %v4708_v21 = vadd.f32 %v4707_v5, %v11314_v47 }
0x1517   :  { %v4717_v38 = vsel %vm1617_vm7, %v4708_v21, -inf }
0x151c   :  { %v4311_v0 = vpop.f32.mrf.mxu1  ;;  %v4710_v43 = vpop.f32.mrf.mxu0 }
0x151d   :  { %v4317_v8 = vadd.f32 %v4311_v0, %v4136_v63  ;;  %v4711_v55 = vadd.f32 %v4710_v43, %v11319_v53 }
0x151f   :  { %v12126_v59 = vadd.f32 %v4490_v54, %v4317_v8  ;;  %v4720_v18 = vsel %vm1617_vm7, %v4711_v55, -inf }
0x1524   :  { %v4313_v20 = vpop.f32.mrf.mxu1  ;;  %v4712_v40 = vpop.f32.mrf.mxu0  ;;  %4790 = vrot.lane.b32.xlu0 %v11827_v4, %s10914_s4 }
0x152c   :  { %v4526_v16 = vpop.f32.mrf.mxu1 }
0x152d   :  { %v4527_v12 = vadd.f32 %v4526_v16, %v11309_v41 }
0x152f   :  { %v4535_v7 = vsel %vm1617_vm7, %v4527_v12, -inf }
0x1530   :  { %4536 = vmax.xlane.f32.xlu2 %v4535_v7 }
0x1534   :  { %v4528_v61 = vpop.f32.mrf.mxu1 }
0x1535   :  { %v4529_v13 = vadd.f32 %v4528_v61, %v11314_v47  ;;  %v9714_v61 = vld [vmem:[#allocation16 + $0x60] sm:$0xff] }
0x1536   :  { %4662 = vmatpush.bf16.msra.mxu3 %v9714_v61 }
0x1537   :  { %v4538_v52 = vsel %vm1617_vm7, %v4529_v13, -inf }
0x1538   :  { %4539 = vmax.xlane.f32.xlu1 %v4538_v52  ;;  %4718 = vmax.xlane.f32.xlu2 %v4717_v38 }
0x153c   :  { %v4531_v50 = vpop.f32.mrf.mxu1 }
0x153d   :  { %v4532_v45 = vadd.f32 %v4531_v50, %v11319_v53 }
0x153f   :  { %v4541_v31 = vsel %vm1617_vm7, %v4532_v45, -inf }
0x1540   :  { %4542 = vmax.xlane.f32.xlu1 %v4541_v31 }
0x1544   :  { %v4533_v27 = vpop.f32.mrf.mxu1 }
0x154e   :  { %4721 = vmax.xlane.f32.xlu0 %v4720_v18 }
0x1583   :  { %v4716_v24 = vpop.xlane.xlu0 %4715 }
0x1584   :  { %v4723_v2 = vsub.f32 %v4706_v22, %v4716_v24 }
0x1586   :  { %v4726_v58 = vmul.f32 1.442695, %v4723_v2 }
0x1588   :  { %10098 = vpow2.f32 %v4726_v58 }
0x158e   :  { %v12140_v26 = vpop.eup %10098 }
0x158f   :  { %v4732_v42 = vsel %vm1617_vm7, %v12140_v26, 0.0 }
0x1590   :  { %4733 = vadd.xlane.f32.xlu0 %v4732_v42 }
0x1596   :  { %v4791_v49 = vpop.permute.xlu0 %4790 }
0x1597   :  { %v4800_v3 = vsel %vm933_vm11, %v4791_v49, 0 }
0x1598   :  { %4808 = vmatpush.bf16.msra.mxu1 %v4800_v3 }
0x15a3   :  { %v4537_v6 = vpop.xlane.xlu2 %4536 }
0x15a4   :  { %v4544_v35 = vsub.f32 %v4527_v12, %v4537_v6  ;;  %4788 = vrot.lane.b32.xlu0 %v11832_v62, %s10914_s4 }
0x15a6   :  { %v4547_v9 = vmul.f32 1.442695, %v4544_v35 }
0x15a8   :  { %10100 = vpow2.f32 %v4547_v9 }
0x15ab   :  { %v4540_v10 = vpop.xlane.xlu1 %4539  ;;  %v4719_v14 = vpop.xlane.xlu2 %4718 }
0x15ac   :  { %v4545_v15 = vsub.f32 %v4529_v13, %v4540_v10  ;;  %v4724_v29 = vsub.f32 %v4708_v21, %v4719_v14  ;;  %5040 = vrot.lane.b32.xlu0 %v11834_v51, %s10892_s6 }
0x15ae   :  { %v12149_v54 = vpop.eup %10100  ;;  %v4549_v19 = vmul.f32 1.442695, %v4545_v15  ;;  %v4728_v44 = vmul.f32 1.442695, %v4724_v29 }
0x15af   :  { %v4553_v22 = vsel %vm1617_vm7, %v12149_v54, 0.0 }
0x15b0   :  { %10102 = vpow2.f32 %v4549_v19  ;;  %4554 = vadd.xlane.f32.xlu2 %v4553_v22 }
0x15b1   :  { %10104 = vpow2.f32 %v4728_v44 }
0x15b3   :  { %v4543_v43 = vpop.xlane.xlu1 %4542 }
0x15b4   :  { %4861 = vrot.lane.b32.xlu0 %v11834_v51, %s10915_s16  ;;  %v4546_v20 = vsub.f32 %v4532_v45, %v4543_v43 }
0x15b6   :  { %v12155_v37 = vpop.eup %10102  ;;  %v4551_v16 = vmul.f32 1.442695, %v4546_v20 }
0x15b7   :  { %v12157_v5 = vpop.eup %10104  ;;  %v4556_v63 = vsel %vm1617_vm7, %v12155_v37, 0.0 }
0x15b8   :  { %4557 = vadd.xlane.f32.xlu1 %v4556_v63  ;;  %v4735_v0 = vsel %vm1617_vm7, %v12157_v5, 0.0 }
0x15b9   :  { %4736 = vadd.xlane.f32.xlu2 %v4735_v0 }
0x15bc   :  { %5038 = vrot.lane.b32.xlu0 %v11840_v1, %s10892_s6 }
0x15c1   :  { %v4722_v51 = vpop.xlane.xlu0 %4721 }
0x15c2   :  { %v4725_v8 = vsub.f32 %v4711_v55, %v4722_v51 }
0x15c4   :  { %4859 = vrot.lane.b32.xlu0 %v11840_v1, %s10915_s16  ;;  %v4730_v40 = vmul.f32 1.442695, %v4725_v8 }
0x15c6   :  { %10106 = vpow2.f32 %v4730_v40 }
0x15c7   :  { %10108 = vpow2.f32 %v4551_v16 }
0x15cc   :  { %5034 = vrot.lane.b32.xlu0 %v11844_v33, %s10892_s6  ;;  %v12175_v1 = vpop.eup %10106 }
0x15cd   :  { %v12177_v12 = vpop.eup %10108  ;;  %v4738_v7 = vsel %vm1617_vm7, %v12175_v1, 0.0 }
0x15ce   :  { %v4559_v21 = vsel %vm1617_vm7, %v12177_v12, 0.0 }
0x15d1   :  { %4609 = vrot.lane.b32.xlu2 %v11832_v62, %s10885_s22  ;;  %4611 = vrot.lane.b32.xlu1 %v11827_v4, %s10885_s22 }
0x15d4   :  { %4857 = vrot.lane.b32.xlu0 %v11848_v11, %s10915_s16 }
0x15fa   :  { %4739 = vadd.xlane.f32.xlu2 %v4738_v7 }
0x15fb   :  { %4560 = vadd.xlane.f32.xlu1 %v4559_v21 }
0x1603   :  { %v4734_v13 = vpop.xlane.xlu0 %4733 }
0x1604   :  { %10110 = vrcp.f32 %v4734_v13  ;;  %v4752_v35 = vand.u32 2147483648, %v4734_v13  ;;  %vm4746_vm5 = vweird.f32 %v4734_v13  ;;  %v4750_v14 = vand.u32 2147483647, %v4734_v13 }
0x1606   :  { %v4753_v63 = vor.u32 1.1754944e-38, %v4752_v35  ;;  %vm4751_vm8 = vcmp.eq.f32.partialorder %v4750_v14, 8.507059e+37 }
0x160a   :  { %v10111_v45 = vpop.eup %10110 }
0x160b   :  { %v4742_v27 = vmul.f32 %v10111_v45, %v4734_v13  ;;  %vm4747_vm4 = vweird.f32 %v10111_v45 }
0x160c   :  { %vm4748_vm6 = vmor %vm4746_vm5, %vm4747_vm4 }
0x160d   :  { %v4743_v18 = vsub.f32 1.0, %v4742_v27 }
0x160f   :  { %v4744_v58 = vmul.f32 %v10111_v45, %v4743_v18 }
0x1611   :  { %v4745_v6 = vadd.f32 %v10111_v45, %v4744_v58 }
0x1612   :  { %5036 = vrot.lane.b32.xlu2 %v11848_v11, %s10892_s6 }
0x1613   :  { %v4749_v22 = vsel %vm4748_vm6, %v10111_v45, %v4745_v6 }
0x1614   :  { %4855 = vrot.lane.b32.xlu1 %v11844_v33, %s10915_s16  ;;  %v4754_v40 = vsel %vm4751_vm8, %v4753_v63, %v4749_v22 }
0x1616   :  { %v4789_v52 = vpop.permute.xlu0 %4788 }
0x1617   :  { %4809 = vmatpush.bf16.msra.mxu1 %v4789_v52  ;;  %v4755_v52 = vmul.f32 %v12140_v26, %v4754_v40 }
0x161e   :  { %v12187_v38 = vpop.permute.xlu0 %5040 }
0x1623   :  { %v12189_v50 = vpop.xlane.xlu2 %4554 }
0x1624   :  { %10112 = vrcp.f32 %v12189_v50  ;;  %vm4567_vm3 = vweird.f32 %v12189_v50  ;;  %v4571_v58 = vand.u32 2147483647, %v12189_v50 }
0x1626   :  { %v4862_v31 = vpop.permute.xlu0 %4861  ;;  %vm4572_vm6 = vcmp.eq.f32.partialorder %v4571_v58, 8.507059e+37 }
0x1627   :  { %v4873_v55 = vsel %vm1586_vm0, %v4862_v31, 0 }
0x1628   :  { %4881 = vmatpush.bf16.xpose.msrb.mxu3 %v4873_v55 }
0x162a   :  { %v12195_v2 = vpop.eup %10112 }
0x162b   :  { %v4558_v11 = vpop.xlane.xlu1 %4557  ;;  %v4563_v49 = vmul.f32 %v12195_v2, %v12189_v50  ;;  %vm4568_vm15 = vweird.f32 %v12195_v2 }
0x162c   :  { %10114 = vrcp.f32 %v4558_v11  ;;  %v4737_v24 = vpop.xlane.xlu2 %4736  ;;  %v4588_v45 = vand.u32 2147483648, %v4558_v11  ;;  %vm4582_vm1 = vweird.f32 %v4558_v11  ;;  %v4586_v55 = vand.u32 2147483647, %v4558_v11  ;;  %vm4569_vm4 = vmor %vm4567_vm3, %vm4568_vm15 }
0x162d   :  { %10116 = vrcp.f32 %v4737_v24  ;;  %v4564_v29 = vsub.f32 1.0, %v4563_v49  ;;  %v4767_v0 = vand.u32 2147483648, %v4737_v24  ;;  %v4765_v20 = vand.u32 2147483647, %v4737_v24 }
0x162e   :  { %v12193_v33 = vpop.permute.xlu0 %5038  ;;  %vm4761_vm10 = vweird.f32 %v4737_v24  ;;  %v4589_v26 = vor.u32 1.1754944e-38, %v4588_v45  ;;  %vm4587_vm5 = vcmp.eq.f32.partialorder %v4586_v55, 8.507059e+37 }
0x162f   :  { %v4565_v16 = vmul.f32 %v12195_v2, %v4564_v29  ;;  %v4768_v21 = vor.u32 1.1754944e-38, %v4767_v0  ;;  %vm4766_vm14 = vcmp.eq.f32.partialorder %v4765_v20, 8.507059e+37 }
0x1631   :  { %v4566_v27 = vadd.f32 %v12195_v2, %v4565_v16 }
0x1632   :  { %v10115_v42 = vpop.eup %10114 }
0x1633   :  { %v10117_v3 = vpop.eup %10116  ;;  %v4578_v9 = vmul.f32 %v10115_v42, %v4558_v11  ;;  %vm4583_vm13 = vweird.f32 %v10115_v42  ;;  %v4570_v6 = vsel %vm4569_vm4, %v12195_v2, %v4566_v27  ;;  %v5052_v2 = vsel %vm1586_vm0, %v12187_v38, 0 }
0x1634   :  { %v4757_v10 = vmul.f32 %v10117_v3, %v4737_v24  ;;  %vm4762_vm9 = vweird.f32 %v10117_v3  ;;  %v4573_v24 = vand.u32 2147483648, %v12189_v50  ;;  %vm4584_vm2 = vmor %vm4582_vm1, %vm4583_vm13  ;;  %v9715_v50 = vld [vmem:[#allocation16 + $0x68] sm:$0xff] }
0x1635   :  { %v4579_v15 = vsub.f32 1.0, %v4578_v9  ;;  %vm4763_vm12 = vmor %vm4761_vm10, %vm4762_vm9 }
0x1636   :  { %v4758_v19 = vsub.f32 1.0, %v4757_v10  ;;  %v4860_v44 = vpop.permute.xlu0 %4859  ;;  %v4574_v35 = vor.u32 1.1754944e-38, %v4573_v24 }
0x1637   :  { %v4870_v51 = vsel %vm1586_vm0, %v4860_v44, 0  ;;  %v4580_v43 = vmul.f32 %v10115_v42, %v4579_v15  ;;  %v4610_v15 = vpop.permute.xlu2 %4609 }
0x1638   :  { %v4759_v8 = vmul.f32 %v10117_v3, %v4758_v19  ;;  %4882 = vmatpush.bf16.xpose.msrb.mxu3 %v4870_v51  ;;  %v4575_v10 = vsel %vm4572_vm6, %v4574_v35, %v4570_v6  ;;  %v5049_v19 = vsel %vm1586_vm0, %v12193_v33, 0 }
0x1639   :  { %v4581_v61 = vadd.f32 %v10115_v42, %v4580_v43 }
0x163a   :  { %v4760_v7 = vadd.f32 %v10117_v3, %v4759_v8 }
0x163b   :  { %v4585_v49 = vsel %vm4584_vm2, %v10115_v42, %v4581_v61  ;;  %v4576_v42 = vmul.f32 %v12149_v54, %v4575_v10 }
0x163c   :  { %v4764_v13 = vsel %vm4763_vm12, %v10117_v3, %v4760_v7  ;;  %v4590_v11 = vsel %vm4587_vm5, %v4589_v26, %v4585_v49 }
0x163d   :  { %v4769_v31 = vsel %vm4766_vm14, %v4768_v21, %v4764_v13  ;;  %v4591_v14 = vmul.f32 %v12155_v37, %v4590_v11 }
0x163e   :  { %v4770_v18 = vmul.f32 %v12157_v5, %v4769_v31 }
0x163f   :  { %v4607_v29 = vpack.c.bf16 %v4591_v14, %v4576_v42 }
0x1640   :  { %v4786_v3 = vpack.c.bf16 %v4770_v18, %v4755_v52 }
0x1642   :  { %9009 = vmatmul.msk.bf16.vlgmr.msra.gmra.mxu1 %vm1617_vm7, %v4786_v3 }
0x1643   :  { %v4612_v9 = vpop.permute.xlu1 %4611 }
0x1644   :  { %v4621_v5 = vsel %vm933_vm11, %v4612_v9, 0 }
0x1645   :  { %4629 = vmatpush.bf16.msrb.mxu2 %v4621_v5 }
0x1649   :  { %4630 = vmatpush.bf16.msrb.mxu2 %v4610_v15 }
0x164c   :  { %8999 = vmatmul.msk.bf16.vlgmr.msrb.gmra.mxu2 %vm1617_vm7, %v4607_v29 }
0x164d   :  { %4841 = vmatpush.bf16.msra.mxu2 %v9715_v50  ;;  %v5035_v50 = vpop.permute.xlu0 %5034 }
0x1651   :  { %5060 = vmatpush.bf16.xpose.msrb.mxu2 %v5052_v2 }
0x1655   :  { %v4858_v29 = vpop.permute.xlu0 %4857 }
0x1659   :  { %5061 = vmatpush.bf16.xpose.msrb.mxu2 %v5049_v19 }
0x166d   :  { %v4740_v44 = vpop.xlane.xlu2 %4739 }
0x166e   :  { %10118 = vrcp.f32 %v4740_v44  ;;  %v4561_v37 = vpop.xlane.xlu1 %4560  ;;  %v4782_v43 = vand.u32 2147483648, %v4740_v44  ;;  %v4780_v40 = vand.u32 2147483647, %v4740_v44  ;;  %vm4776_vm10 = vweird.f32 %v4740_v44 }
0x166f   :  { %10120 = vrcp.f32 %v4561_v37  ;;  %v4603_v38 = vand.u32 2147483648, %v4561_v37  ;;  %v4601_v7 = vand.u32 2147483647, %v4561_v37  ;;  %vm4597_vm13 = vweird.f32 %v4561_v37 }
0x1670   :  { %v4783_v21 = vor.u32 1.1754944e-38, %v4782_v43  ;;  %vm4781_vm15 = vcmp.eq.f32.partialorder %v4780_v40, 8.507059e+37 }
0x1671   :  { %v4604_v13 = vor.u32 1.1754944e-38, %v4603_v38  ;;  %vm4602_vm1 = vcmp.eq.f32.partialorder %v4601_v7, 8.507059e+37 }
0x1674   :  { %v10119_v22 = vpop.eup %10118 }
0x1675   :  { %v10121_v54 = vpop.eup %10120  ;;  %v4772_v63 = vmul.f32 %v10119_v22, %v4740_v44  ;;  %vm4777_vm9 = vweird.f32 %v10119_v22  ;;  %v5037_v15 = vpop.permute.xlu2 %5036 }
0x1676   :  { %v4593_v0 = vmul.f32 %v10121_v54, %v4561_v37  ;;  %vm4598_vm8 = vweird.f32 %v10121_v54  ;;  %vm4778_vm12 = vmor %vm4776_vm10, %vm4777_vm9 }
0x1677   :  { %v4773_v51 = vsub.f32 1.0, %v4772_v63  ;;  %vm4599_vm14 = vmor %vm4597_vm13, %vm4598_vm8 }
0x1678   :  { %v4594_v8 = vsub.f32 1.0, %v4593_v0 }
0x1679   :  { %v4774_v20 = vmul.f32 %v10119_v22, %v4773_v51 }
0x167a   :  { %v4595_v16 = vmul.f32 %v10121_v54, %v4594_v8 }
0x167b   :  { %v4775_v33 = vadd.f32 %v10119_v22, %v4774_v20 }
0x167c   :  { %v4596_v61 = vadd.f32 %v10121_v54, %v4595_v16 }
0x167d   :  { %v4779_v52 = vsel %vm4778_vm12, %v10119_v22, %v4775_v33 }
0x167e   :  { %v4784_v45 = vsel %vm4781_vm15, %v4783_v21, %v4779_v52  ;;  %v4600_v31 = vsel %vm4599_vm14, %v10121_v54, %v4596_v61 }
0x167f   :  { %v4785_v27 = vmul.f32 %v12175_v1, %v4784_v45  ;;  %v4605_v55 = vsel %vm4602_vm1, %v4604_v13, %v4600_v31 }
0x1680   :  { %v4606_v18 = vmul.f32 %v12177_v12, %v4605_v55 }
0x1681   :  { %v4787_v24 = vpack.c.bf16 %v4785_v27, %v4785_v27 }
0x1682   :  { %v4608_v58 = vpack.c.bf16 %v4606_v18, %v4606_v18 }
0x1683   :  { %9010 = vmatmul.msk.bf16.gmra.mxu1 %vm1617_vm7, %v4787_v24 }
0x1684   :  { %9000 = vmatmul.msk.bf16.gmra.mxu2 %vm1617_vm7, %v4608_v58 }
0x1686   :  { %v4856_v42 = vpop.permute.xlu1 %4855 }
0x16bf   :  { %v4811_v49 = vpop.f32.mrf.mxu1 }
0x16c7   :  { %v4813_v3 = vpop.f32.mrf.mxu1 }
0x16c8   :  { %v4820_v26 = vpack.c.bf16 %v4813_v3, %v4811_v49 }
0x16ca   :  { %9015 = vmatmul.msk.bf16.vlgmr.msra.gmra.mxu2 %vm1586_vm0, %v4820_v26 }
0x16cf   :  { %v4632_v6 = vpop.f32.mrf.mxu2 }
0x16d7   :  { %v4634_v35 = vpop.f32.mrf.mxu2 }
0x16d8   :  { %v4641_v11 = vpack.c.bf16 %v4634_v35, %v4632_v6 }
0x16da   :  { %9005 = vmatmul.msk.bf16.vlgmr.msra.gmra.mxu3 %vm1586_vm0, %v4641_v11 }
0x1700   :  { %v4816_v1 = vpop.f32.mrf.mxu1 }
0x1701   :  { %v4821_v9 = vpack.c.bf16 %v4816_v1, %v4816_v1 }
0x1703   :  { %9016 = vmatmul.msk.bf16.gmra.mxu2 %vm1586_vm0, %v4821_v9 }
0x1707   :  { %v4637_v12 = vpop.f32.mrf.mxu2 }
0x1708   :  { %v4642_v5 = vpack.c.bf16 %v4637_v12, %v4637_v12  ;;  %v4818_v10 = vpop.f32.mrf.mxu1 }
0x170a   :  { %9006 = vmatmul.msk.bf16.gmra.mxu3 %vm1586_vm0, %v4642_v5 }
0x170f   :  { %v4639_v14 = vpop.f32.mrf.mxu2 }
0x1713   :  { %9027 = vmatmul.msk.bf16.vlgmr.msrb.gmra.mxu2 %vm1586_vm0, %v5035_v50 }
0x171a   :  { %9017 = vmatmul.msk.bf16.vlgmr.msrb.gmra.mxu3 %vm1586_vm0, %v4856_v42 }
0x1723   :  { %9028 = vmatmul.msk.bf16.gmra.mxu2 %vm1586_vm0, %v5037_v15 }
0x172a   :  { %9018 = vmatmul.msk.bf16.gmra.mxu3 %vm1586_vm0, %v4858_v29 }
0x174d   :  { %v4843_v44 = vpop.f32.mrf.mxu2 }
0x1755   :  { %v12233_v22 = vpop.f32.mrf.mxu2 }
0x175d   :  { %v4664_v2 = vpop.f32.mrf.mxu3 }
0x175e   :  { %v4673_v19 = vadd.f32 %v4664_v2, %v12117_v57 }
0x1760   :  { %v12231_v37 = vadd.f32 %v4843_v44, %v4673_v19 }
0x1765   :  { %v12235_v54 = vpop.f32.mrf.mxu3 }
0x1786   :  { %v4848_v63 = vpop.f32.mrf.mxu2 }
0x178d   :  { %v4669_v0 = vpop.f32.mrf.mxu3 }
0x178e   :  { %v4675_v51 = vadd.f32 %v4669_v0, %v12126_v59  ;;  %v4850_v43 = vpop.f32.mrf.mxu2 }
0x1790   :  { %v12238_v8 = vadd.f32 %v4848_v63, %v4675_v51 }
0x1795   :  { %v4671_v20 = vpop.f32.mrf.mxu3 }
0x1796   :  { %v5063_v38 = vpop.f32.mrf.mxu2 }
0x1797   :  { %v5064_v40 = vadd.f32 %v5063_v38, %v11309_v41 }
0x1799   :  { %v5072_v57 = vsel %vm1617_vm7, %v5064_v40, -inf }
0x179a   :  { %5073 = vmax.xlane.f32.xlu0 %v5072_v57 }
0x179d   :  { %v4884_v16 = vpop.f32.mrf.mxu3 }
0x179e   :  { %v4885_v7 = vadd.f32 %v4884_v16, %v11309_v41  ;;  %v5065_v33 = vpop.f32.mrf.mxu2 }
0x179f   :  { %v5066_v21 = vadd.f32 %v5065_v33, %v11314_v47 }
0x17a0   :  { %v4893_v61 = vsel %vm1617_vm7, %v4885_v7, -inf }
0x17a1   :  { %4894 = vmax.xlane.f32.xlu2 %v4893_v61  ;;  %v5075_v59 = vsel %vm1617_vm7, %v5066_v21, -inf }
0x17a2   :  { %5076 = vmax.xlane.f32.xlu1 %v5075_v59 }
0x17a5   :  { %v4886_v13 = vpop.f32.mrf.mxu3 }
0x17a6   :  { %v4887_v52 = vadd.f32 %v4886_v13, %v11314_v47  ;;  %v5068_v45 = vpop.f32.mrf.mxu2 }
0x17a7   :  { %v5069_v49 = vadd.f32 %v5068_v45, %v11319_v53 }
0x17a8   :  { %v4896_v31 = vsel %vm1617_vm7, %v4887_v52, -inf }
0x17a9   :  { %4897 = vmax.xlane.f32.xlu0 %v4896_v31  ;;  %v5078_v3 = vsel %vm1617_vm7, %v5069_v49, -inf }
0x17ad   :  { %v4889_v27 = vpop.f32.mrf.mxu3 }
0x17ae   :  { %v4890_v55 = vadd.f32 %v4889_v27, %v11319_v53  ;;  %v5070_v18 = vpop.f32.mrf.mxu2 }
0x17b0   :  { %v4899_v24 = vsel %vm1617_vm7, %v4890_v55, -inf }
0x17b1   :  { %4900 = vmax.xlane.f32.xlu1 %v4899_v24 }
0x17b5   :  { %v4891_v58 = vpop.f32.mrf.mxu3 }
0x17bd   :  { %5148 = vrot.lane.b32.xlu0 %v11827_v4, %s10892_s6 }
0x17e7   :  { %5079 = vmax.xlane.f32.xlu0 %v5078_v3 }
0x180d   :  { %v5074_v26 = vpop.xlane.xlu0 %5073 }
0x180e   :  { %v5081_v50 = vsub.f32 %v5064_v40, %v5074_v26 }
0x1810   :  { %v5084_v19 = vmul.f32 1.442695, %v5081_v50 }
0x1814   :  { %v4895_v6 = vpop.xlane.xlu2 %4894 }
0x1815   :  { %v5077_v35 = vpop.xlane.xlu1 %5076  ;;  %v4902_v11 = vsub.f32 %v4885_v7, %v4895_v6 }
0x1816   :  { %v5082_v1 = vsub.f32 %v5066_v21, %v5077_v35 }
0x1817   :  { %v4905_v9 = vmul.f32 1.442695, %v4902_v11 }
0x1818   :  { %v5086_v12 = vmul.f32 1.442695, %v5082_v1 }
0x1819   :  { %10122 = vpow2.f32 %v4905_v9 }
0x181a   :  { %10124 = vpow2.f32 %v5086_v12 }
0x181c   :  { %v4898_v5 = vpop.xlane.xlu0 %4897 }
0x181d   :  { %v4903_v10 = vsub.f32 %v4887_v52, %v4898_v5 }
0x181f   :  { %v12254_v14 = vpop.eup %10122  ;;  %v4907_v42 = vmul.f32 1.442695, %v4903_v10 }
0x1820   :  { %v12256_v15 = vpop.eup %10124  ;;  %v4911_v29 = vsel %vm1617_vm7, %v12254_v14, 0.0 }
0x1821   :  { %10126 = vpow2.f32 %v4907_v42  ;;  %v5093_v2 = vsel %vm1617_vm7, %v12256_v15, 0.0  ;;  %4912 = vadd.xlane.f32.xlu1 %v4911_v29 }
0x1822   :  { %5094 = vadd.xlane.f32.xlu0 %v5093_v2  ;;  %10128 = vpow2.f32 %v5084_v19 }
0x1824   :  { %v4901_v38 = vpop.xlane.xlu1 %4900 }
0x1825   :  { %v4904_v40 = vsub.f32 %v4890_v55, %v4901_v38 }
0x1827   :  { %v12262_v44 = vpop.eup %10126  ;;  %v4909_v57 = vmul.f32 1.442695, %v4904_v40 }
0x1828   :  { %v4914_v63 = vsel %vm1617_vm7, %v12262_v44, 0.0  ;;  %v12266_v0 = vpop.eup %10128 }
0x1829   :  { %4915 = vadd.xlane.f32.xlu2 %v4914_v63  ;;  %v5090_v20 = vsel %vm1617_vm7, %v12266_v0, 0.0  ;;  %10130 = vpow2.f32 %v4909_v57 }
0x182f   :  { %v5149_v51 = vpop.permute.xlu0 %5148  ;;  %v12277_v21 = vpop.eup %10130 }
0x1830   :  { %v5158_v43 = vsel %vm933_vm11, %v5149_v51, 0  ;;  %v4917_v61 = vsel %vm1617_vm7, %v12277_v21, 0.0 }
0x1831   :  { %5091 = vadd.xlane.f32.xlu2 %v5090_v20  ;;  %5166 = vmatpush.bf16.msra.mxu3 %v5158_v43 }
0x1836   :  { %4967 = vrot.lane.b32.xlu0 %v11832_v62, %s10915_s16 }
0x183a   :  { %4969 = vrot.lane.b32.xlu1 %v11827_v4, %s10915_s16 }
0x1849   :  { %5146 = vrot.lane.b32.xlu2 %v11832_v62, %s10892_s6 }
0x185a   :  { %v5080_v16 = vpop.xlane.xlu0 %5079 }
0x185b   :  { %v5083_v7 = vsub.f32 %v5069_v49, %v5080_v16 }
0x185d   :  { %v5088_v33 = vmul.f32 1.442695, %v5083_v7 }
0x185f   :  { %10132 = vpow2.f32 %v5088_v33 }
0x1864   :  { %4918 = vadd.xlane.f32.xlu1 %v4917_v61 }
0x1865   :  { %v12281_v59 = vpop.eup %10132 }
0x1866   :  { %v5096_v4 = vsel %vm1617_vm7, %v12281_v59, 0.0 }
0x1867   :  { %5097 = vadd.xlane.f32.xlu0 %v5096_v4 }
0x1894   :  { %v4913_v62 = vpop.xlane.xlu1 %4912 }
0x1895   :  { %v5095_v13 = vpop.xlane.xlu0 %5094  ;;  %10134 = vrcp.f32 %v4913_v62  ;;  %v4931_v11 = vand.u32 2147483648, %v4913_v62  ;;  %vm4925_vm4 = vweird.f32 %v4913_v62  ;;  %v4929_v10 = vand.u32 2147483647, %v4913_v62 }
0x1896   :  { %10136 = vrcp.f32 %v5095_v13  ;;  %v5125_v57 = vand.u32 2147483648, %v5095_v13  ;;  %vm5119_vm13 = vweird.f32 %v5095_v13  ;;  %v5123_v33 = vand.u32 2147483647, %v5095_v13 }
0x1897   :  { %v4932_v19 = vor.u32 1.1754944e-38, %v4931_v11  ;;  %vm4930_vm12 = vcmp.eq.f32.partialorder %v4929_v10, 8.507059e+37 }
0x1898   :  { %vm5124_vm1 = vcmp.eq.f32.partialorder %v5123_v33, 8.507059e+37 }
0x189b   :  { %v10135_v52 = vpop.eup %10134 }
0x189c   :  { %v4921_v45 = vmul.f32 %v10135_v52, %v4913_v62  ;;  %v4916_v31 = vpop.xlane.xlu2 %4915  ;;  %v10137_v27 = vpop.eup %10136  ;;  %vm4926_vm2 = vweird.f32 %v10135_v52 }
0x189d   :  { %10138 = vrcp.f32 %v4916_v31  ;;  %v5115_v18 = vmul.f32 %v10137_v27, %v5095_v13  ;;  %v4946_v1 = vand.u32 2147483648, %v4916_v31  ;;  %v4944_v5 = vand.u32 2147483647, %v4916_v31  ;;  %vm12285_vm5 = vmor %vm4925_vm4, %vm4926_vm2 }
0x189e   :  { %v4922_v55 = vsub.f32 1.0, %v4921_v45  ;;  %vm4940_vm6 = vweird.f32 %v4916_v31  ;;  %vm5120_vm9 = vweird.f32 %v10137_v27 }
0x189f   :  { %v5116_v49 = vsub.f32 1.0, %v5115_v18  ;;  %v4947_v63 = vor.u32 1.1754944e-38, %v4946_v1  ;;  %vm4945_vm10 = vcmp.eq.f32.partialorder %v4944_v5, 8.507059e+37  ;;  %vm5121_vm14 = vmor %vm5119_vm13, %vm5120_vm9  ;;  %v5126_v18 = vor.u32 1.1754944e-38, %v5125_v57 }
0x18a0   :  { %v4923_v58 = vmul.f32 %v10135_v52, %v4922_v55 }
0x18a1   :  { %v5117_v9 = vmul.f32 %v10137_v27, %v5116_v49 }
0x18a2   :  { %v4924_v35 = vadd.f32 %v10135_v52, %v4923_v58 }
0x18a3   :  { %v10139_v24 = vpop.eup %10138  ;;  %v5118_v51 = vadd.f32 %v10137_v27, %v5117_v9 }
0x18a4   :  { %v4936_v3 = vmul.f32 %v10139_v24, %v4916_v31  ;;  %v5092_v26 = vpop.xlane.xlu2 %5091  ;;  %vm4941_vm3 = vweird.f32 %v10139_v24  ;;  %v4928_v2 = vsel %vm12285_vm5, %v10135_v52, %v4924_v35 }
0x18a5   :  { %10140 = vrcp.f32 %v5092_v26  ;;  %vm4942_vm8 = vmor %vm4940_vm6, %vm4941_vm3  ;;  %v4933_v61 = vsel %vm4930_vm12, %v4932_v19, %v4928_v2  ;;  %v5110_v52 = vand.u32 2147483648, %v5092_v26  ;;  %v5122_v45 = vsel %vm5121_vm14, %v10137_v27, %v5118_v51 }
0x18a6   :  { %v4937_v6 = vsub.f32 1.0, %v4936_v3  ;;  %v5108_v55 = vand.u32 2147483647, %v5092_v26  ;;  %vm5104_vm2 = vweird.f32 %v5092_v26  ;;  %v5127_v13 = vsel %vm5124_vm1, %v5126_v18, %v5122_v45  ;;  %v9717_v45 = vld [vmem:[#allocation16 + $0x78] sm:$0xff] }
0x18a7   :  { %v5111_v3 = vor.u32 1.1754944e-38, %v5110_v52  ;;  %v5128_v27 = vmul.f32 %v12256_v15, %v5127_v13  ;;  %v9716_v52 = vld [vmem:[#allocation16 + $0x70] sm:$0xff] }
0x18a8   :  { %v4938_v12 = vmul.f32 %v10139_v24, %v4937_v6  ;;  %v4968_v58 = vpop.permute.xlu0 %4967  ;;  %vm5109_vm4 = vcmp.eq.f32.partialorder %v5108_v55, 8.507059e+37  ;;  %5020 = vmatpush.bf16.msrb.mxu1 %v9716_v52 }
0x18aa   :  { %v4939_v42 = vadd.f32 %v10139_v24, %v4938_v12 }
0x18ab   :  { %v10141_v29 = vpop.eup %10140 }
0x18ac   :  { %v4943_v43 = vsel %vm4942_vm8, %v10139_v24, %v4939_v42  ;;  %v5100_v20 = vmul.f32 %v10141_v29, %v5092_v26  ;;  %v4970_v38 = vpop.permute.xlu1 %4969  ;;  %v5147_v40 = vpop.permute.xlu2 %5146  ;;  %vm5105_vm15 = vweird.f32 %v10141_v29  ;;  %v4934_v24 = vmul.f32 %v12254_v14, %v4933_v61 }
0x18ad   :  { %v4948_v16 = vsel %vm4945_vm10, %v4947_v63, %v4943_v43  ;;  %v4979_v7 = vsel %vm933_vm11, %v4970_v38, 0  ;;  %5167 = vmatpush.bf16.msra.mxu3 %v5147_v40  ;;  %vm5106_vm3 = vmor %vm5104_vm2, %vm5105_vm15 }
0x18ae   :  { %v5101_v4 = vsub.f32 1.0, %v5100_v20  ;;  %4987 = vmatpush.bf16.msrb.mxu0 %v4979_v7  ;;  %v4949_v62 = vmul.f32 %v12262_v44, %v4948_v16 }
0x18b0   :  { %v5102_v31 = vmul.f32 %v10141_v29, %v5101_v4  ;;  %v4965_v6 = vpack.c.bf16 %v4949_v62, %v4934_v24 }
0x18b2   :  { %v5103_v49 = vadd.f32 %v10141_v29, %v5102_v31  ;;  %4988 = vmatpush.bf16.msrb.mxu0 %v4968_v58 }
0x18b4   :  { %v5107_v35 = vsel %vm5106_vm3, %v10141_v29, %v5103_v49 }
0x18b5   :  { %v5112_v44 = vsel %vm5109_vm4, %v5111_v3, %v5107_v35  ;;  %9019 = vmatmul.msk.bf16.vlgmr.msrb.gmra.mxu0 %vm1617_vm7, %v4965_v6 }
0x18b6   :  { %v5113_v11 = vmul.f32 %v12266_v0, %v5112_v44  ;;  %5199 = vmatpush.bf16.msra.mxu0 %v9717_v45  ;;  %v4133_v44 = vadd.f32 %v11932_v46, %v12106_v60  ;;  %v9097_v45 = vld [vmem:[#allocation18 + $0xf8] sm:$0xf0] }
0x18b8   :  { %v5144_v1 = vpack.c.bf16 %v5128_v27, %v5113_v11  ;;  %v4316_v11 = vadd.f32 %v12123_v34, %v4133_v44 }
0x18ba   :  { %9029 = vmatmul.msk.bf16.vlgmr.msra.gmra.mxu3 %vm1617_vm7, %v5144_v1  ;;  %v4495_v1 = vadd.f32 %v12119_v39, %v4316_v11  ;;  %v9727_v11 = vld [vmem:[#allocation18 + $0xc4] sm:$0xf0] }
0x18d7   :  { %v4919_v14 = vpop.xlane.xlu1 %4918 }
0x18d8   :  { %10142 = vrcp.f32 %v4919_v14  ;;  %v4961_v50 = vand.u32 2147483648, %v4919_v14  ;;  %v4959_v2 = vand.u32 2147483647, %v4919_v14  ;;  %vm4955_vm6 = vweird.f32 %v4919_v14 }
0x18da   :  { %v5098_v26 = vpop.xlane.xlu0 %5097  ;;  %v4962_v63 = vor.u32 1.1754944e-38, %v4961_v50  ;;  %vm4960_vm10 = vcmp.eq.f32.partialorder %v4959_v2, 8.507059e+37 }
0x18db   :  { %10144 = vrcp.f32 %v5098_v26  ;;  %v5140_v0 = vand.u32 2147483648, %v5098_v26  ;;  %v5138_v43 = vand.u32 2147483647, %v5098_v26  ;;  %vm5134_vm12 = vweird.f32 %v5098_v26 }
0x18dd   :  { %v5141_v57 = vor.u32 1.1754944e-38, %v5140_v0  ;;  %vm5139_vm14 = vcmp.eq.f32.partialorder %v5138_v43, 8.507059e+37 }
0x18de   :  { %v10143_v9 = vpop.eup %10142 }
0x18df   :  { %v4951_v12 = vmul.f32 %v10143_v9, %v4919_v14  ;;  %vm4956_vm5 = vweird.f32 %v10143_v9 }
0x18e0   :  { %vm4957_vm9 = vmor %vm4955_vm6, %vm4956_vm5 }
0x18e1   :  { %v10145_v5 = vpop.eup %10144  ;;  %v4952_v10 = vsub.f32 1.0, %v4951_v12  ;;  %v4674_v12 = vadd.f32 %v12235_v54, %v4495_v1  ;;  %v9726_v1 = vld [vmem:[#allocation18 + $0xc4] sm:$0xf] }
0x18e2   :  { %v5130_v42 = vmul.f32 %v10145_v5, %v5098_v26  ;;  %vm5135_vm8 = vweird.f32 %v10145_v5  ;;  %v9920_v26 = vld [vmem:[%s13026_s28 + $0x1] ss:$0 sm:$0xff] }
0x18e3   :  { %v4953_v29 = vmul.f32 %v10143_v9, %v4952_v10  ;;  %vm5136_vm13 = vmor %vm5134_vm12, %vm5135_vm8 }
0x18e4   :  { %v5131_v19 = vsub.f32 1.0, %v5130_v42  ;;  %v4853_v42 = vadd.f32 %v12233_v22, %v4674_v12  ;;  %v9063_v12 = vld [vmem:[#allocation18 + $0xb0] sm:$0xf] }
0x18e5   :  { %v4954_v15 = vadd.f32 %v10143_v9, %v4953_v29 }
0x18e6   :  { %v5132_v51 = vmul.f32 %v10145_v5, %v5131_v19 }
0x18e7   :  { %v4958_v20 = vsel %vm4957_vm9, %v10143_v9, %v4954_v15 }
0x18e8   :  { %v5133_v38 = vadd.f32 %v10145_v5, %v5132_v51  ;;  %v4963_v40 = vsel %vm4960_vm10, %v4962_v63, %v4958_v20 }
0x18e9   :  { %v4964_v16 = vmul.f32 %v12277_v21, %v4963_v40 }
0x18ea   :  { %v5137_v7 = vsel %vm5136_vm13, %v10145_v5, %v5133_v38 }
0x18eb   :  { %v4966_v33 = vpack.c.bf16 %v4964_v16, %v4964_v16  ;;  %v5142_v61 = vsel %vm5139_vm14, %v5141_v57, %v5137_v7 }
0x18ec   :  { %v5143_v4 = vmul.f32 %v12281_v59, %v5142_v61  ;;  %v9095_v61 = vld [vmem:[#allocation18 + $0xf0] sm:$0xf] }
0x18ed   :  { %9020 = vmatmul.msk.bf16.gmra.mxu0 %vm1617_vm7, %v4966_v33 }
0x18ee   :  { %v5145_v62 = vpack.c.bf16 %v5143_v4, %v5143_v4  ;;  %v9733_v4 = vld [vmem:[#allocation18 + $0xf4] sm:$0xf0] }
0x18ef   :  { %v9096_v52 = vor.u32 %v9733_v4, %v9095_v61 }
0x18f0   :  { %9030 = vmatmul.msk.bf16.gmra.mxu3 %vm1617_vm7, %v5145_v62  ;;  %v9732_v62 = vld [vmem:[#allocation18 + $0xf4] sm:$0xf] }
0x18f1   :  { %5381 = vmatpush.bf16.msra.mxu1 %v9096_v52 }
0x1932   :  { %v4990_v31 = vpop.f32.mrf.mxu0 }
0x193a   :  { %v4992_v55 = vpop.f32.mrf.mxu0 }
0x193b   :  { %v4999_v18 = vpack.c.bf16 %v4992_v55, %v4990_v31  ;;  %v9100_v31 = vor.u32 %v9732_v62, %v9097_v45  ;;  %v9087_v55 = vld [vmem:[#allocation18 + $0xe0] sm:$0xf] }
0x193d   :  { %9025 = vmatmul.msk.bf16.vlgmr.msrb.gmra.mxu1 %vm1586_vm0, %v4999_v18  ;;  %v5169_v21 = vpop.f32.mrf.mxu3  ;;  %5399 = vmatpush.bf16.msra.mxu2 %v9100_v31  ;;  %v9731_v18 = vld [vmem:[#allocation18 + $0xe4] sm:$0xf0] }
0x1945   :  { %v5171_v24 = vpop.f32.mrf.mxu3 }
0x1946   :  { %v5178_v58 = vpack.c.bf16 %v5171_v24, %v5169_v21  ;;  %v9730_v21 = vld [vmem:[#allocation18 + $0xe4] sm:$0xf]  ;;  %v9088_v24 = vor.u32 %v9731_v18, %v9087_v55 }
0x1948   :  { %9035 = vmatmul.msk.bf16.vlgmr.msra.gmra.mxu0 %vm1586_vm0, %v5178_v58  ;;  %v9089_v58 = vld [vmem:[#allocation18 + $0xe8] sm:$0xf0]  ;;  %5382 = vmatpush.bf16.msra.mxu1 %v9088_v24 }
0x196a   :  { %v4995_v59 = vpop.f32.mrf.mxu0 }
0x196b   :  { %v5000_v49 = vpack.c.bf16 %v4995_v59, %v4995_v59  ;;  %v9092_v59 = vor.u32 %v9730_v21, %v9089_v58 }
0x196d   :  { %9026 = vmatmul.msk.bf16.gmra.mxu1 %vm1586_vm0, %v5000_v49  ;;  %5400 = vmatpush.bf16.msra.mxu2 %v9092_v59  ;;  %v9079_v49 = vld [vmem:[#allocation18 + $0xd0] sm:$0xf] }
0x1972   :  { %v4997_v13 = vpop.f32.mrf.mxu0 }
0x1973   :  { %v5174_v3 = vpop.f32.mrf.mxu3  ;;  %v9729_v13 = vld [vmem:[#allocation18 + $0xd4] sm:$0xf0] }
0x1974   :  { %v5179_v6 = vpack.c.bf16 %v5174_v3, %v5174_v3  ;;  %v9728_v3 = vld [vmem:[#allocation18 + $0xd4] sm:$0xf] }
0x1976   :  { %9036 = vmatmul.msk.bf16.gmra.mxu0 %vm1586_vm0, %v5179_v6  ;;  %v9080_v6 = vor.u32 %v9729_v13, %v9079_v49 }
0x1978   :  { %5383 = vmatpush.bf16.msra.mxu1 %v9080_v6 }
0x197b   :  { %v5176_v35 = vpop.f32.mrf.mxu3 }
0x197c   :  { %v9081_v35 = vld [vmem:[#allocation18 + $0xd8] sm:$0xf0] }
0x197d   :  { %v9084_v44 = vor.u32 %v9728_v3, %v9081_v35  ;;  %v9921_v3 = vld [vmem:[%s13027_s7 + $0x1] ss:$0 sm:$0xff] }
0x197f   :  { %5401 = vmatpush.bf16.msra.mxu2 %v9084_v44 }
0x19ba   :  { %v5022_v27 = vpop.f32.mrf.mxu1 }
0x19bb   :  { %v5031_v14 = vadd.f32 %v5022_v27, %v12231_v37  ;;  %v9071_v27 = vld [vmem:[#allocation18 + $0xc0] sm:$0xf] }
0x19c2   :  { %v5024_v50 = vpop.f32.mrf.mxu1 }
0x19c3   :  { %v5032_v2 = vadd.f32 %v5024_v50, %v4853_v42  ;;  %v9065_v42 = vld [vmem:[#allocation18 + $0xb8] sm:$0xf0] }
0x19c5   :  { %v5201_v9 = vpop.f32.mrf.mxu0 }
0x19c6   :  { %v5210_v5 = vadd.f32 %v5201_v9, %v5031_v14  ;;  %v9072_v14 = vor.u32 %v9727_v11, %v9071_v27  ;;  %v9922_v27 = vld [vmem:[%s13028_s23 + $0x1] ss:$0 sm:$0xff] }
0x19c8   :  { %v5216_v10 = vadd.f32 %v9920_v26, %v5210_v5  ;;  %5384 = vmatpush.bf16.msra.mxu1 %v9072_v14  ;;  %v9725_v5 = vld [vmem:[#allocation18 + $0xb4] sm:$0xf0] }
0x19c9   :  { %v9064_v50 = vor.u32 %v9725_v5, %v9063_v12  ;;  %v9741_v5 = vld [vmem:[#allocation19 + $0xb8] sm:$0xff] }
0x19ca   :  { %v5219_v29 = vadd.f32 %v5216_v10, %v11815_v17  ;;  %v9724_v10 = vld [vmem:[#allocation18 + $0xb4] sm:$0xf]  ;;  %5526 = vmatpush.bf16.msrb.mxu3 %v9741_v5 }
0x19cc   :  { %5222 = vadd.xlane.f32.xlu2 %v5219_v29  ;;  %5385 = vmatpush.bf16.msra.mxu1 %v9064_v50 }
0x19cd   :  { %v5203_v46 = vpop.f32.mrf.mxu0 }
0x19ce   :  { %v5211_v60 = vadd.f32 %v5203_v46, %v5032_v2  ;;  %v9055_v2 = vld [vmem:[#allocation18 + $0xa0] sm:$0xf]  ;;  %v9723_v46 = vld [vmem:[#allocation18 + $0xa4] sm:$0xf0] }
0x19d0   :  { %v5217_v34 = vadd.f32 %v9920_v26, %v5211_v60  ;;  %v9722_v60 = vld [vmem:[#allocation18 + $0xa4] sm:$0xf] }
0x19d2   :  { %v5220_v39 = vadd.f32 %v5217_v34, %v11817_v23  ;;  %v9056_v34 = vor.u32 %v9723_v46, %v9055_v2  ;;  %v9739_v2 = vld [vmem:[#allocation19 + $0xa8] sm:$0xff] }
0x19d3   :  { %v9747_v46 = vld [vmem:[#allocation19 + $0xe8] sm:$0xff] }
0x19d4   :  { %5224 = vadd.xlane.f32.xlu0 %v5220_v39  ;;  %5386 = vmatpush.bf16.msra.mxu1 %v9056_v34 }
0x19ea   :  { %v5027_v37 = vpop.f32.mrf.mxu1 }
0x19eb   :  { %v5033_v19 = vadd.f32 %v5027_v37, %v12238_v8 }
0x19f2   :  { %v5029_v15 = vpop.f32.mrf.mxu1 }
0x19f3   :  { %v5206_v54 = vpop.f32.mrf.mxu0  ;;  %v9721_v15 = vld [vmem:[#allocation18 + $0x94] sm:$0xf0] }
0x19f4   :  { %v5212_v0 = vadd.f32 %v5206_v54, %v5033_v19  ;;  %v9047_v19 = vld [vmem:[#allocation18 + $0x90] sm:$0xf]  ;;  %v9720_v54 = vld [vmem:[#allocation18 + $0x94] sm:$0xf] }
0x19f6   :  { %v5218_v63 = vadd.f32 %v9920_v26, %v5212_v0  ;;  %v9073_v26 = vld [vmem:[#allocation18 + $0xc8] sm:$0xf0] }
0x19f7   :  { %v9076_v9 = vor.u32 %v9726_v1, %v9073_v26 }
0x19f8   :  { %v5221_v51 = vadd.f32 %v5218_v63, %v11822_v30  ;;  %v9048_v63 = vor.u32 %v9721_v15, %v9047_v19 }
0x19f9   :  { %5402 = vmatpush.bf16.msra.mxu2 %v9076_v9 }
0x19fa   :  { %5226 = vadd.xlane.f32.xlu1 %v5221_v51  ;;  %5387 = vmatpush.bf16.msra.mxu1 %v9048_v63 }
0x19fb   :  { %v5208_v22 = vpop.f32.mrf.mxu0 }
0x1a3f   :  { %v5223_v17 = vpop.xlane.xlu2 %5222 }
0x1a40   :  { %v5228_v43 = vmul.f32 %v5223_v17, %v11748_v56 }
0x1a42   :  { %v12320_v20 = vsub.f32 %v5219_v29, %v5228_v43  ;;  %v9068_v29 = vor.u32 %v9724_v10, %v9065_v42  ;;  %v9740_v42 = vld [vmem:[#allocation19 + $0xb0] sm:$0xff] }
0x1a43   :  { %5527 = vmatpush.bf16.msrb.mxu3 %v9740_v42  ;;  %v9923_v42 = vld [vmem:[#allocation21 + $0x1] ss:$0 sm:$0xff] }
0x1a44   :  { %v5234_v23 = vmul.f32 %v12320_v20, %v12320_v20  ;;  %5403 = vmatpush.bf16.msra.mxu2 %v9068_v29  ;;  %v9748_v29 = vld [vmem:[#allocation19 + $0xf0] sm:$0xff] }
0x1a46   :  { %5237 = vadd.xlane.f32.xlu2 %v5234_v23  ;;  %v9039_v23 = vld [vmem:[#allocation18 + $0x80] sm:$0xf] }
0x1a47   :  { %v5225_v38 = vpop.xlane.xlu0 %5224  ;;  %5528 = vmatpush.bf16.msrb.mxu3 %v9739_v2 }
0x1a48   :  { %v5229_v8 = vmul.f32 %v5225_v38, %v11748_v56  ;;  %v9719_v38 = vld [vmem:[#allocation18 + $0x84] sm:$0xf0] }
0x1a4a   :  { %v12325_v40 = vsub.f32 %v5220_v39, %v5229_v8  ;;  %v9057_v39 = vld [vmem:[#allocation18 + $0xa8] sm:$0xf0]  ;;  %v9040_v8 = vor.u32 %v9719_v38, %v9039_v23  ;;  %v9746_v23 = vld [vmem:[#allocation19 + $0xe0] sm:$0xff]  ;;  %v9736_v38 = vld [vmem:[#allocation19 + $0x90] sm:$0xff] }
0x1a4b   :  { %v9060_v37 = vor.u32 %v9722_v60, %v9057_v39  ;;  %v9738_v60 = vld [vmem:[#allocation19 + $0xa0] sm:$0xff] }
0x1a4c   :  { %v5235_v57 = vmul.f32 %v12325_v40, %v12325_v40  ;;  %5388 = vmatpush.bf16.msra.mxu1 %v9040_v8  ;;  %5529 = vmatpush.bf16.msrb.mxu3 %v9738_v60  ;;  %v9745_v8 = vld [vmem:[#allocation19 + $0xd8] sm:$0xff] }
0x1a4d   :  { %5404 = vmatpush.bf16.msra.mxu2 %v9060_v37 }
0x1a4e   :  { %5239 = vadd.xlane.f32.xlu0 %v5235_v57  ;;  %v9718_v57 = vld [vmem:[#allocation18 + $0x84] sm:$0xf] }
0x1a6d   :  { %v5227_v30 = vpop.xlane.xlu1 %5226 }
0x1a6e   :  { %v5230_v16 = vmul.f32 %v5227_v30, %v11748_v56  ;;  %v9041_v30 = vld [vmem:[#allocation18 + $0x88] sm:$0xf0] }
0x1a70   :  { %v12330_v7 = vsub.f32 %v5221_v51, %v5230_v16  ;;  %v9049_v51 = vld [vmem:[#allocation18 + $0x98] sm:$0xf0]  ;;  %v9044_v16 = vor.u32 %v9718_v57, %v9041_v30  ;;  %v9735_v57 = vld [vmem:[#allocation19 + $0x88] sm:$0xff]  ;;  %v9734_v30 = vld [vmem:[#allocation19 + $0x80] sm:$0xff] }
0x1a71   :  { %v9052_v17 = vor.u32 %v9720_v54, %v9049_v51 }
0x1a72   :  { %v5236_v33 = vmul.f32 %v12330_v7, %v12330_v7 }
0x1a73   :  { %5405 = vmatpush.bf16.msra.mxu2 %v9052_v17 }
0x1a74   :  { %5241 = vadd.xlane.f32.xlu1 %v5236_v33 }
0x1a77   :  { %5406 = vmatpush.bf16.msra.mxu2 %v9044_v16  ;;  %v9743_v16 = vld [vmem:[#allocation19 + $0xc8] sm:$0xff] }
0x1ab9   :  { %v5238_v0 = vpop.xlane.xlu2 %5237 }
0x1aba   :  { %v5243_v22 = vmul.f32 %v5238_v0, %v11748_v56 }
0x1abc   :  { %v5246_v43 = vadd.f32 1e-05, %v5243_v22 }
0x1abe   :  { %10146 = vrsqrt.f32 %v5246_v43  ;;  %vm5255_vm1 = vweird.f32 %v5246_v43 }
0x1ac1   :  { %v5240_v33 = vpop.xlane.xlu0 %5239 }
0x1ac2   :  { %v5244_v61 = vmul.f32 %v5240_v33, %v11748_v56  ;;  %v9742_v33 = vld [vmem:[#allocation19 + $0xc0] sm:$0xff] }
0x1ac4   :  { %v10147_v4 = vpop.eup %10146  ;;  %v5247_v62 = vadd.f32 1e-05, %v5244_v61  ;;  %v8860_v61 = vld [vmem:[%s13029_s9 + $0x2] sm:$0x3] }
0x1ac5   :  { %v5250_v52 = vmul.f32 %v10147_v4, %v5246_v43  ;;  %vm5256_vm15 = vweird.f32 %v10147_v4  ;;  %v9737_v43 = vld [vmem:[#allocation19 + $0x98] sm:$0xff] }
0x1ac6   :  { %10148 = vrsqrt.f32 %v5247_v62  ;;  %vm5257_vm2 = vmor %vm5255_vm1, %vm5256_vm15  ;;  %vm5265_vm4 = vweird.f32 %v5247_v62  ;;  %5530 = vmatpush.bf16.msrb.mxu3 %v9737_v43 }
0x1ac7   :  { %v5251_v45 = vmul.f32 %v10147_v4, %v5250_v52 }
0x1ac9   :  { %v5252_v31 = vmul.f32 0.5, %v5251_v45 }
0x1aca   :  { %5531 = vmatpush.bf16.msrb.mxu3 %v9736_v38 }
0x1acb   :  { %v5253_v55 = vsub.f32 1.5, %v5252_v31 }
0x1acc   :  { %v10149_v18 = vpop.eup %10148 }
0x1acd   :  { %v5254_v21 = vmul.f32 %v10147_v4, %v5253_v55  ;;  %v5260_v24 = vmul.f32 %v10149_v18, %v5247_v62  ;;  %vm5266_vm3 = vweird.f32 %v10149_v18  ;;  %v5297_v62 = vperm.slane %v8860_v61, 0 }
0x1ace   :  { %vm5267_vm5 = vmor %vm5265_vm4, %vm5266_vm3  ;;  %5532 = vmatpush.bf16.msrb.mxu3 %v9735_v57  ;;  %v5298_v55 = vperm.slane %v8860_v61, 1 }
0x1acf   :  { %v5261_v58 = vmul.f32 %v10149_v18, %v5260_v24  ;;  %v5258_v59 = vsel %vm5257_vm2, %v10147_v4, %v5254_v21 }
0x1ad0   :  { %v5279_v6 = vmul.f32 %v5258_v59, %v12320_v20  ;;  %v9749_v20 = vld [vmem:[#allocation19 + $0xf8] sm:$0xff] }
0x1ad1   :  { %v5262_v49 = vmul.f32 0.5, %v5261_v58  ;;  %5544 = vmatpush.bf16.msrb.mxu0 %v9749_v20 }
0x1ad2   :  { %v5285_v11 = vmul.f32 %v9921_v3, %v5279_v6  ;;  %5533 = vmatpush.bf16.msrb.mxu3 %v9734_v30 }
0x1ad3   :  { %v5263_v13 = vsub.f32 1.5, %v5262_v49 }
0x1ad4   :  { %v12340_v26 = vadd.f32 %v9922_v27, %v5285_v11 }
0x1ad5   :  { %v5264_v35 = vmul.f32 %v10149_v18, %v5263_v13  ;;  %5545 = vmatpush.bf16.msrb.mxu0 %v9748_v29 }
0x1ad7   :  { %v5268_v44 = vsel %vm5267_vm5, %v10149_v18, %v5264_v35 }
0x1ad8   :  { %v5280_v1 = vmul.f32 %v5268_v44, %v12325_v40 }
0x1ad9   :  { %5546 = vmatpush.bf16.msrb.mxu0 %v9747_v46 }
0x1ada   :  { %v5286_v14 = vmul.f32 %v9921_v3, %v5280_v1 }
0x1adc   :  { %v12342_v9 = vadd.f32 %v9922_v27, %v5286_v14 }
0x1add   :  { %5547 = vmatpush.bf16.msrb.mxu0 %v9746_v23 }
0x1ade   :  { %v5294_v12 = vpack.c.bf16 %v12342_v9, %v12340_v26 }
0x1ae0   :  { %5389 = vmatmul.bf16.vlgmr.msra.gmra.mxu1 %v5294_v12  ;;  %5407 = vmatmul.bf16.vlgmr.msra.gmra.mxu2 %v5294_v12 }
0x1ae1   :  { %5548 = vmatpush.bf16.msrb.mxu0 %v9745_v8 }
0x1ae7   :  { %v5242_v10 = vpop.xlane.xlu1 %5241 }
0x1ae8   :  { %v5245_v50 = vmul.f32 %v5242_v10, %v11748_v56 }
0x1aea   :  { %v5248_v40 = vadd.f32 1e-05, %v5245_v50 }
0x1aec   :  { %10150 = vrsqrt.f32 %v5248_v40  ;;  %vm5275_vm9 = vweird.f32 %v5248_v40 }
0x1af2   :  { %v10151_v34 = vpop.eup %10150 }
0x1af3   :  { %v5270_v39 = vmul.f32 %v10151_v34, %v5248_v40  ;;  %vm5276_vm6 = vweird.f32 %v10151_v34 }
0x1af4   :  { %vm5277_vm8 = vmor %vm5275_vm9, %vm5276_vm6 }
0x1af5   :  { %v5271_v37 = vmul.f32 %v10151_v34, %v5270_v39 }
0x1af7   :  { %v5272_v19 = vmul.f32 0.5, %v5271_v37 }
0x1af9   :  { %v5273_v15 = vsub.f32 1.5, %v5272_v19 }
0x1afb   :  { %v5274_v54 = vmul.f32 %v10151_v34, %v5273_v15 }
0x1afd   :  { %v5278_v0 = vsel %vm5277_vm8, %v10151_v34, %v5274_v54 }
0x1afe   :  { %v5281_v63 = vmul.f32 %v5278_v0, %v12330_v7  ;;  %v9744_v7 = vld [vmem:[#allocation19 + $0xd0] sm:$0xff] }
0x1aff   :  { %5549 = vmatpush.bf16.msrb.mxu0 %v9744_v7 }
0x1b00   :  { %v5287_v51 = vmul.f32 %v9921_v3, %v5281_v63 }
0x1b02   :  { %v12348_v22 = vadd.f32 %v9922_v27, %v5287_v51 }
0x1b03   :  { %5550 = vmatpush.bf16.msrb.mxu0 %v9743_v16 }
0x1b04   :  { %v5295_v17 = vpack.c.bf16 %v12348_v22, %v12348_v22 }
0x1b06   :  { %5394 = vmatmul.bf16.gmra.mxu1 %v5295_v17  ;;  %5412 = vmatmul.bf16.gmra.mxu2 %v5295_v17 }
0x1b07   :  { %5551 = vmatpush.bf16.msrb.mxu0 %v9742_v33 }
0x1b5d   :  { %v5390_v4 = vpop.f32.mrf.mxu1 }
0x1b5e   :  { %v5391_v45 = vadd.f32 %v5390_v4, %v5297_v62 }
0x1b60   :  { %v5417_v21 = vmax.f32 %v5391_v45, 0.0  ;;  %v9773_v45 = vld [vmem:[#allocation15 + $0xb8] sm:$0xff] }
0x1b61   :  { %5969 = vmatpush.bf16.msra.mxu3 %v9773_v45 }
0x1b63   :  { %v5408_v52 = vpop.f32.mrf.mxu2 }
0x1b64   :  { %v5409_v58 = vadd.f32 %v5408_v52, %v5298_v55  ;;  %v9765_v52 = vld [vmem:[#allocation13 + $0xb8] sm:$0xff] }
0x1b65   :  { %v5392_v31 = vpop.f32.mrf.mxu1  ;;  %5900 = vmatpush.bf16.msrb.mxu2 %v9765_v52 }
0x1b66   :  { %v5393_v18 = vadd.f32 %v5392_v31, %v5297_v62  ;;  %v5418_v3 = vmax.f32 %v5409_v58, 0.0  ;;  %v9756_v31 = vld [vmem:[%s13016_s26 + $0xb0] sm:$0xff] }
0x1b67   :  { %v9771_v58 = vld [vmem:[#allocation15 + $0xa8] sm:$0xff] }
0x1b68   :  { %v5419_v24 = vmax.f32 %v5393_v18, 0.0  ;;  %v9772_v18 = vld [vmem:[#allocation15 + $0xb0] sm:$0xff] }
0x1b69   :  { %5970 = vmatpush.bf16.msra.mxu3 %v9772_v18 }
0x1b6a   :  { %v5423_v59 = vpack.c.bf16 %v5419_v24, %v5417_v21  ;;  %v9755_v21 = vld [vmem:[%s13016_s26 + $0xa8] sm:$0xff]  ;;  %v9763_v24 = vld [vmem:[#allocation13 + $0xa8] sm:$0xff] }
0x1b6b   :  { %v5410_v49 = vpop.f32.mrf.mxu2 }
0x1b6c   :  { %v5411_v13 = vadd.f32 %v5410_v49, %v5298_v55  ;;  %5534 = vmatmul.bf16.vlgmr.msrb.gmra.mxu3 %v5423_v59  ;;  %v9754_v59 = vld [vmem:[%s13016_s26 + $0xa0] sm:$0xff]  ;;  %v9762_v49 = vld [vmem:[#allocation13 + $0xa0] sm:$0xff] }
0x1b6d   :  { %5971 = vmatpush.bf16.msra.mxu3 %v9771_v58 }
0x1b6e   :  { %v5420_v6 = vmax.f32 %v5411_v13, 0.0  ;;  %v9770_v13 = vld [vmem:[#allocation15 + $0xa0] sm:$0xff] }
0x1b70   :  { %v5424_v35 = vpack.c.bf16 %v5420_v6, %v5418_v3  ;;  %v9753_v3 = vld [vmem:[%s13016_s26 + $0x98] sm:$0xff]  ;;  %v9761_v6 = vld [vmem:[#allocation13 + $0x98] sm:$0xff] }
0x1b71   :  { %5972 = vmatpush.bf16.msra.mxu3 %v9770_v13 }
0x1b72   :  { %5552 = vmatmul.bf16.vlgmr.msrb.gmra.mxu0 %v5424_v35  ;;  %v9769_v35 = vld [vmem:[#allocation15 + $0x98] sm:$0xff] }
0x1b75   :  { %5973 = vmatpush.bf16.msra.mxu3 %v9769_v35 }
0x1b83   :  { %v5395_v44 = vpop.f32.mrf.mxu1 }
0x1b84   :  { %v5396_v27 = vadd.f32 %v5395_v44, %v5297_v62  ;;  %v9757_v62 = vld [vmem:[%s13016_s26 + $0xb8] sm:$0xff]  ;;  %v9752_v44 = vld [vmem:[%s13016_s26 + $0x90] sm:$0xff] }
0x1b85   :  { %5828 = vmatpush.bf16.msrb.mxu1 %v9757_v62 }
0x1b86   :  { %v5421_v11 = vmax.f32 %v5396_v27, 0.0  ;;  %v9760_v27 = vld [vmem:[#allocation13 + $0x90] sm:$0xff] }
0x1b88   :  { %v5425_v1 = vpack.c.bf16 %v5421_v11, %v5421_v11  ;;  %v9768_v11 = vld [vmem:[#allocation15 + $0x90] sm:$0xff] }
0x1b89   :  { %v5413_v14 = vpop.f32.mrf.mxu2  ;;  %5829 = vmatpush.bf16.msrb.mxu1 %v9756_v31  ;;  %5974 = vmatpush.bf16.msra.mxu3 %v9768_v11 }
0x1b8a   :  { %v5414_v12 = vadd.f32 %v5413_v14, %v5298_v55  ;;  %5539 = vmatmul.bf16.gmra.mxu3 %v5425_v1  ;;  %v9764_v55 = vld [vmem:[#allocation13 + $0xb0] sm:$0xff]  ;;  %v9751_v14 = vld [vmem:[%s13016_s26 + $0x88] sm:$0xff] }
0x1b8b   :  { %v5397_v5 = vpop.f32.mrf.mxu1  ;;  %5901 = vmatpush.bf16.msrb.mxu2 %v9764_v55 }
0x1b8c   :  { %v5422_v20 = vmax.f32 %v5414_v12, 0.0  ;;  %v9759_v12 = vld [vmem:[#allocation13 + $0x88] sm:$0xff] }
0x1b8d   :  { %5830 = vmatpush.bf16.msrb.mxu1 %v9755_v21  ;;  %v9767_v5 = vld [vmem:[#allocation15 + $0x88] sm:$0xff] }
0x1b8e   :  { %v5426_v10 = vpack.c.bf16 %v5422_v20, %v5422_v20  ;;  %5975 = vmatpush.bf16.msra.mxu3 %v9767_v5  ;;  %v9928_v5 = vld [vmem:[%s13023_s20 + $0x2] ss:$0 sm:$0xff] }
0x1b8f   :  { %5902 = vmatpush.bf16.msrb.mxu2 %v9763_v24 }
0x1b90   :  { %5557 = vmatmul.bf16.gmra.mxu0 %v5426_v10 }
0x1b91   :  { %v5415_v50 = vpop.f32.mrf.mxu2  ;;  %5831 = vmatpush.bf16.msrb.mxu1 %v9754_v59 }
0x1b92   :  { %v9750_v50 = vld [vmem:[%s13016_s26 + $0x80] sm:$0xff] }
0x1b93   :  { %5903 = vmatpush.bf16.msrb.mxu2 %v9762_v49 }
0x1b95   :  { %5832 = vmatpush.bf16.msrb.mxu1 %v9753_v3 }
0x1b97   :  { %5904 = vmatpush.bf16.msrb.mxu2 %v9761_v6 }
0x1b99   :  { %5833 = vmatpush.bf16.msrb.mxu1 %v9752_v44 }
0x1b9b   :  { %5905 = vmatpush.bf16.msrb.mxu2 %v9760_v27 }
0x1b9d   :  { %5834 = vmatpush.bf16.msrb.mxu1 %v9751_v14 }
0x1b9f   :  { %5906 = vmatpush.bf16.msrb.mxu2 %v9759_v12  ;;  %v9927_v12 = vld [vmem:[%s13021_s8 + $0x2] ss:$0 sm:$0xff] }
0x1ba1   :  { %5835 = vmatpush.bf16.msrb.mxu1 %v9750_v50 }
0x1bef   :  { %v5535_v29 = vpop.f32.mrf.mxu3  ;;  %v5553_v40 = vpop.f32.mrf.mxu0 }
0x1bf0   :  { %v5536_v2 = vadd.f32 %v9923_v42, %v5535_v29  ;;  %v9766_v29 = vld [vmem:[#allocation15 + $0x80] sm:$0xff] }
0x1bf1   :  { %5976 = vmatpush.bf16.msra.mxu3 %v9766_v29 }
0x1bf2   :  { %v5554_v46 = vadd.f32 %v5553_v40, %v5536_v2 }
0x1bf4   :  { %v5562_v60 = vadd.f32 %v5554_v46, %v12340_v26 }
0x1bf6   :  { %5565 = vadd.xlane.f32.xlu2 %v5562_v60 }
0x1bf7   :  { %v5537_v34 = vpop.f32.mrf.mxu3  ;;  %v5555_v37 = vpop.f32.mrf.mxu0 }
0x1bf8   :  { %v5538_v39 = vadd.f32 %v9923_v42, %v5537_v34 }
0x1bfa   :  { %v5556_v19 = vadd.f32 %v5555_v37, %v5538_v39 }
0x1bfc   :  { %v5563_v15 = vadd.f32 %v5556_v19, %v12342_v9 }
0x1bfe   :  { %5567 = vadd.xlane.f32.xlu0 %v5563_v15 }
0x1c0d   :  { %v5540_v54 = vpop.f32.mrf.mxu3  ;;  %v5558_v0 = vpop.f32.mrf.mxu0 }
0x1c0e   :  { %v5541_v63 = vadd.f32 %v9923_v42, %v5540_v54  ;;  %v9758_v42 = vld [vmem:[#allocation13 + $0x80] sm:$0xff] }
0x1c0f   :  { %5907 = vmatpush.bf16.msrb.mxu2 %v9758_v42 }
0x1c10   :  { %v5559_v51 = vadd.f32 %v5558_v0, %v5541_v63 }
0x1c12   :  { %v5564_v17 = vadd.f32 %v5559_v51, %v12348_v22 }
0x1c14   :  { %5569 = vadd.xlane.f32.xlu1 %v5564_v17 }
0x1c15   :  { %v5542_v43 = vpop.f32.mrf.mxu3  ;;  %v5560_v23 = vpop.f32.mrf.mxu0 }
0x1c16   :  { %v9924_v23 = vld [vmem:[#allocation22 + $0x1] ss:$0 sm:$0xff] }
0x1c69   :  { %v5566_v38 = vpop.xlane.xlu2 %5565 }
0x1c6a   :  { %v5571_v26 = vmul.f32 %v5566_v38, %v11748_v56 }
0x1c6c   :  { %v12357_v8 = vsub.f32 %v5562_v60, %v5571_v26 }
0x1c6e   :  { %v5577_v57 = vmul.f32 %v12357_v8, %v12357_v8 }
0x1c70   :  { %5580 = vadd.xlane.f32.xlu2 %v5577_v57 }
0x1c71   :  { %v5568_v9 = vpop.xlane.xlu0 %5567 }
0x1c72   :  { %v5572_v7 = vmul.f32 %v5568_v9, %v11748_v56 }
0x1c74   :  { %v12362_v30 = vsub.f32 %v5563_v15, %v5572_v7  ;;  %v9925_v7 = vld [vmem:[#allocation24 + $0x1] ss:$0 sm:$0xff] }
0x1c76   :  { %v5578_v22 = vmul.f32 %v12362_v30, %v12362_v30 }
0x1c78   :  { %5582 = vadd.xlane.f32.xlu0 %v5578_v22 }
0x1c87   :  { %v5570_v16 = vpop.xlane.xlu1 %5569 }
0x1c88   :  { %v5573_v33 = vmul.f32 %v5570_v16, %v11748_v56 }
0x1c8a   :  { %v12367_v61 = vsub.f32 %v5564_v17, %v5573_v33 }
0x1c8c   :  { %v5579_v4 = vmul.f32 %v12367_v61, %v12367_v61 }
0x1c8e   :  { %5584 = vadd.xlane.f32.xlu1 %v5579_v4 }
0x1ce3   :  { %v5581_v1 = vpop.xlane.xlu2 %5580 }
0x1ce4   :  { %v5586_v20 = vmul.f32 %v5581_v1, %v11748_v56 }
0x1ce6   :  { %v5589_v10 = vadd.f32 1e-05, %v5586_v20 }
0x1ce8   :  { %10152 = vrsqrt.f32 %v5589_v10  ;;  %vm5598_vm12 = vweird.f32 %v5589_v10 }
0x1ceb   :  { %v5583_v40 = vpop.xlane.xlu0 %5582 }
0x1cec   :  { %v5587_v2 = vmul.f32 %v5583_v40, %v11748_v56 }
0x1cee   :  { %v10153_v46 = vpop.eup %10152  ;;  %v5590_v60 = vadd.f32 1e-05, %v5587_v2 }
0x1cef   :  { %v5593_v34 = vmul.f32 %v10153_v46, %v5589_v10  ;;  %vm5599_vm10 = vweird.f32 %v10153_v46 }
0x1cf0   :  { %10154 = vrsqrt.f32 %v5590_v60  ;;  %vm5600_vm13 = vmor %vm5598_vm12, %vm5599_vm10  ;;  %vm5608_vm15 = vweird.f32 %v5590_v60 }
0x1cf1   :  { %v5594_v39 = vmul.f32 %v10153_v46, %v5593_v34 }
0x1cf3   :  { %v5595_v37 = vmul.f32 0.5, %v5594_v39 }
0x1cf5   :  { %v5596_v19 = vsub.f32 1.5, %v5595_v37 }
0x1cf6   :  { %v10155_v15 = vpop.eup %10154 }
0x1cf7   :  { %v5597_v54 = vmul.f32 %v10153_v46, %v5596_v19  ;;  %v5603_v0 = vmul.f32 %v10155_v15, %v5590_v60  ;;  %vm5609_vm14 = vweird.f32 %v10155_v15 }
0x1cf8   :  { %vm5610_vm1 = vmor %vm5608_vm15, %vm5609_vm14 }
0x1cf9   :  { %v5604_v63 = vmul.f32 %v10155_v15, %v5603_v0  ;;  %v5601_v51 = vsel %vm5600_vm13, %v10153_v46, %v5597_v54 }
0x1cfa   :  { %v5622_v38 = vmul.f32 %v5601_v51, %v12357_v8 }
0x1cfb   :  { %v5605_v17 = vmul.f32 0.5, %v5604_v63 }
0x1cfc   :  { %v5628_v22 = vmul.f32 %v9924_v23, %v5622_v38 }
0x1cfd   :  { %v5606_v43 = vsub.f32 1.5, %v5605_v17 }
0x1cfe   :  { %v12384_v52 = vadd.f32 %v9925_v7, %v5628_v22 }
0x1cff   :  { %v5607_v26 = vmul.f32 %v10155_v15, %v5606_v43 }
0x1d01   :  { %v5611_v57 = vsel %vm5610_vm1, %v10155_v15, %v5607_v26  ;;  %v5585_v9 = vpop.xlane.xlu1 %5584  ;;  %v9926_v15 = vld [vmem:[%s13022_s5 + $0x2] ss:$0 sm:$0xff] }
0x1d02   :  { %v5623_v16 = vmul.f32 %v5611_v57, %v12362_v30  ;;  %v5588_v33 = vmul.f32 %v5585_v9, %v11748_v56 }
0x1d04   :  { %v5629_v4 = vmul.f32 %v9924_v23, %v5623_v16  ;;  %v5591_v62 = vadd.f32 1e-05, %v5588_v33 }
0x1d06   :  { %v12386_v45 = vadd.f32 %v9925_v7, %v5629_v4  ;;  %10156 = vrsqrt.f32 %v5591_v62  ;;  %vm5618_vm3 = vweird.f32 %v5591_v62 }
0x1d08   :  { %v5775_v8 = vpack.c.bf16 %v12386_v45, %v12384_v52 }
0x1d0a   :  { %5836 = vmatmul.bf16.vlgmr.msrb.gmra.mxu1 %v5775_v8  ;;  %5908 = vmatmul.bf16.vlgmr.msrb.gmra.mxu2 %v5775_v8 }
0x1d0b   :  { %5977 = vmatmul.bf16.vlgmr.msra.gmra.mxu3 %v5775_v8 }
0x1d0c   :  { %v10157_v31 = vpop.eup %10156 }
0x1d0d   :  { %v5613_v55 = vmul.f32 %v10157_v31, %v5591_v62  ;;  %vm5619_vm2 = vweird.f32 %v10157_v31 }
0x1d0e   :  { %vm5620_vm4 = vmor %vm5618_vm3, %vm5619_vm2 }
0x1d0f   :  { %v5614_v18 = vmul.f32 %v10157_v31, %v5613_v55 }
0x1d11   :  { %v5615_v21 = vmul.f32 0.5, %v5614_v18 }
0x1d13   :  { %v5616_v30 = vsub.f32 1.5, %v5615_v21 }
0x1d15   :  { %v5617_v24 = vmul.f32 %v10157_v31, %v5616_v30 }
0x1d17   :  { %v5621_v58 = vsel %vm5620_vm4, %v10157_v31, %v5617_v24 }
0x1d18   :  { %v5624_v59 = vmul.f32 %v5621_v58, %v12367_v61 }
0x1d1a   :  { %v5630_v49 = vmul.f32 %v9924_v23, %v5624_v59 }
0x1d1c   :  { %v12391_v13 = vadd.f32 %v9925_v7, %v5630_v49 }
0x1d1e   :  { %v5776_v3 = vpack.c.bf16 %v12391_v13, %v12391_v13 }
0x1d20   :  { %5841 = vmatmul.bf16.gmra.mxu1 %v5776_v3  ;;  %5913 = vmatmul.bf16.gmra.mxu2 %v5776_v3 }
0x1d21   :  { %5982 = vmatmul.bf16.gmra.mxu3 %v5776_v3 }
0x1d87   :  { %v5837_v6 = vpop.f32.mrf.mxu1 }
0x1d88   :  { %v5838_v17 = vadd.f32 %v9926_v15, %v5837_v6 }
0x1d8a   :  { %v5846_v38 = vmul.f32 0.25, %v5838_v17 }
0x1d8d   :  { %v5909_v35 = vpop.f32.mrf.mxu2 }
0x1d8e   :  { %v5978_v44 = vpop.f32.mrf.mxu3  ;;  %v5910_v39 = vadd.f32 %v9927_v12, %v5909_v35 }
0x1d8f   :  { %v5839_v27 = vpop.f32.mrf.mxu1  ;;  %v5979_v37 = vadd.f32 %v9928_v5, %v5978_v44 }
0x1d90   :  { %v5840_v51 = vadd.f32 %v9926_v15, %v5839_v27 }
0x1d92   :  { %v5847_v23 = vmul.f32 0.25, %v5840_v51 }
0x1d94   :  { %v12413_v26 = vpack.c.bf16 %v5847_v23, %v5846_v38 }
0x1d95   :  { %v5911_v11 = vpop.f32.mrf.mxu2 }
0x1d96   :  { %v5980_v1 = vpop.f32.mrf.mxu3  ;;  %v5912_v2 = vadd.f32 %v9927_v12, %v5911_v11 }
0x1d97   :  { %v5981_v46 = vadd.f32 %v9928_v5, %v5980_v1 }
0x1d98   :  { %v12406_v54 = vpack.c.bf16 %v5912_v2, %v5910_v39 }
0x1d99   :  { %v12408_v0 = vpack.c.bf16 %v5981_v46, %v5979_v37 }
0x1d9a   :  { %v6000_v43 = vsel %vm1586_vm0, %v12406_v54, 0 }
0x1d9d   :  { %v5842_v14 = vpop.f32.mrf.mxu1 }
0x1d9e   :  { %v5843_v57 = vadd.f32 %v9926_v15, %v5842_v14 }
0x1da0   :  { %v5848_v9 = vmul.f32 0.25, %v5843_v57 }
0x1da2   :  { %v12417_v7 = vpack.c.bf16 %v5848_v9, %v5848_v9 }
0x1da3   :  { %v5914_v20 = vpop.f32.mrf.mxu2 }
0x1da4   :  { %v5915_v61 = vadd.f32 %v9927_v12, %v5914_v20  ;;  %v5983_v10 = vpop.f32.mrf.mxu3  ;;  %v9774_v20 = vld [vmem:[#allocation16 + $0x80] sm:$0xff] }
0x1da5   :  { %v5984_v50 = vadd.f32 %v9928_v5, %v5983_v10  ;;  %v5844_v42 = vpop.f32.mrf.mxu1 }
0x1da6   :  { %v12397_v29 = vpack.c.bf16 %v5915_v61, %v5915_v61 }
0x1da7   :  { %v12399_v40 = vpack.c.bf16 %v5984_v50, %v5984_v50 }
0x1da8   :  { %v6003_v60 = vsel %vm1586_vm0, %v12397_v29, 0 }
0x1da9   :  { %6011 = vmatpush.bf16.xpose.msra.mxu0 %v6003_v60  ;;  %v6104_v34 = vsel %vm933_vm11, %v12399_v40, 0 }
0x1daa   :  { %6112 = vmatpush.bf16.msra.mxu1 %v6104_v34 }
0x1dab   :  { %v5916_v19 = vpop.f32.mrf.mxu2 }
0x1dac   :  { %v5985_v63 = vpop.f32.mrf.mxu3 }
0x1dae   :  { %6113 = vmatpush.bf16.msra.mxu1 %v12408_v0 }
0x1db1   :  { %6012 = vmatpush.bf16.xpose.msra.mxu0 %v6000_v43 }
0x1db2   :  { %6327 = vmatpush.bf16.msrb.mxu1 %v9774_v20 }
0x1db8   :  { %9284 = vmatmul.msk.bf16.vlgmr.msra.gmra.mxu0 %vm1586_vm0, %v12413_v26 }
0x1dc8   :  { %9285 = vmatmul.msk.bf16.gmra.mxu0 %vm1586_vm0, %v12417_v7 }
0x1e35   :  { %v6014_v22 = vpop.f32.mrf.mxu0 }
0x1e36   :  { %v6015_v16 = vadd.f32 %v6014_v22, %v11309_v41 }
0x1e38   :  { %v6023_v33 = vsel %vm1617_vm7, %v6015_v16, -inf }
0x1e39   :  { %6024 = vmax.xlane.f32.xlu2 %v6023_v33 }
0x1e3d   :  { %v6016_v4 = vpop.f32.mrf.mxu0 }
0x1e3e   :  { %v6017_v62 = vadd.f32 %v6016_v4, %v11314_v47 }
0x1e40   :  { %v6026_v8 = vsel %vm1617_vm7, %v6017_v62, -inf }
0x1e41   :  { %6027 = vmax.xlane.f32.xlu0 %v6026_v8 }
0x1e45   :  { %v6019_v31 = vpop.f32.mrf.mxu0 }
0x1e46   :  { %v6020_v55 = vadd.f32 %v6019_v31, %v11319_v53 }
0x1e48   :  { %v6029_v18 = vsel %vm1617_vm7, %v6020_v55, -inf }
0x1e49   :  { %6030 = vmax.xlane.f32.xlu1 %v6029_v18 }
0x1e4d   :  { %v6021_v21 = vpop.f32.mrf.mxu0 }
0x1eac   :  { %v6025_v30 = vpop.xlane.xlu2 %6024 }
0x1ead   :  { %v6032_v24 = vsub.f32 %v6015_v16, %v6025_v30 }
0x1eaf   :  { %v6035_v58 = vmul.f32 1.442695, %v6032_v24 }
0x1eb1   :  { %10158 = vpow2.f32 %v6035_v58 }
0x1eb4   :  { %v6028_v59 = vpop.xlane.xlu0 %6027 }
0x1eb5   :  { %v6033_v49 = vsub.f32 %v6017_v62, %v6028_v59 }
0x1eb7   :  { %v12427_v3 = vpop.eup %10158  ;;  %v6037_v6 = vmul.f32 1.442695, %v6033_v49 }
0x1eb8   :  { %v6041_v35 = vsel %vm1617_vm7, %v12427_v3, 0.0 }
0x1eb9   :  { %10160 = vpow2.f32 %v6037_v6  ;;  %6042 = vadd.xlane.f32.xlu2 %v6041_v35 }
0x1ebc   :  { %v6031_v44 = vpop.xlane.xlu1 %6030 }
0x1ebd   :  { %v6034_v27 = vsub.f32 %v6020_v55, %v6031_v44 }
0x1ebf   :  { %v12431_v11 = vpop.eup %10160  ;;  %v6039_v1 = vmul.f32 1.442695, %v6034_v27 }
0x1ec0   :  { %v6044_v14 = vsel %vm1617_vm7, %v12431_v11, 0.0 }
0x1ec1   :  { %10162 = vpow2.f32 %v6039_v1  ;;  %6045 = vadd.xlane.f32.xlu0 %v6044_v14 }
0x1ec7   :  { %v12435_v12 = vpop.eup %10162 }
0x1ec8   :  { %v6047_v5 = vsel %vm1617_vm7, %v12435_v12, 0.0 }
0x1ec9   :  { %6048 = vadd.xlane.f32.xlu1 %v6047_v5 }
0x1ed1   :  { %6136 = vrot.lane.b32.xlu2 %v12397_v29, %s10911_s0 }
0x1ed5   :  { %6134 = vrot.lane.b32.xlu0 %v12406_v54, %s10911_s0 }
0x1ed9   :  { %6130 = vrot.lane.b32.xlu2 %v12417_v7, %s10911_s0 }
0x1edd   :  { %6344 = vrot.lane.b32.xlu0 %v12397_v29, %s10912_s15 }
0x1ee1   :  { %6523 = vrot.lane.b32.xlu2 %v12397_v29, %s10913_s10 }
0x1ee2   :  { %6128 = vrot.lane.b32.xlu1 %v12413_v26, %s10911_s0 }
0x1ee5   :  { %6521 = vrot.lane.b32.xlu0 %v12406_v54, %s10913_s10 }
0x1ee9   :  { %6338 = vrot.lane.b32.xlu2 %v12413_v26, %s10912_s15 }
0x1eea   :  { %6342 = vrot.lane.b32.xlu1 %v12406_v54, %s10912_s15 }
0x1eed   :  { %6340 = vrot.lane.b32.xlu0 %v12417_v7, %s10912_s15 }
0x1ef1   :  { %6519 = vrot.lane.b32.xlu2 %v12417_v7, %s10913_s10 }
0x1ef2   :  { %6517 = vrot.lane.b32.xlu1 %v12413_v26, %s10913_s10 }
0x1f2c   :  { %v6043_v61 = vpop.xlane.xlu2 %6042 }
0x1f2d   :  { %10164 = vrcp.f32 %v6043_v61  ;;  %v6061_v63 = vand.u32 2147483648, %v6043_v61  ;;  %vm6055_vm6 = vweird.f32 %v6043_v61  ;;  %v6059_v17 = vand.u32 2147483647, %v6043_v61 }
0x1f2f   :  { %v6062_v22 = vor.u32 1.1754944e-38, %v6061_v63  ;;  %vm6060_vm10 = vcmp.eq.f32.partialorder %v6059_v17, 8.507059e+37 }
0x1f33   :  { %v10165_v10 = vpop.eup %10164 }
0x1f34   :  { %v6051_v50 = vmul.f32 %v10165_v10, %v6043_v61  ;;  %v6046_v42 = vpop.xlane.xlu0 %6045  ;;  %v6137_v2 = vpop.permute.xlu2 %6136  ;;  %vm6056_vm5 = vweird.f32 %v10165_v10 }
0x1f35   :  { %10166 = vrcp.f32 %v6046_v42  ;;  %v6148_v60 = vsel %vm1586_vm0, %v6137_v2, 0  ;;  %vm6057_vm9 = vmor %vm6055_vm6, %vm6056_vm5  ;;  %v6076_v23 = vand.u32 2147483648, %v6046_v42  ;;  %v6074_v9 = vand.u32 2147483647, %v6046_v42 }
0x1f36   :  { %v6052_v46 = vsub.f32 1.0, %v6051_v50  ;;  %6156 = vmatpush.bf16.xpose.msra.mxu2 %v6148_v60  ;;  %vm6070_vm12 = vweird.f32 %v6046_v42 }
0x1f37   :  { %v6077_v62 = vor.u32 1.1754944e-38, %v6076_v23  ;;  %vm6075_vm14 = vcmp.eq.f32.partialorder %v6074_v9, 8.507059e+37 }
0x1f38   :  { %v6053_v34 = vmul.f32 %v10165_v10, %v6052_v46 }
0x1f3a   :  { %v6054_v37 = vadd.f32 %v10165_v10, %v6053_v34 }
0x1f3b   :  { %v10167_v39 = vpop.eup %10166 }
0x1f3c   :  { %v6066_v19 = vmul.f32 %v10167_v39, %v6046_v42  ;;  %v6049_v15 = vpop.xlane.xlu1 %6048  ;;  %v6131_v51 = vpop.permute.xlu2 %6130  ;;  %v6058_v38 = vsel %vm6057_vm9, %v10165_v10, %v6054_v37  ;;  %vm6071_vm8 = vweird.f32 %v10167_v39 }
0x1f3d   :  { %10168 = vrcp.f32 %v6049_v15  ;;  %v6063_v4 = vsel %vm6060_vm10, %v6062_v22, %v6058_v38  ;;  %vm6072_vm13 = vmor %vm6070_vm12, %vm6071_vm8  ;;  %v6091_v27 = vand.u32 2147483648, %v6049_v15  ;;  %vm6085_vm1 = vweird.f32 %v6049_v15 }
0x1f3e   :  { %v6067_v43 = vsub.f32 1.0, %v6066_v19  ;;  %v6064_v18 = vmul.f32 %v12427_v3, %v6063_v4  ;;  %v6089_v3 = vand.u32 2147483647, %v6049_v15 }
0x1f3f   :  { %v6092_v1 = vor.u32 1.1754944e-38, %v6091_v27 }
0x1f40   :  { %v6068_v57 = vmul.f32 %v10167_v39, %v6067_v43  ;;  %vm6090_vm3 = vcmp.eq.f32.partialorder %v6089_v3, 8.507059e+37 }
0x1f42   :  { %v6069_v16 = vadd.f32 %v10167_v39, %v6068_v57 }
0x1f43   :  { %v10169_v33 = vpop.eup %10168 }
0x1f44   :  { %v6073_v8 = vsel %vm6072_vm13, %v10167_v39, %v6069_v16  ;;  %v6081_v31 = vmul.f32 %v10169_v33, %v6049_v15  ;;  %v6524_v24 = vpop.permute.xlu2 %6523  ;;  %vm6086_vm15 = vweird.f32 %v10169_v33 }
0x1f45   :  { %v6078_v55 = vsel %vm6075_vm14, %v6077_v62, %v6073_v8  ;;  %v6535_v44 = vsel %vm1586_vm0, %v6524_v24, 0  ;;  %vm6087_vm2 = vmor %vm6085_vm1, %vm6086_vm15 }
0x1f46   :  { %v6079_v21 = vmul.f32 %v12431_v11, %v6078_v55  ;;  %v6082_v30 = vsub.f32 1.0, %v6081_v31 }
0x1f47   :  { %v6135_v58 = vpop.permute.xlu0 %6134 }
0x1f48   :  { %v6095_v59 = vpack.c.bf16 %v6079_v21, %v6064_v18  ;;  %v6083_v49 = vmul.f32 %v10169_v33, %v6082_v30  ;;  %v6145_v6 = vsel %vm1586_vm0, %v6135_v58, 0 }
0x1f49   :  { %6157 = vmatpush.bf16.xpose.msra.mxu2 %v6145_v6 }
0x1f4a   :  { %v6084_v35 = vadd.f32 %v10169_v33, %v6083_v49  ;;  %9286 = vmatmul.msk.bf16.vlgmr.msra.gmra.mxu1 %vm1617_vm7, %v6095_v59 }
0x1f4b   :  { %6543 = vmatpush.bf16.xpose.msra.mxu1 %v6535_v44 }
0x1f4c   :  { %v6088_v11 = vsel %vm6087_vm2, %v10169_v33, %v6084_v35  ;;  %v6339_v34 = vpop.permute.xlu2 %6338 }
0x1f4d   :  { %v6093_v20 = vsel %vm6090_vm3, %v6092_v1, %v6088_v11 }
0x1f4e   :  { %v6094_v10 = vmul.f32 %v12435_v12, %v6093_v20 }
0x1f4f   :  { %v6345_v14 = vpop.permute.xlu0 %6344 }
0x1f50   :  { %v6356_v5 = vsel %vm1586_vm0, %v6345_v14, 0  ;;  %v6096_v2 = vpack.c.bf16 %v6094_v10, %v6094_v10 }
0x1f51   :  { %6364 = vmatpush.bf16.xpose.msrb.mxu2 %v6356_v5 }
0x1f54   :  { %v6129_v61 = vpop.permute.xlu1 %6128  ;;  %v6520_v21 = vpop.permute.xlu2 %6519 }
0x1f55   :  { %9288 = vmatmul.msk.bf16.vlgmr.msra.gmra.mxu2 %vm1586_vm0, %v6129_v61 }
0x1f57   :  { %v6522_v50 = vpop.permute.xlu0 %6521 }
0x1f58   :  { %v6532_v42 = vsel %vm1586_vm0, %v6522_v50, 0 }
0x1f59   :  { %6544 = vmatpush.bf16.xpose.msra.mxu1 %v6532_v42 }
0x1f5a   :  { %9287 = vmatmul.msk.bf16.gmra.mxu1 %vm1617_vm7, %v6096_v2 }
0x1f5c   :  { %v6343_v46 = vpop.permute.xlu1 %6342 }
0x1f5d   :  { %v6353_v60 = vsel %vm1586_vm0, %v6343_v46, 0 }
0x1f5e   :  { %6365 = vmatpush.bf16.xpose.msrb.mxu2 %v6353_v60 }
0x1f5f   :  { %v6341_v39 = vpop.permute.xlu0 %6340 }
0x1f64   :  { %v6518_v62 = vpop.permute.xlu1 %6517 }
0x1f65   :  { %9289 = vmatmul.msk.bf16.gmra.mxu2 %vm1586_vm0, %v6131_v51 }
0x1f75   :  { %9304 = vmatmul.msk.bf16.vlgmr.msrb.gmra.mxu2 %vm1586_vm0, %v6339_v34 }
0x1f85   :  { %9305 = vmatmul.msk.bf16.gmra.mxu2 %vm1586_vm0, %v6341_v39 }
0x1fc7   :  { %v6115_v12 = vpop.f32.mrf.mxu1 }
0x1fcf   :  { %v6117_v37 = vpop.f32.mrf.mxu1 }
0x1fd0   :  { %v6124_v19 = vpack.c.bf16 %v6117_v37, %v6115_v12 }
0x1fd2   :  { %9302 = vmatmul.msk.bf16.vlgmr.msrb.gmra.mxu1 %vm1586_vm0, %v6124_v19 }
0x1fd7   :  { %v6120_v15 = vpop.f32.mrf.mxu1 }
0x1fd8   :  { %v6159_v63 = vpop.f32.mrf.mxu2  ;;  %v6125_v51 = vpack.c.bf16 %v6120_v15, %v6120_v15 }
0x1fd9   :  { %v6160_v17 = vadd.f32 %v6159_v63, %v11309_v41 }
0x1fdb   :  { %v6168_v43 = vsel %vm1617_vm7, %v6160_v17, -inf }
0x1fdc   :  { %6169 = vmax.xlane.f32.xlu1 %v6168_v43 }
0x1fdf   :  { %v6122_v23 = vpop.f32.mrf.mxu1 }
0x1fe0   :  { %v6161_v38 = vpop.f32.mrf.mxu2 }
0x1fe1   :  { %v6162_v57 = vadd.f32 %v6161_v38, %v11314_v47 }
0x1fe2   :  { %9303 = vmatmul.msk.bf16.gmra.mxu1 %vm1586_vm0, %v6125_v51 }
0x1fe3   :  { %v6171_v9 = vsel %vm1617_vm7, %v6162_v57, -inf }
0x1fe4   :  { %6172 = vmax.xlane.f32.xlu0 %v6171_v9 }
0x1fe8   :  { %v6164_v22 = vpop.f32.mrf.mxu2 }
0x1fe9   :  { %v6165_v16 = vadd.f32 %v6164_v22, %v11319_v53 }
0x1feb   :  { %v6174_v33 = vsel %vm1617_vm7, %v6165_v16, -inf }
0x1fec   :  { %6175 = vmax.xlane.f32.xlu2 %v6174_v33 }
0x1ff0   :  { %v6166_v4 = vpop.f32.mrf.mxu2 }
0x1ff2   :  { %9314 = vmatmul.msk.bf16.vlgmr.msra.gmra.mxu1 %vm1586_vm0, %v6518_v62 }
0x1ff8   :  { %v6367_v8 = vpop.f32.mrf.mxu2 }
0x1ff9   :  { %v6368_v31 = vadd.f32 %v6367_v8, %v11309_v41 }
0x1ffb   :  { %v6376_v55 = vsel %vm1617_vm7, %v6368_v31, -inf }
0x1ffc   :  { %6377 = vmax.xlane.f32.xlu2 %v6376_v55 }
0x2000   :  { %v6369_v18 = vpop.f32.mrf.mxu2 }
0x2001   :  { %v6370_v30 = vadd.f32 %v6369_v18, %v11314_v47 }
0x2002   :  { %9315 = vmatmul.msk.bf16.gmra.mxu1 %vm1586_vm0, %v6520_v21 }
0x2003   :  { %v6379_v24 = vsel %vm1617_vm7, %v6370_v30, -inf }
0x2004   :  { %6380 = vmax.xlane.f32.xlu1 %v6379_v24 }
0x2008   :  { %v6372_v58 = vpop.f32.mrf.mxu2 }
0x2009   :  { %v12493_v59 = vadd.f32 %v6372_v58, %v11319_v53 }
0x200b   :  { %v6382_v49 = vsel %vm1617_vm7, %v12493_v59, -inf }
0x200c   :  { %6383 = vmax.xlane.f32.xlu0 %v6382_v49 }
0x2010   :  { %v6374_v6 = vpop.f32.mrf.mxu2 }
0x204f   :  { %v12497_v35 = vpop.f32.mrf.mxu1  ;;  %v6170_v44 = vpop.xlane.xlu1 %6169 }
0x2050   :  { %v6177_v27 = vsub.f32 %v6160_v17, %v6170_v44 }
0x2052   :  { %v6180_v3 = vmul.f32 1.442695, %v6177_v27 }
0x2054   :  { %10170 = vpow2.f32 %v6180_v3 }
0x2057   :  { %v12499_v11 = vpop.f32.mrf.mxu1  ;;  %v6173_v1 = vpop.xlane.xlu0 %6172 }
0x2058   :  { %v6178_v14 = vsub.f32 %v6162_v57, %v6173_v1 }
0x205a   :  { %v12501_v5 = vpop.eup %10170  ;;  %v6182_v20 = vmul.f32 1.442695, %v6178_v14 }
0x205b   :  { %v6186_v61 = vsel %vm1617_vm7, %v12501_v5, 0.0 }
0x205c   :  { %10172 = vpow2.f32 %v6182_v20  ;;  %6187 = vadd.xlane.f32.xlu0 %v6186_v61 }
0x205f   :  { %v12505_v10 = vpop.f32.mrf.mxu1  ;;  %v6176_v50 = vpop.xlane.xlu2 %6175 }
0x2060   :  { %v6179_v42 = vsub.f32 %v6165_v16, %v6176_v50 }
0x2062   :  { %v12507_v2 = vpop.eup %10172  ;;  %v6184_v46 = vmul.f32 1.442695, %v6179_v42 }
0x2063   :  { %v6189_v60 = vsel %vm1617_vm7, %v12507_v2, 0.0 }
0x2064   :  { %10174 = vpow2.f32 %v6184_v46  ;;  %6190 = vadd.xlane.f32.xlu2 %v6189_v60 }
0x2067   :  { %v6336_v34 = vpop.f32.mrf.mxu1 }
0x206a   :  { %v12511_v39 = vpop.eup %10174 }
0x206b   :  { %v6192_v12 = vsel %vm1617_vm7, %v12511_v39, 0.0 }
0x206c   :  { %6193 = vadd.xlane.f32.xlu1 %v6192_v12 }
0x206f   :  { %v6546_v37 = vpop.f32.mrf.mxu1  ;;  %v6378_v38 = vpop.xlane.xlu2 %6377 }
0x2070   :  { %v6547_v19 = vadd.f32 %v6546_v37, %v11309_v41  ;;  %v6385_v57 = vsub.f32 %v6368_v31, %v6378_v38 }
0x2072   :  { %v6555_v15 = vsel %vm1617_vm7, %v6547_v19, -inf  ;;  %v6388_v9 = vmul.f32 1.442695, %v6385_v57 }
0x2074   :  { %6556 = vmax.xlane.f32.xlu1 %v6555_v15  ;;  %10176 = vpow2.f32 %v6388_v9 }
0x2077   :  { %v6548_v63 = vpop.f32.mrf.mxu1  ;;  %v6381_v16 = vpop.xlane.xlu1 %6380 }
0x2078   :  { %v6549_v17 = vadd.f32 %v6548_v63, %v11314_v47  ;;  %v6386_v4 = vsub.f32 %v6370_v30, %v6381_v16 }
0x207a   :  { %v6558_v43 = vsel %vm1617_vm7, %v6549_v17, -inf  ;;  %v12527_v22 = vpop.eup %10176  ;;  %v6390_v62 = vmul.f32 1.442695, %v6386_v4 }
0x207b   :  { %6559 = vmax.xlane.f32.xlu0 %v6558_v43  ;;  %v6394_v33 = vsel %vm1617_vm7, %v12527_v22, 0.0 }
0x207c   :  { %6246 = vrot.lane.b32.xlu2 %v12399_v40, %s10911_s0  ;;  %10178 = vpow2.f32 %v6390_v62 }
0x207f   :  { %v6551_v23 = vpop.f32.mrf.mxu1  ;;  %v12548_v21 = vpop.xlane.xlu0 %6383 }
0x2080   :  { %v12536_v55 = vadd.f32 %v6551_v23, %v11319_v53 }
0x2082   :  { %v12531_v8 = vpop.eup %10178  ;;  %v6561_v18 = vsel %vm1617_vm7, %v12536_v55, -inf }
0x2083   :  { %v6397_v31 = vsel %vm1617_vm7, %v12531_v8, 0.0 }
0x2087   :  { %v6553_v51 = vpop.f32.mrf.mxu1 }
0x208d   :  { %6631 = vrot.lane.b32.xlu1 %v12399_v40, %s10913_s10 }
0x208f   :  { %6244 = vrot.lane.b32.xlu0 %v12408_v0, %s10911_s0 }
0x2095   :  { %6452 = vrot.lane.b32.xlu1 %v12399_v40, %s10912_s15 }
0x20a5   :  { %6395 = vadd.xlane.f32.xlu2 %v6394_v33 }
0x20b9   :  { %6398 = vadd.xlane.f32.xlu0 %v6397_v31 }
0x20bd   :  { %6450 = vrot.lane.b32.xlu2 %v12408_v0, %s10912_s15 }
0x20bf   :  { %6562 = vmax.xlane.f32.xlu1 %v6561_v18 }
0x20c5   :  { %6702 = vrot.lane.b32.xlu2 %v12397_v29, %s10885_s22 }
0x20cd   :  { %6700 = vrot.lane.b32.xlu2 %v12406_v54, %s10885_s22 }
0x20cf   :  { %v6188_v24 = vpop.xlane.xlu0 %6187 }
0x20d0   :  { %v6206_v38 = vand.u32 2147483648, %v6188_v24  ;;  %vm6200_vm8 = vweird.f32 %v6188_v24  ;;  %v6204_v9 = vand.u32 2147483647, %v6188_v24 }
0x20d2   :  { %v6207_v18 = vor.u32 1.1754944e-38, %v6206_v38  ;;  %vm6205_vm13 = vcmp.eq.f32.partialorder %v6204_v9, 8.507059e+37 }
0x20d5   :  { %6696 = vrot.lane.b32.xlu2 %v12413_v26, %s10885_s22 }
0x20d7   :  { %v6191_v30 = vpop.xlane.xlu2 %6190 }
0x20d8   :  { %10180 = vrcp.f32 %v6191_v30  ;;  %v6221_v23 = vand.u32 2147483648, %v6191_v30  ;;  %vm6215_vm6 = vweird.f32 %v6191_v30 }
0x20d9   :  { %10182 = vrcp.f32 %v6188_v24 }
0x20da   :  { %v6222_v4 = vor.u32 1.1754944e-38, %v6221_v23 }
0x20de   :  { %v10181_v44 = vpop.eup %10180 }
0x20df   :  { %v12550_v58 = vpop.xlane.xlu1 %6193  ;;  %v6247_v49 = vpop.permute.xlu2 %6246  ;;  %v6211_v14 = vmul.f32 %v10181_v44, %v6191_v30  ;;  %vm6216_vm4 = vweird.f32 %v10181_v44 }
0x20e0   :  { %v6256_v6 = vsel %vm933_vm11, %v6247_v49, 0  ;;  %v10183_v3 = vpop.eup %10182  ;;  %vm6217_vm9 = vmor %vm6215_vm6, %vm6216_vm4  ;;  %vm6230_vm15 = vweird.f32 %v12550_v58 }
0x20e1   :  { %6264 = vmatpush.bf16.msrb.mxu3 %v6256_v6  ;;  %v6196_v61 = vmul.f32 %v10183_v3, %v6188_v24  ;;  %v6212_v50 = vsub.f32 1.0, %v6211_v14  ;;  %vm6201_vm5 = vweird.f32 %v10183_v3 }
0x20e2   :  { %vm6202_vm10 = vmor %vm6200_vm8, %vm6201_vm5 }
0x20e3   :  { %v6197_v46 = vsub.f32 1.0, %v6196_v61  ;;  %v6213_v34 = vmul.f32 %v10181_v44, %v6212_v50  ;;  %v6236_v50 = vand.u32 2147483648, %v12550_v58 }
0x20e5   :  { %v6198_v15 = vmul.f32 %v10183_v3, %v6197_v46 }
0x20e7   :  { %v6557_v27 = vpop.xlane.xlu1 %6556  ;;  %v6199_v51 = vadd.f32 %v10183_v3, %v6198_v15 }
0x20e8   :  { %v6564_v1 = vsub.f32 %v6547_v19, %v6557_v27  ;;  %v6214_v19 = vadd.f32 %v10181_v44, %v6213_v34 }
0x20e9   :  { %v6203_v31 = vsel %vm6202_vm10, %v10183_v3, %v6199_v51 }
0x20ea   :  { %v6567_v20 = vmul.f32 1.442695, %v6564_v1  ;;  %v6218_v16 = vsel %vm6217_vm9, %v10181_v44, %v6214_v19  ;;  %v6208_v6 = vsel %vm6205_vm13, %v6207_v18, %v6203_v31 }
0x20eb   :  { %v6209_v44 = vmul.f32 %v12501_v5, %v6208_v6 }
0x20ec   :  { %10184 = vpow2.f32 %v6567_v20 }
0x20ed   :  { %10186 = vrcp.f32 %v12550_v58 }
0x20ee   :  { %v6560_v42 = vpop.xlane.xlu0 %6559 }
0x20ef   :  { %v6565_v60 = vsub.f32 %v6549_v17, %v6560_v42  ;;  %v6219_v17 = vand.u32 2147483647, %v6191_v30 }
0x20f1   :  { %v6569_v12 = vmul.f32 1.442695, %v6565_v60  ;;  %vm6220_vm12 = vcmp.eq.f32.partialorder %v6219_v17, 8.507059e+37  ;;  %v6237_v60 = vor.u32 1.1754944e-38, %v6236_v50 }
0x20f2   :  { %v12554_v37 = vpop.eup %10184  ;;  %v6223_v49 = vsel %vm6220_vm12, %v6222_v4, %v6218_v16 }
0x20f3   :  { %10188 = vpow2.f32 %v6569_v12  ;;  %v6573_v63 = vsel %vm1617_vm7, %v12554_v37, 0.0  ;;  %v10187_v43 = vpop.eup %10186  ;;  %v6224_v27 = vmul.f32 %v12507_v2, %v6223_v49  ;;  %v6234_v2 = vand.u32 2147483647, %v12550_v58 }
0x20f4   :  { %6574 = vadd.xlane.f32.xlu1 %v6573_v63  ;;  %v6226_v33 = vmul.f32 %v10187_v43, %v12550_v58  ;;  %vm6231_vm14 = vweird.f32 %v10187_v43 }
0x20f5   :  { %v6240_v61 = vpack.c.bf16 %v6224_v27, %v6209_v44  ;;  %vm6232_vm1 = vmor %vm6230_vm15, %vm6231_vm14  ;;  %vm6235_vm2 = vcmp.eq.f32.partialorder %v6234_v2, 8.507059e+37 }
0x20f6   :  { %v6227_v30 = vsub.f32 1.0, %v6226_v33 }
0x20f8   :  { %v6228_v14 = vmul.f32 %v10187_v43, %v6227_v30 }
0x20f9   :  { %v12558_v57 = vpop.eup %10188 }
0x20fa   :  { %v6576_v62 = vsel %vm1617_vm7, %v12558_v57, 0.0  ;;  %v6229_v3 = vadd.f32 %v10187_v43, %v6228_v14 }
0x20fc   :  { %6577 = vadd.xlane.f32.xlu1 %v6576_v62  ;;  %v6233_v5 = vsel %vm6232_vm1, %v10187_v43, %v6229_v3  ;;  %v6387_v43 = vsub.f32 %v12493_v59, %v12548_v21 }
0x20fd   :  { %v6238_v34 = vsel %vm6235_vm2, %v6237_v60, %v6233_v5 }
0x20fe   :  { %v6239_v12 = vmul.f32 %v12511_v39, %v6238_v34  ;;  %v6392_v39 = vmul.f32 1.442695, %v6387_v43 }
0x20ff   :  { %v6632_v1 = vpop.permute.xlu1 %6631 }
0x2100   :  { %v6641_v24 = vsel %vm933_vm11, %v6632_v1, 0  ;;  %v6241_v15 = vpack.c.bf16 %v6239_v12, %v6239_v12 }
0x2101   :  { %v6245_v20 = vpop.permute.xlu0 %6244  ;;  %6649 = vmatpush.bf16.msra.mxu2 %v6641_v24 }
0x2102   :  { %6265 = vmatpush.bf16.msrb.mxu3 %v6245_v20 }
0x2105   :  { %9290 = vmatmul.msk.bf16.vlgmr.msrb.gmra.mxu3 %vm1617_vm7, %v6240_v61 }
0x2107   :  { %v6453_v42 = vpop.permute.xlu1 %6452 }
0x2108   :  { %v6462_v46 = vsel %vm933_vm11, %v6453_v42, 0 }
0x2109   :  { %6470 = vmatpush.bf16.msra.mxu3 %v6462_v46 }
0x2115   :  { %6629 = vrot.lane.b32.xlu1 %v12408_v0, %s10913_s10  ;;  %9291 = vmatmul.msk.bf16.gmra.mxu3 %vm1617_vm7, %v6241_v15  ;;  %v9776_v15 = vld [vmem:[#allocation16 + $0x90] sm:$0xff] }
0x2118   :  { %v6396_v63 = vpop.xlane.xlu2 %6395 }
0x2119   :  { %10190 = vrcp.f32 %v6396_v63  ;;  %v6414_v31 = vand.u32 2147483648, %v6396_v63  ;;  %vm6408_vm4 = vweird.f32 %v6396_v63  ;;  %v6412_v49 = vand.u32 2147483647, %v6396_v63 }
0x211b   :  { %v6415_v1 = vor.u32 1.1754944e-38, %v6414_v31  ;;  %vm6413_vm9 = vcmp.eq.f32.partialorder %v6412_v49, 8.507059e+37 }
0x211f   :  { %v10191_v19 = vpop.eup %10190 }
0x2120   :  { %v6451_v58 = vpop.permute.xlu2 %6450  ;;  %v6404_v23 = vmul.f32 %v10191_v19, %v6396_v63  ;;  %vm6409_vm3 = vweird.f32 %v10191_v19 }
0x2121   :  { %6471 = vmatpush.bf16.msra.mxu3 %v6451_v58  ;;  %vm6410_vm5 = vmor %vm6408_vm4, %vm6409_vm3 }
0x2122   :  { %v6405_v51 = vsub.f32 1.0, %v6404_v23 }
0x2124   :  { %v6406_v38 = vmul.f32 %v10191_v19, %v6405_v51 }
0x2126   :  { %v6407_v4 = vadd.f32 %v10191_v19, %v6406_v38 }
0x2128   :  { %v6411_v59 = vsel %vm6410_vm5, %v10191_v19, %v6407_v4 }
0x2129   :  { %v6416_v44 = vsel %vm6413_vm9, %v6415_v1, %v6411_v59 }
0x212a   :  { %v6417_v50 = vmul.f32 %v12527_v22, %v6416_v44 }
0x212c   :  { %v6399_v17 = vpop.xlane.xlu0 %6398 }
0x212d   :  { %10192 = vrcp.f32 %v6399_v17  ;;  %v6429_v6 = vand.u32 2147483648, %v6399_v17  ;;  %v6427_v27 = vand.u32 2147483647, %v6399_v17  ;;  %vm6423_vm8 = vweird.f32 %v6399_v17 }
0x212e   :  { %10194 = vpow2.f32 %v6392_v39 }
0x212f   :  { %v6430_v14 = vor.u32 1.1754944e-38, %v6429_v6  ;;  %vm6428_vm12 = vcmp.eq.f32.partialorder %v6427_v27, 8.507059e+37 }
0x2132   :  { %v6563_v9 = vpop.xlane.xlu1 %6562 }
0x2133   :  { %v10193_v16 = vpop.eup %10192  ;;  %v6566_v33 = vsub.f32 %v12536_v55, %v6563_v9 }
0x2134   :  { %v6419_v62 = vmul.f32 %v10193_v16, %v6399_v17  ;;  %vm6424_vm6 = vweird.f32 %v10193_v16  ;;  %v12578_v55 = vpop.eup %10194 }
0x2135   :  { %v6571_v18 = vmul.f32 1.442695, %v6566_v33  ;;  %vm6425_vm10 = vmor %vm6423_vm8, %vm6424_vm6  ;;  %v6400_v42 = vsel %vm1617_vm7, %v12578_v55, 0.0 }
0x2136   :  { %v6420_v30 = vsub.f32 1.0, %v6419_v62 }
0x2137   :  { %10196 = vpow2.f32 %v6571_v18 }
0x2138   :  { %v6421_v21 = vmul.f32 %v10193_v16, %v6420_v30 }
0x213a   :  { %v6422_v24 = vadd.f32 %v10193_v16, %v6421_v21 }
0x213c   :  { %v6426_v20 = vsel %vm6425_vm10, %v10193_v16, %v6422_v24  ;;  %v6703_v24 = vpop.permute.xlu2 %6702 }
0x213d   :  { %v12580_v61 = vpop.eup %10196  ;;  %v6431_v3 = vsel %vm6428_vm12, %v6430_v14, %v6426_v20  ;;  %v6714_v20 = vsel %vm1586_vm0, %v6703_v24, 0 }
0x213e   :  { %v6432_v2 = vmul.f32 %v12531_v8, %v6431_v3  ;;  %v6579_v46 = vsel %vm1617_vm7, %v12580_v61, 0.0  ;;  %v9775_v8 = vld [vmem:[#allocation16 + $0x88] sm:$0xff] }
0x213f   :  { %6401 = vadd.xlane.f32.xlu1 %v6400_v42  ;;  %6580 = vadd.xlane.f32.xlu0 %v6579_v46  ;;  %v9777_v42 = vld [vmem:[#allocation16 + $0x98] sm:$0xff] }
0x2140   :  { %v6448_v5 = vpack.c.bf16 %v6432_v2, %v6417_v50  ;;  %6297 = vmatpush.bf16.msrb.mxu0 %v9775_v8  ;;  %6682 = vmatpush.bf16.msrb.mxu3 %v9777_v42 }
0x2142   :  { %9306 = vmatmul.msk.bf16.vlgmr.msra.gmra.mxu3 %vm1617_vm7, %v6448_v5 }
0x2144   :  { %6503 = vmatpush.bf16.msra.mxu0 %v9776_v15  ;;  %v6701_v3 = vpop.permute.xlu2 %6700 }
0x2153   :  { %6881 = vrot.lane.b32.xlu0 %v12397_v29, %s10914_s4 }
0x2158   :  { %6877 = vrot.lane.b32.xlu1 %v12417_v7, %s10914_s4 }
0x215b   :  { %6879 = vrot.lane.b32.xlu0 %v12406_v54, %s10914_s4 }
0x2163   :  { %6875 = vrot.lane.b32.xlu0 %v12413_v26, %s10914_s4 }
0x2167   :  { %v6575_v22 = vpop.xlane.xlu1 %6574 }
0x2168   :  { %10198 = vrcp.f32 %v6575_v22  ;;  %v6593_v16 = vand.u32 2147483648, %v6575_v22  ;;  %vm6587_vm2 = vweird.f32 %v6575_v22  ;;  %v6591_v33 = vand.u32 2147483647, %v6575_v22 }
0x216a   :  { %v6594_v18 = vor.u32 1.1754944e-38, %v6593_v16  ;;  %vm6592_vm5 = vcmp.eq.f32.partialorder %v6591_v33, 8.507059e+37 }
0x216b   :  { %6698 = vrot.lane.b32.xlu0 %v12417_v7, %s10885_s22 }
0x216e   :  { %v10199_v60 = vpop.eup %10198 }
0x216f   :  { %v6578_v34 = vpop.xlane.xlu1 %6577  ;;  %v6583_v12 = vmul.f32 %v10199_v60, %v6575_v22  ;;  %vm6588_vm14 = vweird.f32 %v10199_v60 }
0x2170   :  { %10200 = vrcp.f32 %v6578_v34  ;;  %v6608_v43 = vand.u32 2147483648, %v6578_v34  ;;  %vm6602_vm15 = vweird.f32 %v6578_v34  ;;  %v6606_v9 = vand.u32 2147483647, %v6578_v34  ;;  %vm6589_vm3 = vmor %vm6587_vm2, %vm6588_vm14 }
0x2171   :  { %v6584_v63 = vsub.f32 1.0, %v6583_v12 }
0x2172   :  { %v6609_v62 = vor.u32 1.1754944e-38, %v6608_v43  ;;  %vm6607_vm4 = vcmp.eq.f32.partialorder %v6606_v9, 8.507059e+37 }
0x2173   :  { %v6585_v23 = vmul.f32 %v10199_v60, %v6584_v63 }
0x2175   :  { %v6586_v38 = vadd.f32 %v10199_v60, %v6585_v23 }
0x2176   :  { %v10201_v58 = vpop.eup %10200 }
0x2177   :  { %v6598_v19 = vmul.f32 %v10201_v58, %v6578_v34  ;;  %vm6603_vm13 = vweird.f32 %v10201_v58  ;;  %v6590_v31 = vsel %vm6589_vm3, %v10199_v60, %v6586_v38 }
0x2178   :  { %vm6604_vm1 = vmor %vm6602_vm15, %vm6603_vm13  ;;  %v6595_v30 = vsel %vm6592_vm5, %v6594_v18, %v6590_v31 }
0x2179   :  { %v6599_v51 = vsub.f32 1.0, %v6598_v19  ;;  %v6596_v59 = vmul.f32 %v12554_v37, %v6595_v30 }
0x217b   :  { %v6600_v17 = vmul.f32 %v10201_v58, %v6599_v51 }
0x217d   :  { %v6601_v39 = vadd.f32 %v10201_v58, %v6600_v17 }
0x217f   :  { %v6605_v4 = vsel %vm6604_vm1, %v10201_v58, %v6601_v39 }
0x2180   :  { %v6610_v49 = vsel %vm6607_vm4, %v6609_v62, %v6605_v4 }
0x2181   :  { %v6611_v6 = vmul.f32 %v12558_v57, %v6610_v49  ;;  %v6711_v57 = vsel %vm1586_vm0, %v6701_v3, 0 }
0x2183   :  { %v6627_v1 = vpack.c.bf16 %v6611_v6, %v6596_v59 }
0x2187   :  { %v6630_v21 = vpop.permute.xlu1 %6629 }
0x2188   :  { %v6267_v27 = vpop.f32.mrf.mxu3  ;;  %6650 = vmatpush.bf16.msra.mxu2 %v6630_v21 }
0x218b   :  { %9316 = vmatmul.msk.bf16.vlgmr.msra.gmra.mxu2 %vm1617_vm7, %v6627_v1 }
0x2190   :  { %v6269_v44 = vpop.f32.mrf.mxu3 }
0x2191   :  { %v6276_v14 = vpack.c.bf16 %v6269_v44, %v6267_v27 }
0x2193   :  { %9296 = vmatmul.msk.bf16.vlgmr.msrb.gmra.mxu0 %vm1586_vm0, %v6276_v14 }
0x2194   :  { %6722 = vmatpush.bf16.xpose.msrb.mxu0 %v6714_v20 }
0x2198   :  { %v6272_v50 = vpop.f32.mrf.mxu3 }
0x2199   :  { %v6277_v2 = vpack.c.bf16 %v6272_v50, %v6272_v50 }
0x219c   :  { %6723 = vmatpush.bf16.xpose.msrb.mxu0 %v6711_v57 }
0x21a0   :  { %v6274_v37 = vpop.f32.mrf.mxu3 }
0x21a3   :  { %9297 = vmatmul.msk.bf16.gmra.mxu0 %vm1586_vm0, %v6277_v2 }
0x21b2   :  { %v6581_v46 = vpop.xlane.xlu0 %6580  ;;  %v6402_v5 = vpop.xlane.xlu1 %6401 }
0x21b3   :  { %10202 = vrcp.f32 %v6581_v46  ;;  %v6623_v15 = vand.u32 2147483648, %v6581_v46  ;;  %v6621_v19 = vand.u32 2147483647, %v6581_v46  ;;  %v6444_v23 = vand.u32 2147483648, %v6402_v5 }
0x21b4   :  { %10204 = vrcp.f32 %v6402_v5  ;;  %v6442_v17 = vand.u32 2147483647, %v6402_v5  ;;  %vm6617_vm8 = vweird.f32 %v6581_v46  ;;  %vm6438_vm12 = vweird.f32 %v6402_v5 }
0x21b5   :  { %v6624_v38 = vor.u32 1.1754944e-38, %v6623_v15  ;;  %vm6622_vm13 = vcmp.eq.f32.partialorder %v6621_v19, 8.507059e+37  ;;  %v6445_v9 = vor.u32 1.1754944e-38, %v6444_v23 }
0x21b6   :  { %vm6443_vm15 = vcmp.eq.f32.partialorder %v6442_v17, 8.507059e+37 }
0x21b9   :  { %v10203_v22 = vpop.eup %10202 }
0x21ba   :  { %v10205_v8 = vpop.eup %10204  ;;  %v6613_v60 = vmul.f32 %v10203_v22, %v6581_v46  ;;  %vm6618_vm6 = vweird.f32 %v10203_v22 }
0x21bb   :  { %v6434_v34 = vmul.f32 %v10205_v8, %v6402_v5  ;;  %vm6439_vm9 = vweird.f32 %v10205_v8  ;;  %vm6619_vm10 = vmor %vm6617_vm8, %vm6618_vm6 }
0x21bc   :  { %v6614_v12 = vsub.f32 1.0, %v6613_v60  ;;  %vm6440_vm14 = vmor %vm6438_vm12, %vm6439_vm9  ;;  %v6697_v60 = vpop.permute.xlu2 %6696 }
0x21bd   :  { %v6435_v63 = vsub.f32 1.0, %v6434_v34 }
0x21be   :  { %v6615_v58 = vmul.f32 %v10203_v22, %v6614_v12 }
0x21bf   :  { %v6436_v51 = vmul.f32 %v10205_v8, %v6435_v63 }
0x21c0   :  { %v6616_v43 = vadd.f32 %v10203_v22, %v6615_v58 }
0x21c1   :  { %v6437_v39 = vadd.f32 %v10205_v8, %v6436_v51 }
0x21c2   :  { %v6620_v16 = vsel %vm6619_vm10, %v10203_v22, %v6616_v43 }
0x21c3   :  { %v6441_v33 = vsel %vm6440_vm14, %v10205_v8, %v6437_v39  ;;  %v6625_v4 = vsel %vm6622_vm13, %v6624_v38, %v6620_v16 }
0x21c4   :  { %v6446_v62 = vsel %vm6443_vm15, %v6445_v9, %v6441_v33  ;;  %v6626_v31 = vmul.f32 %v12580_v61, %v6625_v4 }
0x21c5   :  { %v6882_v18 = vpop.permute.xlu0 %6881  ;;  %v6473_v49 = vpop.f32.mrf.mxu3  ;;  %v6447_v30 = vmul.f32 %v12578_v55, %v6446_v62 }
0x21c6   :  { %v6893_v6 = vsel %vm1586_vm0, %v6882_v18, 0  ;;  %v6628_v59 = vpack.c.bf16 %v6626_v31, %v6626_v31 }
0x21c7   :  { %6901 = vmatpush.bf16.xpose.msra.mxu3 %v6893_v6  ;;  %v6449_v21 = vpack.c.bf16 %v6447_v30, %v6447_v30 }
0x21c8   :  { %9317 = vmatmul.msk.bf16.gmra.mxu2 %vm1617_vm7, %v6628_v59 }
0x21c9   :  { %9307 = vmatmul.msk.bf16.gmra.mxu3 %vm1617_vm7, %v6449_v21 }
0x21ca   :  { %v6878_v34 = vpop.permute.xlu1 %6877 }
0x21cd   :  { %v6880_v27 = vpop.permute.xlu0 %6879  ;;  %v6475_v1 = vpop.f32.mrf.mxu3 }
0x21ce   :  { %v6890_v24 = vsel %vm1586_vm0, %v6880_v27, 0  ;;  %v6482_v44 = vpack.c.bf16 %v6475_v1, %v6473_v49 }
0x21cf   :  { %6902 = vmatpush.bf16.xpose.msra.mxu3 %v6890_v24 }
0x21d0   :  { %9312 = vmatmul.msk.bf16.vlgmr.msra.gmra.mxu0 %vm1586_vm0, %v6482_v44 }
0x21d5   :  { %v6876_v8 = vpop.permute.xlu0 %6875 }
0x21dd   :  { %v6699_v12 = vpop.permute.xlu0 %6698 }
0x220e   :  { %v6652_v61 = vpop.f32.mrf.mxu2 }
0x2210   :  { %v6299_v14 = vpop.f32.mrf.mxu0 }
0x2211   :  { %v6330_v63 = vadd.f32 %v12497_v35, %v6299_v14 }
0x2216   :  { %v6654_v55 = vpop.f32.mrf.mxu2 }
0x2217   :  { %v6661_v20 = vpack.c.bf16 %v6654_v55, %v6652_v61 }
0x2218   :  { %v12613_v3 = vpop.f32.mrf.mxu0 }
0x2219   :  { %9322 = vmatmul.msk.bf16.vlgmr.msrb.gmra.mxu3 %vm1586_vm0, %v6661_v20 }
0x2220   :  { %v6304_v50 = vpop.f32.mrf.mxu0 }
0x2221   :  { %v6335_v43 = vadd.f32 %v12505_v10, %v6304_v50 }
0x2228   :  { %v6306_v57 = vpop.f32.mrf.mxu0 }
0x224b   :  { %v6657_v37 = vpop.f32.mrf.mxu2 }
0x224c   :  { %v6478_v2 = vpop.f32.mrf.mxu3  ;;  %v6662_v42 = vpack.c.bf16 %v6657_v37, %v6657_v37 }
0x224d   :  { %v6483_v46 = vpack.c.bf16 %v6478_v2, %v6478_v2  ;;  %v6505_v15 = vpop.f32.mrf.mxu0 }
0x224e   :  { %9323 = vmatmul.msk.bf16.gmra.mxu3 %vm1586_vm0, %v6662_v42  ;;  %v6514_v58 = vadd.f32 %v6505_v15, %v6330_v63 }
0x224f   :  { %9313 = vmatmul.msk.bf16.gmra.mxu0 %vm1586_vm0, %v6483_v46 }
0x2253   :  { %v6659_v5 = vpop.f32.mrf.mxu2 }
0x2254   :  { %v6480_v22 = vpop.f32.mrf.mxu3 }
0x2255   :  { %v12625_v51 = vpop.f32.mrf.mxu0 }
0x225e   :  { %9334 = vmatmul.msk.bf16.vlgmr.msra.gmra.mxu3 %vm1586_vm0, %v6876_v8 }
0x225f   :  { %9324 = vmatmul.msk.bf16.vlgmr.msrb.gmra.mxu0 %vm1586_vm0, %v6697_v60 }
0x226e   :  { %9335 = vmatmul.msk.bf16.gmra.mxu3 %vm1586_vm0, %v6878_v34 }
0x226f   :  { %9325 = vmatmul.msk.bf16.gmra.mxu0 %vm1586_vm0, %v6699_v12 }
0x229c   :  { %v6684_v19 = vpop.f32.mrf.mxu3 }
0x229d   :  { %v12623_v23 = vadd.f32 %v6684_v19, %v6514_v58 }
0x22a4   :  { %v12627_v17 = vpop.f32.mrf.mxu3 }
0x22cc   :  { %v6510_v38 = vpop.f32.mrf.mxu0 }
0x22cd   :  { %v6516_v39 = vadd.f32 %v6510_v38, %v6335_v43 }
0x22d1   :  { %v6689_v9 = vpop.f32.mrf.mxu3 }
0x22d2   :  { %v12630_v16 = vadd.f32 %v6689_v9, %v6516_v39 }
0x22d4   :  { %v6512_v33 = vpop.f32.mrf.mxu0 }
0x22d9   :  { %v6691_v4 = vpop.f32.mrf.mxu3 }
0x22dc   :  { %v6725_v62 = vpop.f32.mrf.mxu0 }
0x22dd   :  { %v6726_v35 = vadd.f32 %v6725_v62, %v11309_v41 }
0x22df   :  { %v6734_v31 = vsel %vm1617_vm7, %v6726_v35, -inf }
0x22e0   :  { %6735 = vmax.xlane.f32.xlu2 %v6734_v31 }
0x22e1   :  { %v6904_v18 = vpop.f32.mrf.mxu3 }
0x22e2   :  { %v6905_v49 = vadd.f32 %v6904_v18, %v11309_v41 }
0x22e4   :  { %v6727_v30 = vpop.f32.mrf.mxu0  ;;  %v6913_v6 = vsel %vm1617_vm7, %v6905_v49, -inf }
0x22e5   :  { %v6728_v10 = vadd.f32 %v6727_v30, %v11314_v47  ;;  %6914 = vmax.xlane.f32.xlu1 %v6913_v6 }
0x22e7   :  { %v6737_v59 = vsel %vm1617_vm7, %v6728_v10, -inf }
0x22e8   :  { %6738 = vmax.xlane.f32.xlu0 %v6737_v59 }
0x22e9   :  { %v6906_v21 = vpop.f32.mrf.mxu3 }
0x22ea   :  { %v6907_v27 = vadd.f32 %v6906_v21, %v11314_v47 }
0x22ec   :  { %v6730_v1 = vpop.f32.mrf.mxu0  ;;  %v6916_v24 = vsel %vm1617_vm7, %v6907_v27, -inf }
0x22ed   :  { %v6731_v44 = vadd.f32 %v6730_v1, %v11319_v53  ;;  %6917 = vmax.xlane.f32.xlu2 %v6916_v24 }
0x22ef   :  { %v6740_v61 = vsel %vm1617_vm7, %v6731_v44, -inf }
0x22f0   :  { %6741 = vmax.xlane.f32.xlu0 %v6740_v61 }
0x22f1   :  { %v6909_v14 = vpop.f32.mrf.mxu3 }
0x22f2   :  { %v6910_v9 = vadd.f32 %v6909_v14, %v11319_v53 }
0x22f4   :  { %v6732_v55 = vpop.f32.mrf.mxu0  ;;  %v6919_v4 = vsel %vm1617_vm7, %v6910_v9, -inf }
0x22f9   :  { %v6911_v20 = vpop.f32.mrf.mxu3 }
0x2353   :  { %v6736_v50 = vpop.xlane.xlu2 %6735 }
0x2354   :  { %v6743_v57 = vsub.f32 %v6726_v35, %v6736_v50 }
0x2356   :  { %v6746_v37 = vmul.f32 1.442695, %v6743_v57 }
0x2358   :  { %10206 = vpow2.f32 %v6746_v37  ;;  %v6915_v2 = vpop.xlane.xlu1 %6914 }
0x2359   :  { %v6922_v42 = vsub.f32 %v6905_v49, %v6915_v2 }
0x235b   :  { %v6925_v46 = vmul.f32 1.442695, %v6922_v42  ;;  %v6739_v5 = vpop.xlane.xlu0 %6738 }
0x235c   :  { %v6744_v22 = vsub.f32 %v6728_v10, %v6739_v5  ;;  %v9778_v10 = vld [vmem:[#allocation16 + $0xa0] sm:$0xff] }
0x235d   :  { %10208 = vpow2.f32 %v6925_v46  ;;  %6861 = vmatpush.bf16.msrb.mxu2 %v9778_v10 }
0x235e   :  { %v12642_v8 = vpop.eup %10206  ;;  %v6748_v60 = vmul.f32 1.442695, %v6744_v22 }
0x235f   :  { %v6752_v34 = vsel %vm1617_vm7, %v12642_v8, 0.0 }
0x2360   :  { %10210 = vpow2.f32 %v6748_v60  ;;  %6753 = vadd.xlane.f32.xlu0 %v6752_v34  ;;  %v6918_v12 = vpop.xlane.xlu2 %6917 }
0x2361   :  { %v6923_v15 = vsub.f32 %v6907_v27, %v6918_v12 }
0x2363   :  { %v12646_v63 = vpop.eup %10208  ;;  %v6927_v58 = vmul.f32 1.442695, %v6923_v15  ;;  %v6742_v62 = vpop.xlane.xlu0 %6741 }
0x2364   :  { %v6931_v19 = vsel %vm1617_vm7, %v12646_v63, 0.0  ;;  %v6745_v35 = vsub.f32 %v6731_v44, %v6742_v62 }
0x2365   :  { %10212 = vpow2.f32 %v6927_v58  ;;  %6932 = vadd.xlane.f32.xlu1 %v6931_v19 }
0x2366   :  { %v12650_v43 = vpop.eup %10210  ;;  %v6750_v31 = vmul.f32 1.442695, %v6745_v35 }
0x2367   :  { %v6755_v38 = vsel %vm1617_vm7, %v12650_v43, 0.0 }
0x2368   :  { %6756 = vadd.xlane.f32.xlu2 %v6755_v38  ;;  %10214 = vpow2.f32 %v6750_v31 }
0x236b   :  { %v12654_v39 = vpop.eup %10212 }
0x236c   :  { %v6934_v33 = vsel %vm1617_vm7, %v12654_v39, 0.0 }
0x236d   :  { %6935 = vadd.xlane.f32.xlu0 %v6934_v33 }
0x236e   :  { %v12672_v18 = vpop.eup %10214 }
0x236f   :  { %v6758_v49 = vsel %vm1617_vm7, %v12672_v18, 0.0 }
0x2370   :  { %6920 = vmax.xlane.f32.xlu2 %v6919_v4 }
0x237e   :  { %6989 = vrot.lane.b32.xlu1 %v12399_v40, %s10914_s4 }
0x2381   :  { %6808 = vrot.lane.b32.xlu0 %v12408_v0, %s10885_s22 }
0x2388   :  { %6810 = vrot.lane.b32.xlu2 %v12399_v40, %s10885_s22  ;;  %s13046_s22 = sld [smem:[#allocation54_spill]] }
0x2390   :  { %6987 = vrot.lane.b32.xlu2 %v12408_v0, %s10914_s4 }
0x2398   :  { %7060 = vrot.lane.b32.xlu2 %v12397_v29, %s10915_s16 }
0x23a0   :  { %7239 = vrot.lane.b32.xlu2 %v12397_v29, %s10892_s6 }
0x23a8   :  { %7058 = vrot.lane.b32.xlu2 %v12406_v54, %s10915_s16 }
0x23ab   :  { %6759 = vadd.xlane.f32.xlu0 %v6758_v49 }
0x23b0   :  { %7237 = vrot.lane.b32.xlu2 %v12406_v54, %s10892_s6 }
0x23b8   :  { %7054 = vrot.lane.b32.xlu2 %v12413_v26, %s10915_s16 }
0x23bf   :  { %7233 = vrot.lane.b32.xlu0 %v12413_v26, %s10892_s6 }
0x23c0   :  { %7056 = vrot.lane.b32.xlu2 %v12417_v7, %s10915_s16 }
0x23d3   :  { %v12686_v29 = vpop.xlane.xlu0 %6753 }
0x23d4   :  { %10216 = vrcp.f32 %v12686_v29  ;;  %vm6766_vm1 = vweird.f32 %v12686_v29  ;;  %v6770_v5 = vand.u32 2147483647, %v12686_v29  ;;  %v6772_v15 = vand.u32 2147483648, %v12686_v29 }
0x23d6   :  { %vm6771_vm15 = vcmp.eq.f32.partialorder %v6770_v5, 8.507059e+37 }
0x23d8   :  { %v12689_v30 = vpop.xlane.xlu1 %6932 }
0x23d9   :  { %10218 = vrcp.f32 %v12689_v30  ;;  %v6951_v58 = vand.u32 2147483648, %v12689_v30  ;;  %vm6945_vm10 = vweird.f32 %v12689_v30 }
0x23da   :  { %v12692_v6 = vpop.eup %10216 }
0x23db   :  { %v6757_v54 = vpop.xlane.xlu2 %6756  ;;  %v6762_v59 = vmul.f32 %v12692_v6, %v12686_v29  ;;  %vm6767_vm3 = vweird.f32 %v12692_v6 }
0x23dc   :  { %10220 = vrcp.f32 %v6757_v54  ;;  %v6787_v57 = vand.u32 2147483648, %v6757_v54  ;;  %vm6781_vm4 = vweird.f32 %v6757_v54  ;;  %v6785_v12 = vand.u32 2147483647, %v6757_v54  ;;  %vm12720_vm9 = vmor %vm6766_vm1, %vm6767_vm3 }
0x23dd   :  { %v6763_v1 = vsub.f32 1.0, %v6762_v59 }
0x23de   :  { %v6788_v38 = vor.u32 1.1754944e-38, %v6787_v57  ;;  %vm6786_vm12 = vcmp.eq.f32.partialorder %v6785_v12, 8.507059e+37 }
0x23df   :  { %v12696_v26 = vpop.eup %10218  ;;  %v6764_v20 = vmul.f32 %v12692_v6, %v6763_v1  ;;  %v6773_v1 = vor.u32 1.1754944e-38, %v6772_v15 }
0x23e0   :  { %v6941_v21 = vmul.f32 %v12696_v26, %v12689_v30  ;;  %v6936_v27 = vpop.xlane.xlu0 %6935  ;;  %vm6946_vm6 = vweird.f32 %v12696_v26 }
0x23e1   :  { %10222 = vrcp.f32 %v6936_v27  ;;  %v6765_v60 = vadd.f32 %v12692_v6, %v6764_v20  ;;  %v6966_v62 = vand.u32 2147483648, %v6936_v27  ;;  %vm12734_vm13 = vmor %vm6945_vm10, %vm6946_vm6  ;;  %vm6960_vm14 = vweird.f32 %v6936_v27 }
0x23e2   :  { %v10221_v24 = vpop.eup %10220  ;;  %v6942_v44 = vsub.f32 1.0, %v6941_v21  ;;  %v6949_v21 = vand.u32 2147483647, %v12689_v30  ;;  %v6952_v20 = vor.u32 1.1754944e-38, %v6951_v58 }
0x23e3   :  { %v6777_v61 = vmul.f32 %v10221_v24, %v6757_v54  ;;  %v6921_v14 = vpop.xlane.xlu2 %6920  ;;  %vm6782_vm2 = vweird.f32 %v10221_v24  ;;  %v6964_v54 = vand.u32 2147483647, %v6936_v27  ;;  %v6769_v59 = vsel %vm12720_vm9, %v12692_v6, %v6765_v60 }
0x23e4   :  { %v6924_v55 = vsub.f32 %v6910_v9, %v6921_v14  ;;  %v6943_v42 = vmul.f32 %v12696_v26, %v6942_v44  ;;  %vm12708_vm5 = vmor %vm6781_vm4, %vm6782_vm2  ;;  %v6967_v30 = vor.u32 1.1754944e-38, %v6966_v62  ;;  %vm6950_vm3 = vcmp.eq.f32.partialorder %v6949_v21, 8.507059e+37 }
0x23e5   :  { %v6778_v50 = vsub.f32 1.0, %v6777_v61  ;;  %vm6965_vm2 = vcmp.eq.f32.partialorder %v6964_v54, 8.507059e+37 }
0x23e6   :  { %v6929_v37 = vmul.f32 1.442695, %v6924_v55  ;;  %v6944_v33 = vadd.f32 %v12696_v26, %v6943_v42  ;;  %v6774_v55 = vsel %vm6771_vm15, %v6773_v1, %v6769_v59 }
0x23e7   :  { %v10223_v2 = vpop.eup %10222  ;;  %v6779_v46 = vmul.f32 %v10221_v24, %v6778_v50  ;;  %v6775_v5 = vmul.f32 %v12642_v8, %v6774_v55 }
0x23e8   :  { %v6956_v22 = vmul.f32 %v10223_v2, %v6936_v27  ;;  %10224 = vpow2.f32 %v6929_v37  ;;  %vm6961_vm8 = vweird.f32 %v10223_v2  ;;  %v6948_v6 = vsel %vm12734_vm13, %v12696_v26, %v6944_v33 }
0x23e9   :  { %v6780_v34 = vadd.f32 %v10221_v24, %v6779_v46  ;;  %vm6962_vm1 = vmor %vm6960_vm14, %vm6961_vm8  ;;  %v9779_v46 = vld [vmem:[#allocation16 + $0xa8] sm:$0xff]  ;;  %v6953_v26 = vsel %vm6950_vm3, %v6952_v20, %v6948_v6 }
0x23ea   :  { %v6957_v9 = vsub.f32 1.0, %v6956_v22 }
0x23eb   :  { %v6784_v4 = vsel %vm12708_vm5, %v10221_v24, %v6780_v34  ;;  %v6811_v35 = vpop.permute.xlu2 %6810 }
0x23ec   :  { %v6958_v49 = vmul.f32 %v10223_v2, %v6957_v9  ;;  %v6820_v10 = vsel %vm933_vm11, %v6811_v35, 0  ;;  %v6789_v44 = vsel %vm6786_vm12, %v6788_v38, %v6784_v4 }
0x23ed   :  { %6828 = vmatpush.bf16.msrb.mxu1 %v6820_v10  ;;  %v6790_v27 = vmul.f32 %v12650_v43, %v6789_v44 }
0x23ee   :  { %v12730_v29 = vpop.eup %10224  ;;  %v6959_v61 = vadd.f32 %v10223_v2, %v6958_v49 }
0x23ef   :  { %v6937_v14 = vsel %vm1617_vm7, %v12730_v29, 0.0  ;;  %v6806_v12 = vpack.c.bf16 %v6790_v27, %v6775_v5 }
0x23f0   :  { %v6963_v50 = vsel %vm6962_vm1, %v10223_v2, %v6959_v61  ;;  %6938 = vadd.xlane.f32.xlu1 %v6937_v14  ;;  %v6990_v57 = vpop.permute.xlu1 %6989  ;;  %v6954_v2 = vmul.f32 %v12646_v63, %v6953_v26 }
0x23f1   :  { %v6968_v37 = vsel %vm6965_vm2, %v6967_v30, %v6963_v50  ;;  %v6999_v42 = vsel %vm933_vm11, %v6990_v57, 0 }
0x23f2   :  { %7007 = vmatpush.bf16.msra.mxu0 %v6999_v42  ;;  %v6969_v22 = vmul.f32 %v12654_v39, %v6968_v37 }
0x23f3   :  { %v6988_v60 = vpop.permute.xlu2 %6987  ;;  %v6809_v34 = vpop.permute.xlu0 %6808 }
0x23f4   :  { %6829 = vmatpush.bf16.msrb.mxu1 %v6809_v34  ;;  %v6985_v15 = vpack.c.bf16 %v6969_v22, %v6954_v2 }
0x23f6   :  { %7008 = vmatpush.bf16.msra.mxu0 %v6988_v60 }
0x23f7   :  { %9326 = vmatmul.msk.bf16.vlgmr.msrb.gmra.mxu1 %vm1617_vm7, %v6806_v12 }
0x23f8   :  { %7040 = vmatpush.bf16.msra.mxu1 %v9779_v46 }
0x23f9   :  { %9336 = vmatmul.msk.bf16.vlgmr.msra.gmra.mxu0 %vm1617_vm7, %v6985_v15 }
0x23fb   :  { %v7061_v43 = vpop.permute.xlu2 %7060 }
0x23fc   :  { %v7072_v58 = vsel %vm1586_vm0, %v7061_v43, 0 }
0x23fd   :  { %7080 = vmatpush.bf16.xpose.msra.mxu2 %v7072_v58 }
0x2403   :  { %v7240_v8 = vpop.permute.xlu2 %7239 }
0x2404   :  { %v7251_v39 = vsel %vm1586_vm0, %v7240_v8, 0 }
0x2405   :  { %7259 = vmatpush.bf16.xpose.msrb.mxu1 %v7251_v39 }
0x2409   :  { %7235 = vrot.lane.b32.xlu1 %v12417_v7, %s10892_s6 }
0x240b   :  { %v7059_v63 = vpop.permute.xlu2 %7058 }
0x240c   :  { %v7069_v19 = vsel %vm1586_vm0, %v7059_v63, 0 }
0x240d   :  { %7081 = vmatpush.bf16.xpose.msra.mxu2 %v7069_v19 }
0x2413   :  { %v7238_v38 = vpop.permute.xlu2 %7237 }
0x2414   :  { %v7248_v9 = vsel %vm1586_vm0, %v7238_v38, 0 }
0x2415   :  { %7260 = vmatpush.bf16.xpose.msrb.mxu1 %v7248_v9  ;;  %v6332_v9 = vadd.f32 %v12499_v11, %v12613_v3 }
0x241b   :  { %v7055_v43 = vpop.permute.xlu2 %7054 }
0x241e   :  { %v6760_v33 = vpop.xlane.xlu0 %6759 }
0x241f   :  { %10226 = vrcp.f32 %v6760_v33  ;;  %v6802_v31 = vand.u32 2147483648, %v6760_v33  ;;  %v6800_v54 = vand.u32 2147483647, %v6760_v33  ;;  %vm6796_vm5 = vweird.f32 %v6760_v33 }
0x2421   :  { %v6803_v7 = vor.u32 1.1754944e-38, %v6802_v31  ;;  %vm6801_vm9 = vcmp.eq.f32.partialorder %v6800_v54, 8.507059e+37 }
0x2425   :  { %v10227_v4 = vpop.eup %10226 }
0x2426   :  { %v6792_v62 = vmul.f32 %v10227_v4, %v6760_v33  ;;  %vm6797_vm4 = vweird.f32 %v10227_v4 }
0x2427   :  { %vm6798_vm6 = vmor %vm6796_vm5, %vm6797_vm4 }
0x2428   :  { %v6793_v35 = vsub.f32 1.0, %v6792_v62 }
0x242a   :  { %v6794_v49 = vmul.f32 %v10227_v4, %v6793_v35 }
0x242c   :  { %v6795_v10 = vadd.f32 %v10227_v4, %v6794_v49 }
0x242e   :  { %v6799_v59 = vsel %vm6798_vm6, %v10227_v4, %v6795_v10  ;;  %v6515_v4 = vadd.f32 %v12625_v51, %v6332_v9 }
0x242f   :  { %v6804_v21 = vsel %vm6801_vm9, %v6803_v7, %v6799_v59 }
0x2430   :  { %v6805_v1 = vmul.f32 %v12672_v18, %v6804_v21  ;;  %v6694_v35 = vadd.f32 %v12627_v17, %v6515_v4 }
0x2431   :  { %v7234_v62 = vpop.permute.xlu0 %7233 }
0x2432   :  { %v6807_v24 = vpack.c.bf16 %v6805_v1, %v6805_v1 }
0x2434   :  { %9327 = vmatmul.msk.bf16.gmra.mxu1 %vm1617_vm7, %v6807_v24 }
0x2463   :  { %v6939_v44 = vpop.xlane.xlu1 %6938 }
0x2464   :  { %10228 = vrcp.f32 %v6939_v44  ;;  %v6981_v14 = vand.u32 2147483648, %v6939_v44  ;;  %v6979_v20 = vand.u32 2147483647, %v6939_v44  ;;  %vm6975_vm10 = vweird.f32 %v6939_v44 }
0x2466   :  { %v6982_v57 = vor.u32 1.1754944e-38, %v6981_v14  ;;  %vm6980_vm13 = vcmp.eq.f32.partialorder %v6979_v20, 8.507059e+37 }
0x246a   :  { %v10229_v61 = vpop.eup %10228 }
0x246b   :  { %v6971_v6 = vmul.f32 %v10229_v61, %v6939_v44  ;;  %vm6976_vm8 = vweird.f32 %v10229_v61 }
0x246c   :  { %vm6977_vm12 = vmor %vm6975_vm10, %vm6976_vm8 }
0x246d   :  { %v6972_v30 = vsub.f32 1.0, %v6971_v6 }
0x246f   :  { %v6973_v55 = vmul.f32 %v10229_v61, %v6972_v30 }
0x2471   :  { %v6974_v50 = vadd.f32 %v10229_v61, %v6973_v55 }
0x2473   :  { %v6978_v27 = vsel %vm6977_vm12, %v10229_v61, %v6974_v50 }
0x2474   :  { %v6831_v37 = vpop.f32.mrf.mxu1  ;;  %v6983_v18 = vsel %vm6980_vm13, %v6982_v57, %v6978_v27 }
0x2475   :  { %v6984_v42 = vmul.f32 %v12730_v29, %v6983_v18  ;;  %v7057_v29 = vpop.permute.xlu2 %7056 }
0x2476   :  { %v7010_v46 = vpop.f32.mrf.mxu0 }
0x2477   :  { %v6986_v26 = vpack.c.bf16 %v6984_v42, %v6984_v42 }
0x2479   :  { %9337 = vmatmul.msk.bf16.gmra.mxu0 %vm1617_vm7, %v6986_v26 }
0x247b   :  { %v7236_v54 = vpop.permute.xlu1 %7235 }
0x247c   :  { %v6833_v5 = vpop.f32.mrf.mxu1 }
0x247d   :  { %v6840_v22 = vpack.c.bf16 %v6833_v5, %v6831_v37 }
0x247e   :  { %v7012_v60 = vpop.f32.mrf.mxu0 }
0x247f   :  { %v7019_v34 = vpack.c.bf16 %v7012_v60, %v7010_v46  ;;  %9332 = vmatmul.msk.bf16.vlgmr.msrb.gmra.mxu2 %vm1586_vm0, %v6840_v22 }
0x2481   :  { %9342 = vmatmul.msk.bf16.vlgmr.msra.gmra.mxu1 %vm1586_vm0, %v7019_v34 }
0x24b1   :  { %v6836_v2 = vpop.f32.mrf.mxu1 }
0x24b2   :  { %v6841_v12 = vpack.c.bf16 %v6836_v2, %v6836_v2 }
0x24b4   :  { %9333 = vmatmul.msk.bf16.gmra.mxu2 %vm1586_vm0, %v6841_v12 }
0x24b9   :  { %v6838_v15 = vpop.f32.mrf.mxu1 }
0x24c4   :  { %9344 = vmatmul.msk.bf16.vlgmr.msra.gmra.mxu2 %vm1586_vm0, %v7055_v43 }
0x24d4   :  { %9345 = vmatmul.msk.bf16.gmra.mxu2 %vm1586_vm0, %v7057_v29 }
0x24f6   :  { %v7015_v58 = vpop.f32.mrf.mxu0 }
0x24f7   :  { %v7020_v8 = vpack.c.bf16 %v7015_v58, %v7015_v58 }
0x24f9   :  { %9343 = vmatmul.msk.bf16.gmra.mxu1 %vm1586_vm0, %v7020_v8 }
0x24fe   :  { %v7017_v39 = vpop.f32.mrf.mxu0  ;;  %v7042_v38 = vpop.f32.mrf.mxu1 }
0x2502   :  { %v6863_v63 = vpop.f32.mrf.mxu2 }
0x2503   :  { %v6872_v19 = vadd.f32 %v6863_v63, %v12623_v23 }
0x2505   :  { %v12770_v33 = vadd.f32 %v7042_v38, %v6872_v19 }
0x2506   :  { %v12783_v44 = vpop.f32.mrf.mxu1 }
0x2509   :  { %9354 = vmatmul.msk.bf16.vlgmr.msrb.gmra.mxu1 %vm1586_vm0, %v7234_v62 }
0x250a   :  { %v6865_v31 = vpop.f32.mrf.mxu2 }
0x250b   :  { %v12775_v49 = vadd.f32 %v6865_v31, %v6694_v35 }
0x2519   :  { %9355 = vmatmul.msk.bf16.gmra.mxu1 %vm1586_vm0, %v7236_v54 }
0x2537   :  { %v6868_v23 = vpop.f32.mrf.mxu2 }
0x2538   :  { %v6874_v10 = vadd.f32 %v6868_v23, %v12630_v16 }
0x253f   :  { %v6870_v7 = vpop.f32.mrf.mxu2 }
0x2547   :  { %v7083_v11 = vpop.f32.mrf.mxu2 }
0x2548   :  { %v7084_v3 = vadd.f32 %v7083_v11, %v11309_v41 }
0x254a   :  { %v7092_v51 = vsel %vm1617_vm7, %v7084_v3, -inf }
0x254b   :  { %7093 = vmax.xlane.f32.xlu1 %v7092_v51 }
0x254f   :  { %v7085_v59 = vpop.f32.mrf.mxu2 }
0x2550   :  { %v7086_v20 = vadd.f32 %v7085_v59, %v11314_v47 }
0x2552   :  { %v7095_v27 = vsel %vm1617_vm7, %v7086_v20, -inf }
0x2557   :  { %v7088_v17 = vpop.f32.mrf.mxu2 }
0x2558   :  { %v7089_v21 = vadd.f32 %v7088_v17, %v11319_v53 }
0x255a   :  { %v7098_v1 = vsel %vm1617_vm7, %v7089_v21, -inf }
0x255b   :  { %7099 = vmax.xlane.f32.xlu0 %v7098_v1 }
0x255f   :  { %v7090_v24 = vpop.f32.mrf.mxu2 }
0x2576   :  { %v7047_v61 = vpop.f32.mrf.mxu1 }
0x2577   :  { %v12785_v6 = vadd.f32 %v7047_v61, %v6874_v10 }
0x257e   :  { %v7049_v16 = vpop.f32.mrf.mxu1 }
0x2586   :  { %v7262_v30 = vpop.f32.mrf.mxu1 }
0x2587   :  { %v7263_v14 = vadd.f32 %v7262_v30, %v11309_v41 }
0x2589   :  { %v7271_v55 = vsel %vm1617_vm7, %v7263_v14, -inf }
0x258a   :  { %7272 = vmax.xlane.f32.xlu2 %v7271_v55 }
0x258e   :  { %v7264_v50 = vpop.f32.mrf.mxu1 }
0x258f   :  { %v7265_v57 = vadd.f32 %v7264_v50, %v11314_v47 }
0x2591   :  { %v7274_v37 = vsel %vm1617_vm7, %v7265_v57, -inf }
0x2592   :  { %7096 = vmax.xlane.f32.xlu2 %v7095_v27  ;;  %7275 = vmax.xlane.f32.xlu0 %v7274_v37 }
0x2596   :  { %v7267_v18 = vpop.f32.mrf.mxu1 }
0x2597   :  { %v7268_v38 = vadd.f32 %v7267_v18, %v11319_v53 }
0x2599   :  { %v7277_v62 = vsel %vm1617_vm7, %v7268_v38, -inf }
0x259e   :  { %v7269_v42 = vpop.f32.mrf.mxu1 }
0x25a6   :  { %7347 = vrot.lane.b32.xlu0 %v12399_v40, %s10892_s6 }
0x25be   :  { %v7094_v41 = vpop.xlane.xlu1 %7093 }
0x25bf   :  { %v7101_v46 = vsub.f32 %v7084_v3, %v7094_v41 }
0x25c1   :  { %v7104_v26 = vmul.f32 1.442695, %v7101_v46 }
0x25c3   :  { %10230 = vpow2.f32 %v7104_v26 }
0x25c9   :  { %v12795_v5 = vpop.eup %10230 }
0x25ca   :  { %v7110_v47 = vsel %vm1617_vm7, %v12795_v5, 0.0 }
0x25cb   :  { %7111 = vadd.xlane.f32.xlu1 %v7110_v47 }
0x25ce   :  { %v7100_v22 = vpop.xlane.xlu0 %7099 }
0x25cf   :  { %v7103_v53 = vsub.f32 %v7089_v21, %v7100_v22 }
0x25d1   :  { %v7108_v54 = vmul.f32 1.442695, %v7103_v53 }
0x25e4   :  { %7168 = vrot.lane.b32.xlu1 %v12399_v40, %s10915_s16 }
0x25fd   :  { %v7273_v60 = vpop.xlane.xlu2 %7272 }
0x25fe   :  { %v7280_v39 = vsub.f32 %v7263_v14, %v7273_v60 }
0x2600   :  { %v7283_v19 = vmul.f32 1.442695, %v7280_v39 }
0x2605   :  { %v7276_v34 = vpop.xlane.xlu0 %7275  ;;  %v7097_v2 = vpop.xlane.xlu2 %7096 }
0x2606   :  { %v7281_v12 = vsub.f32 %v7265_v57, %v7276_v34  ;;  %v7102_v15 = vsub.f32 %v7086_v20, %v7097_v2 }
0x2608   :  { %v7285_v43 = vmul.f32 1.442695, %v7281_v12  ;;  %v7106_v29 = vmul.f32 1.442695, %v7102_v15 }
0x260a   :  { %10232 = vpow2.f32 %v7285_v43 }
0x260b   :  { %10234 = vpow2.f32 %v7106_v29 }
0x260c   :  { %10236 = vpow2.f32 %v7283_v19 }
0x260d   :  { %10238 = vpow2.f32 %v7108_v54 }
0x2610   :  { %v12801_v58 = vpop.eup %10232 }
0x2611   :  { %v12803_v8 = vpop.eup %10234  ;;  %v7292_v63 = vsel %vm1617_vm7, %v12801_v58, 0.0 }
0x2612   :  { %7293 = vadd.xlane.f32.xlu0 %v7292_v63  ;;  %v7113_v40 = vsel %vm1617_vm7, %v12803_v8, 0.0  ;;  %v12812_v35 = vpop.eup %10236 }
0x2613   :  { %7114 = vadd.xlane.f32.xlu2 %v7113_v40  ;;  %v7289_v31 = vsel %vm1617_vm7, %v12812_v35, 0.0  ;;  %v12820_v23 = vpop.eup %10238 }
0x2614   :  { %v7116_v7 = vsel %vm1617_vm7, %v12820_v23, 0.0 }
0x2618   :  { %v7348_v9 = vpop.permute.xlu0 %7347 }
0x2619   :  { %v7357_v4 = vsel %vm933_vm11, %v7348_v9, 0 }
0x261a   :  { %7365 = vmatpush.bf16.msrb.mxu2 %v7357_v4 }
0x261b   :  { %7278 = vmax.xlane.f32.xlu2 %v7277_v62 }
0x2623   :  { %7290 = vadd.xlane.f32.xlu2 %v7289_v31 }
0x2626   :  { %7166 = vrot.lane.b32.xlu0 %v12408_v0, %s10915_s16 }
0x263b   :  { %7345 = vrot.lane.b32.xlu2 %v12408_v0, %s10892_s6  ;;  %s13047_s6 = sld [smem:[#allocation69_spill]] }
0x263e   :  { %v7112_v10 = vpop.xlane.xlu1 %7111 }
0x263f   :  { %10240 = vrcp.f32 %v7112_v10  ;;  %vm7124_vm15 = vweird.f32 %v7112_v10  ;;  %v7130_v55 = vand.u32 2147483648, %v7112_v10  ;;  %v7128_v57 = vand.u32 2147483647, %v7112_v10 }
0x2641   :  { %v7131_v47 = vor.u32 1.1754944e-38, %v7130_v55  ;;  %vm7129_vm3 = vcmp.eq.f32.partialorder %v7128_v57, 8.507059e+37 }
0x2645   :  { %v10241_v51 = vpop.eup %10240 }
0x2646   :  { %v7120_v59 = vmul.f32 %v10241_v51, %v7112_v10  ;;  %vm7125_vm14 = vweird.f32 %v10241_v51 }
0x2647   :  { %vm12828_vm1 = vmor %vm7124_vm15, %vm7125_vm14 }
0x2648   :  { %v7121_v17 = vsub.f32 1.0, %v7120_v59 }
0x264a   :  { %v7122_v21 = vmul.f32 %v10241_v51, %v7121_v17 }
0x264c   :  { %v7123_v61 = vadd.f32 %v10241_v51, %v7122_v21 }
0x264e   :  { %v7127_v37 = vsel %vm12828_vm1, %v10241_v51, %v7123_v61 }
0x264f   :  { %v7132_v60 = vsel %vm7129_vm3, %v7131_v47, %v7127_v37 }
0x2650   :  { %7117 = vadd.xlane.f32.xlu0 %v7116_v7  ;;  %v7133_v29 = vmul.f32 %v12795_v5, %v7132_v60  ;;  %v9781_v60 = vld [vmem:[#allocation16 + $0xb8] sm:$0xff] }
0x2656   :  { %v7169_v11 = vpop.permute.xlu1 %7168 }
0x2657   :  { %v7178_v3 = vsel %vm933_vm11, %v7169_v11, 0 }
0x2658   :  { %7186 = vmatpush.bf16.msrb.mxu3 %v7178_v3 }
0x2685   :  { %v12825_v1 = vpop.xlane.xlu0 %7293 }
0x2686   :  { %v7115_v0 = vpop.xlane.xlu2 %7114  ;;  %v7324_v5 = vand.u32 2147483648, %v12825_v1  ;;  %vm7318_vm8 = vweird.f32 %v12825_v1 }
0x2687   :  { %10242 = vrcp.f32 %v7115_v0  ;;  %v7145_v18 = vand.u32 2147483648, %v7115_v0  ;;  %v7143_v26 = vand.u32 2147483647, %v7115_v0  ;;  %vm7139_vm4 = vweird.f32 %v7115_v0 }
0x2688   :  { %10244 = vrcp.f32 %v12825_v1  ;;  %v7325_v51 = vor.u32 1.1754944e-38, %v7324_v5 }
0x2689   :  { %v7146_v34 = vor.u32 1.1754944e-38, %v7145_v18  ;;  %vm7144_vm6 = vcmp.eq.f32.partialorder %v7143_v26, 8.507059e+37 }
0x268d   :  { %v10243_v24 = vpop.eup %10242 }
0x268e   :  { %v7135_v16 = vmul.f32 %v10243_v24, %v7115_v0  ;;  %v7279_v30 = vpop.xlane.xlu2 %7278  ;;  %v10245_v14 = vpop.eup %10244  ;;  %vm7140_vm2 = vweird.f32 %v10243_v24 }
0x268f   :  { %v7282_v20 = vsub.f32 %v7268_v38, %v7279_v30  ;;  %v7314_v41 = vmul.f32 %v10245_v14, %v12825_v1  ;;  %vm7141_vm5 = vmor %vm7139_vm4, %vm7140_vm2  ;;  %vm7319_vm9 = vweird.f32 %v10245_v14 }
0x2690   :  { %v7136_v27 = vsub.f32 1.0, %v7135_v16  ;;  %vm7320_vm10 = vmor %vm7318_vm8, %vm7319_vm9 }
0x2691   :  { %v7287_v42 = vmul.f32 1.442695, %v7282_v20  ;;  %v7315_v2 = vsub.f32 1.0, %v7314_v41 }
0x2692   :  { %v7137_v46 = vmul.f32 %v10243_v24, %v7136_v27 }
0x2693   :  { %10246 = vpow2.f32 %v7287_v42  ;;  %v7316_v19 = vmul.f32 %v10245_v14, %v7315_v2 }
0x2694   :  { %v7138_v22 = vadd.f32 %v10243_v24, %v7137_v46  ;;  %v9780_v46 = vld [vmem:[#allocation16 + $0xb0] sm:$0xff] }
0x2695   :  { %v7317_v62 = vadd.f32 %v10245_v14, %v7316_v19  ;;  %7219 = vmatpush.bf16.msrb.mxu0 %v9780_v46  ;;  %v9797_v46 = vld [vmem:[#allocation18 + $0x174] sm:$0xf0] }
0x2696   :  { %v7142_v12 = vsel %vm7141_vm5, %v10243_v24, %v7138_v22  ;;  %v7291_v15 = vpop.xlane.xlu2 %7290 }
0x2697   :  { %v7147_v43 = vsel %vm7144_vm6, %v7146_v34, %v7142_v12  ;;  %10248 = vrcp.f32 %v7291_v15  ;;  %v7309_v10 = vand.u32 2147483648, %v7291_v15  ;;  %v7321_v7 = vsel %vm7320_vm10, %v10245_v14, %v7317_v62 }
0x2698   :  { %v7148_v39 = vmul.f32 %v12803_v8, %v7147_v43  ;;  %v7167_v63 = vpop.permute.xlu0 %7166  ;;  %v7322_v8 = vand.u32 2147483647, %v12825_v1  ;;  %v7307_v3 = vand.u32 2147483647, %v7291_v15  ;;  %vm7303_vm14 = vweird.f32 %v7291_v15 }
0x2699   :  { %v12837_v40 = vpop.eup %10246  ;;  %7187 = vmatpush.bf16.msrb.mxu3 %v7167_v63  ;;  %v7310_v0 = vor.u32 1.1754944e-38, %v7309_v10 }
0x269a   :  { %v7164_v38 = vpack.c.bf16 %v7148_v39, %v7133_v29  ;;  %v7295_v9 = vsel %vm1617_vm7, %v12837_v40, 0.0  ;;  %vm7323_vm13 = vcmp.eq.f32.partialorder %v7322_v8, 8.507059e+37  ;;  %vm7308_vm1 = vcmp.eq.f32.partialorder %v7307_v3, 8.507059e+37 }
0x269b   :  { %7296 = vadd.xlane.f32.xlu1 %v7295_v9  ;;  %v7326_v17 = vsel %vm7323_vm13, %v7325_v51, %v7321_v7  ;;  %v9929_v51 = vld [vmem:[%s13026_s28 + $0x2] ss:$0 sm:$0xff] }
0x269c   :  { %9346 = vmatmul.msk.bf16.vlgmr.msrb.gmra.mxu3 %vm1617_vm7, %v7164_v38  ;;  %v7327_v61 = vmul.f32 %v12801_v58, %v7326_v17 }
0x269d   :  { %v10249_v4 = vpop.eup %10248  ;;  %7398 = vmatpush.bf16.msra.mxu3 %v9781_v60 }
0x269e   :  { %v7299_v31 = vmul.f32 %v10249_v4, %v7291_v15  ;;  %v7346_v53 = vpop.permute.xlu2 %7345  ;;  %vm7304_vm12 = vweird.f32 %v10249_v4 }
0x269f   :  { %7366 = vmatpush.bf16.msrb.mxu2 %v7346_v53  ;;  %vm7305_vm15 = vmor %vm7303_vm14, %vm7304_vm12 }
0x26a0   :  { %v7300_v54 = vsub.f32 1.0, %v7299_v31 }
0x26a2   :  { %v7301_v11 = vmul.f32 %v10249_v4, %v7300_v54 }
0x26a4   :  { %v7302_v59 = vadd.f32 %v10249_v4, %v7301_v11 }
0x26a6   :  { %v7306_v21 = vsel %vm7305_vm15, %v10249_v4, %v7302_v59 }
0x26a7   :  { %v7311_v24 = vsel %vm7308_vm1, %v7310_v0, %v7306_v21 }
0x26a8   :  { %v7312_v1 = vmul.f32 %v12812_v35, %v7311_v24  ;;  %v7052_v24 = vadd.f32 %v12783_v44, %v12775_v49 }
0x26aa   :  { %v7343_v16 = vpack.c.bf16 %v7327_v61, %v7312_v1 }
0x26ac   :  { %9356 = vmatmul.msk.bf16.vlgmr.msrb.gmra.mxu2 %vm1617_vm7, %v7343_v16 }
0x26c3   :  { %v7118_v30 = vpop.xlane.xlu0 %7117 }
0x26c4   :  { %10250 = vrcp.f32 %v7118_v30  ;;  %v7160_v50 = vand.u32 2147483648, %v7118_v30  ;;  %v7158_v27 = vand.u32 2147483647, %v7118_v30  ;;  %vm7154_vm3 = vweird.f32 %v7118_v30 }
0x26c6   :  { %v7161_v18 = vor.u32 1.1754944e-38, %v7160_v50  ;;  %vm7159_vm5 = vcmp.eq.f32.partialorder %v7158_v27, 8.507059e+37 }
0x26ca   :  { %v10251_v14 = vpop.eup %10250 }
0x26cb   :  { %v7150_v55 = vmul.f32 %v10251_v14, %v7118_v30  ;;  %vm7155_vm2 = vweird.f32 %v10251_v14 }
0x26cc   :  { %vm7156_vm4 = vmor %vm7154_vm3, %vm7155_vm2 }
0x26cd   :  { %v7151_v20 = vsub.f32 1.0, %v7150_v55 }
0x26cf   :  { %v7152_v57 = vmul.f32 %v10251_v14, %v7151_v20 }
0x26d1   :  { %v7153_v37 = vadd.f32 %v10251_v14, %v7152_v57 }
0x26d3   :  { %v7157_v58 = vsel %vm7156_vm4, %v10251_v14, %v7153_v37 }
0x26d4   :  { %v7162_v42 = vsel %vm7159_vm5, %v7161_v18, %v7157_v58 }
0x26d5   :  { %v7163_v35 = vmul.f32 %v12820_v23, %v7162_v42 }
0x26d7   :  { %v7165_v41 = vpack.c.bf16 %v7163_v35, %v7163_v35 }
0x26d9   :  { %9347 = vmatmul.msk.bf16.gmra.mxu3 %vm1617_vm7, %v7165_v41 }
0x270e   :  { %v7297_v26 = vpop.xlane.xlu1 %7296 }
0x270f   :  { %10252 = vrcp.f32 %v7297_v26  ;;  %v7339_v2 = vand.u32 2147483648, %v7297_v26  ;;  %v7337_v15 = vand.u32 2147483647, %v7297_v26  ;;  %vm7333_vm9 = vweird.f32 %v7297_v26 }
0x2711   :  { %v7340_v23 = vor.u32 1.1754944e-38, %v7339_v2  ;;  %vm7338_vm10 = vcmp.eq.f32.partialorder %v7337_v15, 8.507059e+37  ;;  %v9795_v2 = vld [vmem:[#allocation18 + $0x164] sm:$0xf0] }
0x2715   :  { %v10253_v47 = vpop.eup %10252 }
0x2716   :  { %v7329_v22 = vmul.f32 %v10253_v47, %v7297_v26  ;;  %vm7334_vm6 = vweird.f32 %v10253_v47  ;;  %v9796_v26 = vld [vmem:[#allocation18 + $0x174] sm:$0xf] }
0x2717   :  { %vm7335_vm8 = vmor %vm7333_vm9, %vm7334_vm6 }
0x2718   :  { %v7330_v34 = vsub.f32 1.0, %v7329_v22  ;;  %v9424_v22 = vld [vmem:[#allocation18 + $0x178] sm:$0xf0] }
0x2719   :  { %v9427_v60 = vor.u32 %v9796_v26, %v9424_v22 }
0x271a   :  { %v7331_v12 = vmul.f32 %v10253_v47, %v7330_v34  ;;  %v9414_v34 = vld [vmem:[#allocation18 + $0x160] sm:$0xf] }
0x271b   :  { %7598 = vmatpush.bf16.msra.mxu1 %v9427_v60  ;;  %v9415_v15 = vor.u32 %v9795_v2, %v9414_v34 }
0x271c   :  { %v7332_v43 = vadd.f32 %v10253_v47, %v7331_v12  ;;  %v9794_v12 = vld [vmem:[#allocation18 + $0x164] sm:$0xf] }
0x271e   :  { %v7336_v29 = vsel %vm7335_vm8, %v10253_v47, %v7332_v43  ;;  %v9416_v43 = vld [vmem:[#allocation18 + $0x168] sm:$0xf0] }
0x271f   :  { %v7189_v39 = vpop.f32.mrf.mxu3  ;;  %v7341_v63 = vsel %vm7338_vm10, %v7340_v23, %v7336_v29  ;;  %v9419_v23 = vor.u32 %v9794_v12, %v9416_v43  ;;  %v9406_v29 = vld [vmem:[#allocation18 + $0x150] sm:$0xf] }
0x2720   :  { %v7342_v19 = vmul.f32 %v12837_v40, %v7341_v63  ;;  %v9792_v63 = vld [vmem:[#allocation18 + $0x154] sm:$0xf] }
0x2721   :  { %7599 = vmatpush.bf16.msra.mxu1 %v9419_v23 }
0x2722   :  { %v7344_v38 = vpack.c.bf16 %v7342_v19, %v7342_v19 }
0x2724   :  { %9357 = vmatmul.msk.bf16.gmra.mxu2 %vm1617_vm7, %v7344_v38  ;;  %v9408_v38 = vld [vmem:[#allocation18 + $0x158] sm:$0xf0] }
0x2727   :  { %v7191_v9 = vpop.f32.mrf.mxu3 }
0x2728   :  { %v7198_v4 = vpack.c.bf16 %v7191_v9, %v7189_v39  ;;  %v9793_v39 = vld [vmem:[#allocation18 + $0x154] sm:$0xf0]  ;;  %v9411_v9 = vor.u32 %v9792_v63, %v9408_v38  ;;  %v9930_v63 = vld [vmem:[%s13027_s7 + $0x2] ss:$0 sm:$0xff] }
0x2729   :  { %v9407_v19 = vor.u32 %v9793_v39, %v9406_v29 }
0x272a   :  { %9352 = vmatmul.msk.bf16.vlgmr.msrb.gmra.mxu0 %vm1586_vm0, %v7198_v4  ;;  %7600 = vmatpush.bf16.msra.mxu1 %v9411_v9  ;;  %v9398_v4 = vld [vmem:[#allocation18 + $0x140] sm:$0xf] }
0x272f   :  { %v7368_v62 = vpop.f32.mrf.mxu2 }
0x2737   :  { %v7370_v31 = vpop.f32.mrf.mxu2 }
0x2738   :  { %v7377_v53 = vpack.c.bf16 %v7370_v31, %v7368_v62  ;;  %v9791_v62 = vld [vmem:[#allocation18 + $0x144] sm:$0xf0]  ;;  %v9790_v31 = vld [vmem:[#allocation18 + $0x144] sm:$0xf] }
0x273a   :  { %9362 = vmatmul.msk.bf16.vlgmr.msra.gmra.mxu3 %vm1586_vm0, %v7377_v53  ;;  %v9399_v53 = vor.u32 %v9791_v62, %v9398_v4  ;;  %v9931_v4 = vld [vmem:[%s13028_s23 + $0x2] ss:$0 sm:$0xff] }
0x275c   :  { %v7194_v5 = vpop.f32.mrf.mxu3 }
0x275d   :  { %v7199_v8 = vpack.c.bf16 %v7194_v5, %v7194_v5  ;;  %v9400_v5 = vld [vmem:[#allocation18 + $0x148] sm:$0xf0] }
0x275f   :  { %9353 = vmatmul.msk.bf16.gmra.mxu0 %vm1586_vm0, %v7199_v8  ;;  %v9403_v8 = vor.u32 %v9790_v31, %v9400_v5 }
0x2761   :  { %7601 = vmatpush.bf16.msra.mxu1 %v9403_v8 }
0x2764   :  { %v7196_v54 = vpop.f32.mrf.mxu3 }
0x27a7   :  { %v7373_v10 = vpop.f32.mrf.mxu2  ;;  %v7221_v11 = vpop.f32.mrf.mxu0 }
0x27a8   :  { %v7378_v40 = vpack.c.bf16 %v7373_v10, %v7373_v10  ;;  %v7230_v3 = vadd.f32 %v7221_v11, %v12770_v33  ;;  %v9390_v10 = vld [vmem:[#allocation18 + $0x130] sm:$0xf] }
0x27aa   :  { %9363 = vmatmul.msk.bf16.gmra.mxu3 %vm1586_vm0, %v7378_v40  ;;  %v9789_v40 = vld [vmem:[#allocation18 + $0x134] sm:$0xf0] }
0x27af   :  { %v7375_v7 = vpop.f32.mrf.mxu2  ;;  %v7223_v21 = vpop.f32.mrf.mxu0 }
0x27b0   :  { %v7231_v1 = vadd.f32 %v7223_v21, %v7052_v24  ;;  %v9788_v7 = vld [vmem:[#allocation18 + $0x134] sm:$0xf]  ;;  %v9787_v21 = vld [vmem:[#allocation18 + $0x124] sm:$0xf0]  ;;  %v9786_v24 = vld [vmem:[#allocation18 + $0x124] sm:$0xf] }
0x27bd   :  { %v7400_v59 = vpop.f32.mrf.mxu3 }
0x27be   :  { %v7409_v17 = vadd.f32 %v7400_v59, %v7230_v3  ;;  %v9391_v3 = vor.u32 %v9789_v40, %v9390_v10  ;;  %v9805_v10 = vld [vmem:[#allocation19 + $0x138] sm:$0xff] }
0x27bf   :  { %7725 = vmatpush.bf16.msra.mxu2 %v9805_v10 }
0x27c0   :  { %v7415_v0 = vadd.f32 %v9929_v51, %v7409_v17 }
0x27c2   :  { %v7418_v61 = vadd.f32 %v7415_v0, %v12384_v52  ;;  %v9382_v0 = vld [vmem:[#allocation18 + $0x120] sm:$0xf] }
0x27c4   :  { %7421 = vadd.xlane.f32.xlu2 %v7418_v61 }
0x27c5   :  { %v7402_v16 = vpop.f32.mrf.mxu3 }
0x27c6   :  { %v7410_v30 = vadd.f32 %v7402_v16, %v7231_v1  ;;  %v9383_v1 = vor.u32 %v9787_v21, %v9382_v0  ;;  %v9384_v16 = vld [vmem:[#allocation18 + $0x128] sm:$0xf0]  ;;  %v9802_v0 = vld [vmem:[#allocation19 + $0x120] sm:$0xff] }
0x27c7   :  { %v9810_v21 = vld [vmem:[#allocation19 + $0x160] sm:$0xff] }
0x27c8   :  { %v7416_v14 = vadd.f32 %v9929_v51, %v7410_v30  ;;  %v9387_v30 = vor.u32 %v9786_v24, %v9384_v16 }
0x27ca   :  { %v7419_v55 = vadd.f32 %v7416_v14, %v12386_v45  ;;  %v9374_v14 = vld [vmem:[#allocation18 + $0x110] sm:$0xf] }
0x27cc   :  { %7423 = vadd.xlane.f32.xlu1 %v7419_v55 }
0x27dc   :  { %v7226_v20 = vpop.f32.mrf.mxu0 }
0x27dd   :  { %v7232_v33 = vadd.f32 %v7226_v20, %v12785_v6  ;;  %v9784_v20 = vld [vmem:[#allocation18 + $0x114] sm:$0xf] }
0x27e4   :  { %v7228_v50 = vpop.f32.mrf.mxu0 }
0x27e5   :  { %v9376_v50 = vld [vmem:[#allocation18 + $0x118] sm:$0xf0] }
0x282d   :  { %v7405_v57 = vpop.f32.mrf.mxu3 }
0x282e   :  { %v7411_v27 = vadd.f32 %v7405_v57, %v7232_v33 }
0x2830   :  { %v7417_v37 = vadd.f32 %v9929_v51, %v7411_v27  ;;  %v9392_v51 = vld [vmem:[#allocation18 + $0x138] sm:$0xf0]  ;;  %v9379_v27 = vor.u32 %v9784_v20, %v9376_v50 }
0x2831   :  { %v9395_v59 = vor.u32 %v9788_v7, %v9392_v51  ;;  %v9803_v51 = vld [vmem:[#allocation19 + $0x128] sm:$0xff] }
0x2832   :  { %v7420_v18 = vadd.f32 %v7417_v37, %v12391_v13  ;;  %v9422_v13 = vld [vmem:[#allocation18 + $0x170] sm:$0xf] }
0x2833   :  { %v9423_v47 = vor.u32 %v9797_v46, %v9422_v13  ;;  %7602 = vmatpush.bf16.msra.mxu1 %v9395_v59  ;;  %v9811_v59 = vld [vmem:[#allocation19 + $0x168] sm:$0xff] }
0x2834   :  { %7425 = vadd.xlane.f32.xlu0 %v7420_v18 }
0x2835   :  { %v7407_v49 = vpop.f32.mrf.mxu3  ;;  %7580 = vmatpush.bf16.msra.mxu0 %v9423_v47 }
0x2836   :  { %v9783_v49 = vld [vmem:[#allocation18 + $0x104] sm:$0xf0] }
0x2837   :  { %v7422_v52 = vpop.xlane.xlu2 %7421  ;;  %7603 = vmatpush.bf16.msra.mxu1 %v9387_v30 }
0x2838   :  { %v7427_v44 = vmul.f32 %v7422_v52, %v11748_v56  ;;  %v9782_v52 = vld [vmem:[#allocation18 + $0x104] sm:$0xf] }
0x2839   :  { %7581 = vmatpush.bf16.msra.mxu0 %v9415_v15 }
0x283a   :  { %v12865_v58 = vsub.f32 %v7418_v61, %v7427_v44 }
0x283b   :  { %7604 = vmatpush.bf16.msra.mxu1 %v9379_v27  ;;  %v9808_v27 = vld [vmem:[#allocation19 + $0x150] sm:$0xff] }
0x283c   :  { %v7433_v45 = vmul.f32 %v12865_v58, %v12865_v58 }
0x283d   :  { %7582 = vmatpush.bf16.msra.mxu0 %v9407_v19 }
0x283e   :  { %7436 = vadd.xlane.f32.xlu2 %v7433_v45 }
0x283f   :  { %v7424_v42 = vpop.xlane.xlu1 %7423 }
0x2840   :  { %v7428_v6 = vmul.f32 %v7424_v42, %v11748_v56  ;;  %v9368_v42 = vld [vmem:[#allocation18 + $0x108] sm:$0xf0] }
0x2841   :  { %7583 = vmatpush.bf16.msra.mxu0 %v9399_v53 }
0x2842   :  { %v12870_v35 = vsub.f32 %v7419_v55, %v7428_v6  ;;  %v9785_v55 = vld [vmem:[#allocation18 + $0x114] sm:$0xf0]  ;;  %v9371_v6 = vor.u32 %v9782_v52, %v9368_v42  ;;  %v9807_v52 = vld [vmem:[#allocation19 + $0x148] sm:$0xff]  ;;  %v9806_v42 = vld [vmem:[#allocation19 + $0x140] sm:$0xff] }
0x2843   :  { %v9375_v33 = vor.u32 %v9785_v55, %v9374_v14  ;;  %v9801_v14 = vld [vmem:[#allocation19 + $0x118] sm:$0xff] }
0x2844   :  { %v7434_v41 = vmul.f32 %v12870_v35, %v12870_v35  ;;  %7605 = vmatpush.bf16.msra.mxu1 %v9371_v6  ;;  %v9809_v55 = vld [vmem:[#allocation19 + $0x158] sm:$0xff] }
0x2845   :  { %7584 = vmatpush.bf16.msra.mxu0 %v9391_v3  ;;  %v9812_v3 = vld [vmem:[#allocation19 + $0x170] sm:$0xff]  ;;  %v9187_v6 = vld [vmem:[%s13029_s9 + $0x4] sm:$0x3] }
0x2846   :  { %7438 = vadd.xlane.f32.xlu1 %v7434_v41 }
0x2849   :  { %7585 = vmatpush.bf16.msra.mxu0 %v9383_v1 }
0x284d   :  { %7586 = vmatpush.bf16.msra.mxu0 %v9375_v33 }
0x28a7   :  { %v7426_v54 = vpop.xlane.xlu0 %7425 }
0x28a8   :  { %v7429_v11 = vmul.f32 %v7426_v54, %v11748_v56 }
0x28aa   :  { %v12875_v17 = vsub.f32 %v7420_v18, %v7429_v11  ;;  %v9366_v18 = vld [vmem:[#allocation18 + $0x100] sm:$0xf]  ;;  %v9804_v11 = vld [vmem:[#allocation19 + $0x130] sm:$0xff] }
0x28ab   :  { %v9367_v45 = vor.u32 %v9783_v49, %v9366_v18  ;;  %7726 = vmatpush.bf16.msra.mxu2 %v9804_v11  ;;  %v9799_v49 = vld [vmem:[#allocation19 + $0x108] sm:$0xff] }
0x28ac   :  { %v7435_v61 = vmul.f32 %v12875_v17, %v12875_v17 }
0x28ad   :  { %7587 = vmatpush.bf16.msra.mxu0 %v9367_v45  ;;  %v9798_v45 = vld [vmem:[#allocation19 + $0x100] sm:$0xff] }
0x28ae   :  { %7440 = vadd.xlane.f32.xlu0 %v7435_v61 }
0x28af   :  { %7727 = vmatpush.bf16.msra.mxu2 %v9803_v51 }
0x28b1   :  { %v7437_v57 = vpop.xlane.xlu2 %7436 }
0x28b2   :  { %v7442_v37 = vmul.f32 %v7437_v57, %v11748_v56  ;;  %v9800_v57 = vld [vmem:[#allocation19 + $0x110] sm:$0xff] }
0x28b3   :  { %7728 = vmatpush.bf16.msra.mxu2 %v9802_v0 }
0x28b4   :  { %v7445_v44 = vadd.f32 1e-05, %v7442_v37 }
0x28b6   :  { %10254 = vrsqrt.f32 %v7445_v44  ;;  %vm7454_vm12 = vweird.f32 %v7445_v44 }
0x28b7   :  { %7729 = vmatpush.bf16.msra.mxu2 %v9801_v14 }
0x28b9   :  { %v7439_v41 = vpop.xlane.xlu1 %7438 }
0x28ba   :  { %v7443_v13 = vmul.f32 %v7439_v41, %v11748_v56 }
0x28bb   :  { %7730 = vmatpush.bf16.msra.mxu2 %v9800_v57 }
0x28bc   :  { %v10255_v46 = vpop.eup %10254  ;;  %v7446_v26 = vadd.f32 1e-05, %v7443_v13  ;;  %v7496_v13 = vperm.slane %v9187_v6, 0 }
0x28bd   :  { %v7449_v47 = vmul.f32 %v10255_v46, %v7445_v44  ;;  %vm7455_vm0 = vweird.f32 %v10255_v46 }
0x28be   :  { %10256 = vrsqrt.f32 %v7446_v26  ;;  %vm7456_vm13 = vmor %vm7454_vm12, %vm7455_vm0  ;;  %vm7464_vm15 = vweird.f32 %v7446_v26 }
0x28bf   :  { %v7450_v22 = vmul.f32 %v10255_v46, %v7449_v47  ;;  %7731 = vmatpush.bf16.msra.mxu2 %v9799_v49  ;;  %v9909_v49 = vld [vmem:[#allocation10] ss:$0 sm:$0xff] }
0x28c1   :  { %v7451_v60 = vmul.f32 0.5, %v7450_v22 }
0x28c3   :  { %v7452_v34 = vsub.f32 1.5, %v7451_v60  ;;  %7732 = vmatpush.bf16.msra.mxu2 %v9798_v45  ;;  %v1161_v45 = vadd.f32 %v9909_v49, %v11294_v25 }
0x28c4   :  { %v10257_v2 = vpop.eup %10256 }
0x28c5   :  { %v7453_v12 = vmul.f32 %v10255_v46, %v7452_v34  ;;  %v7459_v15 = vmul.f32 %v10257_v2, %v7446_v26  ;;  %vm7465_vm14 = vweird.f32 %v10257_v2 }
0x28c6   :  { %vm7466_vm1 = vmor %vm7464_vm15, %vm7465_vm14  ;;  %vm7836_vm15 = vcmp.eq.s32.totalorder %v11300_v32, %v11305_v36 }
0x28c7   :  { %v7460_v43 = vmul.f32 %v10257_v2, %v7459_v15  ;;  %v7457_v23 = vsel %vm7456_vm13, %v10255_v46, %v7453_v12  ;;  %v7497_v46 = vperm.slane %v9187_v6, 1 }
0x28c8   :  { %v7478_v19 = vmul.f32 %v7457_v23, %v12865_v58  ;;  %v9813_v58 = vld [vmem:[#allocation19 + $0x178] sm:$0xff] }
0x28c9   :  { %v7461_v29 = vmul.f32 0.5, %v7460_v43  ;;  %7743 = vmatpush.bf16.msrb.mxu3 %v9813_v58  ;;  %v9932_v58 = vld [vmem:[#allocation21 + $0x2] ss:$0 sm:$0xff] }
0x28ca   :  { %v7484_v62 = vmul.f32 %v9930_v63, %v7478_v19 }
0x28cb   :  { %v7462_v39 = vsub.f32 1.5, %v7461_v29 }
0x28cc   :  { %v12885_v5 = vadd.f32 %v9931_v4, %v7484_v62 }
0x28cd   :  { %v7463_v38 = vmul.f32 %v10257_v2, %v7462_v39  ;;  %7744 = vmatpush.bf16.msrb.mxu3 %v9812_v3 }
0x28cf   :  { %v7467_v9 = vsel %vm7466_vm1, %v10257_v2, %v7463_v38 }
0x28d0   :  { %v7479_v31 = vmul.f32 %v7467_v9, %v12870_v35 }
0x28d1   :  { %7745 = vmatpush.bf16.msrb.mxu3 %v9811_v59 }
0x28d2   :  { %v7485_v53 = vmul.f32 %v9930_v63, %v7479_v31 }
0x28d4   :  { %v12887_v8 = vadd.f32 %v9931_v4, %v7485_v53 }
0x28d5   :  { %7746 = vmatpush.bf16.msrb.mxu3 %v9810_v21 }
0x28d6   :  { %v7493_v54 = vpack.c.bf16 %v12887_v8, %v12885_v5 }
0x28d8   :  { %7588 = vmatmul.bf16.vlgmr.msra.gmra.mxu0 %v7493_v54  ;;  %7606 = vmatmul.bf16.vlgmr.msra.gmra.mxu1 %v7493_v54 }
0x28d9   :  { %7747 = vmatpush.bf16.msrb.mxu3 %v9809_v55 }
0x28dd   :  { %7748 = vmatpush.bf16.msrb.mxu3 %v9808_v27 }
0x28e1   :  { %7749 = vmatpush.bf16.msrb.mxu3 %v9807_v52 }
0x28e5   :  { %7750 = vmatpush.bf16.msrb.mxu3 %v9806_v42 }
0x2921   :  { %v7441_v40 = vpop.xlane.xlu0 %7440 }
0x2922   :  { %v7444_v7 = vmul.f32 %v7441_v40, %v11748_v56 }
0x2924   :  { %v7447_v35 = vadd.f32 1e-05, %v7444_v7 }
0x2926   :  { %10258 = vrsqrt.f32 %v7447_v35  ;;  %vm7474_vm3 = vweird.f32 %v7447_v35 }
0x292c   :  { %v10259_v24 = vpop.eup %10258 }
0x292d   :  { %v7469_v61 = vmul.f32 %v10259_v24, %v7447_v35  ;;  %vm7475_vm2 = vweird.f32 %v10259_v24 }
0x292e   :  { %vm7476_vm4 = vmor %vm7474_vm3, %vm7475_vm2 }
0x292f   :  { %v7470_v1 = vmul.f32 %v10259_v24, %v7469_v61 }
0x2931   :  { %v7471_v16 = vmul.f32 0.5, %v7470_v1 }
0x2933   :  { %v7472_v30 = vsub.f32 1.5, %v7471_v16 }
0x2935   :  { %v7473_v20 = vmul.f32 %v10259_v24, %v7472_v30 }
0x2937   :  { %v7477_v33 = vsel %vm7476_vm4, %v10259_v24, %v7473_v20 }
0x2938   :  { %v7480_v50 = vmul.f32 %v7477_v33, %v12875_v17 }
0x293a   :  { %v7486_v37 = vmul.f32 %v9930_v63, %v7480_v50 }
0x293c   :  { %v7492_v18 = vadd.f32 %v9931_v4, %v7486_v37 }
0x293e   :  { %v7494_v44 = vpack.c.bf16 %v7492_v18, %v7492_v18 }
0x2940   :  { %7593 = vmatmul.bf16.gmra.mxu0 %v7494_v44  ;;  %7611 = vmatmul.bf16.gmra.mxu1 %v7494_v44 }
0x2955   :  { %v7589_v17 = vpop.f32.mrf.mxu0  ;;  %v7607_v41 = vpop.f32.mrf.mxu1 }
0x2956   :  { %v7590_v26 = vadd.f32 %v7589_v17, %v7496_v13  ;;  %v7608_v47 = vadd.f32 %v7607_v41, %v7497_v46  ;;  %v1162_v17 = vmax.f32 %v1161_v45, 0.0  ;;  %v9933_v41 = vld [vmem:[#allocation12] ss:$0 sm:$0xff] }
0x2958   :  { %v7616_v12 = vmax.f32 %v7590_v26, 0.0  ;;  %v7617_v15 = vmax.f32 %v7608_v47, 0.0  ;;  %v932_v26 = vmul.f32 %v11272_v48, %v11272_v48 }
0x295a   :  { %v934_v47 = vsel %vm933_vm11, %v932_v26, 0.0 }
0x295d   :  { %v7591_v22 = vpop.f32.mrf.mxu0  ;;  %v7609_v60 = vpop.f32.mrf.mxu1 }
0x295e   :  { %v7592_v34 = vadd.f32 %v7591_v22, %v7496_v13  ;;  %v7610_v2 = vadd.f32 %v7609_v60, %v7497_v46 }
0x2960   :  { %v7618_v43 = vmax.f32 %v7592_v34, 0.0  ;;  %v7619_v23 = vmax.f32 %v7610_v2, 0.0 }
0x2962   :  { %v7622_v29 = vpack.c.bf16 %v7618_v43, %v7616_v12  ;;  %v7623_v39 = vpack.c.bf16 %v7619_v23, %v7617_v15 }
0x2964   :  { %7733 = vmatmul.bf16.vlgmr.msra.gmra.mxu2 %v7622_v29  ;;  %7751 = vmatmul.bf16.vlgmr.msrb.gmra.mxu3 %v7623_v39 }
0x29bd   :  { %v7594_v63 = vpop.f32.mrf.mxu0  ;;  %v7612_v19 = vpop.f32.mrf.mxu1 }
0x29be   :  { %v7595_v38 = vadd.f32 %v7594_v63, %v7496_v13  ;;  %v7613_v9 = vadd.f32 %v7612_v19, %v7497_v46  ;;  %v1166_v13 = vmul.f32 %v9933_v41, %v1162_v17  ;;  %v1170_v17 = vstv %s13046_s22 }
0x29c0   :  { %v7620_v4 = vmax.f32 %v7595_v38, 0.0  ;;  %v7621_v62 = vmax.f32 %v7613_v9, 0.0  ;;  %v1167_v46 = vsel %vm933_vm11, %v1166_v13, 0.0 }
0x29c2   :  { %v7624_v31 = vpack.c.bf16 %v7620_v4, %v7620_v4  ;;  %v7625_v53 = vpack.c.bf16 %v7621_v62, %v7621_v62 }
0x29c4   :  { %7738 = vmatmul.bf16.gmra.mxu2 %v7624_v31  ;;  %7756 = vmatmul.bf16.gmra.mxu3 %v7625_v53 }
0x29c5   :  { %v7596_v54 = vpop.f32.mrf.mxu0  ;;  %v7614_v10 = vpop.f32.mrf.mxu1 }
0x29e7   :  { %v7734_v40 = vpop.f32.mrf.mxu2  ;;  %v7752_v7 = vpop.f32.mrf.mxu3 }
0x29e8   :  { %v7735_v11 = vadd.f32 %v9932_v58, %v7734_v40 }
0x29ea   :  { %v7753_v3 = vadd.f32 %v7752_v7, %v7735_v11 }
0x29ec   :  { %v7761_v35 = vadd.f32 %v7753_v3, %v12885_v5 }
0x29ee   :  { %7764 = vadd.xlane.f32.xlu0 %v7761_v35 }
0x29ef   :  { %v7736_v51 = vpop.f32.mrf.mxu2  ;;  %v7754_v0 = vpop.f32.mrf.mxu3 }
0x29f0   :  { %v7737_v59 = vadd.f32 %v9932_v58, %v7736_v51 }
0x29f2   :  { %v7755_v21 = vadd.f32 %v7754_v0, %v7737_v59 }
0x29f4   :  { %v7762_v24 = vadd.f32 %v7755_v21, %v12887_v8 }
0x29f6   :  { %7766 = vadd.xlane.f32.xlu1 %v7762_v24 }
0x2a47   :  { %v7739_v61 = vpop.f32.mrf.mxu2  ;;  %v7757_v1 = vpop.f32.mrf.mxu3 }
0x2a48   :  { %v7740_v16 = vadd.f32 %v9932_v58, %v7739_v61 }
0x2a4a   :  { %v7758_v30 = vadd.f32 %v7757_v1, %v7740_v16 }
0x2a4c   :  { %v7763_v14 = vadd.f32 %v7758_v30, %v7492_v18  ;;  %v9934_v30 = vld [vmem:[#allocation22 + $0x2] ss:$0 sm:$0xff] }
0x2a4e   :  { %7768 = vadd.xlane.f32.xlu2 %v7763_v14 }
0x2a4f   :  { %v7741_v55 = vpop.f32.mrf.mxu2  ;;  %v7759_v20 = vpop.f32.mrf.mxu3 }
0x2a61   :  { %v7765_v33 = vpop.xlane.xlu0 %7764 }
0x2a62   :  { %v7770_v50 = vmul.f32 %v7765_v33, %v11748_v56  ;;  %v9935_v33 = vld [vmem:[#allocation24 + $0x2] ss:$0 sm:$0xff] }
0x2a64   :  { %v12897_v5 = vsub.f32 %v7761_v35, %v7770_v50 }
0x2a66   :  { %v7776_v57 = vmul.f32 %v12897_v5, %v12897_v5 }
0x2a68   :  { %7779 = vadd.xlane.f32.xlu0 %v7776_v57 }
0x2a69   :  { %v7767_v27 = vpop.xlane.xlu1 %7766 }
0x2a6a   :  { %v7771_v8 = vmul.f32 %v7767_v27, %v11748_v56 }
0x2a6c   :  { %v12902_v37 = vsub.f32 %v7762_v24, %v7771_v8 }
0x2a6e   :  { %v7777_v18 = vmul.f32 %v12902_v37, %v12902_v37 }
0x2a70   :  { %7781 = vadd.xlane.f32.xlu1 %v7777_v18 }
0x2ac1   :  { %v7769_v52 = vpop.xlane.xlu2 %7768 }
0x2ac2   :  { %v7772_v44 = vmul.f32 %v7769_v52, %v11748_v56 }
0x2ac4   :  { %v7775_v42 = vsub.f32 %v7763_v14, %v7772_v44  ;;  %v10917_v44 = vmov 0.0  }
0x2ac5   :  { %v9492_v45 = vsel %vm7836_vm15, 1.0, %v10917_v44 }
0x2ac6   :  { %v7778_v6 = vmul.f32 %v7775_v42, %v7775_v42 }
0x2ac8   :  { %7783 = vadd.xlane.f32.xlu2 %v7778_v6 }
0x2ad0   :  { %1168 = vadd.xlane.f32.xlu2 %v1167_v46 }
0x2ad8   :  { %935 = vadd.xlane.f32.xlu2 %v934_v47 }
0x2adb   :  { %v7780_v60 = vpop.xlane.xlu0 %7779 }
0x2adc   :  { %v7785_v25 = vmul.f32 %v7780_v60, %v11748_v56 }
0x2ade   :  { %v7788_v12 = vadd.f32 1e-05, %v7785_v25 }
0x2ae0   :  { %vm7797_vm10 = vweird.f32 %v7788_v12 }
0x2ae3   :  { %v7782_v22 = vpop.xlane.xlu1 %7781 }
0x2ae4   :  { %v7786_v34 = vmul.f32 %v7782_v22, %v11748_v56 }
0x2ae6   :  { %v7789_v2 = vadd.f32 1e-05, %v7786_v34 }
0x2ae8   :  { %10260 = vrsqrt.f32 %v7789_v2  ;;  %vm7807_vm9 = vweird.f32 %v7789_v2 }
0x2ae9   :  { %10262 = vrsqrt.f32 %v7788_v12 }
0x2aee   :  { %v10261_v15 = vpop.eup %10260 }
0x2aef   :  { %v10263_v43 = vpop.eup %10262  ;;  %v7802_v23 = vmul.f32 %v10261_v15, %v7789_v2  ;;  %vm7808_vm5 = vweird.f32 %v10261_v15 }
0x2af0   :  { %v7792_v29 = vmul.f32 %v10263_v43, %v7788_v12  ;;  %vm7798_vm6 = vweird.f32 %v10263_v43  ;;  %vm7809_vm8 = vmor %vm7807_vm9, %vm7808_vm5 }
0x2af1   :  { %v7803_v19 = vmul.f32 %v10261_v15, %v7802_v23  ;;  %vm7799_vm12 = vmor %vm7797_vm10, %vm7798_vm6 }
0x2af2   :  { %v7793_v9 = vmul.f32 %v10263_v43, %v7792_v29 }
0x2af3   :  { %v7804_v4 = vmul.f32 0.5, %v7803_v19 }
0x2af4   :  { %v7794_v62 = vmul.f32 0.5, %v7793_v9 }
0x2af5   :  { %v7805_v53 = vsub.f32 1.5, %v7804_v4  ;;  %v12931_v4 = vld [vmem:[%s13020_s21] sm:$0xf] }
0x2af6   :  { %v7795_v10 = vsub.f32 1.5, %v7794_v62 }
0x2af7   :  { %v7806_v40 = vmul.f32 %v10261_v15, %v7805_v53 }
0x2af8   :  { %v7796_v11 = vmul.f32 %v10263_v43, %v7795_v10 }
0x2af9   :  { %v7810_v59 = vsel %vm7809_vm8, %v10261_v15, %v7806_v40  ;;  %v9821_v40 = vld [vmem:[#allocation28 + $0x38] sm:$0xff] }
0x2afa   :  { %v7800_v21 = vsel %vm7799_vm12, %v10263_v43, %v7796_v11  ;;  %v7822_v61 = vmul.f32 %v7810_v59, %v12902_v37  ;;  %7982 = vmatpush.bf16.msrb.mxu1 %v9821_v40  ;;  %v9820_v59 = vld [vmem:[#allocation28 + $0x30] sm:$0xff] }
0x2afb   :  { %v7821_v14 = vmul.f32 %v7800_v21, %v12897_v5  ;;  %v9818_v21 = vld [vmem:[#allocation28 + $0x20] sm:$0xff] }
0x2afc   :  { %v7828_v50 = vmul.f32 %v9934_v30, %v7822_v61  ;;  %v9816_v61 = vld [vmem:[#allocation28 + $0x10] sm:$0xff] }
0x2afd   :  { %v7827_v8 = vmul.f32 %v9934_v30, %v7821_v14 }
0x2afe   :  { %v7834_v49 = vadd.f32 %v9935_v33, %v7828_v50  ;;  %7983 = vmatpush.bf16.msrb.mxu1 %v9820_v59  ;;  %v9827_v50 = vld [vmem:[#allocation31 + $0x28] sm:$0xff] }
0x2aff   :  { %v7833_v37 = vadd.f32 %v9935_v33, %v7827_v8 }
0x2b3b   :  { %v7784_v39 = vpop.xlane.xlu2 %7783 }
0x2b3c   :  { %v7787_v63 = vmul.f32 %v7784_v39, %v11748_v56 }
0x2b3e   :  { %v7790_v38 = vadd.f32 1e-05, %v7787_v63 }
0x2b40   :  { %10264 = vrsqrt.f32 %v7790_v38  ;;  %vm7817_vm13 = vweird.f32 %v7790_v38 }
0x2b43   :  { %v1169_v31 = vpop.xlane.xlu2 %1168 }
0x2b44   :  { %v1171_v41 = vadd.f32 %v1170_v17, %v1169_v31 }
0x2b46   :  { %v10265_v54 = vpop.eup %10264  ;;  %v1172_v13 = vand.u32 2147483647, %v1171_v41  ;;  %vm1192_vm9 = vcmp.ge.f32.partialorder %v1171_v41, 0.0 }
0x2b47   :  { %v7812_v58 = vmul.f32 %v10265_v54, %v7790_v38  ;;  %vm7818_vm0 = vweird.f32 %v10265_v54  ;;  %v12927_v38 = vld [vmem:[%s13019_s1] sm:$0xf] }
0x2b48   :  { %vm7819_vm14 = vmor %vm7817_vm13, %vm7818_vm0  ;;  %v1173_v46 = vsub.f32 0.0, %v1172_v13 }
0x2b49   :  { %v7813_v7 = vmul.f32 %v10265_v54, %v7812_v58 }
0x2b4a   :  { %v1174_v26 = vmul.f32 1.442695, %v1173_v46  ;;  %v9823_v46 = vld [vmem:[#allocation31 + $0x8] sm:$0xff] }
0x2b4b   :  { %v7814_v3 = vmul.f32 0.5, %v7813_v7  ;;  %v936_v35 = vpop.xlane.xlu2 %935 }
0x2b4c   :  { %v937_v51 = vmax.f32 %v936_v35, 1e-24 }
0x2b4d   :  { %v7815_v0 = vsub.f32 1.5, %v7814_v3 }
0x2b4e   :  { %10266 = vrsqrt.f32 %v937_v51  ;;  %vm944_vm2 = vweird.f32 %v937_v51 }
0x2b4f   :  { %v7816_v24 = vmul.f32 %v10265_v54, %v7815_v0  ;;  %10268 = vpow2.f32 %v1174_v26  ;;  %v9819_v0 = vld [vmem:[#allocation28 + $0x28] sm:$0xff] }
0x2b50   :  { %7984 = vmatpush.bf16.msrb.mxu1 %v9819_v0  ;;  %v9822_v26 = vld [vmem:[#allocation31] sm:$0xff] }
0x2b51   :  { %v7820_v1 = vsel %vm7819_vm14, %v10265_v54, %v7816_v24  ;;  %v9817_v24 = vld [vmem:[#allocation28 + $0x18] sm:$0xff] }
0x2b52   :  { %v7823_v16 = vmul.f32 %v7820_v1, %v7775_v42  ;;  %v9815_v1 = vld [vmem:[#allocation28 + $0x8] sm:$0xff] }
0x2b54   :  { %v10267_v55 = vpop.eup %10266  ;;  %v7829_v20 = vmul.f32 %v9934_v30, %v7823_v16  ;;  %7985 = vmatpush.bf16.msrb.mxu1 %v9818_v21  ;;  %v9814_v16 = vld [vmem:[#allocation28] sm:$0xff] }
0x2b55   :  { %v939_v57 = vmul.f32 %v10267_v55, %v937_v51  ;;  %vm945_vm1 = vweird.f32 %v10267_v55  ;;  %v10269_v47 = vpop.eup %10268  ;;  %v9829_v30 = vld [vmem:[#allocation31 + $0x38] sm:$0xff] }
0x2b56   :  { %v7835_v27 = vadd.f32 %v9935_v33, %v7829_v20  ;;  %vm946_vm3 = vmor %vm944_vm2, %vm945_vm1  ;;  %v1176_v22 = vadd.f32 1.0, %v10269_v47  ;;  %8048 = vmatpush.bf16.msrb.mxu2 %v9829_v30  ;;  %v9828_v20 = vld [vmem:[#allocation31 + $0x30] sm:$0xff]  ;;  %v9938_v47 = vld [vmem:[#allocation30] ss:$0 sm:$0xff] }
0x2b57   :  { %v940_v18 = vmul.f32 %v10267_v55, %v939_v57  ;;  %v9826_v57 = vld [vmem:[#allocation31 + $0x20] sm:$0xff] }
0x2b58   :  { %7891 = vmatpush.msrb.mxu0 %v7835_v27  ;;  %10270 = vrcp.f32 %v1176_v22  ;;  %v1188_v12 = vand.u32 2147483648, %v1176_v22  ;;  %vm1182_vm4 = vweird.f32 %v1176_v22  ;;  %v1186_v15 = vand.u32 2147483647, %v1176_v22  ;;  %7986 = vmatpush.bf16.msrb.mxu1 %v9817_v24 }
0x2b59   :  { %v941_v52 = vmul.f32 0.5, %v940_v18  ;;  %v9825_v18 = vld [vmem:[#allocation31 + $0x18] sm:$0xff] }
0x2b5a   :  { %7892 = vmatpush.msrb.mxu0 %v7834_v49  ;;  %v1189_v23 = vor.u32 1.1754944e-38, %v1188_v12  ;;  %vm1187_vm6 = vcmp.eq.f32.partialorder %v1186_v15, 8.507059e+37  ;;  %8049 = vmatpush.bf16.msrb.mxu2 %v9828_v20 }
0x2b5b   :  { %v942_v5 = vsub.f32 1.5, %v941_v52 }
0x2b5c   :  { %7893 = vmatpush.msrb.mxu0 %v7833_v37  ;;  %7987 = vmatpush.bf16.msrb.mxu1 %v9816_v61  ;;  %v9824_v37 = vld [vmem:[#allocation31 + $0x10] sm:$0xff] }
0x2b5d   :  { %9493 = vmatmul.msk.f32.vlgmr.msrb.gmra.mxu0 %vm1617_vm7, %v9492_v45  ;;  %v943_v42 = vmul.f32 %v10267_v55, %v942_v5 }
0x2b5e   :  { %v10271_v60 = vpop.eup %10270  ;;  %8050 = vmatpush.bf16.msrb.mxu2 %v9827_v50 }
0x2b5f   :  { %v947_v6 = vsel %vm946_vm3, %v10267_v55, %v943_v42  ;;  %v1178_v34 = vmul.f32 %v10271_v60, %v1176_v22  ;;  %vm1183_vm7 = vweird.f32 %v10271_v60 }
0x2b60   :  { %v12921_v36 = vmul.f32 %v947_v6, %v11272_v48  ;;  %vm1184_vm5 = vmor %vm1182_vm4, %vm1183_vm7  ;;  %7988 = vmatpush.bf16.msrb.mxu1 %v9815_v1  ;;  %v9937_v6 = vld [vmem:[#allocation27] ss:$0 sm:$0xff]  ;;  %vm8118_vm7 = vcmask 27648   ;;  %vm8116_vm4 = vcmp.eq.s32.totalorder %v11300_v32, %v11296_v28 }
0x2b61   :  { %v1179_v25 = vsub.f32 1.0, %v1178_v34 }
0x2b62   :  { %8176 = vst [vmem:[#allocation34] sm:$0xf] %v12921_v36  ;;  %8093 = vmatpush.xpose.msra.mxu0 %v12921_v36  ;;  %8051 = vmatpush.bf16.msrb.mxu2 %v9826_v57 }
0x2b63   :  { %v1180_v2 = vmul.f32 %v10271_v60, %v1179_v25 }
0x2b64   :  { %7989 = vmatpush.bf16.msrb.mxu1 %v9814_v16 }
0x2b65   :  { %v1181_v48 = vadd.f32 %v10271_v60, %v1180_v2 }
0x2b66   :  { %8052 = vmatpush.bf16.msrb.mxu2 %v9825_v18 }
0x2b67   :  { %v1185_v43 = vsel %vm1184_vm5, %v10271_v60, %v1181_v48  ;;  %v9939_v48 = vld [vmem:[#allocation33] ss:$0 sm:$0xff]  ;;  %vm8169_vm5 = vcmask 31744  }
0x2b68   :  { %v1190_v29 = vsel %vm1187_vm6, %v1189_v23, %v1185_v43 }
0x2b69   :  { %v1193_v39 = vsub.f32 1.0, %v1190_v29 }
0x2b6a   :  { %8053 = vmatpush.bf16.msrb.mxu2 %v9824_v37 }
0x2b6b   :  { %v1194_v63 = vsel %vm1192_vm9, %v1190_v29, %v1193_v39  ;;  %v990_v39 = vmul.f32 %v12921_v36, %v12921_v36 }
0x2b6c   :  { %v1196_v19 = vsub.f32 1.0, %v1194_v63  ;;  %v1195_v62 = vmul.f32 %v12931_v4, %v1194_v63 }
0x2b6d   :  { %v991_v63 = vsel %vm933_vm11, %v990_v39, 0.0 }
0x2b6e   :  { %v1197_v9 = vmul.f32 %v12927_v38, %v1196_v19  ;;  %8054 = vmatpush.bf16.msrb.mxu2 %v9823_v46  ;;  %v8098_v19 = vstv %s13047_s6 }
0x2b6f   :  { %vm8104_vm12 = vweird.f32 %v8098_v19 }
0x2b70   :  { %v1198_v53 = vadd.f32 %v1197_v9, %v1195_v62 }
0x2b72   :  { %8055 = vmatpush.bf16.msrb.mxu2 %v9822_v26 }
0x2bda   :  { %v7895_v31 = vpop.f32.mrf.mxu0 }
0x2bdb   :  { %v7898_v54 = vmul.f32 0.16666667, %v7895_v31 }
0x2bdd   :  { %v7899_v10 = vadd.f32 %v7898_v54, %v1198_v53  ;;  %v8110_v53 = vand.u32 2147483648, %v8098_v19 }
0x2bdf   :  { %v7900_v58 = vsel %vm933_vm11, %v7899_v10, 0.0 }
0x2be0   :  { %7901 = vadd.xlane.f32.xlu1 %v7900_v58  ;;  %v8108_v58 = vand.u32 2147483647, %v8098_v19 }
0x2be2   :  { %vm8109_vm15 = vcmp.eq.f32.partialorder %v8108_v58, 8.507059e+37 }
0x2c53   :  { %v7902_v7 = vpop.xlane.xlu1 %7901 }
0x2c54   :  { %v7903_v11 = vmul.f32 %v7902_v7, %v11748_v56  ;;  %v8111_v7 = vor.u32 1.1754944e-38, %v8110_v53  ;;  %v986_v53 = vmul.f32 %v12931_v4, %v12921_v36 }
0x2c56   :  { %v7904_v3 = vsub.f32 %v7899_v10, %v7903_v11 }
0x2c58   :  { %v7905_v35 = vmul.f32 %v7904_v3, %v7904_v3 }
0x2c5a   :  { %v7906_v51 = vsel %vm933_vm11, %v7905_v35, 0.0 }
0x2c5b   :  { %7907 = vadd.xlane.f32.xlu0 %v7906_v51 }
0x2cce   :  { %v7908_v14 = vpop.xlane.xlu0 %7907 }
0x2ccf   :  { %v7909_v55 = vmul.f32 %v7908_v14, %v11748_v56  ;;  %v9936_v56 = vld [vmem:[#allocation25] ss:$0 sm:$0xff] }
0x2cd1   :  { %v7910_v33 = vadd.f32 1e-05, %v7909_v55 }
0x2cd3   :  { %10272 = vrsqrt.f32 %v7910_v33  ;;  %vm7917_vm10 = vweird.f32 %v7910_v33 }
0x2cd4   :  { %10274 = vrcp.f32 %v8098_v19 }
0x2cd9   :  { %v10273_v27 = vpop.eup %10272 }
0x2cda   :  { %v7912_v8 = vmul.f32 %v10273_v27, %v7910_v33  ;;  %vm7918_vm8 = vweird.f32 %v10273_v27  ;;  %v10275_v9 = vpop.eup %10274 }
0x2cdb   :  { %vm7919_vm0 = vmor %vm7917_vm10, %vm7918_vm8  ;;  %v8100_v62 = vmul.f32 %v10275_v9, %v8098_v19  ;;  %vm8105_vm13 = vweird.f32 %v10275_v9 }
0x2cdc   :  { %v7913_v49 = vmul.f32 %v10273_v27, %v7912_v8  ;;  %vm8106_vm14 = vmor %vm8104_vm12, %vm8105_vm13 }
0x2cdd   :  { %v8101_v10 = vsub.f32 1.0, %v8100_v62  ;;  %v1015_v62 = vmul.f32 %v12927_v38, %v12927_v38 }
0x2cde   :  { %v7914_v52 = vmul.f32 0.5, %v7913_v49  ;;  %v1011_v49 = vmul.f32 %v12927_v38, %v12921_v36 }
0x2cdf   :  { %v8102_v40 = vmul.f32 %v10275_v9, %v8101_v10 }
0x2ce0   :  { %v7915_v44 = vsub.f32 1.5, %v7914_v52  ;;  %v1012_v37 = vsel %vm933_vm11, %v1011_v49, 0.0 }
0x2ce1   :  { %v8103_v11 = vadd.f32 %v10275_v9, %v8102_v40 }
0x2ce2   :  { %v7916_v45 = vmul.f32 %v10273_v27, %v7915_v44 }
0x2ce4   :  { %v7920_v5 = vsel %vm7919_vm0, %v10273_v27, %v7916_v45  ;;  %v994_v27 = vmul.f32 %v12931_v4, %v12931_v4 }
0x2ce5   :  { %v7921_v42 = vmul.f32 %v7920_v5, %v7904_v3  ;;  %v8107_v3 = vsel %vm8106_vm14, %v10275_v9, %v8103_v11 }
0x2ce6   :  { %v8112_v35 = vsel %vm8109_vm15, %v8111_v7, %v8107_v3  ;;  %v995_v52 = vsel %vm933_vm11, %v994_v27, 0.0 }
0x2ce7   :  { %v7925_v17 = vmul.f32 %v9936_v56, %v7921_v42  ;;  %9830 = vpush %v8112_v35 }
0x2ce9   :  { %v7929_v41 = vadd.f32 %v9937_v6, %v7925_v17 }
0x2ceb   :  { %v7930_v13 = vpack.c.bf16 %v7929_v41, %v7929_v41 }
0x2ced   :  { %7990 = vmatmul.bf16.vlgmr.msrb.gmra.mxu1 %v7930_v13 }
0x2d18   :  { %s9831_s18 = spop %9830 }
0x2d19   :  { %v8114_v30 = vstv %s9831_s18 }
0x2d6a   :  { %v7991_v22 = vpop.f32.mrf.mxu1 }
0x2d6b   :  { %v7992_v60 = vadd.f32 %v9938_v47, %v7991_v22 }
0x2d6d   :  { %v7995_v34 = vmax.f32 %v7992_v60, 0.0 }
0x2d6f   :  { %v7996_v25 = vpack.c.bf16 %v7995_v34, %v7995_v34 }
0x2d71   :  { %8056 = vmatmul.bf16.vlgmr.msrb.gmra.mxu2 %v7996_v25 }
0x2d72   :  { %v7993_v2 = vpop.f32.mrf.mxu1 }
0x2df4   :  { %v8057_v12 = vpop.f32.mrf.mxu2 }
0x2df5   :  { %v8058_v15 = vadd.f32 %v9939_v48, %v8057_v12 }
0x2df7   :  { %v8061_v43 = vmul.f32 %v8058_v15, %v8058_v15 }
0x2df9   :  { %v8062_v23 = vsel %vm933_vm11, %v8061_v43, 0.0 }
0x2dfa   :  { %8063 = vadd.xlane.f32.xlu1 %v8062_v23 }
0x2dfc   :  { %v8059_v29 = vpop.f32.mrf.mxu2 }
0x2e02   :  { %992 = vadd.xlane.f32.xlu1 %v991_v63 }
0x2e6d   :  { %v8064_v31 = vpop.xlane.xlu1 %8063 }
0x2e6e   :  { %v8065_v54 = vmax.f32 %v8064_v31, 1e-24  ;;  %v1016_v31 = vsel %vm933_vm11, %v1015_v62, 0.0 }
0x2e70   :  { %10276 = vrsqrt.f32 %v8065_v54  ;;  %vm8072_vm2 = vweird.f32 %v8065_v54 }
0x2e76   :  { %v10277_v51 = vpop.eup %10276 }
0x2e77   :  { %v8067_v59 = vmul.f32 %v10277_v51, %v8065_v54  ;;  %vm8073_vm1 = vweird.f32 %v10277_v51  ;;  %v987_v54 = vsel %vm933_vm11, %v986_v53, 0.0 }
0x2e78   :  { %vm8074_vm3 = vmor %vm8072_vm2, %vm8073_vm1 }
0x2e79   :  { %v8068_v0 = vmul.f32 %v10277_v51, %v8067_v59 }
0x2e7b   :  { %v8069_v21 = vmul.f32 0.5, %v8068_v0 }
0x2e7d   :  { %v8070_v24 = vsub.f32 1.5, %v8069_v21 }
0x2e7f   :  { %v8071_v61 = vmul.f32 %v10277_v51, %v8070_v24 }
0x2e81   :  { %v8075_v1 = vsel %vm8074_vm3, %v10277_v51, %v8071_v61 }
0x2e82   :  { %v8076_v16 = vmul.f32 %v8075_v1, %v8058_v15 }
0x2e84   :  { %8177 = vst [vmem:[#allocation35] sm:$0xf] %v8076_v16  ;;  %8094 = vmatmul.f32.vlgmr.msra.gmra.mxu0 %v8076_v16 }
0x2f01   :  { %v8095_v14 = vpop.f32.mrf.mxu0 }
0x2f02   :  { %v8115_v55 = vmul.f32 %v8114_v30, %v8095_v14 }
0x2f04   :  { %v8128_v20 = vsel %vm8118_vm7, %v8115_v55, -inf  ;;  %v8117_v33 = vsel %vm8116_vm4, %v8115_v55, 0.0 }
0x2f05   :  { %8129 = vmax.xlane.f32.xlu0 %v8128_v20  ;;  %v8140_v50 = vrot.slane %v8128_v20, 4  ;;  %v8119_v57 = vsel %vm8118_vm7, %v8117_v33, 0.0 }
0x2f06   :  { %8120 = vadd.xlane.f32.xlu1 %v8119_v57  ;;  %v8122_v17 = vrot.slane %v8119_v57, 4 }
0x2f07   :  { %v8141_v8 = vmax.f32 %v8128_v20, %v8140_v50 }
0x2f08   :  { %v8123_v46 = vadd.f32 %v8122_v17, %v8119_v57 }
0x2f09   :  { %v8142_v18 = vrot.slane %v8141_v8, 2 }
0x2f0a   :  { %v8124_v22 = vrot.slane %v8123_v46, 2 }
0x2f0b   :  { %v8143_v28 = vmax.f32 %v8141_v8, %v8142_v18 }
0x2f0c   :  { %v8125_v34 = vadd.f32 %v8124_v22, %v8123_v46 }
0x2f0d   :  { %v8144_v32 = vrot.slane %v8143_v28, 1  ;;  %996 = vadd.xlane.f32.xlu0 %v995_v52 }
0x2f0e   :  { %1013 = vadd.xlane.f32.xlu1 %v1012_v37  ;;  %v8126_v25 = vrot.slane %v8125_v34, 1 }
0x2f0f   :  { %v8145_v44 = vmax.f32 %v8143_v28, %v8144_v32 }
0x2f10   :  { %v8127_v12 = vadd.f32 %v8126_v25, %v8125_v34 }
0x2f11   :  { %v8146_v45 = vsub.f32 %v8115_v55, %v8145_v44 }
0x2f13   :  { %v8147_v56 = vmul.f32 1.442695, %v8146_v45 }
0x2f15   :  { %10278 = vpow2.f32 %v8147_v56 }
0x2f1b   :  { %v10279_v5 = vpop.eup %10278 }
0x2f1c   :  { %v8149_v42 = vsel %vm8118_vm7, %v10279_v5, 0.0 }
0x2f1d   :  { %v8150_v6 = vrot.slane %v8149_v42, 4 }
0x2f1f   :  { %v8151_v41 = vadd.f32 %v8150_v6, %v8149_v42 }
0x2f21   :  { %v8152_v13 = vrot.slane %v8151_v41, 2 }
0x2f23   :  { %v8153_v26 = vadd.f32 %v8152_v13, %v8151_v41 }
0x2f25   :  { %v8154_v47 = vrot.slane %v8153_v26, 1 }
0x2f27   :  { %v8155_v60 = vadd.f32 %v8154_v47, %v8153_v26 }
0x2f29   :  { %10280 = vlog2.f32 %v8155_v60 }
0x2f2f   :  { %v10281_v2 = vpop.eup %10280 }
0x2f30   :  { %v8157_v48 = vmul.f32 0.6931472, %v10281_v2 }
0x2f32   :  { %v8158_v15 = vadd.f32 %v8157_v48, %v8145_v44 }
0x2f34   :  { %v8168_v43 = vsub.f32 %v8158_v15, %v8127_v12 }
0x2f36   :  { %v8170_v23 = vsel %vm8169_vm5, %v8168_v43, 0.0 }
0x2f37   :  { %8171 = vadd.xlane.f32.xlu0 %v8170_v23 }
0x2f78   :  { %v8130_v29 = vpop.xlane.xlu0 %8129 }
0x2f79   :  { %v8131_v39 = vsub.f32 %v8115_v55, %v8130_v29 }
0x2f7b   :  { %v8132_v63 = vmul.f32 1.442695, %v8131_v39 }
0x2f7d   :  { %10282 = vpow2.f32 %v8132_v63 }
0x2f83   :  { %v10283_v19 = vpop.eup %10282 }
0x2f84   :  { %v8134_v9 = vsel %vm8118_vm7, %v10283_v19, 0.0 }
0x2f85   :  { %8135 = vadd.xlane.f32.xlu2 %v8134_v9 }
0x2f8d   :  { %1017 = vadd.xlane.f32.xlu2 %v1016_v31 }
0x2f95   :  { %988 = vadd.xlane.f32.xlu2 %v987_v54 }
0x2f96   :  { %10774 = shalt.err (!%p10771_p1)
}
0x2f97   :  { %8201 = dma.vmem_to_hbm [thread:$0]  %s8197_s3, 64, %s8199_s30, [#allocation36]  }
0x2f98   :  { %s8187_s19 = sshll.u32 %s11099_s24, 4  ;;  %s10919_s26 = smov [#allocation34]   ;;  %s8188_s19 = int_to_ptr.hbm [resolvable:$true] %s8187_s19 }
0x2f99   :  { %s8185_s2 = sshll.u32 %s10919_s26, 4  ;;  %s10787_s25 = sshra.s32 %s8188_s19, 4  ;;  %s8186_s2 = int_to_ptr.vmem [resolvable:$true] %s8185_s2  ;;  %s10788_s25 = int_to_ptr.hbm [resolvable:$true] %s10787_s25 }
0x2f9a   :  { %s10789_s1 = scalar_lea.hbm %s10788_s25, 4  ;;  %s10791_s21 = scalar_lea.hbm %s11099_s24, 4 }
0x2f9b   :  { %p10790_p2 = scmp.ne.s32.totalorder %s10788_s25, %s10789_s1  ;;  %p10792_p3 = scmp.lt.s32.totalorder %s10788_s25, %s11099_s24 }
0x2f9c   :  { %p10793_p4 = scmp.lt.s32.totalorder %s10791_s21, %s10789_s1 }
0x2f9e   :  { %p10794_p5 = por %p10793_p4, %p10792_p3 }
0x2fa0   :  { %p10795_p6 = pnand %p10794_p5, %p10790_p2 }
0x2fa2   :  { %10798 = shalt.err (!%p10795_p6)
}
0x2fa3   :  { %8190 = dma.vmem_to_hbm [thread:$0]  %s8186_s2, 64, %s8188_s19, [#allocation6]   ;;  %v997_v36 = vpop.xlane.xlu0 %996  ;;  %v993_v38 = vpop.xlane.xlu1 %992 }
0x2fa4   :  { %v998_v4 = vmul.f32 %v997_v36, %v993_v38  ;;  %s10920_s24 = smov [#allocation37]   ;;  %s8211_s8 = sshll.u32 %s11114_s14, 4  ;;  %s8212_s8 = int_to_ptr.hbm [resolvable:$true] %s8211_s8 }
0x2fa5   :  { %s8209_s27 = sshll.u32 %s10920_s24, 4  ;;  %s10811_s5 = sshra.s32 %s8212_s8, 4  ;;  %s8210_s27 = int_to_ptr.vmem [resolvable:$true] %s8209_s27  ;;  %s10812_s5 = int_to_ptr.hbm [resolvable:$true] %s10811_s5 }
0x2fa6   :  { %v999_v10 = vmax.f32 %v998_v4, 1e-16  ;;  %s10813_s0 = scalar_lea.hbm %s10812_s5, 1  ;;  %s10815_s15 = scalar_lea.hbm %s11114_s14, 1 }
0x2fa7   :  { %p10814_p7 = scmp.ne.s32.totalorder %s10812_s5, %s10813_s0  ;;  %p10816_p8 = scmp.lt.s32.totalorder %s10812_s5, %s11114_s14 }
0x2fa8   :  { %10284 = vrsqrt.f32 %v999_v10  ;;  %p10817_p9 = scmp.lt.s32.totalorder %s10815_s15, %s10813_s0 }
0x2faa   :  { %p10818_p10 = por %p10817_p9, %p10816_p8 }
0x2fab   :  { %v8121_v0 = vpop.xlane.xlu1 %8120  ;;  %v8172_v18 = vpop.xlane.xlu0 %8171 }
0x2fac   :  { %v8173_v37 = vmul.f32 0.25, %v8172_v18  ;;  %p10819_p11 = pnand %p10818_p10, %p10814_p7 }
0x2fae   :  { %v10285_v40 = vpop.eup %10284 }
0x2faf   :  { %v1001_v51 = vmul.f32 %v10285_v40, %v999_v10  ;;  %vm1007_vm6 = vweird.f32 %v10285_v40 }
0x2fb1   :  { %v1002_v61 = vmul.f32 %v10285_v40, %v1001_v51 }
0x2fb3   :  { %v1003_v14 = vmul.f32 0.5, %v1002_v61  ;;  %v1014_v42 = vpop.xlane.xlu1 %1013 }
0x2fb5   :  { %v1004_v27 = vsub.f32 1.5, %v1003_v14 }
0x2fb7   :  { %v1005_v32 = vmul.f32 %v10285_v40, %v1004_v27 }
0x2ff8   :  { %v8136_v58 = vpop.xlane.xlu2 %8135 }
0x2ff9   :  { %10286 = vlog2.f32 %v8136_v58 }
0x2fff   :  { %v10287_v7 = vpop.eup %10286 }
0x3000   :  { %v8138_v11 = vmul.f32 0.6931472, %v10287_v7  ;;  %v1018_v3 = vpop.xlane.xlu2 %1017 }
0x3001   :  { %v1019_v35 = vmul.f32 %v1018_v3, %v993_v38 }
0x3002   :  { %v8139_v59 = vadd.f32 %v8138_v11, %v8130_v29 }
0x3003   :  { %v1020_v21 = vmax.f32 %v1019_v35, 1e-16 }
0x3004   :  { %v8159_v24 = vsub.f32 %v8139_v59, %v8121_v0 }
0x3005   :  { %10288 = vrsqrt.f32 %v1020_v21  ;;  %vm1027_vm8 = vweird.f32 %v1020_v21 }
0x3006   :  { %v8160_v1 = vsel %vm933_vm11, %v8159_v24, 0.0  ;;  %vm1006_vm11 = vweird.f32 %v999_v10 }
0x3007   :  { %v8161_v16 = vrot.slane %v8160_v1, 4  ;;  %vm1008_vm10 = vmor %vm1006_vm11, %vm1007_vm6 }
0x3008   :  { %v989_v56 = vpop.xlane.xlu2 %988  ;;  %v1009_v6 = vsel %vm1008_vm10, %v10285_v40, %v1005_v32 }
0x3009   :  { %v8162_v30 = vadd.f32 %v8161_v16, %v8160_v1  ;;  %v1010_v13 = vmul.f32 %v1009_v6, %v989_v56 }
0x300b   :  { %v10289_v55 = vpop.eup %10288  ;;  %v8163_v20 = vrot.slane %v8162_v30, 2 }
0x300c   :  { %v1022_v33 = vmul.f32 %v10289_v55, %v1020_v21  ;;  %vm1028_vm9 = vweird.f32 %v10289_v55 }
0x300d   :  { %v8164_v50 = vadd.f32 %v8163_v20, %v8162_v30  ;;  %vm1029_vm0 = vmor %vm1027_vm8, %vm1028_vm9 }
0x300e   :  { %v1023_v57 = vmul.f32 %v10289_v55, %v1022_v33 }
0x300f   :  { %v8165_v8 = vrot.slane %v8164_v50, 1 }
0x3010   :  { %v1024_v49 = vmul.f32 0.5, %v1023_v57 }
0x3011   :  { %v8166_v52 = vadd.f32 %v8165_v8, %v8164_v50 }
0x3012   :  { %v1025_v28 = vsub.f32 1.5, %v1024_v49 }
0x3013   :  { %v8167_v44 = vmul.f32 0.25, %v8166_v52 }
0x3014   :  { %v1026_v45 = vmul.f32 %v10289_v55, %v1025_v28 }
0x3015   :  { %v8174_v5 = vadd.f32 %v8173_v37, %v8167_v44 }
0x3016   :  { %v1030_v17 = vsel %vm1029_vm0, %v10289_v55, %v1026_v45 }
0x3017   :  { %v1031_v41 = vmul.f32 %v1030_v17, %v1014_v42  ;;  %v8175_v46 = vmul.f32 0.5, %v8174_v5 }
0x3019   :  { %v1032_v26 = vsub.f32 %v1010_v13, %v1031_v41  ;;  %8179 = vst [vmem:[#allocation37] sm:$0x1] %v8175_v46 }
0x301a   :  { %10822 = shalt.err (!%p10819_p11)
}
0x301b   :  { %8214 = dma.vmem_to_hbm [thread:$0]  %s8210_s27, 16, %s8212_s8, [#allocation36]   ;;  %v1033_v47 = vand.u32 2147483647, %v1032_v26 }
0x301d   :  { %8178 = vst [vmem:[%s11109_s13] sm:$0xf] %v1033_v47 }
0x301e   :  { %10843 = dma.done.wait [#allocation6], 64  }
0x301f   :  { %10844 = vsyncadd [#allocation6], 4294967232 }
0x3020   :  { %10845 = dma.done.wait [#allocation36], 80  }
0x3021   :  { %10846 = vsyncadd [#allocation36], 4294967216 }
0x3022   :  { %8229 = vsyncpa [#allocation5], 1 }
0x3023   :  { %8230 = vsyncpa [#allocation8], 1 }
0x3024   :  { %8231 = vsyncpa [#allocation11], 1 }
0x3025   :  { %8232 = vsyncpa [#allocation14], 1 }
0x3026   :  { %8233 = vsyncpa [#allocation17], 1 }
0x3027   :  { %8234 = vsyncpa [#allocation20], 1 }
0x3028   :  { %8235 = vsyncpa [#allocation23], 1 }
0x3029   :  { %8236 = vsyncpa [#allocation26], 1 }
0x302a   :  { %8237 = vsyncpa [#allocation29], 1 }
0x302b   :  { %8238 = vsyncpa [#allocation32], 1 }
0x302c   :  { %8239 = vsyncpa [#allocation6], 1 }
0x302d   :  { %8240 = vsyncpa [#allocation36], 1 }

</bundles_post_ra>
